<compile_context>
chip_gen: v7x
topology: tpu7x:2x2x1
jax: 0.10.0
libtpu: 0.0.40
codegen_flags: <defaults>
</compile_context>

<pallas_src>
import math
import jax
import jax.numpy as jnp
from jax import lax
from jax.experimental import pallas as pl
from jax.experimental.pallas import tpu as pltpu

# ---- hyperps (baked as constants, deterministic synthetic config) ----
LOG_STD_MIN = -20.0
LOG_STD_MAX = 2.0
ACTION_SCALE = 1.0
ACTION_BIAS = 0.0
EPSILON = 1e-6
HALF_LOG_2PI = 0.5 * math.log(2.0 * math.pi)

# ---- ActorSimpleMem default sizes ----
SIZE_1, SIZE_2, SIZE_3, SIZE_MEM = 32, 64, 32, 256

# ---- packed-bias layout (static, 128-lane-aligned offsets) ----
OFF_B1 = 0
OFF_B2 = 128
OFF_B3 = 256
OFF_BIH = 384
OFF_BHH = OFF_BIH + 3 * SIZE_MEM          # 1152
OFF_BOUT = OFF_BHH + 3 * SIZE_MEM         # 1920


def _round_up(x, m):
    return ((x + m - 1) // m) * m


def sac_kernel(
    obs_ref, eps_ref, hid0_ref,
    w1_ref, w2_ref, w3_ref, wih_ref, whh_ref, wout_ref, b_ref,
    stats_ref, hidseq_ref,
    hid_carry,
):
    H = hid0_ref.shape[-1]
    A = eps_ref.shape[-1]
    t = pl.program_id(1)

    # (re)load the initial hidden state at the first timestep of each group
    @pl.when(t == 0)
    def _():
        hid_carry[...] = hid0_ref[...]

    def lin(a, w_ref, boff, bwidth):
        # f32-accurate MXU matmul (multi-pass); essentially free at these shapes
        return (
            jnp.dot(a, w_ref[...],
                    preferred_element_type=jnp.float32,
                    precision=lax.Precision.HIGHEST)
            + b_ref[:, boff:boff + bwidth]
        )

    # ---- ActorSimpleMem.forward ----
    x = obs_ref[...]                     # [B, S]
    h = hid_carry[...]                   # [B, H]
    x = jax.nn.relu(lin(x, w1_ref, OFF_B1, SIZE_1))
    x = jax.nn.relu(lin(x, w2_ref, OFF_B2, SIZE_2))
    x = jax.nn.relu(lin(x, w3_ref, OFF_B3, SIZE_3))

    # GRUCell (gate order r, z, n, like torch.nn.GRUCell)
    gi = lin(x, wih_ref, OFF_BIH, 3 * H)     # [B, 3H]
    gh = lin(h, whh_ref, OFF_BHH, 3 * H)     # [B, 3H]
    r = jax.nn.sigmoid(gi[:, 0:H] + gh[:, 0:H])
    z = jax.nn.sigmoid(gi[:, H:2 * H] + gh[:, H:2 * H])
    cand = jnp.tanh(gi[:, 2 * H:3 * H] + r * gh[:, 2 * H:3 * H])
    h_new = (1.0 - z) * cand + z * h
    hid_carry[...] = h_new               # carry for next timestep (VMEM only)
    hidseq_ref[...] = h_new              # per-step hidden output

    hr = jax.nn.relu(h_new)
    mo = lin(hr, wout_ref, OFF_BOUT, 2 * A)  # [B, 2A]  (mu | log_std fused)
    mu = mo[:, 0:A]
    ls = mo[:, A:2 * A]

    # ---- SAC.sample math ----
    ls = jnp.tanh(ls)
    ls = LOG_STD_MIN + 0.5 * (LOG_STD_MAX - LOG_STD_MIN) * (ls + 1.0)
    std = jnp.exp(ls)
    eps = eps_ref[...]                   # Normal(0,1) noise supplied as input
    x_t = mu + std * eps                 # Normal(mu, std).rsample()
    y_t = jnp.tanh(x_t)
    action = y_t * ACTION_SCALE + ACTION_BIAS
    # exact identity: (x_t - mu) / std == eps  ->  no divide by tiny std
    lp = -0.5 * jnp.square(eps) - ls - HALF_LOG_2PI
    lp = lp - jnp.log(ACTION_SCALE * (1.0 - jnp.square(y_t)) + EPSILON)
    log_prob = jnp.sum(lp, axis=1, keepdims=True)              # [B, 1]
    mean_sq = jnp.tanh(mu) * ACTION_SCALE + ACTION_BIAS        # [B, A]

    # one packed store: [action | mean | log_prob] -> [B, 2A+1]
    stats_ref[...] = jnp.concatenate([action, mean_sq, log_prob], axis=1)


def _pack_biases(p, A):
    """Pack all 1-row biases into one [1, 1920 + roundup(2A,128)] array."""
    def pad_to(b, width):
        return jnp.pad(b, ((0, 0), (0, width - b.shape[1])))
    return jnp.concatenate(
        [pad_to(p["b1"], 128), pad_to(p["b2"], 128), pad_to(p["b3"], 128),
         p["bih"], p["bhh"], pad_to(p["bout"], _round_up(2 * A, 128))],
        axis=1,
    )


def sac_rollout(obs, eps, hidden0, params):
    """Multi-step SAC actor rollout in one pallas_call.

    obs:     [G, T, B, S]   observations per group / timestep
    eps:     [G, T, B, A]   N(0,1) noise for rsample
    hidden0: [G, B, H]      initial GRU hidden per group
    returns  (action [G,T,B,A], log_prob [G,T,B,1], mean [G,T,B,A],
              hidden_seq [G,T,B,H])
    """
    G, T, B, S = obs.shape
    A = eps.shape[-1]
    H = hidden0.shape[-1]
    f32 = jnp.float32
    p = params

    bias_pack = _pack_biases(p, A)

    def step_map(g, t):
        return (g, t, 0, 0)

    def const_map(g, t):
        return (0, 0)

    in_specs = [
        pl.BlockSpec((None, None, B, S), step_map),           # obs   (per step)
        pl.BlockSpec((None, None, B, A), step_map),           # eps   (per step)
        pl.BlockSpec((None, B, H), lambda g, t: (g, 0, 0)),   # hidden0 (per group)
        pl.BlockSpec((S, SIZE_1), const_map),                 # w1 (resident)
        pl.BlockSpec((SIZE_1, SIZE_2), const_map),            # w2
        pl.BlockSpec((SIZE_2, SIZE_3), const_map),            # w3
        pl.BlockSpec((SIZE_3, 3 * H), const_map),             # wih
        pl.BlockSpec((H, 3 * H), const_map),                  # whh
        pl.BlockSpec((H, 2 * A), const_map),                  # wout (mu|log_std)
        pl.BlockSpec((1, bias_pack.shape[1]), const_map),     # packed biases
    ]
    out_specs = (
        pl.BlockSpec((None, None, B, 2 * A + 1), step_map),   # [action|mean|log_prob]
        pl.BlockSpec((None, None, B, H), step_map),           # hidden sequence
    )
    out_shape = (
        jax.ShapeDtypeStruct((G, T, B, 2 * A + 1), f32),
        jax.ShapeDtypeStruct((G, T, B, H), f32),
    )

    flops_per_row = 2 * (S * SIZE_1 + SIZE_1 * SIZE_2 + SIZE_2 * SIZE_3
                         + SIZE_3 * 3 * H + H * 3 * H + H * 2 * A)
    param_bytes = 4 * (S * SIZE_1 + SIZE_1 * SIZE_2 + SIZE_2 * SIZE_3
                       + SIZE_3 * 3 * H + H * 3 * H + H * 2 * A
                       + bias_pack.shape[1])
    io_bytes = 4 * (G * T * B * (S + A + (2 * A + 1) + H) + G * B * H)
    cost = pl.CostEstimate(
        flops=G * T * B * flops_per_row,
        transcendentals=G * T * B * (3 * H + 6 * A),
        bytes_accessed=param_bytes + io_bytes,
    )

    stats, hidseq = pl.pallas_call(
        sac_kernel,
        grid=(G, T),
        in_specs=in_specs,
        out_specs=out_specs,
        out_shape=out_shape,
        scratch_shapes=[pltpu.VMEM((B, H), f32)],              # GRU hidden carry
        compiler_params=pltpu.CompilerParams(
            dimension_semantics=("parallel", "arbitrary")),
        cost_estimate=cost,
    )(obs, eps, hidden0,
      p["w1"], p["w2"], p["w3"], p["wih"], p["whh"], p["wout"], bias_pack)

    action = stats[..., 0:A]
    mean = stats[..., A:2 * A]
    log_prob = stats[..., 2 * A:2 * A + 1]
    return action, log_prob, mean, hidseq


def sac_forward(obs, hidden, params, eps):
    """Single-step SAC.forward: obs [B,S], hidden [B,H], eps [B,A]
    -> (action, log_prob, mean, hidden')."""
    a, lp, m, hs = sac_rollout(obs[None, None], eps[None, None],
                               hidden[None], params)
    return a[0, 0], lp[0, 0], m[0, 0], hs[0, 0]


# ----------------------- deterministic parameter init -----------------------
def init_params(key, state_size, action_size):
    """PyTorch-style U(-1/sqrt(fan_in), 1/sqrt(fan_in)); weights stored [in, out]."""
    def lin_init(k, fan_in, fan_out):
        k1, k2 = jax.random.split(k)
        bound = 1.0 / math.sqrt(fan_in)
        w = jax.random.uniform(k1, (fan_in, fan_out), jnp.float32, -bound, bound)
        b = jax.random.uniform(k2, (1, fan_out), jnp.float32, -bound, bound)
        return w, b

    keys = jax.random.split(key, 5)
    p = {}
    p["w1"], p["b1"] = lin_init(keys[0], state_size, SIZE_1)
    p["w2"], p["b2"] = lin_init(keys[1], SIZE_1, SIZE_2)
    p["w3"], p["b3"] = lin_init(keys[2], SIZE_2, SIZE_3)
    # GRUCell (gate order r,z,n), PyTorch init U(-1/sqrt(H), 1/sqrt(H))
    bound = 1.0 / math.sqrt(SIZE_MEM)
    kg = jax.random.split(keys[3], 4)
    p["wih"] = jax.random.uniform(kg[0], (SIZE_3, 3 * SIZE_MEM), jnp.float32, -bound, bound)
    p["bih"] = jax.random.uniform(kg[1], (1, 3 * SIZE_MEM), jnp.float32, -bound, bound)
    p["whh"] = jax.random.uniform(kg[2], (SIZE_MEM, 3 * SIZE_MEM), jnp.float32, -bound, bound)
    p["bhh"] = jax.random.uniform(kg[3], (1, 3 * SIZE_MEM), jnp.float32, -bound, bound)
    # mu and log_std heads packed along the output axis: cols [0:A]=mu, [A:2A]=log_std
    p["wout"], p["bout"] = lin_init(keys[4], SIZE_MEM, 2 * action_size)
    return p


# ----------------------------- pure-JAX reference ----------------------------
def ref_step(p, obs, hidden, eps):
    H = hidden.shape[1]
    A = eps.shape[1]
    x = jax.nn.relu(obs @ p["w1"] + p["b1"])
    x = jax.nn.relu(x @ p["w2"] + p["b2"])
    x = jax.nn.relu(x @ p["w3"] + p["b3"])
    gi = x @ p["wih"] + p["bih"]
    gh = hidden @ p["whh"] + p["bhh"]
    r = jax.nn.sigmoid(gi[:, :H] + gh[:, :H])
    z = jax.nn.sigmoid(gi[:, H:2 * H] + gh[:, H:2 * H])
    cand = jnp.tanh(gi[:, 2 * H:] + r * gh[:, 2 * H:])
    h_new = (1.0 - z) * cand + z * hidden
    hr = jax.nn.relu(h_new)
    mo = hr @ p["wout"] + p["bout"]
    mu, ls = mo[:, :A], mo[:, A:2 * A]
    ls = jnp.tanh(ls)
    ls = LOG_STD_MIN + 0.5 * (LOG_STD_MAX - LOG_STD_MIN) * (ls + 1.0)
    std = jnp.exp(ls)
    x_t = mu + std * eps
    y_t = jnp.tanh(x_t)
    action = y_t * ACTION_SCALE + ACTION_BIAS
    lp = -0.5 * jnp.square((x_t - mu) / std) - ls - HALF_LOG_2PI
    lp = lp - jnp.log(ACTION_SCALE * (1.0 - jnp.square(y_t)) + EPSILON)
    log_prob = jnp.sum(lp, axis=1, keepdims=True)
    mean = jnp.tanh(mu) * ACTION_SCALE + ACTION_BIAS
    return action, log_prob, mean, h_new


def ref_rollout(p, obs_seq, eps_seq, h0):
    """obs_seq [T,B,S], eps_seq [T,B,A], h0 [B,H]."""
    def f(h, oe):
        o, e = oe
        a, lp, m, h_new = ref_step(p, o, h, e)
        return h_new, (a, lp, m, h_new)
    _, (a, lp, m, hs) = lax.scan(f, h0, (obs_seq, eps_seq))
    return a, lp, m, hs


if __name__ == "__main__":
    G = 2          # independent env groups (parallel grid axis; 2 TCs on v7x)
    T = 6          # timesteps per rollout (sequential grid axis, GRU carry in VMEM)
    B = 8          # fills all 8 vreg sublanes / MXU rows
    STATE = 8
    ACTIONS = 4

    key = jax.random.PRNGKey(0)
    k_param, k_obs, k_hid, k_eps = jax.random.split(key, 4)
    params = init_params(k_param, STATE, ACTIONS)
    obs = jax.random.normal(k_obs, (G, T, B, STATE), jnp.float32)
    hidden0 = jax.random.normal(k_hid, (G, B, SIZE_MEM), jnp.float32) * 0.1
    # TODO(synk): torch.distributions.Normal.rsample draws from torch's RNG
    # stream; the gaussian noise is supplied as an explicit input instead.
    eps = jax.random.normal(k_eps, (G, T, B, ACTIONS), jnp.float32)

    # ---- multi-step rollout (the main kernel path) ----
    rollout = jax.jit(sac_rollout)
    out = jax.block_until_ready(rollout(obs, eps, hidden0, params))
    a_k, lp_k, m_k, hs_k = out

    names = ("action", "log_prob", "mean", "hidden_seq")
    for g in range(G):
        ref = ref_rollout(params, obs[g], eps[g], hidden0[g])
        got = (a_k[g], lp_k[g], m_k[g], hs_k[g])
        for name, gv, rv in zip(names, got, ref):
            assert gv.shape == rv.shape, (name, gv.shape, rv.shape)
            err = float(jnp.max(jnp.abs(gv - rv)))
            assert jnp.allclose(gv, rv, atol=2e-4, rtol=2e-4), (name, g, err)

    # ---- single-step forward (original SAC.forward semantics) ----
    fwd = jax.jit(sac_forward)
    out1 = jax.block_until_ready(fwd(obs[0, 0], hidden0[0], params, eps[0, 0]))
    ref1 = ref_step(params, obs[0, 0], hidden0[0], eps[0, 0])
    for name, gv, rv in zip(("action", "log_prob", "mean", "hidden"), out1, ref1):
        assert gv.shape == rv.shape, (name, gv.shape, rv.shape)
        err = float(jnp.max(jnp.abs(gv - rv)))
        assert jnp.allclose(gv, rv, atol=2e-4, rtol=2e-4), (name, err)

    print("KERNEL_OK")
</pallas_src>

<mosaic_0001>
module attributes {stable_mosaic.version = 11 : i64} {
  func.func @sac_kernel(%arg0: i32, %arg1: i32, %arg2: memref<1x1x8x8xf32, #tpu.memory_space<vmem>>, %arg3: memref<1x1x8x4xf32, #tpu.memory_space<vmem>>, %arg4: memref<1x8x256xf32, #tpu.memory_space<vmem>>, %arg5: memref<8x32xf32, #tpu.memory_space<vmem>>, %arg6: memref<32x64xf32, #tpu.memory_space<vmem>>, %arg7: memref<64x32xf32, #tpu.memory_space<vmem>>, %arg8: memref<32x768xf32, #tpu.memory_space<vmem>>, %arg9: memref<256x768xf32, #tpu.memory_space<vmem>>, %arg10: memref<256x8xf32, #tpu.memory_space<vmem>>, %arg11: memref<1x2048xf32, #tpu.memory_space<vmem>>, %arg12: memref<1x1x8x9xf32, #tpu.memory_space<vmem>>, %arg13: memref<1x1x8x256xf32, #tpu.memory_space<vmem>>, %arg14: memref<8x256xf32, #tpu.memory_space<vmem>>) attributes {dimension_semantics = [#tpu.dimension_semantics<parallel>, #tpu.dimension_semantics<arbitrary>], iteration_bounds = array<i64: 2, 6>, scalar_prefetch = 0 : i64, scratch_operands = 1 : i64, tpu.core_type = #tpu.core_type<tc>, window_params = [{transform_indices = @transform_0, window_bounds = array<i64: 1, 1, 8, 8>}, {transform_indices = @transform_1, window_bounds = array<i64: 1, 1, 8, 4>}, {transform_indices = @transform_2, window_bounds = array<i64: 1, 8, 256>}, {pipeline_mode = #tpu.pipeline_mode<synchronous>, transform_indices = @transform_3, window_bounds = array<i64: 8, 32>}, {pipeline_mode = #tpu.pipeline_mode<synchronous>, transform_indices = @transform_4, window_bounds = array<i64: 32, 64>}, {pipeline_mode = #tpu.pipeline_mode<synchronous>, transform_indices = @transform_5, window_bounds = array<i64: 64, 32>}, {pipeline_mode = #tpu.pipeline_mode<synchronous>, transform_indices = @transform_6, window_bounds = array<i64: 32, 768>}, {pipeline_mode = #tpu.pipeline_mode<synchronous>, transform_indices = @transform_7, window_bounds = array<i64: 256, 768>}, {pipeline_mode = #tpu.pipeline_mode<synchronous>, transform_indices = @transform_8, window_bounds = array<i64: 256, 8>}, {pipeline_mode = #tpu.pipeline_mode<synchronous>, transform_indices = @transform_9, window_bounds = array<i64: 1, 2048>}, {transform_indices = @transform_10, window_bounds = array<i64: 1, 1, 8, 9>}, {transform_indices = @transform_11, window_bounds = array<i64: 1, 1, 8, 256>}]} {
    %c0_i32 = arith.constant 0 : i32
    %0 = arith.cmpi eq, %arg1, %c0_i32 : i32
    %1 = arith.extui %0 : i1 to i32
    %c0_i32_0 = arith.constant 0 : i32
    %2 = arith.cmpi ne, %1, %c0_i32_0 : i32
    scf.if %2 {
      %c0_64 = arith.constant 0 : index
      %c0_65 = arith.constant 0 : index
      %c0_66 = arith.constant 0 : index
      %119 = vector.load %arg4[%c0_64, %c0_65, %c0_66] : memref<1x8x256xf32, #tpu.memory_space<vmem>>, vector<1x8x256xf32>
      %120 = vector.shape_cast %119 : vector<1x8x256xf32> to vector<8x256xf32>
      %c0_67 = arith.constant 0 : index
      %c0_68 = arith.constant 0 : index
      %121 = vector.load %arg14[%c0_67, %c0_68] : memref<8x256xf32, #tpu.memory_space<vmem>>, vector<8x256xf32>
      tpu.vector_store %arg14[%c0_67, %c0_68], %120 {strides = array<i32>} : memref<8x256xf32, #tpu.memory_space<vmem>>, vector<8x256xf32>,
    } else {
    }
    %c0 = arith.constant 0 : index
    %c0_1 = arith.constant 0 : index
    %c0_2 = arith.constant 0 : index
    %c0_3 = arith.constant 0 : index
    %3 = vector.load %arg2[%c0, %c0_1, %c0_2, %c0_3] : memref<1x1x8x8xf32, #tpu.memory_space<vmem>>, vector<1x1x8x8xf32>
    %4 = vector.shape_cast %3 : vector<1x1x8x8xf32> to vector<8x8xf32>
    %c0_4 = arith.constant 0 : index
    %c0_5 = arith.constant 0 : index
    %5 = vector.load %arg14[%c0_4, %c0_5] : memref<8x256xf32, #tpu.memory_space<vmem>>, vector<8x256xf32>
    %c0_6 = arith.constant 0 : index
    %c0_7 = arith.constant 0 : index
    %6 = vector.load %arg5[%c0_6, %c0_7] : memref<8x32xf32, #tpu.memory_space<vmem>>, vector<8x32xf32>
    %cst = arith.constant dense<0.000000e+00> : vector<8x32xf32>
    %7 = tpu.matmul %4, %6, %cst {dimension_numbers = #tpu.dot_dimension_numbers<[1], [0], [0], [1], [0, 0, 1, 1], [], []>, precision = #tpu.contract_precision<fp32>} : vector<8x8xf32>, vector<8x32xf32>, vector<8x32xf32> -> vector<8x32xf32>
    %c0_8 = arith.constant 0 : index
    %c0_9 = arith.constant 0 : index
    %8 = vector.load %arg11[%c0_8, %c0_9] : memref<1x2048xf32, #tpu.memory_space<vmem>>, vector<1x32xf32>
    %9 = vector.broadcast %8 : vector<1x32xf32> to vector<8x32xf32>
    %10 = arith.addf %7, %9 : vector<8x32xf32>
    %cst_10 = arith.constant 0.000000e+00 : f32
    %11 = vector.broadcast %cst_10 : f32 to vector<8x32xf32>
    %12 = arith.maximumf %10, %11 : vector<8x32xf32>
    %c0_11 = arith.constant 0 : index
    %c0_12 = arith.constant 0 : index
    %13 = vector.load %arg6[%c0_11, %c0_12] : memref<32x64xf32, #tpu.memory_space<vmem>>, vector<32x64xf32>
    %cst_13 = arith.constant dense<0.000000e+00> : vector<8x64xf32>
    %14 = tpu.matmul %12, %13, %cst_13 {dimension_numbers = #tpu.dot_dimension_numbers<[1], [0], [0], [1], [0, 0, 1, 1], [], []>, precision = #tpu.contract_precision<fp32>} : vector<8x32xf32>, vector<32x64xf32>, vector<8x64xf32> -> vector<8x64xf32>
    %c0_14 = arith.constant 0 : index
    %c128 = arith.constant 128 : index
    %15 = vector.load %arg11[%c0_14, %c128] : memref<1x2048xf32, #tpu.memory_space<vmem>>, vector<1x64xf32>
    %16 = vector.broadcast %15 : vector<1x64xf32> to vector<8x64xf32>
    %17 = arith.addf %14, %16 : vector<8x64xf32>
    %cst_15 = arith.constant 0.000000e+00 : f32
    %18 = vector.broadcast %cst_15 : f32 to vector<8x64xf32>
    %19 = arith.maximumf %17, %18 : vector<8x64xf32>
    %c0_16 = arith.constant 0 : index
    %c0_17 = arith.constant 0 : index
    %20 = vector.load %arg7[%c0_16, %c0_17] : memref<64x32xf32, #tpu.memory_space<vmem>>, vector<64x32xf32>
    %cst_18 = arith.constant dense<0.000000e+00> : vector<8x32xf32>
    %21 = tpu.matmul %19, %20, %cst_18 {dimension_numbers = #tpu.dot_dimension_numbers<[1], [0], [0], [1], [0, 0, 1, 1], [], []>, precision = #tpu.contract_precision<fp32>} : vector<8x64xf32>, vector<64x32xf32>, vector<8x32xf32> -> vector<8x32xf32>
    %c0_19 = arith.constant 0 : index
    %c256 = arith.constant 256 : index
    %22 = vector.load %arg11[%c0_19, %c256] : memref<1x2048xf32, #tpu.memory_space<vmem>>, vector<1x32xf32>
    %23 = vector.broadcast %22 : vector<1x32xf32> to vector<8x32xf32>
    %24 = arith.addf %21, %23 : vector<8x32xf32>
    %cst_20 = arith.constant 0.000000e+00 : f32
    %25 = vector.broadcast %cst_20 : f32 to vector<8x32xf32>
    %26 = arith.maximumf %24, %25 : vector<8x32xf32>
    %c0_21 = arith.constant 0 : index
    %c0_22 = arith.constant 0 : index
    %27 = vector.load %arg8[%c0_21, %c0_22] : memref<32x768xf32, #tpu.memory_space<vmem>>, vector<32x768xf32>
    %cst_23 = arith.constant dense<0.000000e+00> : vector<8x768xf32>
    %28 = tpu.matmul %26, %27, %cst_23 {dimension_numbers = #tpu.dot_dimension_numbers<[1], [0], [0], [1], [0, 0, 1, 1], [], []>, precision = #tpu.contract_precision<fp32>} : vector<8x32xf32>, vector<32x768xf32>, vector<8x768xf32> -> vector<8x768xf32>
    %c0_24 = arith.constant 0 : index
    %c384 = arith.constant 384 : index
    %29 = vector.load %arg11[%c0_24, %c384] : memref<1x2048xf32, #tpu.memory_space<vmem>>, vector<1x768xf32>
    %30 = vector.broadcast %29 : vector<1x768xf32> to vector<8x768xf32>
    %31 = arith.addf %28, %30 : vector<8x768xf32>
    %c0_25 = arith.constant 0 : index
    %c0_26 = arith.constant 0 : index
    %32 = vector.load %arg9[%c0_25, %c0_26] : memref<256x768xf32, #tpu.memory_space<vmem>>, vector<256x768xf32>
    %cst_27 = arith.constant dense<0.000000e+00> : vector<8x768xf32>
    %33 = tpu.matmul %5, %32, %cst_27 {dimension_numbers = #tpu.dot_dimension_numbers<[1], [0], [0], [1], [0, 0, 1, 1], [], []>, precision = #tpu.contract_precision<fp32>} : vector<8x256xf32>, vector<256x768xf32>, vector<8x768xf32> -> vector<8x768xf32>
    %c0_28 = arith.constant 0 : index
    %c1152 = arith.constant 1152 : index
    %34 = vector.load %arg11[%c0_28, %c1152] : memref<1x2048xf32, #tpu.memory_space<vmem>>, vector<1x768xf32>
    %35 = vector.broadcast %34 : vector<1x768xf32> to vector<8x768xf32>
    %36 = arith.addf %33, %35 : vector<8x768xf32>
    %37 = vector.extract_strided_slice %31 {offsets = [0, 0], sizes = [8, 256], strides = [1, 1]} : vector<8x768xf32> to vector<8x256xf32>
    %38 = vector.extract_strided_slice %36 {offsets = [0, 0], sizes = [8, 256], strides = [1, 1]} : vector<8x768xf32> to vector<8x256xf32>
    %39 = arith.addf %37, %38 : vector<8x256xf32>
    %40 = arith.negf %39 : vector<8x256xf32>
    %41 = math.exp %40 : vector<8x256xf32>
    %cst_29 = arith.constant 1.000000e+00 : f32
    %42 = vector.broadcast %cst_29 : f32 to vector<8x256xf32>
    %43 = arith.addf %42, %41 : vector<8x256xf32>
    %44 = arith.divf %42, %43 : vector<8x256xf32>
    %45 = vector.extract_strided_slice %31 {offsets = [0, 256], sizes = [8, 256], strides = [1, 1]} : vector<8x768xf32> to vector<8x256xf32>
    %46 = vector.extract_strided_slice %36 {offsets = [0, 256], sizes = [8, 256], strides = [1, 1]} : vector<8x768xf32> to vector<8x256xf32>
    %47 = arith.addf %45, %46 : vector<8x256xf32>
    %48 = arith.negf %47 : vector<8x256xf32>
    %49 = math.exp %48 : vector<8x256xf32>
    %cst_30 = arith.constant 1.000000e+00 : f32
    %50 = vector.broadcast %cst_30 : f32 to vector<8x256xf32>
    %51 = arith.addf %50, %49 : vector<8x256xf32>
    %52 = arith.divf %50, %51 : vector<8x256xf32>
    %53 = vector.extract_strided_slice %31 {offsets = [0, 512], sizes = [8, 256], strides = [1, 1]} : vector<8x768xf32> to vector<8x256xf32>
    %54 = vector.extract_strided_slice %36 {offsets = [0, 512], sizes = [8, 256], strides = [1, 1]} : vector<8x768xf32> to vector<8x256xf32>
    %55 = arith.mulf %44, %54 : vector<8x256xf32>
    %56 = arith.addf %53, %55 : vector<8x256xf32>
    %57 = math.tanh %56 : vector<8x256xf32>
    %cst_31 = arith.constant 1.000000e+00 : f32
    %58 = vector.broadcast %cst_31 : f32 to vector<8x256xf32>
    %59 = arith.subf %58, %52 : vector<8x256xf32>
    %60 = arith.mulf %59, %57 : vector<8x256xf32>
    %61 = arith.mulf %52, %5 : vector<8x256xf32>
    %62 = arith.addf %60, %61 : vector<8x256xf32>
    %c0_32 = arith.constant 0 : index
    %c0_33 = arith.constant 0 : index
    %63 = vector.load %arg14[%c0_32, %c0_33] : memref<8x256xf32, #tpu.memory_space<vmem>>, vector<8x256xf32>
    tpu.vector_store %arg14[%c0_32, %c0_33], %62 {strides = array<i32>} : memref<8x256xf32, #tpu.memory_space<vmem>>, vector<8x256xf32>,
    %c0_34 = arith.constant 0 : index
    %c0_35 = arith.constant 0 : index
    %c0_36 = arith.constant 0 : index
    %c0_37 = arith.constant 0 : index
    %64 = vector.load %arg13[%c0_34, %c0_35, %c0_36, %c0_37] : memref<1x1x8x256xf32, #tpu.memory_space<vmem>>, vector<1x1x8x256xf32>
    %65 = vector.shape_cast %64 : vector<1x1x8x256xf32> to vector<8x256xf32>
    %66 = vector.shape_cast %62 : vector<8x256xf32> to vector<1x1x8x256xf32>
    tpu.vector_store %arg13[%c0_34, %c0_35, %c0_36, %c0_37], %66 {strides = array<i32>} : memref<1x1x8x256xf32, #tpu.memory_space<vmem>>, vector<1x1x8x256xf32>,
    %cst_38 = arith.constant 0.000000e+00 : f32
    %67 = vector.broadcast %cst_38 : f32 to vector<8x256xf32>
    %68 = arith.maximumf %62, %67 : vector<8x256xf32>
    %c0_39 = arith.constant 0 : index
    %c0_40 = arith.constant 0 : index
    %69 = vector.load %arg10[%c0_39, %c0_40] : memref<256x8xf32, #tpu.memory_space<vmem>>, vector<256x8xf32>
    %cst_41 = arith.constant dense<0.000000e+00> : vector<8x8xf32>
    %70 = tpu.matmul %68, %69, %cst_41 {dimension_numbers = #tpu.dot_dimension_numbers<[1], [0], [0], [1], [0, 0, 1, 1], [], []>, precision = #tpu.contract_precision<fp32>} : vector<8x256xf32>, vector<256x8xf32>, vector<8x8xf32> -> vector<8x8xf32>
    %c0_42 = arith.constant 0 : index
    %c1920 = arith.constant 1920 : index
    %71 = vector.load %arg11[%c0_42, %c1920] : memref<1x2048xf32, #tpu.memory_space<vmem>>, vector<1x8xf32>
    %72 = vector.broadcast %71 : vector<1x8xf32> to vector<8x8xf32>
    %73 = arith.addf %70, %72 : vector<8x8xf32>
    %74 = vector.extract_strided_slice %73 {offsets = [0, 0], sizes = [8, 4], strides = [1, 1]} : vector<8x8xf32> to vector<8x4xf32>
    %75 = vector.extract_strided_slice %73 {offsets = [0, 4], sizes = [8, 4], strides = [1, 1]} : vector<8x8xf32> to vector<8x4xf32>
    %76 = math.tanh %75 : vector<8x4xf32>
    %cst_43 = arith.constant 1.000000e+00 : f32
    %77 = vector.broadcast %cst_43 : f32 to vector<8x4xf32>
    %78 = arith.addf %76, %77 : vector<8x4xf32>
    %cst_44 = arith.constant 1.100000e+01 : f32
    %79 = vector.broadcast %cst_44 : f32 to vector<8x4xf32>
    %80 = arith.mulf %79, %78 : vector<8x4xf32>
    %cst_45 = arith.constant -2.000000e+01 : f32
    %81 = vector.broadcast %cst_45 : f32 to vector<8x4xf32>
    %82 = arith.addf %81, %80 : vector<8x4xf32>
    %83 = math.exp %82 : vector<8x4xf32>
    %c0_46 = arith.constant 0 : index
    %c0_47 = arith.constant 0 : index
    %c0_48 = arith.constant 0 : index
    %c0_49 = arith.constant 0 : index
    %84 = vector.load %arg3[%c0_46, %c0_47, %c0_48, %c0_49] : memref<1x1x8x4xf32, #tpu.memory_space<vmem>>, vector<1x1x8x4xf32>
    %85 = vector.shape_cast %84 : vector<1x1x8x4xf32> to vector<8x4xf32>
    %86 = arith.mulf %83, %85 : vector<8x4xf32>
    %87 = arith.addf %74, %86 : vector<8x4xf32>
    %88 = math.tanh %87 : vector<8x4xf32>
    %cst_50 = arith.constant 1.000000e+00 : f32
    %89 = vector.broadcast %cst_50 : f32 to vector<8x4xf32>
    %90 = arith.mulf %88, %89 : vector<8x4xf32>
    %cst_51 = arith.constant 0.000000e+00 : f32
    %91 = vector.broadcast %cst_51 : f32 to vector<8x4xf32>
    %92 = arith.addf %90, %91 : vector<8x4xf32>
    %93 = arith.mulf %85, %85 : vector<8x4xf32>
    %cst_52 = arith.constant -5.000000e-01 : f32
    %94 = vector.broadcast %cst_52 : f32 to vector<8x4xf32>
    %95 = arith.mulf %94, %93 : vector<8x4xf32>
    %96 = arith.subf %95, %82 : vector<8x4xf32>
    %cst_53 = arith.constant 0.918938517 : f32
    %97 = vector.broadcast %cst_53 : f32 to vector<8x4xf32>
    %98 = arith.subf %96, %97 : vector<8x4xf32>
    %99 = arith.mulf %88, %88 : vector<8x4xf32>
    %cst_54 = arith.constant 1.000000e+00 : f32
    %100 = vector.broadcast %cst_54 : f32 to vector<8x4xf32>
    %101 = arith.subf %100, %99 : vector<8x4xf32>
    %cst_55 = arith.constant 1.000000e+00 : f32
    %102 = vector.broadcast %cst_55 : f32 to vector<8x4xf32>
    %103 = arith.mulf %102, %101 : vector<8x4xf32>
    %cst_56 = arith.constant 9.99999997E-7 : f32
    %104 = vector.broadcast %cst_56 : f32 to vector<8x4xf32>
    %105 = arith.addf %103, %104 : vector<8x4xf32>
    %106 = math.log %105 : vector<8x4xf32>
    %107 = arith.subf %98, %106 : vector<8x4xf32>
    %cst_57 = arith.constant dense<0.000000e+00> : vector<8xf32>
    %108 = vector.multi_reduction <add>, %107, %cst_57 [1] : vector<8x4xf32> to vector<8xf32>
    %109 = vector.shape_cast %108 : vector<8xf32> to vector<8x1xf32>
    %110 = math.tanh %74 : vector<8x4xf32>
    %cst_58 = arith.constant 1.000000e+00 : f32
    %111 = vector.broadcast %cst_58 : f32 to vector<8x4xf32>
    %112 = arith.mulf %110, %111 : vector<8x4xf32>
    %cst_59 = arith.constant 0.000000e+00 : f32
    %113 = vector.broadcast %cst_59 : f32 to vector<8x4xf32>
    %114 = arith.addf %112, %113 : vector<8x4xf32>
    %115 = tpu.concatenate %92, %114, %109 in 1 : vector<8x4xf32>, vector<8x4xf32>, vector<8x1xf32> -> vector<8x9xf32>
    %c0_60 = arith.constant 0 : index
    %c0_61 = arith.constant 0 : index
    %c0_62 = arith.constant 0 : index
    %c0_63 = arith.constant 0 : index
    %116 = vector.load %arg12[%c0_60, %c0_61, %c0_62, %c0_63] : memref<1x1x8x9xf32, #tpu.memory_space<vmem>>, vector<1x1x8x9xf32>
    %117 = vector.shape_cast %116 : vector<1x1x8x9xf32> to vector<8x9xf32>
    %118 = vector.shape_cast %115 : vector<8x9xf32> to vector<1x1x8x9xf32>
    tpu.vector_store %arg12[%c0_60, %c0_61, %c0_62, %c0_63], %118 {strides = array<i32>} : memref<1x1x8x9xf32, #tpu.memory_space<vmem>>, vector<1x1x8x9xf32>,
    return
  }
  func.func @transform_0(%arg0: i32, %arg1: i32) -> (i32, i32, i32, i32) {
    %c0_i32 = arith.constant 0 : i32
    %c0_i32_0 = arith.constant 0 : i32
    %c0_i32_1 = arith.constant 0 : i32
    return %arg0, %arg1, %c0_i32, %c0_i32_0 : i32, i32, i32, i32
  }
  func.func @transform_1(%arg0: i32, %arg1: i32) -> (i32, i32, i32, i32) {
    %c0_i32 = arith.constant 0 : i32
    %c0_i32_0 = arith.constant 0 : i32
    %c0_i32_1 = arith.constant 0 : i32
    return %arg0, %arg1, %c0_i32, %c0_i32_0 : i32, i32, i32, i32
  }
  func.func @transform_2(%arg0: i32, %arg1: i32) -> (i32, i32, i32) {
    %c0_i32 = arith.constant 0 : i32
    %c0_i32_0 = arith.constant 0 : i32
    %c0_i32_1 = arith.constant 0 : i32
    return %arg0, %c0_i32, %c0_i32_0 : i32, i32, i32
  }
  func.func @transform_3(%arg0: i32, %arg1: i32) -> (i32, i32) {
    %c0_i32 = arith.constant 0 : i32
    %c0_i32_0 = arith.constant 0 : i32
    %c0_i32_1 = arith.constant 0 : i32
    return %c0_i32, %c0_i32_0 : i32, i32
  }
  func.func @transform_4(%arg0: i32, %arg1: i32) -> (i32, i32) {
    %c0_i32 = arith.constant 0 : i32
    %c0_i32_0 = arith.constant 0 : i32
    %c0_i32_1 = arith.constant 0 : i32
    return %c0_i32, %c0_i32_0 : i32, i32
  }
  func.func @transform_5(%arg0: i32, %arg1: i32) -> (i32, i32) {
    %c0_i32 = arith.constant 0 : i32
    %c0_i32_0 = arith.constant 0 : i32
    %c0_i32_1 = arith.constant 0 : i32
    return %c0_i32, %c0_i32_0 : i32, i32
  }
  func.func @transform_6(%arg0: i32, %arg1: i32) -> (i32, i32) {
    %c0_i32 = arith.constant 0 : i32
    %c0_i32_0 = arith.constant 0 : i32
    %c0_i32_1 = arith.constant 0 : i32
    return %c0_i32, %c0_i32_0 : i32, i32
  }
  func.func @transform_7(%arg0: i32, %arg1: i32) -> (i32, i32) {
    %c0_i32 = arith.constant 0 : i32
    %c0_i32_0 = arith.constant 0 : i32
    %c0_i32_1 = arith.constant 0 : i32
    return %c0_i32, %c0_i32_0 : i32, i32
  }
  func.func @transform_8(%arg0: i32, %arg1: i32) -> (i32, i32) {
    %c0_i32 = arith.constant 0 : i32
    %c0_i32_0 = arith.constant 0 : i32
    %c0_i32_1 = arith.constant 0 : i32
    return %c0_i32, %c0_i32_0 : i32, i32
  }
  func.func @transform_9(%arg0: i32, %arg1: i32) -> (i32, i32) {
    %c0_i32 = arith.constant 0 : i32
    %c0_i32_0 = arith.constant 0 : i32
    %c0_i32_1 = arith.constant 0 : i32
    return %c0_i32, %c0_i32_0 : i32, i32
  }
  func.func @transform_10(%arg0: i32, %arg1: i32) -> (i32, i32, i32, i32) {
    %c0_i32 = arith.constant 0 : i32
    %c0_i32_0 = arith.constant 0 : i32
    %c0_i32_1 = arith.constant 0 : i32
    return %arg0, %arg1, %c0_i32, %c0_i32_0 : i32, i32, i32, i32
  }
  func.func @transform_11(%arg0: i32, %arg1: i32) -> (i32, i32, i32, i32) {
    %c0_i32 = arith.constant 0 : i32
    %c0_i32_0 = arith.constant 0 : i32
    %c0_i32_1 = arith.constant 0 : i32
    return %arg0, %arg1, %c0_i32, %c0_i32_0 : i32, i32, i32, i32
  }
}

</mosaic_0001>

<bundles_post_ra>
// kernel: sac_rollout.1
= control target key start
LH: loop header
LB: loop body
LE: loop exit
PB: predicated region body
PF: predicated region fallthrough
CT: control target
= control target key end

     0   :  { %s16076_s0 = inlined_call_operand.vmem [shape: f32[2,6,8,8], index: 0, kind: input, shape index: {}]   ;;  %s16077_s1 = inlined_call_operand.vmem [shape: f32[2,6,8,4], index: 1, kind: input, shape index: {}]   ;;  %s16078_s2 = inlined_call_operand.vmem [shape: f32[2,8,256], index: 2, kind: input, shape index: {}]   ;;  %s16079_s3 = inlined_call_operand.vmem [shape: f32[8,32], index: 3, kind: input, shape index: {}]   ;;  %s16080_s4 = inlined_call_operand.vmem [shape: f32[32,64], index: 4, kind: input, shape index: {}]   ;;  %s16081_s5 = inlined_call_operand.vmem [shape: f32[64,32], index: 5, kind: input, shape index: {}]   ;;  %s16082_s6 = inlined_call_operand.vmem [shape: f32[32,768], index: 6, kind: input, shape index: {}]   ;;  %s16083_s7 = inlined_call_operand.hbm [shape: f32[256,768], index: 7, kind: input, shape index: {}]   ;;  %s16084_s8 = inlined_call_operand.vmem [shape: f32[256,8], index: 8, kind: input, shape index: {}]   ;;  %s16085_s9 = inlined_call_operand.vmem [shape: f32[1,2048], index: 9, kind: input, shape index: {}]   ;;  %s16086_s10 = inlined_call_operand.vmem [shape: f32[2,6,8,9], index: 10, kind: output, shape index: {0}]   ;;  %s16087_s11 = inlined_call_operand.hbm [shape: f32[2,6,8,256], index: 11, kind: output, shape index: {1}]  }
   0x1   :  { %16795 = sst [smem:[#allocation206_spill]] %s16083_s7 }
   0x2   :  { %16796 = sst [smem:[#allocation207_spill]] %s16087_s11 }
   0x3   :  { %17 = vsyncpa [#allocation4], 0 }
   0x4   :  { %18 = vsyncpa [#allocation5], 0 }
   0x5   :  { %20 = vsyncpa [#allocation5 + $0x1], 0  ;;  %s11537_s17 = smov 0   ;;  %s11539_s18 = smov 0  }
   0x6   :  { %s11541_s19 = smov 0   ;;  %s11543_s20 = smov 0  }
   0x7   :  { %s11545_s21 = smov 0   ;;  %s11547_s22 = smov 0  }
   0x8   :  { %s11549_s23 = smov 0   ;;  %s11551_s24 = smov 0  }
   0x9 LB: > { %16797 = sst [smem:[#allocation9_spill]] %s11438_s17  ;;  %s8969_s25 = sadd.s32 4294967295, %s11466_s24   ;;  %s11466_s24 = sphi %s11551_s24, %s26_s24   ;;  %s11462_s23 = sphi %s11549_s23, %s18349_s23   ;;  %s11458_s22 = sphi %s11547_s22, %s18352_s22   ;;  %s11454_s21 = sphi %s11545_s21, %s18347_s21   ;;  %s11450_s20 = sphi %s11543_s20, %s18346_s20   ;;  %s11446_s19 = sphi %s11541_s19, %s18345_s19   ;;  %s11442_s18 = sphi %s11539_s18, %s18351_s18   ;;  %s11438_s17 = sphi %s11537_s17, %s18350_s17  }
   0xa   : > { %16798 = sst [smem:[#allocation10_spill]] %s11446_s19  ;;  %s8970_s26 = sadd.s32 4294967294, %s11466_s24  }
   0xb   : > { %16799 = sst [smem:[#allocation11_spill]] %s11458_s22  ;;  %s35_s27 = sadd.s32 1, %s11458_s22 }
   0xc   : > { %16800 = sst [smem:[#allocation12_spill]] %s11462_s23  ;;  %s38_s28 = sadd.s32 1, %s11462_s23 }
   0xd   : > { %16801 = sst [smem:[#allocation13_spill]] %s11466_s24  ;;  %p36_p0 = scmp.ge.s32.totalorder %s35_s27, 6 }
   0xe   : > { %s304_s29 = sadd.s32 1, %s11446_s19  ;;  %p314_p1 = scmp.ne.s32.totalorder %s11446_s19, %s11442_s18 }
   0xf   : > { %p315_p2 = scmp.eq.s32.totalorder %s8969_s25, 11  ;;  %s18354_s27 = smov (%p36_p0, %s35_s27), 0 }
  0x10   : > { %16802 = sst [smem:[#allocation14_spill]] %s18354_s27  ;;  %s18356_s28 = smov (!%p36_p0, %s38_s28), %s11462_s23 }
  0x11   : > { %s300_s30 = ssub.s32 %s11458_s22, %s18354_s27  ;;  %p11589_p3 = por %p315_p2, %p314_p1 }
  0x12   : > { %p40_p4 = scmp.ge.s32.totalorder %s18356_s28, 2  ;;  %p320_p5 = scmp.ne.s32.totalorder %s11442_s18, %s11438_s17 }
  0x13   : > { %s16803_s12 = scalar_select %p11589_p3, 1, 0 }
  0x14   : > { %p321_p6 = scmp.eq.s32.totalorder %s8970_s26, 11  ;;  %p8971_p7 = scmp.ge.s32.totalorder %s11466_s24, 1 }
  0x15   : > { %16804 = sst [smem:[#allocation15_spill]] %s16803_s12  ;;  %s18358_s28 = smov (%p40_p4, %s18356_s28), 0 }
  0x16   : > { %16805 = sst [smem:[#allocation16_spill]] %s18358_s28  ;;  %p11598_p8 = por %p321_p6, %p320_p5 }
  0x17   : > { %p328_p9 = scmp.lt.s32.totalorder %s11466_s24, 13  ;;  %s299_s14 = ssub.s32 %s11462_s23, %s18358_s28 }
  0x18   : > { %s16806_s13 = scalar_select %p11598_p8, 1, 0 }
  0x19   : > { %s301_s15 = sor.u32 %s300_s30, %s299_s14  ;;  %p11605_p10 = pnand %p8971_p7, %p328_p9 }
  0x1a   : > { %16807 = sst [smem:[#allocation17_spill]] %s16806_s13  ;;  %p302_p11 = scmp.eq.s32.totalorder %s301_s15, 0 }
  0x1b   : > { %s16808_s16 = scalar_select %p11605_p10, 1, 0 }
  0x1c   : > { %p11609_p12 = scmp.eq.s32.totalorder %s8969_s25, 0  ;;  %p11225_p13 = pneg %p11605_p10 }
  0x1d   : > { %s11616_s26 = scalar_select %p302_p11, %s11446_s19, %s304_s29  }
  0x1e   : > { %s16809_s27 = scalar_select %p11609_p12, 1, 0 }
  0x1f   : > { %16810 = sst [smem:[#allocation18_spill]] %s11616_s26  ;;  %s11468_s22 = smov [#allocation3]  }
  0x20   : > { %s352_s13 = sshll.u32 %s11468_s22, 4  ;;  %p11620_p0 = pnand %p11609_p12, %p11225_p13  ;;  %s353_s13 = int_to_ptr.vmem [resolvable:$true] %s352_s13 }
  0x21   : > { %s16812_s7 = sld [smem:[#allocation206_spill]] }
  0x22   : > { %p11342_p2 = pneg %p11620_p0 }
  0x27   : > { %s11340_s25 = scalar_lea.hbm %s16812_s7, 24576 }
  0x28   : > { %p11341_p1 = scmp.ne.s32.totalorder %s16812_s7, %s11340_s25  ;;  %p11347_p6 = scmp.lt.u32.totalorder %s11340_s25, %s16812_s7 }
  0x2a   : > { %p11343_p4 = pnand %p11342_p2, %p11341_p1 }
  0x2c   : > { %p11344_p5 = pneg %p11343_p4 }
  0x2e   : > { %p11349_p7 = pnand %p11347_p6, %p11344_p5 }
  0x30   : > { %11352 = shalt.err (!%p11349_p7)
}
  0x31   : > { %s11353_s26 = scalar_lea.vmem %s353_s13, 24576  ;;  %p11361_p8 = scmp.lt.s32.totalorder %s353_s13, %s353_s13 }
  0x32   : > { %p11354_p9 = scmp.ne.s32.totalorder %s353_s13, %s11353_s26  ;;  %p11362_p3 = scmp.lt.s32.totalorder %s11353_s26, %s11353_s26 }
  0x34   : > { %p11356_p11 = pnand %p11354_p9, %p11342_p2  ;;  %p11363_p12 = por %p11362_p3, %p11361_p8 }
  0x36   : > { %p11357_p13 = pneg %p11356_p11 }
  0x38   : > { %p11364_p10 = pnand %p11363_p12, %p11357_p13 }
  0x3a   : > { %11367 = shalt.err (!%p11364_p10)
}
  0x3b   : > { %s11469_s23 = smov 768   ;;  %s11470_s28 = smov 48  }
  0x3c   : > { %11228 = dma.hbm_to_vmem [thread:$0]  (!%p11620_p0), %s16812_s7, 24576, %s353_s13, [#allocation4], %s11469_s23, %s11469_s23, %s11470_s28  }
  0x3d   : > { %p16813_p1 = scmp.ne.s32.totalorder %s16808_s16, 0 }
  0x3f   : > { %404 = sbr.rel (%p16813_p1) target bundleno = 2684 (0xa7c), region = 60 }
  0x46   : > { %p16814_p4 = scmp.ne.s32.totalorder %s16809_s27, 0 }
  0x48   : > { %11429 = dma.done.wait (%p16814_p4), [#allocation4], 24576  }
  0x49   : > { %11431 = vsyncadd (%p16814_p4), [#allocation4], 4294942720  ;;  %s16098_s26 = sand.u32 1, %s11442_s18   ;;  %p468_p3 = scmp.lt.s32.totalorder %s11454_s21, 1 }
  0x4a   : > { %s8976_s30 = sshll.u32 %s16098_s26, 4  ;;  %p470_p8 = scmp.lt.s32.totalorder %s11450_s20, 5 }
  0x4b   : > { %s469_s13 = scalar_select %p468_p3, %s11454_s21, 1 }
  0x4c   : > { %s471_s16 = scalar_select %p470_p8, %s11450_s20, 5 }
  0x4d   : > { %s11217_s25 = smul.u32 6, %s469_s13  ;;  %s8997_s22 = sshll.u32 %s469_s13, 4 }
  0x4e   : > { %s488_s27 = scalar_lea.vmem %s16078_s2, %s8997_s22  ;;  %s11670_s29 = scalar_lea.vmem [#allocation6], %s8976_s30 }
  0x4f   : > { %s473_s28 = sadd.s32 %s11217_s25, %s471_s16  ;;  %p8982_p10 = scmp.ne.s32.totalorder %s11450_s20, 0 }
  0x50   : > { %s11656_s14 = sshll.u32 %s473_s28, 3  ;;  %v501_v0 = vld [vmem:[%s488_s27] sm:$0xff] (!%p8982_p10)  ;;  %v502_v1 = vld [vmem:[%s488_s27 + $0x8] sm:$0xff] (!%p8982_p10) }
  0x51   : > { %s475_s19 = scalar_lea.vmem %s16076_s0, %s11656_s14  ;;  %s483_s24 = scalar_lea.vmem %s16077_s1, %s11656_s14  ;;  %503 = vst [vmem:[#allocation2] sm:$0xff] (!%p8982_p10), %v501_v0  ;;  %504 = vst [vmem:[#allocation2 + $0x8] sm:$0xff] (!%p8982_p10), %v502_v1 }
  0x52   : > { %s496_s12 = scalar_lea.vmem %s16086_s10, %s11656_s14  ;;  %500 = sbr.rel (%p8982_p10) target bundleno = 89 (0x59), region = 68 }
  0x59 PF: > { %v508_v2 = vld [vmem:[%s16079_s3] sm:$0xff]  ;;  %vm516_vm0 = vcmask 64512   ;;  %v16105_v4 = vmov 0.0   ;;  %vm11472_vm1 = vmmov 0   ;;  %v968_v17 = vld [vmem:[%s16080_s4 + $0x8] sm:$0xff]  ;;  %v11473_v21 = vmov 0.0|0.0  }
  0x5a   : > { %v505_v3 = vld [vmem:[%s475_s19] sm:$0xff]  ;;  %9309 = vmatprep.subr.mxu0 %v16105_v4  ;;  %v521_v5 = vand.u32 4294901760, %v508_v2  ;;  %9311 = vmatprep.mubr.msk.f32.mxu0 %vm11472_vm1, %v16105_v4  ;;  %v986_v19 = vand.u32 4294901760, %v968_v17  ;;  %v969_v22 = vld [vmem:[%s16080_s4 + $0x10] sm:$0xff]  ;;  %v970_v23 = vld [vmem:[%s16080_s4 + $0x18] sm:$0xff]  ;;  %vm978_vm2 = vcmask 261120  }
  0x5b   : > { %v518_v6 = vsel %vm516_vm0, %v505_v3, 0  ;;  %9304 = vmatprep.subr.mxu1 %v16105_v4  ;;  %9306 = vmatprep.mubr.msk.f32.mxu1 %vm11472_vm1, %v16105_v4  ;;  %v967_v16 = vld [vmem:[%s16080_s4] sm:$0xff]  ;;  %v989_v24 = vand.u32 4294901760, %v969_v22  ;;  %v992_v25 = vand.u32 4294901760, %v970_v23  ;;  %v1469_v0 = vld [vmem:[%s16081_s5 + $0x8] sm:$0xff]  ;;  %vm1483_vm3 = vcmask 523264  }
  0x5c   : > { %v586_v7 = vand.u32 4294901760, %v518_v6  ;;  %v598_v8 = vsub.f32 %v508_v2, %v521_v5  ;;  %9305 = vmatpush3.msra.mxu1 %v521_v5  ;;  %v983_v18 = vand.u32 4294901760, %v967_v16  ;;  %v1070_v27 = vsub.f32 %v968_v17, %v986_v19  ;;  %v8983_v51 = vld [vmem:[%s16085_s9] ss:$0 sm:$0xff]  ;;  %v1474_v17 = vld [vmem:[%s16081_s5 + $0x30] sm:$0xff]  ;;  %s11474_s7 = smov 4  }
  0x5d   : > { %9532 = vmatprep.subr.bf16.mxu1 %v11473_v21  ;;  %v9518_v28 = vpack.c.bf16 %v992_v25, %v989_v24  ;;  %v1077_v29 = vsub.f32 %v969_v22, %v989_v24  ;;  %v1084_v30 = vsub.f32 %v970_v23, %v992_v25  ;;  %v1468_v63 = vld [vmem:[%s16081_s5] sm:$0xff]  ;;  %v1491_v2 = vand.u32 4294901760, %v1469_v0  ;;  %s18336_s17 = sld [smem:[#allocation15_spill]]  ;;  %s11218_s19 = smul.u32 12, %s11454_s21 }
  0x5e   : > { %v587_v9 = vsub.f32 %v518_v6, %v586_v7  ;;  %v599_v10 = vand.u32 4294901760, %v598_v8  ;;  %v11705_v20 = vpack.c.bf16 %v986_v19, %v983_v18  ;;  %v1063_v26 = vsub.f32 %v967_v16, %v983_v18  ;;  %v1471_v6 = vld [vmem:[%s16081_s5 + $0x18] sm:$0xff]  ;;  %s8993_s26 = sshll.u32 %s11450_s20, 1  ;;  %s8812_s22 = sshll.u32 %s11670_s29, 4  ;;  %s8813_s22 = int_to_ptr.vmem [resolvable:$true] %s8812_s22 }
  0x5f   : > { %v1071_v32 = vand.u32 4294901760, %v1070_v27  ;;  %v1078_v38 = vand.u32 4294901760, %v1077_v29  ;;  %v1085_v39 = vand.u32 4294901760, %v1084_v30  ;;  %v9530_v48 = vpack.c.bf16 %v1084_v30, %v1077_v29  ;;  %v1475_v18 = vld [vmem:[%s16081_s5 + $0x38] sm:$0xff]  ;;  %s8808_s30 = sadd.s32 %s11218_s19, %s8993_s26  ;;  %s18337_s28 = sld [smem:[#allocation207_spill]] }
  0x60   : > { %v588_v11 = vand.u32 4294901760, %v587_v9  ;;  %v600_v12 = vsub.f32 %v598_v8, %v599_v10  ;;  %v1064_v31 = vand.u32 4294901760, %v1063_v26  ;;  %v9527_v47 = vpack.c.bf16 %v1070_v27, %v1063_v26  ;;  %s8994_s25 = sshll.u32 %s8808_s30, 7  ;;  %s18338_s13 = sand.u32 1, %s11442_s18  }
  0x61   : > { %v1072_v35 = vsub.f32 %v1070_v27, %v1071_v32  ;;  %v9542_v41 = vpack.c.bf16 %v1085_v39, %v1078_v38  ;;  %v1079_v42 = vsub.f32 %v1077_v29, %v1078_v38  ;;  %v1086_v43 = vsub.f32 %v1084_v30, %v1085_v39  ;;  %s11368_s16 = scalar_lea.vmem %s8813_s22, 256  ;;  %s11476_s11 = smov [#allocation6]  }
  0x62   : > { %v589_v13 = vsub.f32 %v587_v9, %v588_v11  ;;  %v601_v14 = vand.u32 4294901760, %v600_v12  ;;  %v9539_v33 = vpack.c.bf16 %v1071_v32, %v1064_v31  ;;  %v1065_v34 = vsub.f32 %v1063_v26, %v1064_v31  ;;  %p11369_p12 = scmp.ne.s32.totalorder %s8813_s22, %s11368_s16 }
  0x63   : > { %v1073_v37 = vand.u32 4294901760, %v1072_v35  ;;  %v1080_v44 = vand.u32 4294901760, %v1079_v42  ;;  %v1087_v45 = vand.u32 4294901760, %v1086_v43  ;;  %v1488_v1 = vand.u32 4294901760, %v1468_v63  ;;  %p18339_p0 = scmp.ne.s32.totalorder %s18336_s17, 0 }
  0x64   : > { %v590_v15 = vand.u32 4294901760, %v589_v13  ;;  %9310 = vmatpush3.msra.mxu0 %v601_v14  ;;  %v1066_v36 = vand.u32 4294901760, %v1065_v34  ;;  %v1506_v24 = vand.u32 4294901760, %v1474_v17  ;;  %v1509_v25 = vand.u32 4294901760, %v1475_v18 }
  0x65   : > { %9312 = vmatmul.mubr.f32.vlgmr.msra.gmra.mrb[0].mxu0 %v586_v7  ;;  %9314 = vmatprep.subr.mxu0 %v16105_v4  ;;  %v9524_v46 = vpack.c.bf16 %v1087_v45, %v1080_v44  ;;  %v11750_v3 = vpack.c.bf16 %v1491_v2, %v1488_v1  ;;  %v11770_v14 = vsub.f32 %v1468_v63, %v1488_v1  ;;  %vm8771_vm4 = vcmask 31744   ;;  %s16021_s15 = scalar_lea.hbm %s18337_s28, %s8994_s25  ;;  %p11370_p2 = pnand %p11369_p12, %p18339_p0 }
  0x66   : > { %9315 = vmatpush3.msra.mxu0 %v598_v8  ;;  %9316 = vmatprep.mubr.msk.f32.mxu0 %vm11472_vm1, %v16105_v4  ;;  %v9521_v40 = vpack.c.bf16 %v1073_v37, %v1066_v36  ;;  %v1497_v8 = vand.u32 4294901760, %v1471_v6  ;;  %v11796_v29 = vsub.f32 %v1474_v17, %v1506_v24  ;;  %v11798_v30 = vsub.f32 %v1475_v18, %v1509_v25 }
  0x67   : > { %9319 = vmatprep.subr.mxu0 %v16105_v4  ;;  %9307 = vmatmul.mubr.f32.vlgmr.msra.gmra.mrb[0].mxu1 %v590_v15  ;;  %v11772_v15 = vsub.f32 %v1469_v0, %v1491_v2  ;;  %v1573_v26 = vand.u32 4294901760, %v11770_v14  ;;  %p11371_p5 = pneg %p11370_p2 }
  0x68   : > { %9375 = vmatprep.mubr.msk.f32.mxu1 %vm11472_vm1, %v16105_v4  ;;  %9534 = vmatpush3.bf16.msra.mxu1 %v11705_v20 }
  0x69   : > { %9535 = vmatprep.subr.bf16.mxu1 %v11473_v21  ;;  %v1580_v27 = vand.u32 4294901760, %v11772_v15  ;;  %v1574_v31 = vsub.f32 %v11770_v14, %v1573_v26 }
  0x6b   : > { %v1581_v32 = vsub.f32 %v11772_v15, %v1580_v27 }
  0x6c   : > { %9537 = vmatpush3.bf16.msra.mxu1 %v9518_v28 }
  0x6d   : > { %9317 = vmatmul.mubr.f32.vlgmr.msra.gmra.mrb[0].mxu0 %v587_v9  ;;  %9538 = vmatprep.subr.bf16.mxu1 %v11473_v21  ;;  %v1582_v36 = vand.u32 4294901760, %v1581_v32 }
  0x6e   : > { %9320 = vmatpush3.msra.mxu0 %v521_v5  ;;  %9321 = vmatprep.mubr.msk.f32.mxu0 %vm11472_vm1, %v16105_v4 }
  0x6f   : > { %9324 = vmatprep.subr.mxu0 %v16105_v4 }
  0x75   : > { %9322 = vmatmul.mubr.f32.vlgmr.msra.gmra.mrb[0].mxu0 %v588_v11  ;;  %v1473_v11 = vld [vmem:[%s16081_s5 + $0x28] sm:$0xff] }
  0x76   : > { %9325 = vmatpush3.msra.mxu0 %v599_v10  ;;  %9326 = vmatprep.mubr.msk.f32.mxu0 %vm11472_vm1, %v16105_v4  ;;  %v1472_v10 = vld [vmem:[%s16081_s5 + $0x20] sm:$0xff]  ;;  %v1503_v13 = vand.u32 4294901760, %v1473_v11 }
  0x77   : > { %9329 = vmatprep.subr.mxu0 %v16105_v4  ;;  %v1500_v12 = vand.u32 4294901760, %v1472_v10 }
  0x78   : > { %v11789_v23 = vsub.f32 %v1473_v11, %v1503_v13 }
  0x79   : > { %v11774_v16 = vpack.c.bf16 %v1503_v13, %v1500_v12  ;;  %v11787_v22 = vsub.f32 %v1472_v10, %v1500_v12 }
  0x7a   : > { %v1608_v43 = vand.u32 4294901760, %v11789_v23 }
  0x7b   : > { %v1601_v42 = vand.u32 4294901760, %v11787_v22 }
  0x7d   : > { %9327 = vmatmul.mubr.f32.vlgmr.msra.gmra.mrb[0].mxu0 %v586_v7  ;;  %v1602_v45 = vsub.f32 %v11787_v22, %v1601_v42  ;;  %v9605_v63 = vpack.c.bf16 %v1608_v43, %v1601_v42 }
  0x7e   : > { %9330 = vmatpush3.msra.mxu0 %v521_v5  ;;  %9331 = vmatprep.mubr.msk.f32.mxu0 %vm11472_vm1, %v16105_v4  ;;  %v1470_v5 = vld [vmem:[%s16081_s5 + $0x10] sm:$0xff] }
  0x7f   : > { %9514 = vmatprep.subr.bf16.mxu0 %v11473_v21 }
  0x85   : > { %9332 = vmatmul.mubr.f32.vlgmr.msra.gmra.mrb[0].mxu0 %v586_v7  ;;  %v1494_v7 = vand.u32 4294901760, %v1470_v5 }
  0x86   : > { %9342 = vmatprep.mubr.msk.f32.mxu0 %vm11472_vm1, %v16105_v4  ;;  %9516 = vmatpush3.bf16.msra.mxu0 %v11705_v20 }
  0x87   : > { %9517 = vmatprep.subr.bf16.mxu0 %v11473_v21  ;;  %v11760_v9 = vpack.c.bf16 %v1497_v8, %v1494_v7  ;;  %v11782_v19 = vsub.f32 %v1470_v5, %v1494_v7  ;;  %v8984_v5 = vld [vmem:[%s16085_s9 + $0x1] ss:$0 sm:$0xff] }
  0x89   : > { %v1587_v34 = vand.u32 4294901760, %v11782_v19 }
  0x8a   : > { %9519 = vmatpush3.bf16.msra.mxu0 %v9518_v28 }
  0x8b   : > { %9520 = vmatprep.subr.bf16.mxu0 %v11473_v21  ;;  %v1588_v37 = vsub.f32 %v11782_v19, %v1587_v34 }
 0x13a   : > { %v592_v49 = vpop.f32.mrb[0].mxu1 }
 0x13b   : > { %v9308_v50 = vpop.f32.mrb[1].mxu1  ;;  %v593_v52 = vadd.f32 %v8983_v51, %v592_v49  ;;  %v1615_v49 = vand.u32 4294901760, %v11796_v29 }
 0x13c   : > { %v1622_v50 = vand.u32 4294901760, %v11798_v30 }
 0x13e   : > { %v9608_v0 = vpack.c.bf16 %v1622_v50, %v1615_v49 }
 0x158   : > { %v962_v53 = vpop.f32.mrb[0].mxu0 }
 0x159   : > { %v11111_v54 = vadd.f32 %v962_v53, %v593_v52  ;;  %v9333_v55 = vpop.f32.mrb[1].mxu0  ;;  %v1616_v52 = vsub.f32 %v11796_v29, %v1615_v49  ;;  %v1623_v53 = vsub.f32 %v11798_v30, %v1622_v50  ;;  %v2043_v50 = vld [vmem:[%s16082_s6 + $0x90] sm:$0xff] }
 0x15b   : > { %v966_v56 = vmax.f32 %v11111_v54, 0.0  ;;  %v1617_v54 = vand.u32 4294901760, %v1616_v52  ;;  %v1624_v55 = vand.u32 4294901760, %v1623_v53  ;;  %v2041_v52 = vld [vmem:[%s16082_s6 + $0x80] sm:$0xff] }
 0x15d   : > { %v980_v57 = vsel %vm978_vm2, %v966_v56, 0  ;;  %v9572_v56 = vpack.c.bf16 %v1624_v55, %v1617_v54 }
 0x15e   : > { %v1051_v58 = vand.u32 4294901760, %v980_v57 }
 0x160   : > { %v1052_v59 = vsub.f32 %v980_v57, %v1051_v58  ;;  %v9575_v57 = vpack.c.bf16 %v11772_v15, %v11770_v14 }
 0x162   : > { %v1053_v60 = vand.u32 4294901760, %v1052_v59 }
 0x164   : > { %9376 = vmatmul.mubr.f32.vlgmr.msra.gmra.mrb[2].mxu1 %v1053_v60  ;;  %v1054_v61 = vsub.f32 %v1052_v59, %v1053_v60  ;;  %v9584_v60 = vpack.c.bf16 %v11798_v30, %v11796_v29  ;;  %v2035_v29 = vld [vmem:[%s16082_s6 + $0x50] sm:$0xff] }
 0x165   : > { %9540 = vmatpush3.bf16.msra.mxu1 %v9539_v33  ;;  %9386 = vmatprep.mubr.msk.f32.mxu1 %vm11472_vm1, %v16105_v4  ;;  %v1575_v33 = vand.u32 4294901760, %v1574_v31 }
 0x166   : > { %v1055_v62 = vand.u32 4294901760, %v1054_v61  ;;  %9541 = vmatprep.subr.bf16.mxu1 %v11473_v21  ;;  %v9599_v61 = vpack.c.bf16 %v1580_v27, %v1573_v26 }
 0x167   : > { %v9563_v39 = vpack.c.bf16 %v1582_v36, %v1575_v33 }
 0x168   : > { %9343 = vmatmul.mubr.f32.vlgmr.msra.gmra.mrb[2].mxu0 %v1055_v62 }
 0x169   : > { %9522 = vmatpush3.bf16.msra.mxu0 %v9521_v40  ;;  %9543 = vmatpush3.bf16.msra.mxu1 %v9542_v41  ;;  %v1589_v40 = vand.u32 4294901760, %v1588_v37 }
 0x16a   : > { %9523 = vmatprep.subr.bf16.mxu0 %v11473_v21  ;;  %9544 = vmatprep.subr.bf16.mxu1 %v11473_v21 }
 0x16b   : > { %9353 = vmatprep.mubr.msk.f32.mxu0 %vm11472_vm1, %v16105_v4 }
 0x16c   : > { %9387 = vmatmul.mubr.f32.vlgmr.msra.gmra.mrb[2].mxu1 %v1051_v58 }
 0x16d   : > { %9525 = vmatpush3.bf16.msra.mxu0 %v9524_v46  ;;  %9546 = vmatpush3.bf16.msra.mxu1 %v11705_v20  ;;  %v11784_v20 = vsub.f32 %v1471_v6, %v1497_v8  ;;  %v1609_v46 = vsub.f32 %v11789_v23, %v1608_v43  ;;  %v3176_v43 = vand.u32 4294901760, %v2035_v29 }
 0x16e   : > { %9526 = vmatprep.subr.bf16.mxu0 %v11473_v21  ;;  %9547 = vmatprep.subr.bf16.mxu1 %v11473_v21 }
 0x16f   : > { %9397 = vmatprep.mubr.msk.f32.mxu1 %vm11472_vm1, %v16105_v4  ;;  %v1594_v35 = vand.u32 4294901760, %v11784_v20  ;;  %v11935_v55 = vsub.f32 %v2035_v29, %v3176_v43 }
 0x170   : > { %9354 = vmatmul.mubr.f32.vlgmr.msra.gmra.mrb[2].mxu0 %v1051_v58 }
 0x171   : > { %9528 = vmatpush3.bf16.msra.mxu0 %v9527_v47  ;;  %9549 = vmatpush3.bf16.msra.mxu1 %v9518_v28  ;;  %v11794_v28 = vpack.c.bf16 %v1509_v25, %v1506_v24  ;;  %v1595_v38 = vsub.f32 %v11784_v20, %v1594_v35  ;;  %v1603_v47 = vand.u32 4294901760, %v1602_v45  ;;  %v9602_v62 = vpack.c.bf16 %v1594_v35, %v1587_v34  ;;  %v2031_v24 = vld [vmem:[%s16082_s6 + $0x30] sm:$0xff]  ;;  %v2048_v45 = vld [vmem:[%s16082_s6 + $0xb8] sm:$0xff] }
 0x172   : > { %9529 = vmatprep.subr.bf16.mxu0 %v11473_v21  ;;  %9364 = vmatprep.mubr.msk.f32.mxu0 %vm11472_vm1, %v16105_v4  ;;  %v2090_v27 = vand.u32 4294901760, %v2031_v24  ;;  %v3182_v49 = vand.u32 4294901760, %v2048_v45 }
 0x173   : > { %v1596_v41 = vand.u32 4294901760, %v1595_v38  ;;  %v2038_v38 = vld [vmem:[%s16082_s6 + $0x68] sm:$0xff] }
 0x174   : > { %9398 = vmatmul.mubr.f32.vlgmr.msra.gmra.mrb[2].mxu1 %v1051_v58  ;;  %v9578_v58 = vpack.c.bf16 %v11784_v20, %v11782_v19  ;;  %v2032_v19 = vld [vmem:[%s16082_s6 + $0x38] sm:$0xff] }
 0x175   : > { %9531 = vmatpush3.bf16.msra.mxu0 %v9530_v48  ;;  %2156 = vmatprep.mubr.f32.mxu1 %v16105_v4  ;;  %v9566_v44 = vpack.c.bf16 %v1596_v41, %v1589_v40  ;;  %v1610_v48 = vand.u32 4294901760, %v1609_v46  ;;  %v2088_v20 = vand.u32 4294901760, %v2032_v19  ;;  %v2042_v40 = vld [vmem:[%s16082_s6 + $0x88] sm:$0xff]  ;;  %v11915_v41 = vsub.f32 %v2031_v24, %v2090_v27  ;;  %v2037_v46 = vld [vmem:[%s16082_s6 + $0x60] sm:$0xff] }
 0x176   : > { %9550 = vmatprep.subr.bf16.mxu0 %v11473_v21 }
 0x177   : > { %v9569_v51 = vpack.c.bf16 %v1610_v48, %v1603_v47  ;;  %v11893_v32 = vsub.f32 %v2032_v19, %v2088_v20  ;;  %v3178_v48 = vand.u32 4294901760, %v2042_v40 }
 0x178   : > { %9365 = vmatmul.mubr.f32.vlgmr.msra.gmra.mrb[2].mxu0 %v1052_v59  ;;  %v9581_v59 = vpack.c.bf16 %v11789_v23, %v11787_v22  ;;  %v2025_v23 = vld [vmem:[%s16082_s6] sm:$0xff] }
 0x179   : > { %9416 = vmatprep.mubr.msk.f32.mxu0 %vm11472_vm1, %v16105_v4  ;;  %9552 = vmatpush3.bf16.msra.mxu0 %v11750_v3  ;;  %v2086_v26 = vand.u32 4294901760, %v2025_v23 }
 0x17a   : > { %9553 = vmatprep.subr.bf16.mxu0 %v11473_v21 }
 0x17b   : > { %v11901_v36 = vpack.c.bf16 %v2090_v27, %v2086_v26  ;;  %v11903_v37 = vsub.f32 %v2025_v23, %v2086_v26 }
 0x17d   : > { %9555 = vmatpush3.bf16.msra.mxu0 %v11760_v9  ;;  %v2176_v19 = vand.u32 4294901760, %v11903_v37 }
 0x17e   : > { %9556 = vmatprep.subr.bf16.mxu0 %v11473_v21 }
 0x181   : > { %9558 = vmatpush3.bf16.msra.mxu0 %v11774_v16 }
 0x182   : > { %9559 = vmatprep.subr.bf16.mxu0 %v11473_v21 }
 0x185   : > { %9561 = vmatpush3.bf16.msra.mxu0 %v11794_v28 }
 0x186   : > { %9562 = vmatprep.subr.bf16.mxu0 %v11473_v21 }
 0x247   : > { %v1463_v1 = vpop.f32.mrb[2].mxu1 }
 0x248   : > { %v9399_v2 = vpop.f32.mrb[3].mxu1 }
 0x24b   : > { %v1228_v6 = vpop.f32.mrb[2].mxu0 }
 0x24c   : > { %v11112_v7 = vadd.f32 %v8984_v5, %v1228_v6  ;;  %v9366_v8 = vpop.f32.mrb[3].mxu0  ;;  %v2182_v6 = vand.u32 4294901760, %v11893_v32 }
 0x24e   : > { %v11113_v10 = vadd.f32 %v11112_v7, %v1463_v1  ;;  %v3180_v1 = vand.u32 4294901760, %v2041_v52 }
 0x250   : > { %v1467_v11 = vmax.f32 %v11113_v10, 0.0 }
 0x252   : > { %v1485_v12 = vsel %vm1483_vm3, %v1467_v11, 0  ;;  %v11964_v11 = vsub.f32 %v2041_v52, %v3180_v1 }
 0x253   : > { %v1560_v13 = vand.u32 4294901760, %v1485_v12 }
 0x255   : > { %v1561_v14 = vsub.f32 %v1485_v12, %v1560_v13 }
 0x257   : > { %v1562_v15 = vand.u32 4294901760, %v1561_v14 }
 0x259   : > { %v1563_v17 = vsub.f32 %v1561_v14, %v1562_v15 }
 0x25b   : > { %v1564_v18 = vand.u32 4294901760, %v1563_v17  ;;  %v2183_v17 = vsub.f32 %v11893_v32, %v2182_v6 }
 0x25d   : > { %9417 = vmatmul.mubr.f32.vlgmr.msra.gmra.mrb[4].mxu0 %v1564_v18 }
 0x25e   : > { %9564 = vmatpush3.bf16.msra.mxu0 %v9563_v39  ;;  %9435 = vmatprep.mubr.msk.f32.mxu0 %vm11472_vm1, %v16105_v4  ;;  %v2044_v39 = vld [vmem:[%s16082_s6 + $0x98] sm:$0xff] }
 0x25f   : > { %9565 = vmatprep.subr.bf16.mxu0 %v11473_v21  ;;  %v2096_v47 = vand.u32 4294901760, %v2044_v39 }
 0x262   : > { %9567 = vmatpush3.bf16.msra.mxu0 %v9566_v44  ;;  %v2092_v44 = vand.u32 4294901760, %v2038_v38 }
 0x263   : > { %9568 = vmatprep.subr.bf16.mxu0 %v11473_v21 }
 0x266   : > { %9570 = vmatpush3.bf16.msra.mxu0 %v9569_v51  ;;  %v2094_v51 = vand.u32 4294901760, %v2037_v46 }
 0x267   : > { %9571 = vmatprep.subr.bf16.mxu0 %v11473_v21 }
 0x26a   : > { %9573 = vmatpush3.bf16.msra.mxu0 %v9572_v56  ;;  %v11937_v56 = vsub.f32 %v2038_v38, %v2092_v44 }
 0x26b   : > { %9574 = vmatprep.subr.bf16.mxu0 %v11473_v21 }
 0x26c   : > { %v2194_v38 = vand.u32 4294901760, %v11937_v56 }
 0x26d   : > { %9436 = vmatmul.mubr.f32.vlgmr.msra.gmra.mrb[4].mxu0 %v1560_v13 }
 0x26e   : > { %9576 = vmatpush3.bf16.msra.mxu0 %v9575_v57  ;;  %9454 = vmatprep.mubr.msk.f32.mxu0 %vm11472_vm1, %v16105_v4  ;;  %v2047_v57 = vld [vmem:[%s16082_s6 + $0xb0] sm:$0xff] }
 0x26f   : > { %9577 = vmatprep.subr.bf16.mxu0 %v11473_v21  ;;  %v3184_v2 = vand.u32 4294901760, %v2047_v57 }
 0x272   : > { %9579 = vmatpush3.bf16.msra.mxu0 %v9578_v58  ;;  %v11942_v58 = vpack.c.bf16 %v2096_v47, %v2092_v44 }
 0x273   : > { %9580 = vmatprep.subr.bf16.mxu0 %v11473_v21 }
 0x276   : > { %9582 = vmatpush3.bf16.msra.mxu0 %v9581_v59  ;;  %v11944_v59 = vsub.f32 %v2044_v39, %v2096_v47 }
 0x277   : > { %9583 = vmatprep.subr.bf16.mxu0 %v11473_v21 }
 0x27a   : > { %9585 = vmatpush3.bf16.msra.mxu0 %v9584_v60  ;;  %v11946_v60 = vpack.c.bf16 %v3182_v49, %v3178_v48 }
 0x27b   : > { %9586 = vmatprep.subr.bf16.mxu0 %v11473_v21 }
 0x27c   : > { %16815 = vst [vmem:[#allocation19_spill] sm:$0xff] %v11946_v60 }
 0x27d   : > { %9455 = vmatmul.mubr.f32.vlgmr.msra.gmra.mrb[4].mxu0 %v1561_v14  ;;  %v11969_v14 = vsub.f32 %v2047_v57, %v3184_v2 }
 0x27e   : > { %9588 = vmatpush3.bf16.msra.mxu0 %v11750_v3  ;;  %9473 = vmatprep.mubr.msk.f32.mxu0 %vm11472_vm1, %v16105_v4 }
 0x27f   : > { %9589 = vmatprep.subr.bf16.mxu0 %v11473_v21 }
 0x282   : > { %9591 = vmatpush3.bf16.msra.mxu0 %v11760_v9 }
 0x283   : > { %9592 = vmatprep.subr.bf16.mxu0 %v11473_v21 }
 0x286   : > { %9594 = vmatpush3.bf16.msra.mxu0 %v11774_v16 }
 0x287   : > { %9595 = vmatprep.subr.bf16.mxu0 %v11473_v21 }
 0x28a   : > { %9597 = vmatpush3.bf16.msra.mxu0 %v11794_v28 }
 0x28b   : > { %9598 = vmatprep.subr.bf16.mxu0 %v11473_v21 }
 0x28d   : > { %9474 = vmatmul.mubr.f32.vlgmr.msra.gmra.mrb[4].mxu0 %v1562_v15 }
 0x28e   : > { %9600 = vmatpush3.bf16.msra.mxu0 %v9599_v61  ;;  %9492 = vmatprep.mubr.msk.f32.mxu0 %vm11472_vm1, %v16105_v4  ;;  %v11948_v61 = vsub.f32 %v2042_v40, %v3178_v48 }
 0x28f   : > { %9601 = vmatprep.subr.bf16.mxu0 %v11473_v21 }
 0x290   : > { %v3280_v47 = vand.u32 4294901760, %v11948_v61 }
 0x292   : > { %9603 = vmatpush3.bf16.msra.mxu0 %v9602_v62  ;;  %v11951_v62 = vsub.f32 %v2048_v45, %v3182_v49 }
 0x293   : > { %9604 = vmatprep.subr.bf16.mxu0 %v11473_v21 }
 0x296   : > { %9606 = vmatpush3.bf16.msra.mxu0 %v9605_v63  ;;  %v2098_v63 = vand.u32 4294901760, %v2043_v50 }
 0x297   : > { %9607 = vmatprep.subr.bf16.mxu0 %v11473_v21 }
 0x298   : > { %v11960_v8 = vpack.c.bf16 %v2098_v63, %v2094_v51  ;;  %v11962_v10 = vsub.f32 %v2043_v50, %v2098_v63  ;;  %v3292_v50 = vand.u32 4294901760, %v11951_v62  ;;  %v3281_v63 = vsub.f32 %v11948_v61, %v3280_v47 }
 0x29a   : > { %9609 = vmatpush3.bf16.msra.mxu0 %v9608_v0  ;;  %v11953_v0 = vsub.f32 %v2037_v46, %v2094_v51  ;;  %16816 = vst [vmem:[#allocation20_spill] sm:$0xff] %v11960_v8  ;;  %v2195_v46 = vsub.f32 %v11937_v56, %v2194_v38 }
 0x29b   : > { %9610 = vmatprep.subr.bf16.mxu0 %v11473_v21 }
 0x29c   : > { %v2200_v51 = vand.u32 4294901760, %v11953_v0  ;;  %v2196_v57 = vand.u32 4294901760, %v2195_v46 }
 0x29d   : > { %9493 = vmatmul.mubr.f32.vlgmr.msra.gmra.mrb[4].mxu0 %v1560_v13 }
 0x29e   : > { %9612 = vmatpush3.bf16.msra.mxu0 %v11750_v3  ;;  %9511 = vmatprep.mubr.msk.f32.mxu0 %vm11472_vm1, %v16105_v4  ;;  %v2026_v3 = vld [vmem:[%s16082_s6 + $0x8] sm:$0xff] }
 0x29f   : > { %9613 = vmatprep.subr.bf16.mxu0 %v11473_v21 }
 0x2a2   : > { %9615 = vmatpush3.bf16.msra.mxu0 %v11760_v9  ;;  %v2030_v9 = vld [vmem:[%s16082_s6 + $0x28] sm:$0xff] }
 0x2a3   : > { %9616 = vmatprep.subr.bf16.mxu0 %v11473_v21  ;;  %v3170_v22 = vand.u32 4294901760, %v2030_v9 }
 0x2a5   : > { %v11895_v33 = vsub.f32 %v2030_v9, %v3170_v22  ;;  %v2188_v9 = vand.u32 4294901760, %v11915_v41 }
 0x2a6   : > { %9618 = vmatpush3.bf16.msra.mxu0 %v11774_v16  ;;  %v2084_v16 = vand.u32 4294901760, %v2026_v3 }
 0x2a7   : > { %9619 = vmatprep.subr.bf16.mxu0 %v11473_v21  ;;  %v2036_v21 = vld [vmem:[%s16082_s6 + $0x58] sm:$0xff]  ;;  %v3256_v7 = vand.u32 4294901760, %v11895_v33  ;;  %v2189_v26 = vsub.f32 %v11915_v41, %v2188_v9 }
 0x2a8   : > { %v3174_v25 = vand.u32 4294901760, %v2036_v21  ;;  %v11889_v30 = vpack.c.bf16 %v2088_v20, %v2084_v16  ;;  %v11891_v31 = vsub.f32 %v2026_v3, %v2084_v16  ;;  %v2184_v20 = vand.u32 4294901760, %v2183_v17 }
 0x2a9   : > { %v3257_v18 = vsub.f32 %v11895_v33, %v3256_v7  ;;  %v2201_v17 = vsub.f32 %v11953_v0, %v2200_v51 }
 0x2aa   : > { %9621 = vmatpush3.bf16.msra.mxu0 %v11794_v28  ;;  %v2029_v28 = vld [vmem:[%s16082_s6 + $0x20] sm:$0xff]  ;;  %v11897_v34 = vpack.c.bf16 %v3174_v25, %v3170_v22  ;;  %v11899_v35 = vsub.f32 %v2036_v21, %v3174_v25  ;;  %9623 = vmatprep.subr.bf16.mxu1 %v11889_v30  ;;  %v2170_v5 = vand.u32 4294901760, %v11891_v31  ;;  %v3274_v22 = vand.u32 4294901760, %v11935_v55 }
 0x2ab   : > { %v3172_v42 = vand.u32 4294901760, %v2029_v28  ;;  %9625 = vmatpush1.bf16.msra.mxu1 %v11901_v36  ;;  %v3258_v23 = vand.u32 4294901760, %v3257_v18  ;;  %v2177_v25 = vsub.f32 %v11903_v37, %v2176_v19  ;;  %v3286_v18 = vand.u32 4294901760, %v11964_v11 }
 0x2ac   : > { %9719 = vmatprep.subr.bf16.mxu0 %v11897_v34  ;;  %9627 = vmatprep.subr.bf16.mxu1 %v11942_v58  ;;  %v3268_v12 = vand.u32 4294901760, %v11899_v35  ;;  %v2171_v15 = vsub.f32 %v11891_v31, %v2170_v5  ;;  %v3275_v29 = vsub.f32 %v11935_v55, %v3274_v22 }
 0x2ad   : > { %9512 = vmatmul.mubr.f32.vlgmr.msra.gmra.mrb[4].mxu0 %v1560_v13  ;;  %v11931_v53 = vpack.c.bf16 %v3176_v43, %v3172_v42  ;;  %v11933_v54 = vsub.f32 %v2029_v28, %v3172_v42  ;;  %v11967_v13 = vpack.c.bf16 %v3184_v2, %v3180_v1  ;;  %v2178_v40 = vand.u32 4294901760, %v2177_v25 }
 0x2ae   : > { %3242 = vmatprep.mubr.f32.mxu0 %v16105_v4  ;;  %v3269_v3 = vsub.f32 %v11899_v35, %v3268_v12  ;;  %v2172_v16 = vand.u32 4294901760, %v2171_v15  ;;  %v2190_v42 = vand.u32 4294901760, %v2189_v26  ;;  %v2206_v43 = vand.u32 4294901760, %v11944_v59  ;;  %v3732_v4 = vld [vmem:[#allocation3 + $0x98] sm:$0xff] }
 0x2af   : > { %9721 = vmatpush1.bf16.msra.mxu0 %v11931_v53  ;;  %16817 = vst [vmem:[#allocation21_spill] sm:$0xff] %v11967_v13  ;;  %9629 = vmatpush1.bf16.msra.mxu1 %v11960_v8  ;;  %v3262_v21 = vand.u32 4294901760, %v11933_v54  ;;  %v3276_v45 = vand.u32 4294901760, %v3275_v29  ;;  %v2212_v1 = vand.u32 4294901760, %v11962_v10  ;;  %v3293_v15 = vsub.f32 %v11951_v62, %v3292_v50 }
 0x2b0   : > { %9723 = vmatprep.subr.bf16.mxu0 %v11946_v60  ;;  %v3270_v24 = vand.u32 4294901760, %v3269_v3  ;;  %v9630_v27 = vpack.c.bf16 %v2184_v20, %v2172_v16  ;;  %v11997_v48 = vpack.c.bf16 %v2190_v42, %v2178_v40  ;;  %v2207_v49 = vsub.f32 %v11944_v59, %v2206_v43 }
 0x2b1   : > { %v3263_v28 = vsub.f32 %v11933_v54, %v3262_v21  ;;  %v3282_v3 = vand.u32 4294901760, %v3281_v63  ;;  %v2213_v16 = vsub.f32 %v11962_v10, %v2212_v1  ;;  %v3298_v20 = vand.u32 4294901760, %v11969_v14  ;;  %v2046_v63 = vld [vmem:[%s16082_s6 + $0xa8] sm:$0xff] }
 0x2b2   : > { %v9726_v39 = vpack.c.bf16 %v3270_v24, %v3258_v23  ;;  %9631 = vmatprep.subr.bf16.mxu1 %v9630_v27  ;;  %v2208_v2 = vand.u32 4294901760, %v2207_v49  ;;  %v3294_v25 = vand.u32 4294901760, %v3293_v15  ;;  %v2202_v26 = vand.u32 4294901760, %v2201_v17  ;;  %v3726_v23 = vld [vmem:[#allocation3 + $0x68] sm:$0xff] }
 0x2b3   : > { %9725 = vmatpush1.bf16.msra.mxu0 %v11967_v13  ;;  %v3264_v44 = vand.u32 4294901760, %v3263_v28  ;;  %v3287_v27 = vsub.f32 %v11964_v11, %v3286_v18  ;;  %v2214_v28 = vand.u32 4294901760, %v2213_v16  ;;  %v3299_v29 = vsub.f32 %v11969_v14, %v3298_v20 }
 0x2b4   : > { %9727 = vmatprep.subr.bf16.mxu0 %v9726_v39  ;;  %v12013_v24 = vpack.c.bf16 %v2208_v2, %v2196_v57  ;;  %v12021_v42 = vpack.c.bf16 %v3294_v25, %v3282_v3  ;;  %v12041_v3 = vpack.c.bf16 %v2182_v6, %v2170_v5  ;;  %v12047_v16 = vpack.c.bf16 %v3268_v12, %v3256_v7  ;;  %v2028_v5 = vld [vmem:[%s16082_s6 + $0x18] sm:$0xff]  ;;  %v2034_v6 = vld [vmem:[%s16082_s6 + $0x48] sm:$0xff] }
 0x2b5   : > { %v12002_v52 = vpack.c.bf16 %v3276_v45, %v3264_v44  ;;  %v3288_v44 = vand.u32 4294901760, %v3287_v27  ;;  %v12027_v49 = vpack.c.bf16 %v2214_v28, %v2202_v26  ;;  %v3300_v57 = vand.u32 4294901760, %v3299_v29  ;;  %v3714_v7 = vld [vmem:[#allocation3 + $0x8] sm:$0xff]  ;;  %v3720_v12 = vld [vmem:[#allocation3 + $0x38] sm:$0xff] }
 0x2b6   : > { %16818 = vst [vmem:[#allocation22_spill] sm:$0xff] %v12041_v3  ;;  %16819 = vst [vmem:[#allocation23_spill] sm:$0xff] %v12047_v16  ;;  %v12049_v25 = vpack.c.bf16 %v2188_v9, %v2176_v19  ;;  %v12051_v26 = vpack.c.bf16 %v3274_v22, %v3262_v21  ;;  %v12053_v27 = vpack.c.bf16 %v2206_v43, %v2194_v38  ;;  %v8985_v19 = vld [vmem:[%s16085_s9 + $0x2] ss:$0 sm:$0xff]  ;;  %v2627_v9 = vand.u32 4294901760, %v2028_v5  ;;  %v2027_v22 = vld [vmem:[%s16082_s6 + $0x10] sm:$0xff] }
 0x2b7   : > { %v12035_v17 = vpack.c.bf16 %v3300_v57, %v3288_v44  ;;  %v12055_v28 = vpack.c.bf16 %v3292_v50, %v3280_v47  ;;  %v12057_v29 = vpack.c.bf16 %v2212_v1, %v2200_v51  ;;  %v12059_v44 = vpack.c.bf16 %v3298_v20, %v3286_v18  ;;  %v2033_v38 = vld [vmem:[%s16082_s6 + $0x40] sm:$0xff]  ;;  %v3713_v51 = vld [vmem:[#allocation3] sm:$0xff]  ;;  %v2040_v2 = vld [vmem:[%s16082_s6 + $0x78] sm:$0xff] }
 0x2b8   : > { %16820 = vst [vmem:[#allocation24_spill] sm:$0xff] %v12049_v25  ;;  %16821 = vst [vmem:[#allocation25_spill] sm:$0xff] %v12051_v26  ;;  %v2631_v21 = vand.u32 4294901760, %v2034_v6  ;;  %v3937_v47 = vand.u32 4294901760, %v3714_v7  ;;  %v3941_v50 = vand.u32 4294901760, %v3720_v12  ;;  %v3719_v1 = vld [vmem:[#allocation3 + $0x30] sm:$0xff] }
 0x2b9   : > { %16822 = vst [vmem:[#allocation26_spill] sm:$0xff] %v12053_v27  ;;  %16823 = vst [vmem:[#allocation27_spill] sm:$0xff] %v12055_v28  ;;  %v2629_v57 = vand.u32 4294901760, %v2027_v22  ;;  %v2633_v15 = vand.u32 4294901760, %v2033_v38  ;;  %v3939_v40 = vand.u32 4294901760, %v3713_v51  ;;  %v3943_v39 = vand.u32 4294901760, %v3719_v1 }
 0x2ba   : > { %16824 = vst [vmem:[#allocation28_spill] sm:$0xff] %v12057_v29  ;;  %16825 = vst [vmem:[#allocation29_spill] sm:$0xff] %v12059_v44  ;;  %v12082_v45 = vpack.c.bf16 %v2631_v21, %v2627_v9  ;;  %v12091_v44 = vpack.c.bf16 %v3941_v50, %v3937_v47  ;;  %v12093_v29 = vsub.f32 %v3714_v7, %v3937_v47  ;;  %v2639_v27 = vand.u32 4294901760, %v2046_v63  ;;  %v2045_v26 = vld [vmem:[%s16082_s6 + $0xa0] sm:$0xff]  ;;  %v3738_v16 = vld [vmem:[#allocation3 + $0xc8] sm:$0xff] }
 0x2bb   : > { %v12096_v28 = vsub.f32 %v3720_v12, %v3941_v50  ;;  %v12107_v7 = vsub.f32 %v2033_v38, %v2633_v15  ;;  %v2641_v47 = vand.u32 4294901760, %v2045_v26  ;;  %v3725_v50 = vld [vmem:[#allocation3 + $0x60] sm:$0xff]  ;;  %v12116_v3 = vsub.f32 %v3713_v51, %v3939_v40 }
 0x2bc   : > { %16826 = vst [vmem:[#allocation30_spill] sm:$0xff] %v12082_v45  ;;  %16827 = vst [vmem:[#allocation31_spill] sm:$0xff] %v12091_v44  ;;  %v2635_v45 = vand.u32 4294901760, %v2040_v2  ;;  %v12105_v44 = vsub.f32 %v2027_v22, %v2629_v57  ;;  %v12118_v13 = vsub.f32 %v3719_v1, %v3943_v39 }
 0x2bd   : > { %16828 = vst [vmem:[#allocation32_spill] sm:$0xff] %v12093_v29  ;;  %16829 = vst [vmem:[#allocation33_spill] sm:$0xff] %v12096_v28  ;;  %v3731_v28 = vld [vmem:[#allocation3 + $0x90] sm:$0xff]  ;;  %v3947_v29 = vand.u32 4294901760, %v3725_v50  ;;  %v12137_v51 = vsub.f32 %v2045_v26, %v2641_v47 }
 0x2be   : > { %16833 = vst [vmem:[#allocation37_spill] sm:$0xff] %v12116_v3  ;;  %16834 = vst [vmem:[#allocation38_spill] sm:$0xff] %v12118_v13  ;;  %v12120_v22 = vsub.f32 %v2040_v2, %v2635_v45  ;;  %v3953_v3 = vand.u32 4294901760, %v3738_v16  ;;  %v3743_v2 = vld [vmem:[#allocation3 + $0xf0] sm:$0xff] }
 0x380   : > { %v2020_v43 = vpop.f32.mrb[4].mxu0 }
 0x381   : > { %v11114_v18 = vadd.f32 %v8985_v19, %v2020_v43  ;;  %v9513_v20 = vpop.f32.mrb[5].mxu0  ;;  %v2039_v19 = vld [vmem:[%s16082_s6 + $0x70] sm:$0xff]  ;;  %v12087_v43 = vsub.f32 %v2028_v5, %v2627_v9  ;;  %v3945_v5 = vand.u32 4294901760, %v3726_v23  ;;  %v3949_v9 = vand.u32 4294901760, %v3732_v4 }
 0x382   : > { %v12089_v20 = vsub.f32 %v2034_v6, %v2631_v21  ;;  %v2637_v6 = vand.u32 4294901760, %v2039_v19  ;;  %v12103_v21 = vpack.c.bf16 %v2633_v15, %v2629_v57  ;;  %v12122_v15 = vsub.f32 %v2046_v63, %v2639_v27 }
 0x383   : > { %v2024_v46 = vmax.f32 %v11114_v18, 0.0  ;;  %v12127_v57 = vpack.c.bf16 %v2639_v27, %v2635_v45  ;;  %v16838_v45 = vand.u32 4294901760, %v12087_v43 }
 0x384   : > { %16830 = vst [vmem:[#allocation34_spill] sm:$0xff] %v12103_v21  ;;  %v3951_v21 = vand.u32 4294901760, %v3731_v28  ;;  %v16839_v1 = vand.u32 4294901760, %v12089_v20  ;;  %v12153_v26 = vpack.c.bf16 %v2641_v47, %v2637_v6 }
 0x385   : > { %v2082_v18 = vsel %vm978_vm2, %v2024_v46, 0  ;;  %v12109_v46 = vpack.c.bf16 %v3943_v39, %v3939_v40  ;;  %16836 = vst [vmem:[#allocation40_spill] sm:$0xff] %v12127_v57  ;;  %v3744_v40 = vld [vmem:[#allocation3 + $0xf8] sm:$0xff]  ;;  %v2714_v27 = vsub.f32 %v12087_v43, %v16838_v45  ;;  %v12147_v57 = vsub.f32 %v3732_v4, %v3949_v9 }
 0x386   : > { %v12101_v25 = vand.u32 4294901760, %v2082_v18  ;;  %16843 = vst [vmem:[#allocation45_spill] sm:$0xff] %v12153_v26  ;;  %v12155_v8 = vpack.c.bf16 %v3951_v21, %v3947_v29  ;;  %v12157_v45 = vsub.f32 %v3725_v50, %v3947_v29  ;;  %v16847_v4 = vand.u32 4294901760, %v12107_v7  ;;  %v3756_v39 = vld [vmem:[#allocation3 + $0x158] sm:$0xff] }
 0x387   : > { %16831 = vst [vmem:[#allocation35_spill] sm:$0xff] %v12109_v46  ;;  %v12131_v46 = vsub.f32 %v2039_v19, %v2637_v6  ;;  %v2726_v19 = vsub.f32 %v12089_v20, %v16839_v1  ;;  %16841 = vst [vmem:[#allocation43_spill] sm:$0xff] %v12147_v57  ;;  %v16846_v1 = vand.u32 4294901760, %v12105_v44  ;;  %v2715_v6 = vand.u32 4294901760, %v2714_v27 }
 0x388   : > { %v12112_v12 = vsub.f32 %v2082_v18, %v12101_v25  ;;  %v12129_v18 = vpack.c.bf16 %v3949_v9, %v3945_v5  ;;  %16844 = vst [vmem:[#allocation46_spill] sm:$0xff] %v12155_v8  ;;  %16845 = vst [vmem:[#allocation47_spill] sm:$0xff] %v12157_v45  ;;  %v3737_v9 = vld [vmem:[#allocation3 + $0xc0] sm:$0xff]  ;;  %v12183_v50 = vsub.f32 %v3738_v16, %v3953_v3  ;;  %v16853_v29 = vmov 0.0   ;;  %v3762_v45 = vld [vmem:[#allocation3 + $0x188] sm:$0xff] }
 0x389   : > { %v2727_v47 = vand.u32 4294901760, %v2726_v19 }
 0x38a   : > { %16832 = vst [vmem:[#allocation36_spill] sm:$0xff] %v12112_v12  ;;  %v12125_v38 = vand.u32 4294901760, %v12112_v12  ;;  %16837 = vst [vmem:[#allocation41_spill] sm:$0xff] %v12129_v18  ;;  %v12145_v18 = vsub.f32 %v3726_v23, %v3945_v5  ;;  %v2720_v23 = vsub.f32 %v12105_v44, %v16846_v1  ;;  %v2732_v5 = vsub.f32 %v12107_v7, %v16847_v4 }
 0x38b   : > { %v12171_v1 = vsub.f32 %v3731_v28, %v3951_v21  ;;  %v16849_v4 = vand.u32 4294901760, %v12120_v22  ;;  %16852 = vst [vmem:[#allocation50_spill] sm:$0xff] %v12183_v50  ;;  %v3749_v28 = vld [vmem:[#allocation3 + $0x120] sm:$0xff]  ;;  %v3755_v21 = vld [vmem:[#allocation3 + $0x150] sm:$0xff]  ;;  %v12187_v57 = vpack.c.bf16 %v2727_v47, %v2715_v6 }
 0x38c   : > { %16835 = vst [vmem:[#allocation39_spill] sm:$0xff] %v12125_v38  ;;  %v2160_v63 = vsub.f32 %v12112_v12, %v12125_v38  ;;  %16840 = vst [vmem:[#allocation42_spill] sm:$0xff] %v12145_v18  ;;  %v3957_v38 = vand.u32 4294901760, %v3744_v40  ;;  %v2733_v26 = vand.u32 4294901760, %v2732_v5  ;;  %v3963_v18 = vand.u32 4294901760, %v3749_v28 }
 0x38d   : > { %16848 = vst [vmem:[#allocation48_spill] sm:$0xff] %v12171_v1  ;;  %v2738_v8 = vsub.f32 %v12120_v22, %v16849_v4  ;;  %v2721_v4 = vand.u32 4294901760, %v2720_v23  ;;  %v3967_v60 = vand.u32 4294901760, %v3755_v21 }
 0x38e   : > { %v12151_v13 = vand.u32 4294901760, %v2160_v63  ;;  %v3750_v63 = vld [vmem:[#allocation3 + $0x128] sm:$0xff]  ;;  %v12181_v19 = vpack.c.bf16 %v3957_v38, %v3953_v3  ;;  %v16855_v3 = vand.u32 4294901760, %v12131_v46 }
 0x38f   : > { %v3961_v1 = vand.u32 4294901760, %v3750_v63  ;;  %v2739_v23 = vand.u32 4294901760, %v2738_v8 }
 0x390   : > { %16842 = vst [vmem:[#allocation44_spill] sm:$0xff] %v12151_v13  ;;  %2162 = vmatmul.mubr.f32.vlgmr.msra.gmra.mrb[4].mxu1 %v12151_v13  ;;  %3248 = vmatmul.mubr.f32.vlgmr.msra.gmra.mrb[6].mxu0 %v12151_v13  ;;  %v16850_v13 = vand.u32 4294901760, %v12122_v15  ;;  %16851 = vst [vmem:[#allocation49_spill] sm:$0xff] %v12181_v19  ;;  %v2744_v16 = vsub.f32 %v12131_v46, %v16855_v3  ;;  %v16856_v19 = vand.u32 4294901760, %v12137_v51 }
 0x391   : > { %9633 = vmatpush1.bf16.msra.mxu1 %v11997_v48  ;;  %9729 = vmatpush1.bf16.msra.mxu0 %v12002_v52  ;;  %v3955_v48 = vand.u32 4294901760, %v3737_v9  ;;  %v3959_v52 = vand.u32 4294901760, %v3743_v2  ;;  %v12209_v3 = vpack.c.bf16 %v2733_v26, %v2721_v4  ;;  %v3774_v26 = vld [vmem:[#allocation3 + $0x1e8] sm:$0xff]  ;;  %v3780_v4 = vld [vmem:[#allocation3 + $0x218] sm:$0xff] }
 0x392   : > { %v2750_v27 = vsub.f32 %v12122_v15, %v16850_v13  ;;  %9635 = vmatprep.subr.bf16.mxu1 %v12013_v24  ;;  %9731 = vmatprep.subr.bf16.mxu0 %v12021_v42  ;;  %v3965_v13 = vand.u32 4294901760, %v3756_v39  ;;  %v3768_v24 = vld [vmem:[#allocation3 + $0x1b8] sm:$0xff]  ;;  %v12189_v42 = vsub.f32 %v3744_v40, %v3957_v38  ;;  %v2756_v50 = vsub.f32 %v12137_v51, %v16856_v19 }
 0x393   : > { %2272 = vmatprep.mubr.f32.mxu1 %v16853_v29  ;;  %3358 = vmatprep.mubr.f32.mxu0 %v16853_v29  ;;  %v16857_v38 = vpack.c.bf16 %v11893_v32, %v11891_v31  ;;  %v16858_v40 = vpack.c.bf16 %v11899_v35, %v11895_v33  ;;  %v12205_v6 = vpack.c.bf16 %v3959_v52, %v3955_v48  ;;  %v3969_v19 = vand.u32 4294901760, %v3762_v45  ;;  %v3761_v31 = vld [vmem:[#allocation3 + $0x180] sm:$0xff]  ;;  %v3767_v32 = vld [vmem:[#allocation3 + $0x1b0] sm:$0xff] }
 0x394   : > { %16854 = vst [vmem:[#allocation51_spill] sm:$0xff] %v12189_v42  ;;  %v2751_v5 = vand.u32 4294901760, %v2750_v27  ;;  %v12207_v47 = vsub.f32 %v3737_v9, %v3955_v48  ;;  %v12211_v8 = vsub.f32 %v3743_v2, %v3959_v52  ;;  %v12215_v27 = vsub.f32 %v3750_v63, %v3961_v1 }
 0x395   : > { %9637 = vmatpush1.bf16.msra.mxu1 %v12027_v49  ;;  %9733 = vmatpush1.bf16.msra.mxu0 %v12035_v17  ;;  %16859 = vst [vmem:[#allocation52_spill] sm:$0xff] %v12205_v6  ;;  %v3973_v49 = vand.u32 4294901760, %v3768_v24  ;;  %v12213_v17 = vpack.c.bf16 %v3965_v13, %v3961_v1  ;;  %v12219_v33 = vsub.f32 %v3756_v39, %v3965_v13  ;;  %v2745_v35 = vand.u32 4294901760, %v2744_v16  ;;  %v3786_v16 = vld [vmem:[#allocation3 + $0x248] sm:$0xff] }
 0x396   : > { %9639 = vmatprep.subr.bf16.mxu1 %v16857_v38  ;;  %9735 = vmatprep.subr.bf16.mxu0 %v16858_v40  ;;  %16860 = vst [vmem:[#allocation53_spill] sm:$0xff] %v12207_v47  ;;  %16861 = vst [vmem:[#allocation54_spill] sm:$0xff] %v12211_v8  ;;  %v2757_v9 = vand.u32 4294901760, %v2756_v50  ;;  %v12221_v48 = vsub.f32 %v3749_v28, %v3963_v18  ;;  %v16866_v2 = vpack.c.bf16 %v11915_v41, %v11903_v37  ;;  %v3773_v50 = vld [vmem:[#allocation3 + $0x1e0] sm:$0xff] }
 0x397   : > { %16862 = vst [vmem:[#allocation55_spill] sm:$0xff] %v12213_v17  ;;  %16863 = vst [vmem:[#allocation56_spill] sm:$0xff] %v12215_v27  ;;  %v16867_v63 = vpack.c.bf16 %v11935_v55, %v11933_v54  ;;  %v12229_v1 = vpack.c.bf16 %v2751_v5, %v2739_v23  ;;  %v12231_v52 = vpack.c.bf16 %v3967_v60, %v3963_v18  ;;  %v3971_v55 = vand.u32 4294901760, %v3761_v31  ;;  %v3779_v18 = vld [vmem:[#allocation3 + $0x210] sm:$0xff]  ;;  %v3792_v23 = vld [vmem:[#allocation3 + $0x278] sm:$0xff] }
 0x398   : > { %2274 = vmatmul.mubr.f32.vlgmr.msra.gmra.mrb[4].mxu1 %v12101_v25  ;;  %3360 = vmatmul.mubr.f32.vlgmr.msra.gmra.mrb[6].mxu0 %v12101_v25  ;;  %16864 = vst [vmem:[#allocation57_spill] sm:$0xff] %v12219_v33  ;;  %16865 = vst [vmem:[#allocation58_spill] sm:$0xff] %v12221_v48  ;;  %v16869_v28 = vpack.c.bf16 %v11944_v59, %v11937_v56  ;;  %v16870_v37 = vpack.c.bf16 %v11951_v62, %v11948_v61  ;;  %v3975_v13 = vand.u32 4294901760, %v3767_v32  ;;  %v3785_v40 = vld [vmem:[#allocation3 + $0x240] sm:$0xff] }
 0x399   : > { %9641 = vmatpush1.bf16.msra.mxu1 %v16866_v2  ;;  %9737 = vmatpush1.bf16.msra.mxu0 %v16867_v63  ;;  %16868 = vst [vmem:[#allocation59_spill] sm:$0xff] %v12231_v52  ;;  %v12241_v41 = vsub.f32 %v3755_v21, %v3967_v60  ;;  %v12243_v54 = vpack.c.bf16 %v3973_v49, %v3969_v19  ;;  %v3977_v59 = vand.u32 4294901760, %v3774_v26  ;;  %v3981_v61 = vand.u32 4294901760, %v3780_v4  ;;  %v3791_v2 = vld [vmem:[#allocation3 + $0x270] sm:$0xff]  ;;  %v3798_v63 = vld [vmem:[#allocation3 + $0x2a8] sm:$0xff] }
 0x39a   : > { %9643 = vmatprep.subr.bf16.mxu1 %v16869_v28  ;;  %9739 = vmatprep.subr.bf16.mxu0 %v16870_v37  ;;  %v12247_v5 = vsub.f32 %v3762_v45, %v3969_v19  ;;  %v12249_v56 = vsub.f32 %v3768_v24, %v3973_v49  ;;  %v12251_v62 = vpack.c.bf16 %v2757_v9, %v2745_v35  ;;  %v3979_v19 = vand.u32 4294901760, %v3773_v50  ;;  %v3804_v28 = vld [vmem:[#allocation3 + $0x2d8] sm:$0xff]  ;;  %v3803_v21 = vld [vmem:[#allocation3 + $0x2d0] sm:$0xff] }
 0x39b   : > { %16871 = vst [vmem:[#allocation60_spill] sm:$0xff] %v12241_v41  ;;  %16872 = vst [vmem:[#allocation61_spill] sm:$0xff] %v12243_v54  ;;  %2360 = vmatprep.mubr.f32.mxu1 %v16853_v29  ;;  %3446 = vmatprep.mubr.f32.mxu0 %v16853_v29  ;;  %v16875_v45 = vpack.c.bf16 %v11962_v10, %v11953_v0  ;;  %v16876_v24 = vpack.c.bf16 %v11969_v14, %v11964_v11  ;;  %v3983_v49 = vand.u32 4294901760, %v3779_v18 }
 0x39c   : > { %16873 = vst [vmem:[#allocation62_spill] sm:$0xff] %v12247_v5  ;;  %16874 = vst [vmem:[#allocation63_spill] sm:$0xff] %v12249_v56  ;;  %v3985_v35 = vand.u32 4294901760, %v3786_v16  ;;  %v3989_v9 = vand.u32 4294901760, %v3792_v23  ;;  %v12267_v37 = vpack.c.bf16 %v3975_v13, %v3971_v55  ;;  %v12269_v38 = vsub.f32 %v3761_v31, %v3971_v55  ;;  %v3834_v56 = vld [vmem:[#allocation3 + $0x3c8] sm:$0xff]  ;;  %v3840_v5 = vld [vmem:[#allocation3 + $0x3f8] sm:$0xff] }
 0x39d   : > { %9645 = vmatpush1.bf16.msra.mxu1 %v16875_v45  ;;  %9741 = vmatpush1.bf16.msra.mxu0 %v16876_v24  ;;  %v12271_v0 = vsub.f32 %v3767_v32, %v3975_v13  ;;  %v12273_v10 = vpack.c.bf16 %v3981_v61, %v3977_v59  ;;  %v12275_v11 = vsub.f32 %v3774_v26, %v3977_v59  ;;  %v3987_v14 = vand.u32 4294901760, %v3785_v40  ;;  %v3797_v24 = vld [vmem:[#allocation3 + $0x2a0] sm:$0xff]  ;;  %v3810_v32 = vld [vmem:[#allocation3 + $0x308] sm:$0xff]  ;;  %v3816_v13 = vld [vmem:[#allocation3 + $0x338] sm:$0xff] }
 0x39e   : > { %9647 = vmatprep.subr.bf16.mxu1 %v11889_v30  ;;  %9743 = vmatprep.subr.bf16.mxu0 %v11897_v34  ;;  %16877 = vst [vmem:[#allocation64_spill] sm:$0xff] %v12267_v37  ;;  %16878 = vst [vmem:[#allocation65_spill] sm:$0xff] %v12269_v38  ;;  %v3991_v45 = vand.u32 4294901760, %v3791_v2  ;;  %v12279_v60 = vsub.f32 %v3780_v4, %v3981_v61  ;;  %v12281_v39 = vsub.f32 %v3773_v50, %v3979_v19  ;;  %v16887_v4 = vld [vmem:[#allocation19_spill] sm:$0xff]  ;;  %v16899_v37 = vld [vmem:[#allocation22_spill] sm:$0xff] }
 0x39f   : > { %16879 = vst [vmem:[#allocation66_spill] sm:$0xff] %v12271_v0  ;;  %16880 = vst [vmem:[#allocation67_spill] sm:$0xff] %v12273_v10  ;;  %v3993_v31 = vand.u32 4294901760, %v3798_v63  ;;  %v3997_v55 = vand.u32 4294901760, %v3804_v28  ;;  %v12285_v26 = vpack.c.bf16 %v3983_v49, %v3979_v19  ;;  %v12287_v59 = vsub.f32 %v3779_v18, %v3983_v49  ;;  %v3809_v0 = vld [vmem:[#allocation3 + $0x300] sm:$0xff] }
 0x3a0   : > { %16881 = vst [vmem:[#allocation68_spill] sm:$0xff] %v12275_v11  ;;  %2363 = vmatmul.mubr.f32.vlgmr.msra.gmra.mrb[4].mxu1 %v12112_v12  ;;  %3449 = vmatmul.mubr.f32.vlgmr.msra.gmra.mrb[6].mxu0 %v12112_v12  ;;  %16882 = vst [vmem:[#allocation69_spill] sm:$0xff] %v12279_v60  ;;  %v12289_v11 = vpack.c.bf16 %v3989_v9, %v3985_v35  ;;  %v3815_v12 = vld [vmem:[#allocation3 + $0x330] sm:$0xff]  ;;  %v12293_v50 = vsub.f32 %v3786_v16, %v3985_v35  ;;  %v3999_v60 = vand.u32 4294901760, %v3803_v21 }
 0x3a1   : > { %16883 = vst [vmem:[#allocation70_spill] sm:$0xff] %v12281_v39  ;;  %9649 = vmatpush1.bf16.msra.mxu1 %v11901_v36  ;;  %9745 = vmatpush1.bf16.msra.mxu0 %v11931_v53  ;;  %16884 = vst [vmem:[#allocation71_spill] sm:$0xff] %v12285_v26  ;;  %v12295_v61 = vsub.f32 %v3792_v23, %v3989_v9  ;;  %v3995_v39 = vand.u32 4294901760, %v3797_v24  ;;  %v12299_v18 = vpack.c.bf16 %v3991_v45, %v3987_v14  ;;  %v3828_v26 = vld [vmem:[#allocation3 + $0x398] sm:$0xff] }
 0x3a2   : > { %16885 = vst [vmem:[#allocation72_spill] sm:$0xff] %v12287_v59  ;;  %16886 = vst [vmem:[#allocation73_spill] sm:$0xff] %v12289_v11  ;;  %9651 = vmatprep.subr.bf16.mxu1 %v11942_v58  ;;  %9747 = vmatprep.subr.bf16.mxu0 %v16887_v4  ;;  %v12301_v19 = vsub.f32 %v3785_v40, %v3987_v14  ;;  %v4001_v49 = vand.u32 4294901760, %v3810_v32  ;;  %v4005_v59 = vand.u32 4294901760, %v3816_v13  ;;  %v3822_v11 = vld [vmem:[#allocation3 + $0x368] sm:$0xff]  ;;  %v4003_v23 = vand.u32 4294901760, %v3809_v0 }
 0x3a3   : > { %16888 = vst [vmem:[#allocation19_spill] sm:$0xff] %v12293_v50  ;;  %16889 = vst [vmem:[#allocation74_spill] sm:$0xff] %v12295_v61  ;;  %2441 = vmatprep.mubr.f32.mxu1 %v16853_v29  ;;  %3527 = vmatprep.mubr.f32.mxu0 %v16853_v29  ;;  %v12303_v38 = vsub.f32 %v3791_v2, %v3991_v45  ;;  %v12305_v16 = vpack.c.bf16 %v3997_v55, %v3993_v31  ;;  %v4007_v35 = vand.u32 4294901760, %v3815_v12  ;;  %v507_v9 = vld [vmem:[#allocation2 + $0x8] sm:$0xff]  ;;  %v16894_v61 = vld [vmem:[#allocation20_spill] sm:$0xff] }
 0x3a4   : > { %16890 = vst [vmem:[#allocation75_spill] sm:$0xff] %v12299_v18  ;;  %16891 = vst [vmem:[#allocation76_spill] sm:$0xff] %v12301_v19  ;;  %v16895_v50 = vld [vmem:[#allocation21_spill] sm:$0xff]  ;;  %v12309_v10 = vsub.f32 %v3798_v63, %v3993_v31  ;;  %v12311_v18 = vsub.f32 %v3804_v28, %v3997_v55  ;;  %v12313_v40 = vsub.f32 %v3797_v24, %v3995_v39  ;;  %v3821_v14 = vld [vmem:[#allocation3 + $0x360] sm:$0xff]  ;;  %v4013_v54 = vand.u32 4294901760, %v3828_v26 }
 0x3a5   : > { %16892 = vst [vmem:[#allocation77_spill] sm:$0xff] %v12303_v38  ;;  %16893 = vst [vmem:[#allocation78_spill] sm:$0xff] %v12305_v16  ;;  %9653 = vmatpush1.bf16.msra.mxu1 %v16894_v61  ;;  %9749 = vmatpush1.bf16.msra.mxu0 %v16895_v50  ;;  %v3827_v19 = vld [vmem:[#allocation3 + $0x390] sm:$0xff]  ;;  %v16900_v2 = vld [vmem:[#allocation23_spill] sm:$0xff]  ;;  %v12317_v45 = vpack.c.bf16 %v3999_v60, %v3995_v39  ;;  %v12319_v38 = vsub.f32 %v3803_v21, %v3999_v60  ;;  %v4009_v16 = vand.u32 4294901760, %v3822_v11 }
 0x3a6   : > { %16896 = vst [vmem:[#allocation20_spill] sm:$0xff] %v12309_v10  ;;  %16897 = vst [vmem:[#allocation21_spill] sm:$0xff] %v12311_v18  ;;  %9655 = vmatprep.subr.bf16.mxu1 %v16899_v37  ;;  %9751 = vmatprep.subr.bf16.mxu0 %v16900_v2  ;;  %v16903_v63 = vand.u32 4294901760, %v12087_v43  ;;  %v16904_v28 = vand.u32 4294901760, %v12089_v20  ;;  %v12327_v31 = vpack.c.bf16 %v4005_v59, %v4001_v49  ;;  %v16907_v37 = vand.u32 4294901760, %v12105_v44  ;;  %v16911_v21 = vld [vmem:[#allocation39_spill] sm:$0xff] }
 0x3a7   : > { %16898 = vst [vmem:[#allocation79_spill] sm:$0xff] %v12313_v40  ;;  %16901 = vst [vmem:[#allocation22_spill] sm:$0xff] %v12317_v45  ;;  %v16908_v55 = vand.u32 4294901760, %v12107_v7  ;;  %v12335_v60 = vand.u32 4294901760, %v507_v9  ;;  %v12339_v2 = vsub.f32 %v3810_v32, %v4001_v49  ;;  %v3833_v40 = vld [vmem:[#allocation3 + $0x3c0] sm:$0xff]  ;;  %v3839_v18 = vld [vmem:[#allocation3 + $0x3f0] sm:$0xff]  ;;  %v12351_v49 = vsub.f32 %v3815_v12, %v4007_v35 }
 0x3a8   : > { %16902 = vst [vmem:[#allocation23_spill] sm:$0xff] %v12319_v38  ;;  %v12325_v24 = vpack.c.bf16 %v16904_v28, %v16903_v63  ;;  %16906 = vst [vmem:[#allocation81_spill] sm:$0xff] %v12327_v31  ;;  %2445 = vmatmul.mubr.f32.vlgmr.msra.gmra.mrb[4].mxu1 %v16911_v21  ;;  %3531 = vmatmul.mubr.f32.vlgmr.msra.gmra.mrb[6].mxu0 %v16911_v21  ;;  %v12341_v38 = vpack.c.bf16 %v4007_v35, %v4003_v23  ;;  %v4011_v63 = vand.u32 4294901760, %v3821_v14  ;;  %v16914_v10 = vld [vmem:[#allocation24_spill] sm:$0xff]  ;;  %v16915_v31 = vld [vmem:[#allocation25_spill] sm:$0xff] }
 0x3a9   : > { %v12333_v39 = vpack.c.bf16 %v16908_v55, %v16907_v37  ;;  %16910 = vst [vmem:[#allocation83_spill] sm:$0xff] %v12335_v60  ;;  %16912 = vst [vmem:[#allocation84_spill] sm:$0xff] %v12339_v2  ;;  %v4015_v28 = vand.u32 4294901760, %v3827_v19  ;;  %9657 = vmatpush1.bf16.msra.mxu1 %v16914_v10  ;;  %9753 = vmatpush1.bf16.msra.mxu0 %v16915_v31  ;;  %v12345_v37 = vsub.f32 %v3816_v13, %v4005_v59  ;;  %v16918_v45 = vld [vmem:[#allocation26_spill] sm:$0xff]  ;;  %v16919_v32 = vld [vmem:[#allocation27_spill] sm:$0xff] }
 0x3aa   : > { %16905 = vst [vmem:[#allocation80_spill] sm:$0xff] %v12325_v24  ;;  %16913 = vst [vmem:[#allocation85_spill] sm:$0xff] %v12341_v38  ;;  %v12347_v55 = vsub.f32 %v3809_v0, %v4003_v23  ;;  %v4021_v24 = vand.u32 4294901760, %v3840_v5  ;;  %9659 = vmatprep.subr.bf16.mxu1 %v16918_v45  ;;  %9755 = vmatprep.subr.bf16.mxu0 %v16919_v32  ;;  %v16921_v2 = vand.u32 4294901760, %v12120_v22  ;;  %v16922_v38 = vand.u32 4294901760, %v12122_v15  ;;  %v3846_v32 = vld [vmem:[#allocation3 + $0x428] sm:$0xff] }
 0x3ab   : > { %16909 = vst [vmem:[#allocation82_spill] sm:$0xff] %v12333_v39  ;;  %16916 = vst [vmem:[#allocation24_spill] sm:$0xff] %v12345_v37  ;;  %v4017_v39 = vand.u32 4294901760, %v3834_v56  ;;  %v12359_v10 = vpack.c.bf16 %v4013_v54, %v4009_v16  ;;  %2539 = vmatprep.mubr.f32.mxu1 %v16853_v29  ;;  %3625 = vmatprep.mubr.f32.mxu0 %v16853_v29  ;;  %v12363_v0 = vsub.f32 %v3822_v11, %v4009_v16  ;;  %v3852_v11 = vld [vmem:[#allocation3 + $0x458] sm:$0xff]  ;;  %v16931_v16 = vld [vmem:[#allocation28_spill] sm:$0xff] }
 0x3ac   : > { %16917 = vst [vmem:[#allocation25_spill] sm:$0xff] %v12347_v55  ;;  %16920 = vst [vmem:[#allocation26_spill] sm:$0xff] %v12351_v49  ;;  %v12357_v21 = vpack.c.bf16 %v16922_v38, %v16921_v2  ;;  %v4019_v13 = vand.u32 4294901760, %v3833_v40  ;;  %v4023_v59 = vand.u32 4294901760, %v3839_v18  ;;  %v12366_v23 = vsub.f32 %v507_v9, %v12335_v60  ;;  %v3851_v60 = vld [vmem:[#allocation3 + $0x450] sm:$0xff]  ;;  %v3858_v37 = vld [vmem:[#allocation3 + $0x488] sm:$0xff] }
 0x3ad   : > { %16923 = vst [vmem:[#allocation27_spill] sm:$0xff] %v12359_v10  ;;  %16924 = vst [vmem:[#allocation86_spill] sm:$0xff] %v12363_v0  ;;  %v12368_v12 = vsub.f32 %v3828_v26, %v4013_v54  ;;  %v16927_v35 = vand.u32 4294901760, %v12131_v46  ;;  %v16928_v38 = vand.u32 4294901760, %v12137_v51  ;;  %v12376_v31 = vpack.c.bf16 %v4015_v28, %v4011_v63  ;;  %9661 = vmatpush1.bf16.msra.mxu1 %v16931_v16  ;;  %v16932_v0 = vld [vmem:[#allocation29_spill] sm:$0xff]  ;;  %v3845_v26 = vld [vmem:[#allocation3 + $0x420] sm:$0xff] }
 0x3ae   : > { %16925 = vst [vmem:[#allocation87_spill] sm:$0xff] %v12366_v23  ;;  %v12378_v2 = vsub.f32 %v3821_v14, %v4011_v63  ;;  %9757 = vmatpush1.bf16.msra.mxu0 %v16932_v0  ;;  %v12382_v9 = vsub.f32 %v3827_v19, %v4015_v28  ;;  %v12384_v54 = vpack.c.bf16 %v4021_v24, %v4017_v39  ;;  %v16939_v16 = vld [vmem:[#allocation37_spill] sm:$0xff]  ;;  %v16940_v19 = vld [vmem:[#allocation38_spill] sm:$0xff]  ;;  %v4029_v55 = vand.u32 4294901760, %v3852_v11 }
 0x3af   : > { %16926 = vst [vmem:[#allocation88_spill] sm:$0xff] %v12368_v12  ;;  %v12374_v45 = vpack.c.bf16 %v16928_v38, %v16927_v35  ;;  %16929 = vst [vmem:[#allocation89_spill] sm:$0xff] %v12376_v31  ;;  %v16935_v12 = vld [vmem:[#allocation32_spill] sm:$0xff]  ;;  %v16936_v35 = vld [vmem:[#allocation33_spill] sm:$0xff]  ;;  %9663 = vmatprep.subr.bf16.mxu1 %v11889_v30  ;;  %9759 = vmatprep.subr.bf16.mxu0 %v11897_v34  ;;  %v12390_v14 = vsub.f32 %v3834_v56, %v4017_v39  ;;  %v12399_v38 = vand.u32 4294901760, %v12366_v23 }
 0x3b0   : > { %16930 = vst [vmem:[#allocation90_spill] sm:$0xff] %v12378_v2  ;;  %16933 = vst [vmem:[#allocation28_spill] sm:$0xff] %v12382_v9  ;;  %v12392_v63 = vsub.f32 %v3840_v5, %v4021_v24  ;;  %v12396_v9 = vpack.c.bf16 %v4023_v59, %v4019_v13  ;;  %v4025_v2 = vand.u32 4294901760, %v3846_v32  ;;  %v3864_v49 = vld [vmem:[#allocation3 + $0x4b8] sm:$0xff]  ;;  %2541 = vmatmul.mubr.f32.vlgmr.msra.gmra.mrb[4].mxu1 %v12101_v25  ;;  %v4027_v5 = vand.u32 4294901760, %v3845_v26 }
 0x3b1   : > { %16934 = vst [vmem:[#allocation29_spill] sm:$0xff] %v12384_v54  ;;  %16937 = vst [vmem:[#allocation91_spill] sm:$0xff] %v12390_v14  ;;  %3627 = vmatmul.mubr.f32.vlgmr.msra.gmra.mrb[6].mxu0 %v12101_v25  ;;  %v12403_v30 = vsub.f32 %v3833_v40, %v4019_v13  ;;  %v12405_v34 = vsub.f32 %v3839_v18, %v4023_v59  ;;  %v4031_v56 = vand.u32 4294901760, %v3851_v60  ;;  %9665 = vmatpush1.bf16.msra.mxu1 %v11901_v36  ;;  %v3857_v40 = vld [vmem:[#allocation3 + $0x480] sm:$0xff]  ;;  %v3863_v13 = vld [vmem:[#allocation3 + $0x4b0] sm:$0xff] }
 0x3b2   : > { %16938 = vst [vmem:[#allocation92_spill] sm:$0xff] %v12392_v63  ;;  %16941 = vst [vmem:[#allocation93_spill] sm:$0xff] %v12396_v9  ;;  %9761 = vmatpush1.bf16.msra.mxu0 %v11931_v53  ;;  %v12409_v24 = vsub.f32 %v3846_v32, %v4025_v2  ;;  %v16946_v39 = vand.u32 4294901760, %v16935_v12  ;;  %v16947_v0 = vand.u32 4294901760, %v16936_v35  ;;  %9667 = vmatprep.subr.bf16.mxu1 %v11942_v58  ;;  %v4033_v18 = vand.u32 4294901760, %v3858_v37  ;;  %v16952_v58 = vld [vmem:[#allocation42_spill] sm:$0xff] }
 0x3b3   : > { %16942 = vst [vmem:[#allocation94_spill] sm:$0xff] %v12399_v38  ;;  %16943 = vst [vmem:[#allocation95_spill] sm:$0xff] %v12403_v30  ;;  %9763 = vmatprep.subr.bf16.mxu0 %v16887_v4  ;;  %v4037_v36 = vand.u32 4294901760, %v3864_v49  ;;  %v16948_v53 = vand.u32 4294901760, %v16939_v16  ;;  %v16949_v32 = vand.u32 4294901760, %v16940_v19  ;;  %2619 = vmatprep.mubr.f32.mxu1 %v16853_v29  ;;  %v3876_v30 = vld [vmem:[#allocation3 + $0x518] sm:$0xff] }
 0x3b4   : > { %16944 = vst [vmem:[#allocation96_spill] sm:$0xff] %v12405_v34  ;;  %16945 = vst [vmem:[#allocation97_spill] sm:$0xff] %v12409_v24  ;;  %v4085_v28 = vsub.f32 %v16935_v12, %v16946_v39  ;;  %v4097_v63 = vsub.f32 %v16936_v35, %v16947_v0  ;;  %3705 = vmatprep.mubr.f32.mxu0 %v16853_v29  ;;  %v12427_v0 = vpack.c.bf16 %v4029_v55, %v4025_v2  ;;  %v3870_v34 = vld [vmem:[#allocation3 + $0x4e8] sm:$0xff] }
 0x3b5   : > { %v4091_v59 = vsub.f32 %v16939_v16, %v16948_v53  ;;  %v4103_v39 = vsub.f32 %v16940_v19, %v16949_v32  ;;  %v12429_v35 = vsub.f32 %v3852_v11, %v4029_v55  ;;  %v4068_v12 = vsub.f32 %v12366_v23, %v12399_v38  ;;  %v16954_v32 = vld [vmem:[#allocation43_spill] sm:$0xff]  ;;  %9669 = vmatpush1.bf16.msra.mxu1 %v16894_v61  ;;  %v3875_v61 = vld [vmem:[#allocation3 + $0x510] sm:$0xff] }
 0x3b6   : > { %16950 = vst [vmem:[#allocation98_spill] sm:$0xff] %v12427_v0  ;;  %v12434_v24 = vpack.c.bf16 %v4031_v56, %v4027_v5  ;;  %v4035_v53 = vand.u32 4294901760, %v3857_v40  ;;  %v4039_v16 = vand.u32 4294901760, %v3863_v13  ;;  %9765 = vmatpush1.bf16.msra.mxu0 %v16895_v50  ;;  %v12439_v2 = vsub.f32 %v3845_v26, %v4027_v5  ;;  %v16958_v38 = vld [vmem:[#allocation31_spill] sm:$0xff] }
 0x3b7   : > { %16951 = vst [vmem:[#allocation99_spill] sm:$0xff] %v12429_v35  ;;  %v12441_v55 = vsub.f32 %v3851_v60, %v4031_v56  ;;  %v4086_v11 = vand.u32 4294901760, %v4085_v28  ;;  %v4098_v4 = vand.u32 4294901760, %v4097_v63  ;;  %v16957_v35 = vld [vmem:[#allocation30_spill] sm:$0xff]  ;;  %9767 = vmatprep.subr.bf16.mxu0 %v16958_v38  ;;  %v12445_v23 = vpack.c.bf16 %v4037_v36, %v4033_v18  ;;  %v3869_v0 = vld [vmem:[#allocation3 + $0x4e0] sm:$0xff] }
 0x3b8   : > { %16953 = vst [vmem:[#allocation100_spill] sm:$0xff] %v12434_v24  ;;  %16955 = vst [vmem:[#allocation101_spill] sm:$0xff] %v12439_v2  ;;  %9671 = vmatprep.subr.bf16.mxu1 %v16957_v35  ;;  %v12447_v14 = vsub.f32 %v3858_v37, %v4033_v18  ;;  %v4092_v24 = vand.u32 4294901760, %v4091_v59  ;;  %v4104_v19 = vand.u32 4294901760, %v4103_v39  ;;  %v4041_v9 = vand.u32 4294901760, %v3870_v34  ;;  %2621 = vmatmul.mubr.f32.vlgmr.msra.gmra.mrb[4].mxu1 %v12101_v25  ;;  %v16966_v18 = vld [vmem:[#allocation47_spill] sm:$0xff] }
 0x3b9   : > { %16956 = vst [vmem:[#allocation102_spill] sm:$0xff] %v12441_v55  ;;  %16959 = vst [vmem:[#allocation30_spill] sm:$0xff] %v12445_v23  ;;  %v4045_v50 = vand.u32 4294901760, %v3876_v30  ;;  %v16961_v26 = vand.u32 4294901760, %v16952_v58  ;;  %v12452_v28 = vand.u32 4294901760, %v4068_v12  ;;  %3707 = vmatmul.mubr.f32.vlgmr.msra.gmra.mrb[6].mxu0 %v12101_v25  ;;  %v12456_v63 = vsub.f32 %v3864_v49, %v4037_v36  ;;  %v16967_v39 = vld [vmem:[#allocation34_spill] sm:$0xff]  ;;  %2699 = vmatprep.mubr.f32.mxu1 %v16853_v29 }
 0x3ba   : > { %16960 = vst [vmem:[#allocation103_spill] sm:$0xff] %v12447_v14  ;;  %v12458_v37 = vpack.c.bf16 %v4039_v16, %v4035_v53  ;;  %v16965_v5 = vand.u32 4294901760, %v16954_v32  ;;  %9673 = vmatpush1.bf16.msra.mxu1 %v16967_v39  ;;  %v16968_v38 = vld [vmem:[#allocation35_spill] sm:$0xff]  ;;  %v12466_v12 = vpack.c.bf16 %v4098_v4, %v4086_v11  ;;  %v16970_v14 = vld [vmem:[#allocation48_spill] sm:$0xff]  ;;  %v3888_v36 = vld [vmem:[#allocation3 + $0x578] sm:$0xff]  ;;  %v12478_v4 = vpack.c.bf16 %v4104_v19, %v4092_v24 }
 0x3bb   : > { %v4109_v60 = vsub.f32 %v16952_v58, %v16961_v26  ;;  %16962 = vst [vmem:[#allocation104_spill] sm:$0xff] %v12452_v28  ;;  %16963 = vst [vmem:[#allocation105_spill] sm:$0xff] %v12456_v63  ;;  %9769 = vmatpush1.bf16.msra.mxu0 %v16968_v38  ;;  %v4043_v26 = vand.u32 4294901760, %v3869_v0  ;;  %v4047_v58 = vand.u32 4294901760, %v3875_v61  ;;  %v3882_v49 = vld [vmem:[#allocation3 + $0x548] sm:$0xff]  ;;  %v16972_v2 = vld [vmem:[#allocation41_spill] sm:$0xff]  ;;  %v12480_v11 = vpack.c.bf16 %v4045_v50, %v4041_v9 }
 0x3bc   : > { %16964 = vst [vmem:[#allocation106_spill] sm:$0xff] %v12458_v37  ;;  %v4121_v56 = vsub.f32 %v16954_v32, %v16965_v5  ;;  %16969 = vst [vmem:[#allocation34_spill] sm:$0xff] %v12466_v12  ;;  %v16971_v63 = vld [vmem:[#allocation40_spill] sm:$0xff]  ;;  %9771 = vmatprep.subr.bf16.mxu0 %v16972_v2  ;;  %v12471_v37 = vsub.f32 %v3857_v40, %v4035_v53  ;;  %v12473_v5 = vsub.f32 %v3863_v13, %v4039_v16  ;;  %v16975_v59 = vld [vmem:[#allocation50_spill] sm:$0xff] }
 0x3bd   : > { %9675 = vmatprep.subr.bf16.mxu1 %v16971_v63  ;;  %16976 = vst [vmem:[#allocation108_spill] sm:$0xff] %v12480_v11  ;;  %v12482_v55 = vsub.f32 %v3870_v34, %v4041_v9  ;;  %v4110_v12 = vand.u32 4294901760, %v4109_v60  ;;  %4070 = vmatprep.mubr.f32.mxu0 %v12452_v28  ;;  %v16978_v40 = vand.u32 4294901760, %v16966_v18  ;;  %v4049_v13 = vand.u32 4294901760, %v3882_v49  ;;  %v3881_v32 = vld [vmem:[#allocation3 + $0x540] sm:$0xff]  ;;  %v3887_v38 = vld [vmem:[#allocation3 + $0x570] sm:$0xff] }
 0x3be   : > { %16973 = vst [vmem:[#allocation40_spill] sm:$0xff] %v12471_v37  ;;  %16974 = vst [vmem:[#allocation107_spill] sm:$0xff] %v12473_v5  ;;  %v4122_v2 = vand.u32 4294901760, %v4121_v56  ;;  %v4053_v53 = vand.u32 4294901760, %v3888_v36  ;;  %v16979_v5 = vld [vmem:[#allocation45_spill] sm:$0xff]  ;;  %v16980_v19 = vld [vmem:[#allocation46_spill] sm:$0xff]  ;;  %v12490_v24 = vsub.f32 %v3876_v30, %v4045_v50  ;;  %v12492_v9 = vpack.c.bf16 %v4047_v58, %v4043_v26 }
 0x3bf   : > { %16977 = vst [vmem:[#allocation109_spill] sm:$0xff] %v12482_v55  ;;  %v4115_v16 = vsub.f32 %v16966_v18, %v16978_v40  ;;  %9677 = vmatpush1.bf16.msra.mxu1 %v16979_v5  ;;  %9773 = vmatpush1.bf16.msra.mxu0 %v16980_v19  ;;  %v16983_v34 = vand.u32 4294901760, %v16970_v14  ;;  %v16984_v56 = vld [vmem:[#allocation49_spill] sm:$0xff]  ;;  %v16985_v40 = vand.u32 4294901760, %v16975_v59  ;;  %v16986_v55 = vand.u32 4294901760, %v12189_v42 }
 0x3c0   : > { %16981 = vst [vmem:[#allocation45_spill] sm:$0xff] %v12490_v24  ;;  %16982 = vst [vmem:[#allocation110_spill] sm:$0xff] %v12492_v9  ;;  %9679 = vmatprep.subr.bf16.mxu1 %v12187_v57  ;;  %9775 = vmatprep.subr.bf16.mxu0 %v16984_v56  ;;  %v16205_v30 = vand.u32 4294901760, %v12207_v47  ;;  %v16206_v50 = vand.u32 4294901760, %v12211_v8  ;;  %v12507_v24 = vsub.f32 %v3869_v0, %v4043_v26  ;;  %v4055_v57 = vand.u32 4294901760, %v3887_v38  ;;  %v3900_v26 = vld [vmem:[#allocation3 + $0x5d8] sm:$0xff] }
 0x3c1   : > { %v4127_v60 = vsub.f32 %v16970_v14, %v16983_v34  ;;  %v4133_v18 = vsub.f32 %v16975_v59, %v16985_v40  ;;  %v4145_v19 = vsub.f32 %v12189_v42, %v16986_v55  ;;  %v12509_v37 = vsub.f32 %v3875_v61, %v4047_v58  ;;  %v16989_v14 = vld [vmem:[#allocation44_spill] sm:$0xff] }
 0x3c2   : > { %16987 = vst [vmem:[#allocation111_spill] sm:$0xff] %v12507_v24  ;;  %v4051_v34 = vand.u32 4294901760, %v3881_v32  ;;  %2705 = vmatmul.mubr.f32.vlgmr.msra.gmra.mrb[6].mxu1 %v16989_v14  ;;  %v12512_v56 = vpack.c.bf16 %v4122_v2, %v4110_v12  ;;  %v4116_v28 = vand.u32 4294901760, %v4115_v16  ;;  %v12514_v40 = vpack.c.bf16 %v4053_v53, %v4049_v13  ;;  %v3894_v61 = vld [vmem:[#allocation3 + $0x5a8] sm:$0xff]  ;;  %v17042_v24 = vld [vmem:[#allocation22_spill] sm:$0xff] }
 0x3c3   : > { %16988 = vst [vmem:[#allocation112_spill] sm:$0xff] %v12509_v37  ;;  %v16211_v59 = vand.u32 4294901760, %v12215_v27  ;;  %9681 = vmatpush1.bf16.msra.mxu1 %v12209_v3  ;;  %9777 = vmatpush1.bf16.msra.mxu0 %v12205_v6  ;;  %v4128_v55 = vand.u32 4294901760, %v4127_v60  ;;  %v12519_v0 = vsub.f32 %v3882_v49, %v4049_v13  ;;  %v12521_v58 = vsub.f32 %v3888_v36, %v4053_v53  ;;  %v506_v36 = vld [vmem:[#allocation2] sm:$0xff]  ;;  %v17036_v37 = vld [vmem:[#allocation19_spill] sm:$0xff] }
 0x3c4   : > { %16990 = vst [vmem:[#allocation44_spill] sm:$0xff] %v12514_v40  ;;  %v16218_v14 = vand.u32 4294901760, %v12219_v33  ;;  %9683 = vmatprep.subr.bf16.mxu1 %v12229_v1  ;;  %9779 = vmatprep.subr.bf16.mxu0 %v12213_v17  ;;  %v4134_v2 = vand.u32 4294901760, %v4133_v18  ;;  %v4146_v12 = vand.u32 4294901760, %v4145_v19  ;;  %v4139_v3 = vsub.f32 %v12207_v47, %v16205_v30  ;;  %v16998_v18 = vld [vmem:[#allocation63_spill] sm:$0xff] }
 0x3c5   : > { %16991 = vst [vmem:[#allocation113_spill] sm:$0xff] %v12519_v0  ;;  %16992 = vst [vmem:[#allocation114_spill] sm:$0xff] %v12521_v58  ;;  %v4151_v49 = vsub.f32 %v12211_v8, %v16206_v50  ;;  %2815 = vmatprep.mubr.f32.mxu1 %v16853_v29  ;;  %v12533_v16 = vpack.c.bf16 %v4055_v57, %v4051_v34  ;;  %v12535_v13 = vsub.f32 %v3881_v32, %v4051_v34  ;;  %v3893_v50 = vld [vmem:[#allocation3 + $0x5a0] sm:$0xff]  ;;  %v3899_v34 = vld [vmem:[#allocation3 + $0x5d0] sm:$0xff] }
 0x3c6   : > { %v12539_v53 = vsub.f32 %v3887_v38, %v4055_v57  ;;  %v4057_v19 = vand.u32 4294901760, %v3894_v61  ;;  %v4061_v60 = vand.u32 4294901760, %v3900_v26  ;;  %v4157_v30 = vsub.f32 %v12215_v27, %v16211_v59  ;;  %v16997_v38 = vld [vmem:[#allocation62_spill] sm:$0xff]  ;;  %v17000_v59 = vld [vmem:[#allocation61_spill] sm:$0xff] }
 0x3c7   : > { %16993 = vst [vmem:[#allocation115_spill] sm:$0xff] %v12533_v16  ;;  %16994 = vst [vmem:[#allocation116_spill] sm:$0xff] %v12535_v13  ;;  %9685 = vmatpush1.bf16.msra.mxu1 %v12251_v62  ;;  %9781 = vmatpush1.bf16.msra.mxu0 %v12231_v52  ;;  %v4169_v32 = vsub.f32 %v12219_v33, %v16218_v14  ;;  %v12549_v1 = vand.u32 4294901760, %v506_v36  ;;  %v16999_v6 = vpack.c.bf16 %v12089_v20, %v12087_v43  ;;  %v17055_v13 = vld [vmem:[#allocation21_spill] sm:$0xff] }
 0x3c8   : > { %16995 = vst [vmem:[#allocation117_spill] sm:$0xff] %v12539_v53  ;;  %9783 = vmatprep.subr.bf16.mxu0 %v17000_v59  ;;  %v12557_v62 = vpack.c.bf16 %v4128_v55, %v4116_v28  ;;  %v12559_v52 = vpack.c.bf16 %v4146_v12, %v4134_v2  ;;  %v4140_v27 = vand.u32 4294901760, %v4139_v3  ;;  %v4152_v8 = vand.u32 4294901760, %v4151_v49  ;;  %v3718_v2 = vld [vmem:[#allocation3 + $0x28] sm:$0xff] }
 0x3c9   : > { %16996 = vst [vmem:[#allocation118_spill] sm:$0xff] %v12549_v1  ;;  %9687 = vmatprep.subr.bf16.mxu1 %v16999_v6  ;;  %v12561_v14 = vsub.f32 %v3894_v61, %v4057_v19  ;;  %v4059_v33 = vand.u32 4294901760, %v3893_v50  ;;  %v17002_v47 = vand.u32 4294901760, %v12221_v48  ;;  %v17003_v17 = vand.u32 4294901760, %v12241_v41  ;;  %v3724_v61 = vld [vmem:[#allocation3 + $0x58] sm:$0xff]  ;;  %v17007_v3 = vld [vmem:[#allocation64_spill] sm:$0xff] }
 0x3ca   : > { %2817 = vmatmul.mubr.f32.vlgmr.msra.gmra.mrb[6].mxu1 %v12101_v25  ;;  %v12570_v20 = vpack.c.bf16 %v4061_v60, %v4057_v19  ;;  %v12572_v6 = vsub.f32 %v3900_v26, %v4061_v60  ;;  %v4158_v28 = vand.u32 4294901760, %v4157_v30  ;;  %v4063_v55 = vand.u32 4294901760, %v3899_v34  ;;  %v17054_v53 = vld [vmem:[#allocation20_spill] sm:$0xff] }
 0x3cb   : > { %17001 = vst [vmem:[#allocation119_spill] sm:$0xff] %v12561_v14  ;;  %v4163_v57 = vsub.f32 %v12221_v48, %v17002_v47  ;;  %v4175_v43 = vsub.f32 %v12241_v41, %v17003_v17  ;;  %v17006_v12 = vpack.c.bf16 %v12107_v7, %v12105_v44  ;;  %9785 = vmatpush1.bf16.msra.mxu0 %v17007_v3  ;;  %v4170_v47 = vand.u32 4294901760, %v4169_v32  ;;  %v17012_v44 = vld [vmem:[#allocation67_spill] sm:$0xff]  ;;  %v17015_v3 = vld [vmem:[#allocation66_spill] sm:$0xff]  ;;  %v17029_v48 = vld [vmem:[#allocation72_spill] sm:$0xff] }
 0x3cc   : > { %17004 = vst [vmem:[#allocation120_spill] sm:$0xff] %v12570_v20  ;;  %17005 = vst [vmem:[#allocation121_spill] sm:$0xff] %v12572_v6  ;;  %v12579_v49 = vsub.f32 %v506_v36, %v12549_v1  ;;  %v17009_v17 = vand.u32 4294901760, %v16997_v38  ;;  %v17010_v26 = vand.u32 4294901760, %v16998_v18  ;;  %v17011_v60 = vpack.c.bf16 %v12122_v15, %v12120_v22  ;;  %9787 = vmatprep.subr.bf16.mxu0 %v17012_v44  ;;  %v17014_v36 = vld [vmem:[#allocation65_spill] sm:$0xff]  ;;  %v17018_v15 = vld [vmem:[#allocation68_spill] sm:$0xff] }
 0x3cd   : > { %9689 = vmatpush1.bf16.msra.mxu1 %v17006_v12  ;;  %v12591_v7 = vpack.c.bf16 %v4152_v8, %v4140_v27  ;;  %v12593_v32 = vsub.f32 %v3893_v50, %v4059_v33  ;;  %2903 = vmatprep.mubr.f32.mxu1 %v16853_v29  ;;  %v6505_v41 = vand.u32 4294901760, %v3718_v2  ;;  %v12600_v22 = vsub.f32 %v3899_v34, %v4063_v55  ;;  %v17019_v8 = vld [vmem:[#allocation69_spill] sm:$0xff]  ;;  %v17021_v12 = vld [vmem:[#allocation71_spill] sm:$0xff]  ;;  %v17045_v14 = vld [vmem:[#allocation80_spill] sm:$0xff] }
 0x3ce   : > { %17008 = vst [vmem:[#allocation122_spill] sm:$0xff] %v12579_v49  ;;  %v4181_v19 = vsub.f32 %v16997_v38, %v17009_v17  ;;  %v4193_v30 = vsub.f32 %v16998_v18, %v17010_v26  ;;  %9691 = vmatprep.subr.bf16.mxu1 %v17011_v60  ;;  %v4164_v17 = vand.u32 4294901760, %v4163_v57  ;;  %v4176_v38 = vand.u32 4294901760, %v4175_v43  ;;  %v3717_v44 = vld [vmem:[#allocation3 + $0x20] sm:$0xff]  ;;  %v3723_v34 = vld [vmem:[#allocation3 + $0x50] sm:$0xff]  ;;  %v17028_v60 = vld [vmem:[#allocation70_spill] sm:$0xff] }
 0x3cf   : > { %17013 = vst [vmem:[#allocation123_spill] sm:$0xff] %v12593_v32  ;;  %v6509_v26 = vand.u32 4294901760, %v3724_v61  ;;  %v12598_v18 = vpack.c.bf16 %v4063_v55, %v4059_v33  ;;  %17017 = vst [vmem:[#allocation125_spill] sm:$0xff] %v12600_v22  ;;  %v17020_v50 = vpack.c.bf16 %v12137_v51, %v12131_v46  ;;  %9789 = vmatpush1.bf16.msra.mxu0 %v17021_v12  ;;  %v12611_v57 = vand.u32 4294901760, %v12579_v49  ;;  %v17023_v55 = vld [vmem:[#allocation73_spill] sm:$0xff]  ;;  %v17035_v12 = vld [vmem:[#allocation78_spill] sm:$0xff] }
 0x3d0   : > { %v12608_v59 = vpack.c.bf16 %v4170_v47, %v4158_v28  ;;  %v4182_v43 = vand.u32 4294901760, %v4181_v19  ;;  %v4194_v33 = vand.u32 4294901760, %v4193_v30  ;;  %9791 = vmatprep.subr.bf16.mxu0 %v17023_v55  ;;  %v12615_v27 = vsub.f32 %v3718_v2, %v6505_v41  ;;  %v3730_v30 = vld [vmem:[#allocation3 + $0x88] sm:$0xff] }
 0x3d1   : > { %17016 = vst [vmem:[#allocation124_spill] sm:$0xff] %v12598_v18  ;;  %9693 = vmatpush1.bf16.msra.mxu1 %v17020_v50  ;;  %17022 = vst [vmem:[#allocation126_spill] sm:$0xff] %v12611_v57  ;;  %v17025_v46 = vand.u32 4294901760, %v17014_v36  ;;  %v17026_v28 = vand.u32 4294901760, %v17015_v3  ;;  %v12623_v50 = vpack.c.bf16 %v4176_v38, %v4164_v17  ;;  %v12625_v19 = vpack.c.bf16 %v6509_v26, %v6505_v41  ;;  %v17030_v55 = vld [vmem:[#allocation36_spill] sm:$0xff]  ;;  %v3736_v17 = vld [vmem:[#allocation3 + $0xb8] sm:$0xff] }
 0x3d2   : > { %9695 = vmatprep.subr.bf16.mxu1 %v16957_v35  ;;  %17024 = vst [vmem:[#allocation127_spill] sm:$0xff] %v12615_v27  ;;  %v6507_v2 = vand.u32 4294901760, %v3717_v44  ;;  %v6511_v42 = vand.u32 4294901760, %v3723_v34  ;;  %v17031_v27 = vand.u32 4294901760, %v17018_v15  ;;  %v17033_v41 = vld [vmem:[#allocation75_spill] sm:$0xff]  ;;  %v12640_v1 = vpack.c.bf16 %v4194_v33, %v4182_v43  ;;  %v17039_v33 = vld [vmem:[#allocation74_spill] sm:$0xff] }
 0x3d3   : > { %v4187_v51 = vsub.f32 %v17014_v36, %v17025_v46  ;;  %v4199_v47 = vsub.f32 %v17015_v3, %v17026_v28  ;;  %17027 = vst [vmem:[#allocation128_spill] sm:$0xff] %v12625_v19  ;;  %v17032_v36 = vand.u32 4294901760, %v17019_v8  ;;  %9793 = vmatpush1.bf16.msra.mxu0 %v17033_v41  ;;  %v6513_v3 = vand.u32 4294901760, %v3730_v30 }
 0x3d4   : > { %2906 = vmatmul.mubr.f32.vlgmr.msra.gmra.mrb[6].mxu1 %v17030_v55  ;;  %v4205_v46 = vsub.f32 %v17018_v15, %v17031_v27  ;;  %v12642_v55 = vsub.f32 %v3724_v61, %v6509_v26  ;;  %9795 = vmatprep.subr.bf16.mxu0 %v17035_v12  ;;  %v6517_v41 = vand.u32 4294901760, %v3736_v17  ;;  %v17037_v28 = vand.u32 4294901760, %v17028_v60 }
 0x3d5   : > { %v4217_v38 = vsub.f32 %v17019_v8, %v17032_v36  ;;  %9697 = vmatpush1.bf16.msra.mxu1 %v16967_v39  ;;  %v4188_v27 = vand.u32 4294901760, %v4187_v51  ;;  %v4200_v15 = vand.u32 4294901760, %v4199_v47  ;;  %v3729_v36 = vld [vmem:[#allocation3 + $0x80] sm:$0xff]  ;;  %v3735_v8 = vld [vmem:[#allocation3 + $0xb0] sm:$0xff]  ;;  %2984 = vmatprep.mubr.f32.mxu1 %v16853_v29  ;;  %v17038_v61 = vand.u32 4294901760, %v17029_v48 }
 0x3d6   : > { %17034 = vst [vmem:[#allocation36_spill] sm:$0xff] %v12642_v55  ;;  %9699 = vmatprep.subr.bf16.mxu1 %v16971_v63  ;;  %v4211_v43 = vsub.f32 %v17028_v60, %v17037_v28  ;;  %v12655_v51 = vpack.c.bf16 %v6511_v42, %v6507_v2  ;;  %v12657_v47 = vsub.f32 %v3717_v44, %v6507_v2  ;;  %v4206_v55 = vand.u32 4294901760, %v4205_v46  ;;  %v3742_v46 = vld [vmem:[#allocation3 + $0xe8] sm:$0xff] }
 0x3d7   : > { %v4223_v26 = vsub.f32 %v17029_v48, %v17038_v61  ;;  %v4218_v22 = vand.u32 4294901760, %v4217_v38  ;;  %9797 = vmatpush1.bf16.msra.mxu0 %v17042_v24  ;;  %v12661_v32 = vsub.f32 %v3723_v34, %v6511_v42  ;;  %v12663_v6 = vsub.f32 %v3730_v30, %v6513_v3  ;;  %v17046_v61 = vld [vmem:[#allocation81_spill] sm:$0xff]  ;;  %v3748_v38 = vld [vmem:[#allocation3 + $0x118] sm:$0xff]  ;;  %v17048_v48 = vld [vmem:[#allocation76_spill] sm:$0xff] }
 0x3d8   : > { %17040 = vst [vmem:[#allocation129_spill] sm:$0xff] %v12655_v51  ;;  %17041 = vst [vmem:[#allocation130_spill] sm:$0xff] %v12657_v47  ;;  %v6515_v28 = vand.u32 4294901760, %v3729_v36  ;;  %v6519_v60 = vand.u32 4294901760, %v3735_v8  ;;  %9799 = vmatprep.subr.bf16.mxu0 %v17046_v61  ;;  %v12667_v12 = vpack.c.bf16 %v4200_v15, %v4188_v27  ;;  %v17047_v44 = vand.u32 4294901760, %v17036_v37  ;;  %v17049_v42 = vld [vmem:[#allocation77_spill] sm:$0xff] }
 0x3d9   : > { %9701 = vmatpush1.bf16.msra.mxu1 %v16979_v5  ;;  %17043 = vst [vmem:[#allocation131_spill] sm:$0xff] %v12661_v32  ;;  %17044 = vst [vmem:[#allocation132_spill] sm:$0xff] %v12663_v6  ;;  %v12674_v30 = vpack.c.bf16 %v6517_v41, %v6513_v3  ;;  %v4212_v6 = vand.u32 4294901760, %v4211_v43  ;;  %v4224_v32 = vand.u32 4294901760, %v4223_v26  ;;  %v17052_v15 = vld [vmem:[#allocation39_spill] sm:$0xff]  ;;  %v12680_v27 = vpack.c.bf16 %v4218_v22, %v4206_v55  ;;  %v17056_v3 = vld [vmem:[#allocation82_spill] sm:$0xff] }
 0x3da   : > { %9703 = vmatprep.subr.bf16.mxu1 %v17045_v14  ;;  %v4229_v2 = vsub.f32 %v17036_v37, %v17047_v44  ;;  %v17051_v14 = vand.u32 4294901760, %v17039_v33  ;;  %v12682_v47 = vsub.f32 %v3736_v17, %v6517_v41  ;;  %v3741_v44 = vld [vmem:[#allocation3 + $0xe0] sm:$0xff]  ;;  %v3747_v37 = vld [vmem:[#allocation3 + $0x110] sm:$0xff]  ;;  %v12688_v26 = vpack.c.bf16 %v6519_v60, %v6515_v28 }
 0x3db   : > { %17050 = vst [vmem:[#allocation80_spill] sm:$0xff] %v12674_v30  ;;  %v17057_v43 = vld [vmem:[#allocation85_spill] sm:$0xff]  ;;  %v12690_v58 = vsub.f32 %v3729_v36, %v6515_v28  ;;  %v12694_v22 = vsub.f32 %v3735_v8, %v6519_v60  ;;  %v17061_v41 = vand.u32 4294901760, %v17048_v48  ;;  %v12703_v36 = vpack.c.bf16 %v4224_v32, %v4212_v6 }
 0x3dc   : > { %v4241_v61 = vsub.f32 %v17039_v33, %v17051_v14  ;;  %2988 = vmatmul.mubr.f32.vlgmr.msra.gmra.mrb[6].mxu1 %v17052_v15  ;;  %17053 = vst [vmem:[#allocation39_spill] sm:$0xff] %v12682_v47  ;;  %9801 = vmatpush1.bf16.msra.mxu0 %v17057_v43  ;;  %17058 = vst [vmem:[#allocation82_spill] sm:$0xff] %v12688_v26  ;;  %v6521_v14 = vand.u32 4294901760, %v3742_v46  ;;  %v6525_v15 = vand.u32 4294901760, %v3748_v38  ;;  %v4230_v17 = vand.u32 4294901760, %v4229_v2  ;;  %v3754_v43 = vld [vmem:[#allocation3 + $0x148] sm:$0xff] }
 0x3dd   : > { %9705 = vmatpush1.bf16.msra.mxu1 %v17056_v3  ;;  %17059 = vst [vmem:[#allocation133_spill] sm:$0xff] %v12690_v58  ;;  %9803 = vmatprep.subr.bf16.mxu0 %v12359_v10  ;;  %17060 = vst [vmem:[#allocation134_spill] sm:$0xff] %v12694_v22  ;;  %v4235_v55 = vsub.f32 %v17048_v48, %v17061_v41  ;;  %v17062_v3 = vand.u32 4294901760, %v17049_v42  ;;  %v6523_v24 = vand.u32 4294901760, %v3741_v44  ;;  %v3760_v10 = vld [vmem:[#allocation3 + $0x178] sm:$0xff]  ;;  %v17063_v60 = vand.u32 4294901760, %v17054_v53 }
 0x3de   : > { %9707 = vmatprep.subr.bf16.mxu1 %v12357_v21  ;;  %3082 = vmatprep.mubr.f32.mxu1 %v16853_v29  ;;  %v4242_v28 = vand.u32 4294901760, %v4241_v61  ;;  %v6527_v21 = vand.u32 4294901760, %v3747_v37  ;;  %v17064_v2 = vand.u32 4294901760, %v17055_v13  ;;  %v17065_v48 = vld [vmem:[#allocation79_spill] sm:$0xff]  ;;  %v12715_v6 = vpack.c.bf16 %v6525_v15, %v6521_v14  ;;  %v17071_v22 = vld [vmem:[#allocation84_spill] sm:$0xff] }
 0x3df   : > { %v4247_v34 = vsub.f32 %v17049_v42, %v17062_v3  ;;  %v4253_v8 = vsub.f32 %v17054_v53, %v17063_v60  ;;  %v17066_v3 = vld [vmem:[#allocation23_spill] sm:$0xff]  ;;  %v12717_v32 = vsub.f32 %v3742_v46, %v6521_v14  ;;  %v12719_v61 = vsub.f32 %v3748_v38, %v6525_v15  ;;  %v17072_v46 = vld [vmem:[#allocation24_spill] sm:$0xff]  ;;  %v17078_v14 = vld [vmem:[#allocation25_spill] sm:$0xff] }
 0x3e0   : > { %v4265_v41 = vsub.f32 %v17055_v13, %v17064_v2  ;;  %9805 = vmatpush1.bf16.msra.mxu0 %v12376_v31  ;;  %17067 = vst [vmem:[#allocation135_spill] sm:$0xff] %v12715_v6  ;;  %v4236_v60 = vand.u32 4294901760, %v4235_v55  ;;  %v6529_v13 = vand.u32 4294901760, %v3754_v43  ;;  %v6533_v33 = vand.u32 4294901760, %v3760_v10  ;;  %v3759_v31 = vld [vmem:[#allocation3 + $0x170] sm:$0xff]  ;;  %v3862_v47 = vld [vmem:[#allocation3 + $0x4a8] sm:$0xff] }
 0x3e1   : > { %9709 = vmatpush1.bf16.msra.mxu1 %v12374_v45  ;;  %17068 = vst [vmem:[#allocation136_spill] sm:$0xff] %v12717_v32  ;;  %17069 = vst [vmem:[#allocation137_spill] sm:$0xff] %v12719_v61  ;;  %9807 = vmatprep.subr.bf16.mxu0 %v12384_v54  ;;  %v4248_v2 = vand.u32 4294901760, %v4247_v34  ;;  %v12723_v53 = vpack.c.bf16 %v4242_v28, %v4230_v17  ;;  %v12725_v42 = vpack.c.bf16 %v6527_v21, %v6523_v24  ;;  %v3753_v45 = vld [vmem:[#allocation3 + $0x140] sm:$0xff]  ;;  %v17075_v28 = vld [vmem:[#allocation93_spill] sm:$0xff] }
 0x3e2   : > { %9711 = vmatprep.subr.bf16.mxu1 %v16957_v35  ;;  %v4254_v38 = vand.u32 4294901760, %v4253_v8  ;;  %v4266_v35 = vand.u32 4294901760, %v4265_v41  ;;  %v17073_v15 = vand.u32 4294901760, %v17065_v48  ;;  %v17074_v55 = vand.u32 4294901760, %v17066_v3  ;;  %v17079_v8 = vld [vmem:[#allocation26_spill] sm:$0xff] }
 0x3e3   : > { %17070 = vst [vmem:[#allocation138_spill] sm:$0xff] %v12725_v42  ;;  %v12738_v54 = vsub.f32 %v3741_v44, %v6523_v24  ;;  %v12740_v58 = vsub.f32 %v3747_v37, %v6527_v21  ;;  %v17080_v32 = vld [vmem:[#allocation98_spill] sm:$0xff]  ;;  %v12751_v37 = vsub.f32 %v3754_v43, %v6529_v13  ;;  %v12753_v24 = vsub.f32 %v3760_v10, %v6533_v33 }
 0x3e4   : > { %3084 = vmatmul.mubr.f32.vlgmr.msra.gmra.mrb[6].mxu1 %v12101_v25  ;;  %v4259_v34 = vsub.f32 %v17065_v48, %v17073_v15  ;;  %v4271_v17 = vsub.f32 %v17066_v3, %v17074_v55  ;;  %9809 = vmatpush1.bf16.msra.mxu0 %v17075_v28  ;;  %v12746_v15 = vpack.c.bf16 %v4248_v2, %v4236_v60  ;;  %v6531_v55 = vand.u32 4294901760, %v3753_v45  ;;  %v3766_v3 = vld [vmem:[#allocation3 + $0x1a8] sm:$0xff]  ;;  %v3772_v28 = vld [vmem:[#allocation3 + $0x1d8] sm:$0xff] }
 0x3e5   : > { %9713 = vmatpush1.bf16.msra.mxu1 %v16967_v39  ;;  %17076 = vst [vmem:[#allocation139_spill] sm:$0xff] %v12738_v54  ;;  %17077 = vst [vmem:[#allocation140_spill] sm:$0xff] %v12740_v58  ;;  %9811 = vmatprep.subr.bf16.mxu0 %v17080_v32  ;;  %v12748_v48 = vpack.c.bf16 %v6533_v33, %v6529_v13  ;;  %v6535_v39 = vand.u32 4294901760, %v3759_v31  ;;  %v17084_v44 = vand.u32 4294901760, %v17071_v22  ;;  %v17085_v21 = vand.u32 4294901760, %v17072_v46 }
 0x3e6   : > { %9715 = vmatprep.subr.bf16.mxu1 %v16971_v63  ;;  %3162 = vmatprep.mubr.f32.mxu1 %v16853_v29  ;;  %17082 = vst [vmem:[#allocation142_spill] sm:$0xff] %v12751_v37  ;;  %17083 = vst [vmem:[#allocation143_spill] sm:$0xff] %v12753_v24  ;;  %v12761_v2 = vpack.c.bf16 %v4266_v35, %v4254_v38  ;;  %v4260_v41 = vand.u32 4294901760, %v4259_v34  ;;  %v4272_v61 = vand.u32 4294901760, %v4271_v17  ;;  %v17087_v29 = vld [vmem:[#allocation100_spill] sm:$0xff]  ;;  %v6537_v10 = vand.u32 4294901760, %v3766_v3 }
 0x3e7   : > { %17081 = vst [vmem:[#allocation141_spill] sm:$0xff] %v12748_v48  ;;  %v4277_v63 = vsub.f32 %v17071_v22, %v17084_v44  ;;  %v4289_v60 = vsub.f32 %v17072_v46, %v17085_v21  ;;  %v12763_v32 = vsub.f32 %v3753_v45, %v6531_v55  ;;  %v6541_v13 = vand.u32 4294901760, %v3772_v28  ;;  %v3765_v38 = vld [vmem:[#allocation3 + $0x1a0] sm:$0xff]  ;;  %v3771_v35 = vld [vmem:[#allocation3 + $0x1d0] sm:$0xff]  ;;  %v17090_v45 = vld [vmem:[#allocation34_spill] sm:$0xff] }
 0x3e8   : > { %9813 = vmatpush1.bf16.msra.mxu0 %v17087_v29  ;;  %v17088_v33 = vand.u32 4294901760, %v17078_v14  ;;  %v17089_v44 = vand.u32 4294901760, %v17079_v8  ;;  %v12775_v34 = vpack.c.bf16 %v6535_v39, %v6531_v55  ;;  %v17093_v17 = vld [vmem:[#allocation86_spill] sm:$0xff]  ;;  %v17094_v46 = vld [vmem:[#allocation88_spill] sm:$0xff]  ;;  %v6539_v55 = vand.u32 4294901760, %v3765_v38 }
 0x3e9   : > { %17086 = vst [vmem:[#allocation144_spill] sm:$0xff] %v12763_v32  ;;  %9717 = vmatpush1.bf16.msra.mxu1 %v16979_v5  ;;  %9815 = vmatprep.subr.bf16.mxu0 %v12445_v23  ;;  %v12777_v5 = vsub.f32 %v3759_v31, %v6535_v39  ;;  %v16280_v29 = vand.u32 4294901760, %v17093_v17  ;;  %v4278_v32 = vand.u32 4294901760, %v4277_v63  ;;  %v17096_v37 = vld [vmem:[#allocation28_spill] sm:$0xff]  ;;  %v12786_v23 = vsub.f32 %v3766_v3, %v6537_v10  ;;  %v17098_v39 = vld [vmem:[#allocation106_spill] sm:$0xff] }
 0x3ea   : > { %v4283_v43 = vsub.f32 %v17078_v14, %v17088_v33  ;;  %v4295_v21 = vsub.f32 %v17079_v8, %v17089_v44  ;;  %9831 = vmatprep.subr.bf16.mxu1 %v17090_v45  ;;  %17091 = vst [vmem:[#allocation34_spill] sm:$0xff] %v12775_v34  ;;  %v4290_v33 = vand.u32 4294901760, %v4289_v60  ;;  %v17095_v14 = vld [vmem:[#allocation90_spill] sm:$0xff]  ;;  %v12784_v8 = vpack.c.bf16 %v4272_v61, %v4260_v41  ;;  %v3778_v31 = vld [vmem:[#allocation3 + $0x208] sm:$0xff] }
 0x3eb   : > { %17092 = vst [vmem:[#allocation145_spill] sm:$0xff] %v12777_v5  ;;  %17097 = vst [vmem:[#allocation146_spill] sm:$0xff] %v12786_v23  ;;  %v6543_v45 = vand.u32 4294901760, %v3771_v35  ;;  %v12790_v22 = vpack.c.bf16 %v6541_v13, %v6537_v10  ;;  %v12792_v63 = vsub.f32 %v3772_v28, %v6541_v13  ;;  %v3784_v44 = vld [vmem:[#allocation3 + $0x238] sm:$0xff]  ;;  %v4301_v3 = vsub.f32 %v17093_v17, %v16280_v29  ;;  %v17107_v17 = vld [vmem:[#allocation91_spill] sm:$0xff] }
 0x3ec   : > { %3164 = vmatmul.mubr.f32.vlgmr.msra.gmra.mrb[6].mxu1 %v12101_v25  ;;  %9817 = vmatpush1.bf16.msra.mxu0 %v17098_v39  ;;  %v4284_v60 = vand.u32 4294901760, %v4283_v43  ;;  %v4296_v24 = vand.u32 4294901760, %v4295_v21  ;;  %v12796_v25 = vsub.f32 %v3765_v38, %v6539_v55  ;;  %v17102_v61 = vand.u32 4294901760, %v17094_v46  ;;  %v17105_v21 = vld [vmem:[#allocation83_spill] sm:$0xff]  ;;  %v3783_v39 = vld [vmem:[#allocation3 + $0x230] sm:$0xff] }
 0x3ed   : > { %9833 = vmatpush1.bf16.msra.mxu1 %v12478_v4  ;;  %17099 = vst [vmem:[#allocation147_spill] sm:$0xff] %v12790_v22  ;;  %17100 = vst [vmem:[#allocation148_spill] sm:$0xff] %v12792_v63  ;;  %9819 = vmatprep.subr.bf16.mxu0 %v12480_v11  ;;  %v12804_v41 = vpack.c.bf16 %v4290_v33, %v4278_v32  ;;  %v6545_v28 = vand.u32 4294901760, %v3778_v31  ;;  %v17103_v10 = vand.u32 4294901760, %v17095_v14  ;;  %v17104_v43 = vand.u32 4294901760, %v17096_v37  ;;  %v3777_v11 = vld [vmem:[#allocation3 + $0x200] sm:$0xff] }
 0x3ee   : > { %9835 = vmatprep.subr.bf16.mxu1 %v12512_v56  ;;  %17101 = vst [vmem:[#allocation149_spill] sm:$0xff] %v12796_v25  ;;  %v4313_v4 = vsub.f32 %v17094_v46, %v17102_v61  ;;  %4467 = vmatprep.mubr.f32.mxu1 %v17105_v21  ;;  %v12813_v38 = vpack.c.bf16 %v6543_v45, %v6539_v55  ;;  %v6549_v29 = vand.u32 4294901760, %v3784_v44  ;;  %v17108_v32 = vld [vmem:[#allocation92_spill] sm:$0xff]  ;;  %v4302_v33 = vand.u32 4294901760, %v4301_v3  ;;  %v17113_v46 = vld [vmem:[#allocation95_spill] sm:$0xff] }
 0x3ef   : > { %v4307_v13 = vsub.f32 %v17095_v14, %v17103_v10  ;;  %v4319_v56 = vsub.f32 %v17096_v37, %v17104_v43  ;;  %v17109_v10 = vsub.f32 %v12579_v49, %v12611_v57  ;;  %v12824_v43 = vpack.c.bf16 %v4296_v24, %v4284_v60  ;;  %v17114_v21 = vld [vmem:[#allocation96_spill] sm:$0xff]  ;;  %v3796_v60 = vld [vmem:[#allocation3 + $0x298] sm:$0xff]  ;;  %v3789_v25 = vld [vmem:[#allocation3 + $0x260] sm:$0xff] }
 0x3f0   : > { %17106 = vst [vmem:[#allocation150_spill] sm:$0xff] %v12813_v38  ;;  %9821 = vmatpush1.bf16.msra.mxu0 %v12492_v9  ;;  %v12826_v55 = vsub.f32 %v3771_v35, %v6543_v45  ;;  %v12828_v37 = vsub.f32 %v3778_v31, %v6545_v28  ;;  %v4314_v61 = vand.u32 4294901760, %v4313_v4  ;;  %v3790_v9 = vld [vmem:[#allocation3 + $0x268] sm:$0xff]  ;;  %v6547_v49 = vand.u32 4294901760, %v3777_v11 }
 0x3f1   : > { %9837 = vmatpush1.bf16.msra.mxu1 %v12557_v62  ;;  %v12822_v14 = vand.u32 4294901760, %v17109_v10  ;;  %9823 = vmatprep.subr.bf16.mxu0 %v12514_v40  ;;  %v4308_v57 = vand.u32 4294901760, %v4307_v13  ;;  %v4320_v10 = vand.u32 4294901760, %v4319_v56  ;;  %v6551_v24 = vand.u32 4294901760, %v3783_v39  ;;  %v17120_v62 = vld [vmem:[#allocation97_spill] sm:$0xff] }
 0x3f2   : > { %17111 = vst [vmem:[#allocation152_spill] sm:$0xff] %v12826_v55  ;;  %17112 = vst [vmem:[#allocation153_spill] sm:$0xff] %v12828_v37  ;;  %9839 = vmatprep.subr.bf16.mxu1 %v12559_v52  ;;  %v12834_v35 = vpack.c.bf16 %v6549_v29, %v6545_v28  ;;  %v12836_v45 = vsub.f32 %v3784_v44, %v6549_v29  ;;  %v17117_v31 = vand.u32 4294901760, %v17107_v17  ;;  %v17118_v3 = vand.u32 4294901760, %v17108_v32  ;;  %v3795_v28 = vld [vmem:[#allocation3 + $0x290] sm:$0xff]  ;;  %v17121_v44 = vld [vmem:[#allocation99_spill] sm:$0xff] }
 0x3f3   : > { %17110 = vst [vmem:[#allocation151_spill] sm:$0xff] %v12822_v14  ;;  %v12846_v13 = vsub.f32 %v3777_v11, %v6547_v49  ;;  %v6553_v56 = vand.u32 4294901760, %v3790_v9  ;;  %v17123_v11 = vand.u32 4294901760, %v17114_v21  ;;  %v12862_v29 = vpack.c.bf16 %v6551_v24, %v6547_v49  ;;  %v3808_v37 = vld [vmem:[#allocation3 + $0x2f8] sm:$0xff] }
 0x3f4   : > { %17115 = vst [vmem:[#allocation154_spill] sm:$0xff] %v12834_v35  ;;  %17116 = vst [vmem:[#allocation155_spill] sm:$0xff] %v12836_v45  ;;  %v4325_v52 = vsub.f32 %v17107_v17, %v17117_v31  ;;  %v4337_v4 = vsub.f32 %v17108_v32, %v17118_v3  ;;  %9825 = vmatpush1.bf16.msra.mxu0 %v12533_v16  ;;  %v12852_v31 = vpack.c.bf16 %v4314_v61, %v4302_v33  ;;  %v3802_v45 = vld [vmem:[#allocation3 + $0x2c8] sm:$0xff] }
 0x3f5   : > { %9841 = vmatpush1.bf16.msra.mxu1 %v12591_v7  ;;  %17119 = vst [vmem:[#allocation156_spill] sm:$0xff] %v12846_v13  ;;  %9827 = vmatprep.subr.bf16.mxu0 %v12570_v20  ;;  %v6557_v3 = vand.u32 4294901760, %v3796_v60  ;;  %v17122_v16 = vand.u32 4294901760, %v17113_v46  ;;  %v4343_v32 = vsub.f32 %v17114_v21, %v17123_v11  ;;  %v12860_v17 = vpack.c.bf16 %v4320_v10, %v4308_v57 }
 0x3f6   : > { %9843 = vmatprep.subr.bf16.mxu1 %v12608_v59  ;;  %17124 = vst [vmem:[#allocation157_spill] sm:$0xff] %v12862_v29  ;;  %v12864_v40 = vsub.f32 %v3783_v39, %v6551_v24  ;;  %v12866_v20 = vsub.f32 %v3790_v9, %v6553_v56  ;;  %v4326_v59 = vand.u32 4294901760, %v4325_v52  ;;  %v4338_v61 = vand.u32 4294901760, %v4337_v4  ;;  %v17129_v9 = vld [vmem:[#allocation101_spill] sm:$0xff]  ;;  %v17130_v24 = vld [vmem:[#allocation102_spill] sm:$0xff] }
 0x3f7   : > { %v4331_v7 = vsub.f32 %v17113_v46, %v17122_v16  ;;  %v6555_v33 = vand.u32 4294901760, %v3789_v25  ;;  %v6559_v13 = vand.u32 4294901760, %v3795_v28  ;;  %v17127_v16 = vand.u32 4294901760, %v17120_v62  ;;  %v3801_v46 = vld [vmem:[#allocation3 + $0x2c0] sm:$0xff] }
 0x3f8   : > { %17125 = vst [vmem:[#allocation158_spill] sm:$0xff] %v12864_v40  ;;  %17126 = vst [vmem:[#allocation159_spill] sm:$0xff] %v12866_v20  ;;  %9829 = vmatpush1.bf16.msra.mxu0 %v12598_v18  ;;  %v17128_v49 = vand.u32 4294901760, %v17121_v44  ;;  %v12880_v4 = vpack.c.bf16 %v6557_v3, %v6553_v56  ;;  %v12882_v11 = vsub.f32 %v3796_v60, %v6557_v3  ;;  %v4344_v18 = vand.u32 4294901760, %v4343_v32  ;;  %v3807_v56 = vld [vmem:[#allocation3 + $0x2f0] sm:$0xff] }
 0x3f9   : > { %9845 = vmatpush1.bf16.msra.mxu1 %v12623_v50  ;;  %v4349_v57 = vsub.f32 %v17120_v62, %v17127_v16  ;;  %10535 = vmatprep.subr.bf16.mxu0 %v12625_v19  ;;  %v4332_v50 = vand.u32 4294901760, %v4331_v7  ;;  %v12884_v21 = vsub.f32 %v3789_v25, %v6555_v33  ;;  %v6561_v16 = vand.u32 4294901760, %v3802_v45  ;;  %v17137_v60 = vld [vmem:[#allocation105_spill] sm:$0xff]  ;;  %v17145_v19 = vld [vmem:[#allocation104_spill] sm:$0xff] }
 0x3fa   : > { %v4361_v39 = vsub.f32 %v17121_v44, %v17128_v49  ;;  %9847 = vmatprep.subr.bf16.mxu1 %v12640_v1  ;;  %17131 = vst [vmem:[#allocation160_spill] sm:$0xff] %v12880_v4  ;;  %17132 = vst [vmem:[#allocation161_spill] sm:$0xff] %v12882_v11  ;;  %v6565_v62 = vand.u32 4294901760, %v3808_v37  ;;  %v17134_v49 = vld [vmem:[#allocation103_spill] sm:$0xff]  ;;  %v12888_v52 = vpack.c.bf16 %v4338_v61, %v4326_v59  ;;  %v17138_v7 = vand.u32 4294901760, %v17129_v9 }
 0x3fb   : > { %17133 = vst [vmem:[#allocation162_spill] sm:$0xff] %v12884_v21  ;;  %4076 = vmatmul.mubr.f32.vlgmr.msra.gmra.mrb[8].mxu0 %v12822_v14  ;;  %v12890_v1 = vpack.c.bf16 %v6559_v13, %v6555_v33  ;;  %v12892_v10 = vsub.f32 %v3795_v28, %v6559_v13  ;;  %v4350_v25 = vand.u32 4294901760, %v4349_v57  ;;  %v17139_v59 = vand.u32 4294901760, %v17130_v24  ;;  %v17141_v33 = vld [vmem:[#allocation114_spill] sm:$0xff]  ;;  %v17148_v57 = vld [vmem:[#allocation107_spill] sm:$0xff]  ;;  %v17161_v21 = vld [vmem:[#allocation125_spill] sm:$0xff] }
 0x3fc   : > { %10537 = vmatpush1.bf16.msra.mxu0 %v12655_v51  ;;  %v4362_v32 = vand.u32 4294901760, %v4361_v39  ;;  %v4355_v44 = vsub.f32 %v17129_v9, %v17138_v7  ;;  %v12905_v13 = vpack.c.bf16 %v4344_v18, %v4332_v50  ;;  %v12907_v28 = vsub.f32 %v3802_v45, %v6561_v16  ;;  %6638 = vmatprep.mubr.f32.mxu0 %v17145_v19  ;;  %v3820_v50 = vld [vmem:[#allocation3 + $0x358] sm:$0xff]  ;;  %v17149_v9 = vld [vmem:[#allocation116_spill] sm:$0xff] }
 0x3fd   : > { %17135 = vst [vmem:[#allocation163_spill] sm:$0xff] %v12890_v1  ;;  %17136 = vst [vmem:[#allocation164_spill] sm:$0xff] %v12892_v10  ;;  %9849 = vmatpush1.bf16.msra.mxu1 %v12667_v12  ;;  %v4367_v61 = vsub.f32 %v17130_v24, %v17139_v59  ;;  %10539 = vmatprep.subr.bf16.mxu0 %v12674_v30  ;;  %v6563_v12 = vand.u32 4294901760, %v3801_v46  ;;  %v12911_v39 = vpack.c.bf16 %v6565_v62, %v6561_v16  ;;  %v17147_v30 = vld [vmem:[#allocation40_spill] sm:$0xff]  ;;  %v17152_v24 = vld [vmem:[#allocation109_spill] sm:$0xff] }
 0x3fe   : > { %9851 = vmatprep.subr.bf16.mxu1 %v12680_v27  ;;  %17140 = vst [vmem:[#allocation165_spill] sm:$0xff] %v12907_v28  ;;  %v12913_v3 = vsub.f32 %v3808_v37, %v6565_v62  ;;  %v6567_v7 = vand.u32 4294901760, %v3807_v56  ;;  %v17144_v51 = vand.u32 4294901760, %v17134_v49  ;;  %v3814_v27 = vld [vmem:[#allocation3 + $0x328] sm:$0xff]  ;;  %v17146_v18 = vand.u32 4294901760, %v17137_v60  ;;  %v17150_v37 = vld [vmem:[#allocation117_spill] sm:$0xff] }
 0x3ff   : > { %17142 = vst [vmem:[#allocation166_spill] sm:$0xff] %v12911_v39  ;;  %v4368_v19 = vand.u32 4294901760, %v4367_v61  ;;  %v12930_v14 = vsub.f32 %v3801_v46, %v6563_v12  ;;  %v17154_v62 = vld [vmem:[#allocation119_spill] sm:$0xff]  ;;  %v17155_v28 = vld [vmem:[#allocation121_spill] sm:$0xff]  ;;  %v17159_v16 = vand.u32 4294901760, %v17148_v57 }
 0x400   : > { %17143 = vst [vmem:[#allocation167_spill] sm:$0xff] %v12913_v3  ;;  %v4373_v59 = vsub.f32 %v17134_v49, %v17144_v51  ;;  %v4385_v45 = vsub.f32 %v17137_v60, %v17146_v18  ;;  %10541 = vmatpush1.bf16.msra.mxu0 %v12688_v26  ;;  %v12928_v51 = vpack.c.bf16 %v4362_v32, %v4350_v25  ;;  %v4356_v49 = vand.u32 4294901760, %v4355_v44  ;;  %v17153_v60 = vld [vmem:[#allocation45_spill] sm:$0xff]  ;;  %v3813_v46 = vld [vmem:[#allocation3 + $0x320] sm:$0xff] }
 0x401   : > { %9853 = vmatpush1.bf16.msra.mxu1 %v12703_v36  ;;  %17151 = vst [vmem:[#allocation168_spill] sm:$0xff] %v12930_v14  ;;  %10543 = vmatprep.subr.bf16.mxu0 %v12715_v6  ;;  %v6569_v18 = vand.u32 4294901760, %v3814_v27  ;;  %v12938_v10 = vpack.c.bf16 %v6567_v7, %v6563_v12  ;;  %v12940_v25 = vsub.f32 %v3807_v56, %v6567_v7  ;;  %v6573_v32 = vand.u32 4294901760, %v3820_v50  ;;  %v3819_v61 = vld [vmem:[#allocation3 + $0x350] sm:$0xff]  ;;  %v17160_v14 = vld [vmem:[#allocation123_spill] sm:$0xff] }
 0x402   : > { %9855 = vmatprep.subr.bf16.mxu1 %v12723_v53  ;;  %v4374_v44 = vand.u32 4294901760, %v4373_v59  ;;  %v4386_v26 = vand.u32 4294901760, %v4385_v45  ;;  %v17158_v53 = vand.u32 4294901760, %v17147_v30  ;;  %v4391_v3 = vsub.f32 %v17148_v57, %v17159_v16  ;;  %v17163_v7 = vld [vmem:[#allocation111_spill] sm:$0xff]  ;;  %v17164_v45 = vld [vmem:[#allocation112_spill] sm:$0xff]  ;;  %v17209_v58 = vld [vmem:[#allocation162_spill] sm:$0xff] }
 0x403   : > { %17156 = vst [vmem:[#allocation169_spill] sm:$0xff] %v12938_v10  ;;  %17157 = vst [vmem:[#allocation170_spill] sm:$0xff] %v12940_v25  ;;  %v12952_v56 = vpack.c.bf16 %v4368_v19, %v4356_v49  ;;  %v12954_v12 = vsub.f32 %v3814_v27, %v6569_v18  ;;  %v6571_v16 = vand.u32 4294901760, %v3813_v46  ;;  %v17165_v36 = vand.u32 4294901760, %v17152_v24  ;;  %v3826_v49 = vld [vmem:[#allocation3 + $0x388] sm:$0xff]  ;;  %v3832_v27 = vld [vmem:[#allocation3 + $0x3b8] sm:$0xff] }
 0x404   : > { %v4379_v6 = vsub.f32 %v17147_v30, %v17158_v53  ;;  %10545 = vmatpush1.bf16.msra.mxu0 %v12725_v42  ;;  %v6575_v53 = vand.u32 4294901760, %v3819_v61  ;;  %v17166_v42 = vand.u32 4294901760, %v17153_v60  ;;  %v12966_v57 = vpack.c.bf16 %v6573_v32, %v6569_v18 }
 0x405   : > { %9857 = vmatpush1.bf16.msra.mxu1 %v12746_v15  ;;  %17162 = vst [vmem:[#allocation171_spill] sm:$0xff] %v12954_v12  ;;  %10547 = vmatprep.subr.bf16.mxu0 %v12748_v48  ;;  %v4397_v15 = vsub.f32 %v17152_v24, %v17165_v36  ;;  %v12968_v59 = vsub.f32 %v3820_v50, %v6573_v32  ;;  %v4392_v12 = vand.u32 4294901760, %v4391_v3  ;;  %v6581_v36 = vand.u32 4294901760, %v3832_v27  ;;  %v17199_v24 = vld [vmem:[#allocation142_spill] sm:$0xff] }
 0x406   : > { %9859 = vmatprep.subr.bf16.mxu1 %v12761_v2  ;;  %v4409_v19 = vsub.f32 %v17153_v60, %v17166_v42  ;;  %17167 = vst [vmem:[#allocation172_spill] sm:$0xff] %v12966_v57  ;;  %v12972_v48 = vpack.c.bf16 %v4386_v26, %v4374_v44  ;;  %v4380_v30 = vand.u32 4294901760, %v4379_v6  ;;  %v12974_v11 = vsub.f32 %v3813_v46, %v6571_v16  ;;  %v3825_v26 = vld [vmem:[#allocation3 + $0x380] sm:$0xff]  ;;  %v3831_v44 = vld [vmem:[#allocation3 + $0x3b0] sm:$0xff] }
 0x407   : > { %17168 = vst [vmem:[#allocation173_spill] sm:$0xff] %v12968_v59  ;;  %v6577_v42 = vand.u32 4294901760, %v3826_v49  ;;  %v17170_v18 = vand.u32 4294901760, %v17163_v7  ;;  %v17171_v32 = vand.u32 4294901760, %v17164_v45  ;;  %v12986_v6 = vpack.c.bf16 %v6575_v53, %v6571_v16  ;;  %v3861_v60 = vld [vmem:[#allocation3 + $0x4a0] sm:$0xff] }
 0x408   : > { %17169 = vst [vmem:[#allocation174_spill] sm:$0xff] %v12974_v11  ;;  %10549 = vmatpush1.bf16.msra.mxu0 %v12775_v34  ;;  %v4398_v3 = vand.u32 4294901760, %v4397_v15  ;;  %v4410_v46 = vand.u32 4294901760, %v4409_v19  ;;  %v12999_v16 = vpack.c.bf16 %v4392_v12, %v4380_v30  ;;  %v6603_v11 = vand.u32 4294901760, %v3861_v60 }
 0x409   : > { %9861 = vmatpush1.bf16.msra.mxu1 %v12784_v8  ;;  %v4403_v50 = vsub.f32 %v17163_v7, %v17170_v18  ;;  %v4415_v25 = vsub.f32 %v17164_v45, %v17171_v32  ;;  %10551 = vmatprep.subr.bf16.mxu0 %v12790_v22  ;;  %17172 = vst [vmem:[#allocation175_spill] sm:$0xff] %v12986_v6  ;;  %v17175_v18 = vand.u32 4294901760, %v12519_v0  ;;  %v17176_v32 = vand.u32 4294901760, %v17141_v33  ;;  %v3838_v7 = vld [vmem:[#allocation3 + $0x3e8] sm:$0xff] }
 0x40a   : > { %9863 = vmatprep.subr.bf16.mxu1 %v12804_v41  ;;  %v12988_v8 = vsub.f32 %v3819_v61, %v6575_v53  ;;  %v12990_v2 = vsub.f32 %v3826_v49, %v6577_v42  ;;  %v3844_v41 = vld [vmem:[#allocation3 + $0x418] sm:$0xff]  ;;  %v6579_v61 = vand.u32 4294901760, %v3825_v26  ;;  %v6583_v53 = vand.u32 4294901760, %v3831_v44 }
 0x40b   : > { %v4421_v34 = vsub.f32 %v12519_v0, %v17175_v18  ;;  %v4433_v45 = vsub.f32 %v17141_v33, %v17176_v32  ;;  %v13004_v19 = vpack.c.bf16 %v6581_v36, %v6577_v42  ;;  %v13006_v49 = vsub.f32 %v3832_v27, %v6581_v36  ;;  %v3837_v0 = vld [vmem:[#allocation3 + $0x3e0] sm:$0xff] }
 0x40c   : > { %17173 = vst [vmem:[#allocation176_spill] sm:$0xff] %v12988_v8  ;;  %17174 = vst [vmem:[#allocation177_spill] sm:$0xff] %v12990_v2  ;;  %10553 = vmatpush1.bf16.msra.mxu0 %v12813_v38  ;;  %v4404_v18 = vand.u32 4294901760, %v4403_v50  ;;  %v4416_v32 = vand.u32 4294901760, %v4415_v25  ;;  %v13010_v30 = vpack.c.bf16 %v4410_v46, %v4398_v3  ;;  %v13012_v12 = vsub.f32 %v3825_v26, %v6579_v61  ;;  %v3874_v8 = vld [vmem:[#allocation3 + $0x508] sm:$0xff] }
 0x40d   : > { %9865 = vmatpush1.bf16.msra.mxu1 %v12824_v43  ;;  %17177 = vst [vmem:[#allocation178_spill] sm:$0xff] %v13004_v19  ;;  %17178 = vst [vmem:[#allocation179_spill] sm:$0xff] %v13006_v49  ;;  %10555 = vmatprep.subr.bf16.mxu0 %v12834_v35  ;;  %v6585_v15 = vand.u32 4294901760, %v3838_v7  ;;  %v6589_v22 = vand.u32 4294901760, %v3844_v41  ;;  %v13014_v43 = vld [vmem:[#allocation3 + $0x410] sm:$0xff]  ;;  %v4422_v38 = vand.u32 4294901760, %v4421_v34  ;;  %v13024_v50 = vsub.f32 %v3831_v44, %v6583_v53 }
 0x40e   : > { %9867 = vmatprep.subr.bf16.mxu1 %v12852_v31  ;;  %17179 = vst [vmem:[#allocation180_spill] sm:$0xff] %v13012_v12  ;;  %v4434_v42 = vand.u32 4294901760, %v4433_v45  ;;  %v17180_v27 = vand.u32 4294901760, %v17149_v9  ;;  %v16357_v25 = vand.u32 4294901760, %v17154_v62  ;;  %v13022_v31 = vpack.c.bf16 %v6583_v53, %v6579_v61  ;;  %v13031_v35 = vld [vmem:[#allocation3 + $0x448] sm:$0xff]  ;;  %v3891_v12 = vld [vmem:[#allocation3 + $0x590] sm:$0xff] }
 0x40f   : > { %17182 = vst [vmem:[#allocation182_spill] sm:$0xff] %v13024_v50  ;;  %v17183_v26 = vand.u32 4294901760, %v17150_v37  ;;  %v6587_v46 = vand.u32 4294901760, %v3837_v0  ;;  %v13035_v34 = vpack.c.bf16 %v4416_v32, %v4404_v18  ;;  %v13037_v45 = vsub.f32 %v3838_v7, %v6585_v15  ;;  %v3856_v32 = vld [vmem:[#allocation3 + $0x478] sm:$0xff]  ;;  %v3886_v2 = vld [vmem:[#allocation3 + $0x568] sm:$0xff]  ;;  %v3885_v50 = vld [vmem:[#allocation3 + $0x560] sm:$0xff] }
 0x410   : > { %v13019_v36 = vsub.f32 %v17149_v9, %v17180_v27  ;;  %17181 = vst [vmem:[#allocation181_spill] sm:$0xff] %v13022_v31  ;;  %10557 = vmatpush1.bf16.msra.mxu0 %v12862_v29  ;;  %v6591_v61 = vand.u32 4294901760, %v13014_v43  ;;  %v13043_v53 = vpack.c.bf16 %v6589_v22, %v6585_v15  ;;  %v13045_v27 = vsub.f32 %v3844_v41, %v6589_v22  ;;  %v17188_v22 = vld [vmem:[#allocation127_spill] sm:$0xff]  ;;  %v17189_v41 = vld [vmem:[#allocation36_spill] sm:$0xff]  ;;  %v17190_v29 = vld [vmem:[#allocation130_spill] sm:$0xff] }
 0x411   : > { %v13029_v3 = vsub.f32 %v17150_v37, %v17183_v26  ;;  %9869 = vmatpush1.bf16.msra.mxu1 %v12860_v17  ;;  %17184 = vst [vmem:[#allocation183_spill] sm:$0xff] %v13037_v45  ;;  %10559 = vmatprep.subr.bf16.mxu0 %v12880_v4  ;;  %v13047_v26 = vsub.f32 %v3837_v0, %v6587_v46  ;;  %v6593_v44 = vand.u32 4294901760, %v13031_v35  ;;  %v3849_v4 = vld [vmem:[#allocation3 + $0x440] sm:$0xff]  ;;  %v17195_v0 = vld [vmem:[#allocation133_spill] sm:$0xff] }
 0x412   : > { %9871 = vmatprep.subr.bf16.mxu1 %v12888_v52  ;;  %17185 = vst [vmem:[#allocation184_spill] sm:$0xff] %v13043_v53  ;;  %17186 = vst [vmem:[#allocation185_spill] sm:$0xff] %v13045_v27  ;;  %v13049_v17 = vpack.c.bf16 %v4434_v42, %v4422_v38  ;;  %v4428_v18 = vand.u32 4294901760, %v13019_v36  ;;  %v4445_v7 = vsub.f32 %v17154_v62, %v16357_v25  ;;  %v17193_v25 = vand.u32 4294901760, %v17155_v28  ;;  %v17200_v38 = vld [vmem:[#allocation143_spill] sm:$0xff]  ;;  %v17242_v27 = vld [vmem:[#allocation54_spill] sm:$0xff] }
 0x413   : > { %17187 = vst [vmem:[#allocation186_spill] sm:$0xff] %v13047_v26  ;;  %v4440_v52 = vand.u32 4294901760, %v13029_v3  ;;  %v13064_v36 = vpack.c.bf16 %v6591_v61, %v6587_v46  ;;  %v6597_v42 = vand.u32 4294901760, %v3856_v32  ;;  %v6595_v3 = vand.u32 4294901760, %v3849_v4  ;;  %v17241_v26 = vld [vmem:[#allocation53_spill] sm:$0xff] }
 0x414   : > { %10561 = vmatpush1.bf16.msra.mxu0 %v12890_v1  ;;  %v4457_v62 = vsub.f32 %v17155_v28, %v17193_v25  ;;  %v17197_v1 = vld [vmem:[#allocation136_spill] sm:$0xff]  ;;  %v4446_v25 = vand.u32 4294901760, %v4445_v7  ;;  %v3855_v28 = vld [vmem:[#allocation3 + $0x470] sm:$0xff]  ;;  %v13111_v23 = vsub.f32 %v13014_v43, %v6591_v61  ;;  %v13114_v37 = vsub.f32 %v13031_v35, %v6593_v44 }
 0x415   : > { %9873 = vmatpush1.bf16.msra.mxu1 %v12905_v13  ;;  %17192 = vst [vmem:[#allocation36_spill] sm:$0xff] %v13064_v36  ;;  %10563 = vmatprep.subr.bf16.mxu0 %v12911_v39  ;;  %v17196_v13 = vld [vmem:[#allocation134_spill] sm:$0xff]  ;;  %v17202_v39 = vand.u32 4294901760, %v17160_v14  ;;  %v9888_v63 = vpack.c.bf16 %v4440_v52, %v4428_v18  ;;  %v3867_v7 = vld [vmem:[#allocation3 + $0x4d0] sm:$0xff]  ;;  %v13124_v43 = vsub.f32 %v3856_v32, %v6597_v42  ;;  %v17220_v52 = vld [vmem:[#allocation32_spill] sm:$0xff]  ;;  %v6617_v46 = vand.u32 4294901760, %v3886_v2 }
 0x416   : > { %9875 = vmatprep.subr.bf16.mxu1 %v12928_v51  ;;  %v4458_v9 = vand.u32 4294901760, %v4457_v62  ;;  %v17206_v51 = vand.u32 4294901760, %v17161_v21  ;;  %17215 = vst [vmem:[#allocation130_spill] sm:$0xff] %v13111_v23  ;;  %v13120_v62 = vpack.c.bf16 %v6597_v42, %v6593_v44  ;;  %v13126_v33 = vsub.f32 %v3849_v4, %v6595_v3  ;;  %v3873_v32 = vld [vmem:[#allocation3 + $0x500] sm:$0xff]  ;;  %v3879_v42 = vld [vmem:[#allocation3 + $0x530] sm:$0xff]  ;;  %v3892_v4 = vld [vmem:[#allocation3 + $0x598] sm:$0xff] }
 0x417   : > { %v4451_v15 = vsub.f32 %v17160_v14, %v17202_v39  ;;  %v3868_v39 = vld [vmem:[#allocation3 + $0x4d8] sm:$0xff]  ;;  %v17207_v14 = vld [vmem:[#allocation156_spill] sm:$0xff]  ;;  %17218 = vst [vmem:[#allocation188_spill] sm:$0xff] %v13124_v43 }
 0x418   : > { %10565 = vmatpush1.bf16.msra.mxu0 %v12938_v10  ;;  %v4463_v5 = vsub.f32 %v17161_v21, %v17206_v51  ;;  %17217 = vst [vmem:[#allocation187_spill] sm:$0xff] %v13120_v62  ;;  %v6601_v10 = vand.u32 4294901760, %v3862_v47  ;;  %v6605_v55 = vand.u32 4294901760, %v3868_v39  ;;  %v9890_v44 = vpack.c.bf16 %v4458_v9, %v4446_v25  ;;  %v17225_v25 = vld [vmem:[#allocation38_spill] sm:$0xff]  ;;  %v3903_v51 = vld [vmem:[#allocation3 + $0x5f0] sm:$0xff] }
 0x419   : > { %9877 = vmatpush1.bf16.msra.mxu1 %v12952_v56  ;;  %10567 = vmatprep.subr.bf16.mxu0 %v12966_v57  ;;  %v6599_v56 = vand.u32 4294901760, %v3855_v28  ;;  %v4452_v35 = vand.u32 4294901760, %v4451_v15  ;;  %v17221_v57 = vld [vmem:[#allocation33_spill] sm:$0xff]  ;;  %v6621_v21 = vand.u32 4294901760, %v3892_v4 }
 0x41a   : > { %9879 = vmatprep.subr.bf16.mxu1 %v12972_v48  ;;  %v4464_v61 = vand.u32 4294901760, %v4463_v5  ;;  %v13140_v9 = vpack.c.bf16 %v6605_v55, %v6601_v10  ;;  %v13142_v15 = vsub.f32 %v3862_v47, %v6601_v10  ;;  %v13148_v59 = vsub.f32 %v3868_v39, %v6605_v55  ;;  %v17227_v47 = vld [vmem:[#allocation42_spill] sm:$0xff]  ;;  %v17228_v10 = vld [vmem:[#allocation43_spill] sm:$0xff] }
 0x41b   : > { %v13130_v18 = vpack.c.bf16 %v6599_v56, %v6595_v3  ;;  %v17224_v3 = vld [vmem:[#allocation37_spill] sm:$0xff]  ;;  %v6609_v5 = vand.u32 4294901760, %v3874_v8  ;;  %v6615_v48 = vand.u32 4294901760, %v3879_v42  ;;  %v13158_v55 = vsub.f32 %v3861_v60, %v6603_v11  ;;  %v17230_v39 = vld [vmem:[#allocation47_spill] sm:$0xff] }
 0x41c   : > { %10569 = vmatpush1.bf16.msra.mxu0 %v12986_v6  ;;  %v6607_v6 = vand.u32 4294901760, %v3867_v7  ;;  %17222 = vst [vmem:[#allocation190_spill] sm:$0xff] %v13140_v9  ;;  %17223 = vst [vmem:[#allocation191_spill] sm:$0xff] %v13142_v15 }
 0x41d   : > { %9881 = vmatpush1.bf16.msra.mxu1 %v12999_v16  ;;  %10571 = vmatprep.subr.bf16.mxu0 %v13004_v19  ;;  %17219 = vst [vmem:[#allocation189_spill] sm:$0xff] %v13130_v18  ;;  %v3880_v16 = vld [vmem:[#allocation3 + $0x538] sm:$0xff]  ;;  %v9892_v19 = vpack.c.bf16 %v4464_v61, %v4452_v35  ;;  %17226 = vst [vmem:[#allocation192_spill] sm:$0xff] %v13148_v59  ;;  %v17231_v35 = vld [vmem:[#allocation48_spill] sm:$0xff]  ;;  %v13180_v23 = vsub.f32 %v3879_v42, %v6615_v48 }
 0x41e   : > { %9883 = vmatprep.subr.bf16.mxu1 %v13010_v30  ;;  %v13138_v30 = vsub.f32 %v3855_v28, %v6599_v56  ;;  %v6613_v49 = vand.u32 4294901760, %v3880_v16  ;;  %v6611_v56 = vand.u32 4294901760, %v3873_v32  ;;  %v13166_v28 = vsub.f32 %v3874_v8, %v6609_v5  ;;  %v3898_v8 = vld [vmem:[#allocation3 + $0x5c8] sm:$0xff] }
 0x41f   : > { %17237 = vst [vmem:[#allocation199_spill] sm:$0xff] %v13180_v23  ;;  %v13195_v42 = vsub.f32 %v3892_v4, %v6621_v21  ;;  %v6631_v4 = vand.u32 4294901760, %v3903_v51 }
 0x420   : > { %10573 = vmatpush1.bf16.msra.mxu0 %v13022_v31  ;;  %v13156_v31 = vpack.c.bf16 %v6607_v6, %v6603_v11  ;;  %17233 = vst [vmem:[#allocation195_spill] sm:$0xff] %v13166_v28  ;;  %v13171_v11 = vsub.f32 %v3880_v16, %v6613_v49  ;;  %v13173_v60 = vsub.f32 %v3873_v32, %v6611_v56  ;;  %v3897_v16 = vld [vmem:[#allocation3 + $0x5c0] sm:$0xff]  ;;  %v17244_v32 = vld [vmem:[#allocation57_spill] sm:$0xff] }
 0x421   : > { %9885 = vmatpush1.bf16.msra.mxu1 %v13035_v34  ;;  %10575 = vmatprep.subr.bf16.mxu0 %v13043_v53  ;;  %v13164_v53 = vsub.f32 %v3867_v7, %v6607_v6  ;;  %v13169_v34 = vpack.c.bf16 %v6613_v49, %v6609_v5  ;;  %v13176_v61 = vpack.c.bf16 %v6615_v48, %v6611_v56  ;;  %v6619_v6 = vand.u32 4294901760, %v3885_v50  ;;  %v17238_v5 = vld [vmem:[#allocation50_spill] sm:$0xff] }
 0x422   : > { %9887 = vmatprep.subr.bf16.mxu1 %v13049_v17  ;;  %17229 = vst [vmem:[#allocation193_spill] sm:$0xff] %v13156_v31  ;;  %17235 = vst [vmem:[#allocation197_spill] sm:$0xff] %v13171_v11  ;;  %v6623_v7 = vand.u32 4294901760, %v3891_v12  ;;  %v3904_v17 = vld [vmem:[#allocation3 + $0x5f8] sm:$0xff]  ;;  %v13187_v56 = vpack.c.bf16 %v6621_v21, %v6617_v46  ;;  %v17247_v48 = vand.u32 4294901760, %v17188_v22 }
 0x423   : > { %17232 = vst [vmem:[#allocation194_spill] sm:$0xff] %v13164_v53  ;;  %17234 = vst [vmem:[#allocation196_spill] sm:$0xff] %v13169_v34  ;;  %v13205_v45 = vsub.f32 %v3885_v50, %v6619_v6 }
 0x424   : > { %10577 = vmatpush1.bf16.msra.mxu0 %v13064_v36  ;;  %17236 = vst [vmem:[#allocation198_spill] sm:$0xff] %v13176_v61  ;;  %v17239_v36 = vld [vmem:[#allocation51_spill] sm:$0xff]  ;;  %17240 = vst [vmem:[#allocation200_spill] sm:$0xff] %v13187_v56 }
 0x425   : > { %9889 = vmatpush1.bf16.msra.mxu1 %v9888_v63  ;;  %10579 = vmatprep.subr.bf16.mxu0 %v13120_v62  ;;  %v9902_v49 = vpack.c.bf16 %v17239_v36, %v17238_v5  ;;  %v13189_v62 = vsub.f32 %v3886_v2, %v6617_v46  ;;  %v17243_v63 = vld [vmem:[#allocation56_spill] sm:$0xff]  ;;  %v6625_v5 = vand.u32 4294901760, %v3898_v8  ;;  %v17245_v2 = vpack.c.bf16 %v17221_v57, %v17220_v52  ;;  %v17248_v57 = vld [vmem:[#allocation118_spill] sm:$0xff]  ;;  %v17252_v52 = vld [vmem:[#allocation131_spill] sm:$0xff] }
 0x426   : > { %9891 = vmatprep.subr.bf16.mxu1 %v9890_v44  ;;  %v6629_v44 = vand.u32 4294901760, %v3904_v17  ;;  %v13203_v46 = vpack.c.bf16 %v6623_v7, %v6619_v6  ;;  %v6653_v36 = vsub.f32 %v17188_v22, %v17247_v48  ;;  %v17251_v6 = vand.u32 4294901760, %v17189_v41  ;;  %v17258_v22 = vld [vmem:[#allocation39_spill] sm:$0xff] }
 0x427   : > { %v13218_v50 = vsub.f32 %v3898_v8, %v6625_v5  ;;  %v17253_v48 = vpack.c.bf16 %v17225_v25, %v17224_v3  ;;  %v17262_v25 = vld [vmem:[#allocation63_spill] sm:$0xff]  ;;  %v17264_v8 = vand.u32 4294901760, %v17190_v29 }
 0x428   : > { %10581 = vmatpush1.bf16.msra.mxu0 %v13130_v18  ;;  %17246 = vst [vmem:[#allocation201_spill] sm:$0xff] %v13203_v46  ;;  %v6665_v21 = vsub.f32 %v17189_v41, %v17251_v6  ;;  %v13228_v18 = vpack.c.bf16 %v6629_v44, %v6625_v5  ;;  %v17259_v6 = vpack.c.bf16 %v17228_v10, %v17227_v47  ;;  %v17270_v10 = vld [vmem:[#allocation137_spill] sm:$0xff] }
 0x429   : > { %9893 = vmatpush1.bf16.msra.mxu1 %v9892_v19  ;;  %10583 = vmatprep.subr.bf16.mxu0 %v13140_v9  ;;  %v6627_v19 = vand.u32 4294901760, %v3897_v16  ;;  %v13216_v9 = vsub.f32 %v3891_v12, %v6623_v7  ;;  %17250 = vst [vmem:[#allocation203_spill] sm:$0xff] %v13218_v50  ;;  %v17257_v7 = vld [vmem:[#allocation132_spill] sm:$0xff]  ;;  %v13238_v59 = vsub.f32 %v3904_v17, %v6629_v44  ;;  %v17266_v44 = vand.u32 4294901760, %v17252_v52 }
 0x42a   : > { %9895 = vmatprep.subr.bf16.mxu1 %v17245_v2  ;;  %17254 = vst [vmem:[#allocation131_spill] sm:$0xff] %v13228_v18  ;;  %v17255_v2 = vld [vmem:[#allocation58_spill] sm:$0xff]  ;;  %v6659_v53 = vsub.f32 %v17190_v29, %v17264_v8  ;;  %v6666_v17 = vand.u32 4294901760, %v6665_v21  ;;  %v17268_v8 = vand.u32 4294901760, %v17257_v7  ;;  %v17269_v21 = vand.u32 4294901760, %v17258_v22 }
 0x42b   : > { %17249 = vst [vmem:[#allocation202_spill] sm:$0xff] %v13216_v9  ;;  %17260 = vst [vmem:[#allocation132_spill] sm:$0xff] %v13238_v59  ;;  %v13244_v3 = vpack.c.bf16 %v6631_v4, %v6627_v19  ;;  %v13270_v5 = vsub.f32 %v3897_v16, %v6627_v19  ;;  %v17276_v16 = vand.u32 4294901760, %v17195_v0  ;;  %v17277_v19 = vand.u32 4294901760, %v17196_v13 }
 0x42c   : > { %4469 = vmatmul.mubr.f32.vlgmr.msra.gmra.mrb[8].mxu1 %v17248_v57  ;;  %10585 = vmatpush1.bf16.msra.mxu0 %v13156_v31  ;;  %v17256_v57 = vld [vmem:[#allocation60_spill] sm:$0xff] }
 0x42d   : > { %9897 = vmatpush1.bf16.msra.mxu1 %v17253_v48  ;;  %v9908_v12 = vpack.c.bf16 %v17256_v57, %v17255_v2  ;;  %10587 = vmatprep.subr.bf16.mxu0 %v13169_v34  ;;  %v17261_v48 = vld [vmem:[#allocation62_spill] sm:$0xff]  ;;  %17263 = vst [vmem:[#allocation39_spill] sm:$0xff] %v13244_v3  ;;  %v6654_v57 = vand.u32 4294901760, %v6653_v36  ;;  %v17265_v2 = vld [vmem:[#allocation87_spill] sm:$0xff]  ;;  %v6671_v34 = vsub.f32 %v17252_v52, %v17266_v44  ;;  %17271 = vst [vmem:[#allocation204_spill] sm:$0xff] %v13270_v5 }
 0x42e   : > { %9899 = vmatprep.subr.bf16.mxu1 %v17259_v6  ;;  %v9910_v31 = vpack.c.bf16 %v17262_v25, %v17261_v48  ;;  %4669 = vmatprep.mubr.f32.mxu1 %v17265_v2  ;;  %v17267_v36 = vpack.c.bf16 %v17231_v35, %v17230_v39  ;;  %v6677_v48 = vsub.f32 %v17257_v7, %v17268_v8  ;;  %v17273_v35 = vld [vmem:[#allocation65_spill] sm:$0xff]  ;;  %v17274_v39 = vld [vmem:[#allocation66_spill] sm:$0xff]  ;;  %v17275_v2 = vld [vmem:[#allocation140_spill] sm:$0xff] }
 0x42f   : > { %v6689_v6 = vsub.f32 %v17258_v22, %v17269_v21  ;;  %v9912_v47 = vpack.c.bf16 %v17274_v39, %v17273_v35  ;;  %v6660_v21 = vand.u32 4294901760, %v6659_v53  ;;  %v10598_v25 = vpack.c.bf16 %v6666_v17, %v6654_v57  ;;  %v17297_v35 = vld [vmem:[#allocation74_spill] sm:$0xff] }
 0x430   : > { %10589 = vmatpush1.bf16.msra.mxu0 %v13176_v61  ;;  %v16451_v61 = vand.u32 4294901760, %v12738_v54  ;;  %v17278_v8 = vpack.c.bf16 %v17242_v27, %v17241_v26  ;;  %v6678_v53 = vand.u32 4294901760, %v6677_v48 }
 0x431   : > { %9901 = vmatpush1.bf16.msra.mxu1 %v17267_v36  ;;  %10591 = vmatprep.subr.bf16.mxu0 %v13187_v56  ;;  %v13272_v36 = vsub.f32 %v3903_v51, %v6631_v4  ;;  %v6672_v56 = vand.u32 4294901760, %v6671_v34  ;;  %v6683_v51 = vsub.f32 %v17195_v0, %v17276_v16  ;;  %v6695_v4 = vsub.f32 %v17196_v13, %v17277_v19 }
 0x432   : > { %9903 = vmatprep.subr.bf16.mxu1 %v9902_v49  ;;  %v6690_v44 = vand.u32 4294901760, %v6689_v6  ;;  %v17279_v49 = vand.u32 4294901760, %v17197_v1  ;;  %v17280_v34 = vand.u32 4294901760, %v17270_v10  ;;  %v17281_v16 = vpack.c.bf16 %v17244_v32, %v17243_v63  ;;  %v17285_v32 = vld [vmem:[#allocation68_spill] sm:$0xff]  ;;  %v17287_v6 = vld [vmem:[#allocation146_spill] sm:$0xff] }
 0x433   : > { %17272 = vst [vmem:[#allocation205_spill] sm:$0xff] %v13272_v36  ;;  %v17282_v19 = vand.u32 4294901760, %v17275_v2  ;;  %v6684_v48 = vand.u32 4294901760, %v6683_v51  ;;  %v6696_v27 = vand.u32 4294901760, %v6695_v4  ;;  %v17292_v4 = vand.u32 4294901760, %v17200_v38 }
 0x434   : > { %10593 = vmatpush1.bf16.msra.mxu0 %v13203_v46  ;;  %v6701_v57 = vsub.f32 %v17197_v1, %v17279_v49  ;;  %v6713_v17 = vsub.f32 %v17270_v10, %v17280_v34  ;;  %v17283_v46 = vld [vmem:[#allocation144_spill] sm:$0xff]  ;;  %v10600_v49 = vpack.c.bf16 %v6672_v56, %v6660_v21 }
 0x435   : > { %9905 = vmatpush1.bf16.msra.mxu1 %v17278_v8  ;;  %10595 = vmatprep.subr.bf16.mxu0 %v13228_v18  ;;  %v6707_v8 = vsub.f32 %v12738_v54, %v16451_v61  ;;  %v6719_v34 = vsub.f32 %v17275_v2, %v17282_v19  ;;  %v17286_v61 = vld [vmem:[#allocation69_spill] sm:$0xff]  ;;  %v10602_v54 = vpack.c.bf16 %v6690_v44, %v6678_v53  ;;  %v17288_v19 = vld [vmem:[#allocation70_spill] sm:$0xff]  ;;  %v17289_v2 = vld [vmem:[#allocation72_spill] sm:$0xff]  ;;  %v17293_v44 = vand.u32 4294901760, %v17283_v46 }
 0x436   : > { %9907 = vmatprep.subr.bf16.mxu1 %v17281_v16  ;;  %v17284_v16 = vld [vmem:[#allocation145_spill] sm:$0xff]  ;;  %v9914_v63 = vpack.c.bf16 %v17286_v61, %v17285_v32  ;;  %v9916_v39 = vpack.c.bf16 %v17289_v2, %v17288_v19  ;;  %v17290_v1 = vld [vmem:[#allocation148_spill] sm:$0xff]  ;;  %v6702_v18 = vand.u32 4294901760, %v6701_v57  ;;  %v6714_v10 = vand.u32 4294901760, %v6713_v17  ;;  %v17296_v17 = vld [vmem:[#allocation19_spill] sm:$0xff] }
 0x437   : > { %v17291_v61 = vand.u32 4294901760, %v17199_v24  ;;  %v6708_v26 = vand.u32 4294901760, %v6707_v8  ;;  %v6720_v56 = vand.u32 4294901760, %v6719_v34  ;;  %v6731_v21 = vsub.f32 %v17283_v46, %v17293_v44  ;;  %v17299_v8 = vld [vmem:[#allocation149_spill] sm:$0xff]  ;;  %v17301_v19 = vld [vmem:[#allocation152_spill] sm:$0xff] }
 0x438   : > { %10597 = vmatpush1.bf16.msra.mxu0 %v13244_v3  ;;  %v17294_v53 = vand.u32 4294901760, %v17284_v16  ;;  %v10604_v57 = vpack.c.bf16 %v6696_v27, %v6684_v48  ;;  %v17298_v3 = vand.u32 4294901760, %v17287_v6  ;;  %v17300_v44 = vand.u32 4294901760, %v17290_v1  ;;  %v17302_v32 = vld [vmem:[#allocation153_spill] sm:$0xff]  ;;  %v17303_v27 = vld [vmem:[#allocation155_spill] sm:$0xff] }
 0x439   : > { %9909 = vmatpush1.bf16.msra.mxu1 %v9908_v12  ;;  %10599 = vmatprep.subr.bf16.mxu0 %v10598_v25  ;;  %v6725_v51 = vsub.f32 %v17199_v24, %v17291_v61  ;;  %v6737_v12 = vsub.f32 %v17200_v38, %v17292_v4  ;;  %v17295_v25 = vld [vmem:[#allocation151_spill] sm:$0xff]  ;;  %v9918_v61 = vpack.c.bf16 %v17297_v35, %v17296_v17  ;;  %v16468_v48 = vand.u32 4294901760, %v17303_v27  ;;  %v17304_v17 = vld [vmem:[#allocation76_spill] sm:$0xff]  ;;  %v17305_v46 = vld [vmem:[#allocation77_spill] sm:$0xff] }
 0x43a   : > { %9911 = vmatprep.subr.bf16.mxu1 %v9910_v31  ;;  %v6743_v31 = vsub.f32 %v17284_v16, %v17294_v53  ;;  %v6749_v4 = vsub.f32 %v17287_v6, %v17298_v3  ;;  %v6761_v2 = vsub.f32 %v17290_v1, %v17300_v44  ;;  %v10606_v35 = vpack.c.bf16 %v6714_v10, %v6702_v18  ;;  %v17307_v16 = vld [vmem:[#allocation21_spill] sm:$0xff]  ;;  %v17308_v1 = vld [vmem:[#allocation83_spill] sm:$0xff] }
 0x43b   : > { %6644 = vmatmul.mubr.f32.vlgmr.msra.gmra.mrb[10].mxu0 %v17295_v25  ;;  %v9920_v3 = vpack.c.bf16 %v17305_v46, %v17304_v17  ;;  %v6726_v6 = vand.u32 4294901760, %v6725_v51  ;;  %v6738_v34 = vand.u32 4294901760, %v6737_v12  ;;  %v6732_v38 = vand.u32 4294901760, %v6731_v21  ;;  %v17318_v46 = vld [vmem:[#allocation26_spill] sm:$0xff] }
 0x43c   : > { %10601 = vmatpush1.bf16.msra.mxu0 %v10600_v49  ;;  %v17306_v49 = vld [vmem:[#allocation20_spill] sm:$0xff]  ;;  %v6744_v44 = vand.u32 4294901760, %v6743_v31  ;;  %7035 = vmatprep.mubr.f32.mxu0 %v17308_v1  ;;  %v6750_v53 = vand.u32 4294901760, %v6749_v4  ;;  %v17309_v25 = vand.u32 4294901760, %v17299_v8  ;;  %v6762_v10 = vand.u32 4294901760, %v6761_v2  ;;  %v17313_v4 = vld [vmem:[#allocation23_spill] sm:$0xff] }
 0x43d   : > { %9913 = vmatpush1.bf16.msra.mxu1 %v9912_v47  ;;  %10603 = vmatprep.subr.bf16.mxu0 %v10602_v54  ;;  %v10608_v47 = vpack.c.bf16 %v6720_v56, %v6708_v26  ;;  %v9922_v24 = vpack.c.bf16 %v17307_v16, %v17306_v49  ;;  %v17310_v26 = vand.u32 4294901760, %v17301_v19  ;;  %v17311_v12 = vand.u32 4294901760, %v17302_v32  ;;  %v17315_v54 = vld [vmem:[#allocation84_spill] sm:$0xff]  ;;  %v17317_v49 = vld [vmem:[#allocation25_spill] sm:$0xff] }
 0x43e   : > { %9915 = vmatprep.subr.bf16.mxu1 %v9914_v63  ;;  %v6755_v63 = vsub.f32 %v17299_v8, %v17309_v25  ;;  %v6785_v21 = vsub.f32 %v17303_v27, %v16468_v48  ;;  %v10610_v31 = vpack.c.bf16 %v6738_v34, %v6726_v6  ;;  %v17312_v25 = vld [vmem:[#allocation79_spill] sm:$0xff]  ;;  %v17319_v1 = vld [vmem:[#allocation164_spill] sm:$0xff]  ;;  %v17320_v6 = vand.u32 4294901760, %v17207_v14 }
 0x43f   : > { %v6767_v51 = vsub.f32 %v17301_v19, %v17310_v26  ;;  %v6773_v56 = vsub.f32 %v17302_v32, %v17311_v12  ;;  %v17316_v26 = vld [vmem:[#allocation24_spill] sm:$0xff]  ;;  %v9928_v12 = vpack.c.bf16 %v17318_v46, %v17317_v49  ;;  %v17321_v2 = vand.u32 4294901760, %v12864_v40  ;;  %v17325_v49 = vld [vmem:[#allocation167_spill] sm:$0xff]  ;;  %v17335_v32 = vld [vmem:[#allocation173_spill] sm:$0xff] }
 0x440   : > { %10605 = vmatpush1.bf16.msra.mxu0 %v10604_v57  ;;  %v17314_v57 = vld [vmem:[#allocation161_spill] sm:$0xff]  ;;  %v9926_v16 = vpack.c.bf16 %v17316_v26, %v17315_v54  ;;  %v6779_v34 = vsub.f32 %v17207_v14, %v17320_v6  ;;  %v10614_v26 = vpack.c.bf16 %v6762_v10, %v6750_v53  ;;  %v6786_v46 = vand.u32 4294901760, %v6785_v21  ;;  %v17328_v10 = vld [vmem:[#allocation168_spill] sm:$0xff]  ;;  %v17330_v21 = vld [vmem:[#allocation86_spill] sm:$0xff] }
 0x441   : > { %9917 = vmatpush1.bf16.msra.mxu1 %v9916_v39  ;;  %10607 = vmatprep.subr.bf16.mxu0 %v10606_v35  ;;  %v9924_v39 = vpack.c.bf16 %v17313_v4, %v17312_v25  ;;  %v6756_v35 = vand.u32 4294901760, %v6755_v63  ;;  %v6791_v18 = vsub.f32 %v12864_v40, %v17321_v2  ;;  %v6768_v54 = vand.u32 4294901760, %v6767_v51  ;;  %v17324_v6 = vld [vmem:[#allocation165_spill] sm:$0xff] }
 0x442   : > { %9919 = vmatprep.subr.bf16.mxu1 %v9918_v61  ;;  %v10612_v61 = vpack.c.bf16 %v6744_v44, %v6732_v38  ;;  %v6774_v4 = vand.u32 4294901760, %v6773_v56  ;;  %v17322_v48 = vand.u32 4294901760, %v12866_v20  ;;  %v17323_v44 = vand.u32 4294901760, %v17314_v57  ;;  %v17329_v56 = vld [vmem:[#allocation170_spill] sm:$0xff] }
 0x443   : > { %v6792_v2 = vand.u32 4294901760, %v6791_v18  ;;  %v10616_v14 = vpack.c.bf16 %v6768_v54, %v6756_v35  ;;  %v17340_v35 = vld [vmem:[#allocation91_spill] sm:$0xff] }
 0x444   : > { %10609 = vmatpush1.bf16.msra.mxu0 %v10608_v47  ;;  %v6797_v38 = vsub.f32 %v12866_v20, %v17322_v48  ;;  %v6809_v63 = vsub.f32 %v17314_v57, %v17323_v44  ;;  %v17327_v47 = vand.u32 4294901760, %v17319_v1  ;;  %v17332_v44 = vld [vmem:[#allocation90_spill] sm:$0xff]  ;;  %v17333_v20 = vld [vmem:[#allocation28_spill] sm:$0xff]  ;;  %v6780_v57 = vand.u32 4294901760, %v6779_v34 }
 0x445   : > { %9921 = vmatpush1.bf16.msra.mxu1 %v9920_v3  ;;  %10611 = vmatprep.subr.bf16.mxu0 %v10610_v31  ;;  %v17326_v3 = vand.u32 4294901760, %v17209_v58  ;;  %v17331_v31 = vld [vmem:[#allocation88_spill] sm:$0xff]  ;;  %v9932_v17 = vpack.c.bf16 %v17333_v20, %v17332_v44  ;;  %v17337_v20 = vand.u32 4294901760, %v17325_v49  ;;  %v17346_v44 = vld [vmem:[#allocation177_spill] sm:$0xff] }
 0x446   : > { %9923 = vmatprep.subr.bf16.mxu1 %v9922_v24  ;;  %v6815_v24 = vsub.f32 %v17319_v1, %v17327_v47  ;;  %v9930_v25 = vpack.c.bf16 %v17331_v31, %v17330_v21  ;;  %v6798_v51 = vand.u32 4294901760, %v6797_v38  ;;  %v6810_v48 = vand.u32 4294901760, %v6809_v63  ;;  %v17341_v34 = vld [vmem:[#allocation92_spill] sm:$0xff]  ;;  %v17342_v63 = vld [vmem:[#allocation174_spill] sm:$0xff] }
 0x447   : > { %v6803_v53 = vsub.f32 %v17209_v58, %v17326_v3  ;;  %v10618_v3 = vpack.c.bf16 %v6786_v46, %v6774_v4  ;;  %v17334_v58 = vld [vmem:[#allocation171_spill] sm:$0xff]  ;;  %v17336_v1 = vand.u32 4294901760, %v17324_v6  ;;  %v6833_v18 = vsub.f32 %v17325_v49, %v17337_v20  ;;  %v17343_v47 = vld [vmem:[#allocation176_spill] sm:$0xff]  ;;  %v17367_v49 = vld [vmem:[#allocation130_spill] sm:$0xff] }
 0x448   : > { %10613 = vmatpush1.bf16.msra.mxu0 %v10612_v61  ;;  %v6816_v61 = vand.u32 4294901760, %v6815_v24  ;;  %v17338_v46 = vand.u32 4294901760, %v17328_v10  ;;  %v17339_v4 = vand.u32 4294901760, %v17329_v56  ;;  %v9934_v38 = vpack.c.bf16 %v17341_v34, %v17340_v35  ;;  %v17349_v35 = vld [vmem:[#allocation96_spill] sm:$0xff] }
 0x449   : > { %9925 = vmatpush1.bf16.msra.mxu1 %v9924_v39  ;;  %10615 = vmatprep.subr.bf16.mxu0 %v10614_v26  ;;  %v6821_v31 = vsub.f32 %v17324_v6, %v17336_v1  ;;  %v6804_v39 = vand.u32 4294901760, %v6803_v53  ;;  %v10620_v26 = vpack.c.bf16 %v6792_v2, %v6780_v57  ;;  %v17344_v20 = vand.u32 4294901760, %v17334_v58  ;;  %v17347_v57 = vld [vmem:[#allocation179_spill] sm:$0xff] }
 0x44a   : > { %9927 = vmatprep.subr.bf16.mxu1 %v9926_v16  ;;  %v6827_v54 = vsub.f32 %v17328_v10, %v17338_v46  ;;  %v6839_v16 = vsub.f32 %v17329_v56, %v17339_v4  ;;  %v17345_v24 = vand.u32 4294901760, %v17335_v32  ;;  %v10622_v34 = vpack.c.bf16 %v6810_v48, %v6798_v51  ;;  %v17348_v1 = vld [vmem:[#allocation95_spill] sm:$0xff]  ;;  %v17350_v10 = vld [vmem:[#allocation97_spill] sm:$0xff]  ;;  %v17354_v51 = vld [vmem:[#allocation180_spill] sm:$0xff] }
 0x44b   : > { %v6845_v53 = vsub.f32 %v17334_v58, %v17344_v20  ;;  %v9936_v40 = vpack.c.bf16 %v17349_v35, %v17348_v1  ;;  %v10624_v21 = vpack.c.bf16 %v6816_v61, %v6804_v39  ;;  %v17351_v56 = vld [vmem:[#allocation99_spill] sm:$0xff]  ;;  %v17353_v2 = vand.u32 4294901760, %v17343_v47 }
 0x44c   : > { %10617 = vmatpush1.bf16.msra.mxu0 %v10616_v14  ;;  %v6857_v46 = vsub.f32 %v17335_v32, %v17345_v24  ;;  %v6834_v14 = vand.u32 4294901760, %v6833_v18  ;;  %v9938_v20 = vpack.c.bf16 %v17351_v56, %v17350_v10  ;;  %v6828_v58 = vand.u32 4294901760, %v6827_v54  ;;  %v17359_v56 = vld [vmem:[#allocation102_spill] sm:$0xff]  ;;  %v17360_v10 = vld [vmem:[#allocation183_spill] sm:$0xff] }
 0x44d   : > { %9929 = vmatpush1.bf16.msra.mxu1 %v9928_v12  ;;  %10619 = vmatprep.subr.bf16.mxu0 %v10618_v3  ;;  %v6822_v12 = vand.u32 4294901760, %v6821_v31  ;;  %v6840_v6 = vand.u32 4294901760, %v6839_v16  ;;  %v17352_v24 = vand.u32 4294901760, %v17342_v63  ;;  %v17355_v3 = vld [vmem:[#allocation182_spill] sm:$0xff]  ;;  %v6846_v31 = vand.u32 4294901760, %v6845_v53  ;;  %v17362_v53 = vld [vmem:[#allocation103_spill] sm:$0xff] }
 0x44e   : > { %9931 = vmatprep.subr.bf16.mxu1 %v9930_v25  ;;  %v6863_v25 = vsub.f32 %v17343_v47, %v17353_v2  ;;  %v6858_v18 = vand.u32 4294901760, %v6857_v46  ;;  %v17356_v39 = vand.u32 4294901760, %v17346_v44  ;;  %v17357_v54 = vand.u32 4294901760, %v17347_v57  ;;  %v17358_v2 = vld [vmem:[#allocation101_spill] sm:$0xff]  ;;  %v17365_v47 = vld [vmem:[#allocation107_spill] sm:$0xff] }
 0x44f   : > { %v6851_v4 = vsub.f32 %v17342_v63, %v17352_v24  ;;  %v10626_v24 = vpack.c.bf16 %v6834_v14, %v6822_v12  ;;  %v9940_v48 = vpack.c.bf16 %v17359_v56, %v17358_v2  ;;  %v17363_v46 = vld [vmem:[#allocation105_spill] sm:$0xff]  ;;  %v17364_v63 = vld [vmem:[#allocation40_spill] sm:$0xff]  ;;  %v17368_v12 = vand.u32 4294901760, %v17354_v51 }
 0x450   : > { %10621 = vmatpush1.bf16.msra.mxu0 %v10620_v26  ;;  %v6869_v61 = vsub.f32 %v17346_v44, %v17356_v39  ;;  %v6881_v16 = vsub.f32 %v17347_v57, %v17357_v54  ;;  %v9942_v1 = vpack.c.bf16 %v17363_v46, %v17362_v53  ;;  %v9944_v39 = vpack.c.bf16 %v17365_v47, %v17364_v63  ;;  %v17366_v44 = vld [vmem:[#allocation186_spill] sm:$0xff] }
 0x451   : > { %9933 = vmatpush1.bf16.msra.mxu1 %v9932_v17  ;;  %10623 = vmatprep.subr.bf16.mxu0 %v10622_v34  ;;  %v17361_v17 = vld [vmem:[#allocation185_spill] sm:$0xff]  ;;  %v6864_v34 = vand.u32 4294901760, %v6863_v25  ;;  %v6875_v14 = vsub.f32 %v17354_v51, %v17368_v12  ;;  %v17369_v35 = vand.u32 4294901760, %v17355_v3  ;;  %v10628_v46 = vpack.c.bf16 %v6840_v6, %v6828_v58  ;;  %v17374_v6 = vld [vmem:[#allocation111_spill] sm:$0xff] }
 0x452   : > { %9935 = vmatprep.subr.bf16.mxu1 %v9934_v38  ;;  %v6852_v38 = vand.u32 4294901760, %v6851_v4  ;;  %v10630_v53 = vpack.c.bf16 %v6858_v18, %v6846_v31  ;;  %v6870_v56 = vand.u32 4294901760, %v6869_v61  ;;  %v6882_v47 = vand.u32 4294901760, %v6881_v16  ;;  %v17375_v31 = vld [vmem:[#allocation112_spill] sm:$0xff] }
 0x453   : > { %v6887_v26 = vsub.f32 %v17355_v3, %v17369_v35  ;;  %v17370_v54 = vand.u32 4294901760, %v17360_v10  ;;  %v17371_v25 = vand.u32 4294901760, %v17361_v17  ;;  %v9948_v18 = vpack.c.bf16 %v17375_v31, %v17374_v6  ;;  %v17378_v6 = vld [vmem:[#allocation192_spill] sm:$0xff] }
 0x454   : > { %10625 = vmatpush1.bf16.msra.mxu0 %v10624_v21  ;;  %v17373_v21 = vld [vmem:[#allocation45_spill] sm:$0xff]  ;;  %v17377_v16 = vand.u32 4294901760, %v17367_v49  ;;  %v16487_v32 = vand.u32 4294901760, %v13126_v33  ;;  %v10634_v35 = vpack.c.bf16 %v6882_v47, %v6870_v56  ;;  %v16489_v47 = vand.u32 4294901760, %v13158_v55 }
 0x455   : > { %9937 = vmatpush1.bf16.msra.mxu1 %v9936_v40  ;;  %10627 = vmatprep.subr.bf16.mxu0 %v10626_v24  ;;  %v6893_v4 = vsub.f32 %v17360_v10, %v17370_v54  ;;  %v6905_v12 = vsub.f32 %v17361_v17, %v17371_v25  ;;  %v17372_v40 = vld [vmem:[#allocation109_spill] sm:$0xff]  ;;  %v10632_v54 = vpack.c.bf16 %v6864_v34, %v6852_v38  ;;  %v6876_v25 = vand.u32 4294901760, %v6875_v14  ;;  %v17381_v34 = vld [vmem:[#allocation194_spill] sm:$0xff] }
 0x456   : > { %9939 = vmatprep.subr.bf16.mxu1 %v9938_v20  ;;  %v9946_v58 = vpack.c.bf16 %v17373_v21, %v17372_v40  ;;  %v17376_v20 = vand.u32 4294901760, %v17366_v44  ;;  %v6911_v24 = vsub.f32 %v17367_v49, %v17377_v16  ;;  %v6888_v63 = vand.u32 4294901760, %v6887_v26 }
 0x457   : > { %v16493_v21 = vand.u32 4294901760, %v13138_v30  ;;  %v16491_v40 = vand.u32 4294901760, %v17378_v6  ;;  %v6906_v2 = vand.u32 4294901760, %v6905_v12  ;;  %v17379_v16 = vand.u32 4294901760, %v13114_v37 }
 0x458   : > { %v6899_v61 = vsub.f32 %v17366_v44, %v17376_v20  ;;  %10629 = vmatpush1.bf16.msra.mxu0 %v10628_v46  ;;  %v6894_v20 = vand.u32 4294901760, %v6893_v4  ;;  %v17380_v26 = vand.u32 4294901760, %v13124_v43  ;;  %v6912_v56 = vand.u32 4294901760, %v6911_v24 }
 0x459   : > { %9941 = vmatpush1.bf16.msra.mxu1 %v9940_v48  ;;  %10631 = vmatprep.subr.bf16.mxu0 %v10630_v53  ;;  %v6917_v38 = vsub.f32 %v13114_v37, %v17379_v16  ;;  %v16488_v14 = vand.u32 4294901760, %v17381_v34  ;;  %v10636_v31 = vpack.c.bf16 %v6888_v63, %v6876_v25  ;;  %v16490_v53 = vand.u32 4294901760, %v13166_v28 }
 0x45a   : > { %9943 = vmatprep.subr.bf16.mxu1 %v9942_v1  ;;  %v6929_v48 = vsub.f32 %v13124_v43, %v17380_v26  ;;  %v6900_v46 = vand.u32 4294901760, %v6899_v61  ;;  %v6923_v1 = vsub.f32 %v13126_v33, %v16487_v32  ;;  %v16492_v4 = vand.u32 4294901760, %v13171_v11 }
 0x45b   : > { %v6935_v12 = vsub.f32 %v13138_v30, %v16493_v21  ;;  %v17382_v61 = vand.u32 4294901760, %v13142_v15  ;;  %v6953_v63 = vsub.f32 %v17378_v6, %v16491_v40  ;;  %v10638_v25 = vpack.c.bf16 %v6906_v2, %v6894_v20 }
 0x45c   : > { %10633 = vmatpush1.bf16.msra.mxu0 %v10632_v54  ;;  %v6918_v16 = vand.u32 4294901760, %v6917_v38  ;;  %v6930_v26 = vand.u32 4294901760, %v6929_v48  ;;  %v10640_v32 = vpack.c.bf16 %v6912_v56, %v6900_v46  ;;  %v6959_v54 = vsub.f32 %v17381_v34, %v16488_v14  ;;  %v17383_v56 = vld [vmem:[#allocation114_spill] sm:$0xff]  ;;  %v17384_v14 = vld [vmem:[#allocation113_spill] sm:$0xff] }
 0x45d   : > { %9945 = vmatpush1.bf16.msra.mxu1 %v9944_v39  ;;  %v6941_v24 = vsub.f32 %v13142_v15, %v17382_v61  ;;  %10635 = vmatprep.subr.bf16.mxu0 %v10634_v35  ;;  %v6947_v39 = vsub.f32 %v13158_v55, %v16489_v47  ;;  %v6965_v61 = vsub.f32 %v13166_v28, %v16490_v53  ;;  %v6924_v20 = vand.u32 4294901760, %v6923_v1 }
 0x45e   : > { %9947 = vmatprep.subr.bf16.mxu1 %v9946_v58  ;;  %v6977_v35 = vsub.f32 %v13171_v11, %v16492_v4  ;;  %v6936_v38 = vand.u32 4294901760, %v6935_v12  ;;  %v6954_v46 = vand.u32 4294901760, %v6953_v63  ;;  %v17385_v47 = vpack.c.bf16 %v17383_v56, %v17384_v14 }
 0x45f   : > { %v6942_v48 = vand.u32 4294901760, %v6941_v24  ;;  %v10642_v53 = vpack.c.bf16 %v6930_v26, %v6918_v16  ;;  %v16496_v40 = vand.u32 4294901760, %v13189_v62  ;;  %v16497_v4 = vand.u32 4294901760, %v13195_v42  ;;  %v17388_v24 = vld [vmem:[#allocation117_spill] sm:$0xff]  ;;  %v17395_v26 = vld [vmem:[#allocation123_spill] sm:$0xff] }
 0x460   : > { %10637 = vmatpush1.bf16.msra.mxu0 %v10636_v31  ;;  %v6948_v21 = vand.u32 4294901760, %v6947_v39  ;;  %v6960_v2 = vand.u32 4294901760, %v6959_v54  ;;  %v6966_v28 = vand.u32 4294901760, %v6965_v61  ;;  %v6978_v58 = vand.u32 4294901760, %v6977_v35  ;;  %v17391_v54 = vld [vmem:[#allocation121_spill] sm:$0xff]  ;;  %v17392_v61 = vld [vmem:[#allocation119_spill] sm:$0xff] }
 0x461   : > { %9949 = vmatpush1.bf16.msra.mxu1 %v9948_v18  ;;  %10639 = vmatprep.subr.bf16.mxu0 %v10638_v25  ;;  %v17386_v31 = vand.u32 4294901760, %v13173_v60  ;;  %v17387_v1 = vand.u32 4294901760, %v13180_v23  ;;  %v10644_v25 = vpack.c.bf16 %v6936_v38, %v6924_v20  ;;  %v10646_v16 = vpack.c.bf16 %v6954_v46, %v6942_v48  ;;  %v17394_v39 = vld [vmem:[#allocation125_spill] sm:$0xff] }
 0x462   : > { %9951 = vmatprep.subr.bf16.mxu1 %v17385_v47  ;;  %v17389_v47 = vld [vmem:[#allocation116_spill] sm:$0xff]  ;;  %v17393_v35 = vpack.c.bf16 %v17391_v54, %v17392_v61  ;;  %v16498_v20 = vand.u32 4294901760, %v13238_v59  ;;  %v10648_v38 = vpack.c.bf16 %v6960_v2, %v6948_v21  ;;  %v10650_v48 = vpack.c.bf16 %v6978_v58, %v6966_v28  ;;  %v17399_v28 = vld [vmem:[#allocation31_spill] sm:$0xff] }
 0x463   : > { %v6971_v18 = vsub.f32 %v13173_v60, %v17386_v31  ;;  %v6983_v12 = vsub.f32 %v13180_v23, %v17387_v1  ;;  %v17390_v63 = vpack.c.bf16 %v17388_v24, %v17389_v47  ;;  %v6989_v31 = vsub.f32 %v13189_v62, %v16496_v40  ;;  %v17409_v61 = vld [vmem:[#allocation52_spill] sm:$0xff] }
 0x464   : > { %10641 = vmatpush1.bf16.msra.mxu0 %v10640_v32  ;;  %v7001_v1 = vsub.f32 %v13195_v42, %v16497_v4  ;;  %v17398_v54 = vand.u32 4294901760, %v13216_v9 }
 0x465   : > { %9953 = vmatpush1.bf16.msra.mxu1 %v17390_v63  ;;  %10643 = vmatprep.subr.bf16.mxu0 %v10642_v53  ;;  %v6972_v46 = vand.u32 4294901760, %v6971_v18  ;;  %v6984_v63 = vand.u32 4294901760, %v6983_v12  ;;  %v17397_v53 = vand.u32 4294901760, %v13205_v45  ;;  %v6990_v2 = vand.u32 4294901760, %v6989_v31 }
 0x466   : > { %9955 = vmatprep.subr.bf16.mxu1 %v17393_v35  ;;  %v17396_v35 = vpack.c.bf16 %v17394_v39, %v17395_v26  ;;  %v7007_v4 = vsub.f32 %v13216_v9, %v17398_v54  ;;  %v7002_v58 = vand.u32 4294901760, %v7001_v1  ;;  %v17400_v18 = vand.u32 4294901760, %v13218_v50 }
 0x467   : > { %v6995_v40 = vsub.f32 %v13205_v45, %v17397_v53  ;;  %v10652_v54 = vpack.c.bf16 %v6984_v63, %v6972_v46  ;;  %v17402_v53 = vld [vmem:[#allocation35_spill] sm:$0xff]  ;;  %v17404_v1 = vand.u32 4294901760, %v13272_v36  ;;  %v17406_v46 = vld [vmem:[#allocation94_spill] sm:$0xff] }
 0x468   : > { %10645 = vmatpush1.bf16.msra.mxu0 %v10644_v25  ;;  %v7013_v12 = vsub.f32 %v13218_v50, %v17400_v18  ;;  %v7025_v25 = vsub.f32 %v13238_v59, %v16498_v20  ;;  %v7008_v32 = vand.u32 4294901760, %v7007_v4  ;;  %v10654_v20 = vpack.c.bf16 %v7002_v58, %v6990_v2  ;;  %v17407_v63 = vld [vmem:[#allocation46_spill] sm:$0xff]  ;;  %v17411_v2 = vld [vmem:[#allocation59_spill] sm:$0xff]  ;;  %v17412_v58 = vld [vmem:[#allocation61_spill] sm:$0xff] }
 0x469   : > { %9957 = vmatpush1.bf16.msra.mxu1 %v17396_v35  ;;  %10647 = vmatprep.subr.bf16.mxu0 %v10646_v16  ;;  %v17401_v35 = vld [vmem:[#allocation122_spill] sm:$0xff]  ;;  %v6996_v21 = vand.u32 4294901760, %v6995_v40  ;;  %v17403_v16 = vand.u32 4294901760, %v13270_v5  ;;  %v7031_v18 = vsub.f32 %v13272_v36, %v17404_v1 }
 0x46a   : > { %9959 = vmatprep.subr.bf16.mxu1 %v17399_v28  ;;  %v17405_v28 = vld [vmem:[#allocation41_spill] sm:$0xff]  ;;  %v7014_v39 = vand.u32 4294901760, %v7013_v12  ;;  %v7026_v26 = vand.u32 4294901760, %v7025_v25  ;;  %v17415_v12 = vld [vmem:[#allocation118_spill] sm:$0xff]  ;;  %v17419_v25 = vpack.c.bf16 %v17258_v22, %v17257_v7 }
 0x46b   : > { %v7019_v31 = vsub.f32 %v13270_v5, %v17403_v16  ;;  %v10656_v40 = vpack.c.bf16 %v7008_v32, %v6996_v21  ;;  %v17413_v32 = vld [vmem:[#allocation127_spill] sm:$0xff] }
 0x46c   : > { %4672 = vmatmul.mubr.f32.vlgmr.msra.gmra.mrb[8].mxu1 %v17401_v35  ;;  %10649 = vmatpush1.bf16.msra.mxu0 %v10648_v38  ;;  %v7032_v38 = vand.u32 4294901760, %v7031_v18  ;;  %v10658_v16 = vpack.c.bf16 %v7026_v26, %v7014_v39  ;;  %v17414_v21 = vpack.c.bf16 %v17189_v41, %v17413_v32  ;;  %v17417_v26 = vpack.c.bf16 %v17252_v52, %v17190_v29  ;;  %v17418_v39 = vld [vmem:[#allocation67_spill] sm:$0xff] }
 0x46d   : > { %9961 = vmatpush1.bf16.msra.mxu1 %v17402_v53  ;;  %10651 = vmatprep.subr.bf16.mxu0 %v10650_v48  ;;  %v7020_v4 = vand.u32 4294901760, %v7019_v31  ;;  %v17408_v53 = vld [vmem:[#allocation49_spill] sm:$0xff]  ;;  %v17410_v48 = vld [vmem:[#allocation55_spill] sm:$0xff]  ;;  %v17422_v18 = vpack.c.bf16 %v17196_v13, %v17195_v0  ;;  %v17435_v13 = vld [vmem:[#allocation22_spill] sm:$0xff] }
 0x46e   : > { %9963 = vmatprep.subr.bf16.mxu1 %v17405_v28  ;;  %4809 = vmatprep.mubr.f32.mxu1 %v17406_v46  ;;  %v17421_v31 = vld [vmem:[#allocation71_spill] sm:$0xff] }
 0x46f   : > { %v10660_v1 = vpack.c.bf16 %v7032_v38, %v7020_v4  ;;  %v17424_v4 = vld [vmem:[#allocation137_spill] sm:$0xff]  ;;  %v17425_v38 = vld [vmem:[#allocation136_spill] sm:$0xff] }
 0x470   : > { %10653 = vmatpush1.bf16.msra.mxu0 %v10652_v54  ;;  %v17420_v54 = vld [vmem:[#allocation87_spill] sm:$0xff] }
 0x471   : > { %9965 = vmatpush1.bf16.msra.mxu1 %v17407_v63  ;;  %10655 = vmatprep.subr.bf16.mxu0 %v10654_v20  ;;  %v17416_v20 = vld [vmem:[#allocation64_spill] sm:$0xff] }
 0x472   : > { %9967 = vmatprep.subr.bf16.mxu1 %v17408_v53 }
 0x474   : > { %10657 = vmatpush1.bf16.msra.mxu0 %v10656_v40  ;;  %v17423_v40 = vld [vmem:[#allocation73_spill] sm:$0xff] }
 0x475   : > { %9969 = vmatpush1.bf16.msra.mxu1 %v17409_v61  ;;  %10659 = vmatprep.subr.bf16.mxu0 %v10658_v16  ;;  %v17426_v16 = vpack.c.bf16 %v17424_v4, %v17425_v38  ;;  %v17439_v4 = vld [vmem:[#allocation81_spill] sm:$0xff] }
 0x476   : > { %9971 = vmatprep.subr.bf16.mxu1 %v17410_v48 }
 0x478   : > { %10661 = vmatpush1.bf16.msra.mxu0 %v10660_v1  ;;  %v17427_v1 = vld [vmem:[#allocation75_spill] sm:$0xff] }
 0x479   : > { %9973 = vmatpush1.bf16.msra.mxu1 %v17411_v2  ;;  %10663 = vmatprep.subr.bf16.mxu0 %v17414_v21  ;;  %v17428_v21 = vld [vmem:[#allocation140_spill] sm:$0xff] }
 0x47a   : > { %9975 = vmatprep.subr.bf16.mxu1 %v17412_v58 }
 0x47b   : > { %7037 = vmatmul.mubr.f32.vlgmr.msra.gmra.mrb[10].mxu0 %v17415_v12 }
 0x47c   : > { %10665 = vmatpush1.bf16.msra.mxu0 %v17417_v26  ;;  %7237 = vmatprep.mubr.f32.mxu0 %v17420_v54  ;;  %v17429_v26 = vld [vmem:[#allocation139_spill] sm:$0xff] }
 0x47d   : > { %9977 = vmatpush1.bf16.msra.mxu1 %v17416_v20  ;;  %10667 = vmatprep.subr.bf16.mxu0 %v17419_v25  ;;  %v17431_v25 = vld [vmem:[#allocation78_spill] sm:$0xff]  ;;  %v17432_v54 = vld [vmem:[#allocation143_spill] sm:$0xff] }
 0x47e   : > { %9979 = vmatprep.subr.bf16.mxu1 %v17418_v39  ;;  %v17430_v39 = vpack.c.bf16 %v17428_v21, %v17429_v26  ;;  %v17443_v21 = vld [vmem:[#allocation85_spill] sm:$0xff] }
 0x480   : > { %10669 = vmatpush1.bf16.msra.mxu0 %v17422_v18  ;;  %v17436_v18 = vld [vmem:[#allocation145_spill] sm:$0xff] }
 0x481   : > { %9981 = vmatpush1.bf16.msra.mxu1 %v17421_v31  ;;  %10671 = vmatprep.subr.bf16.mxu0 %v17426_v16  ;;  %v17433_v31 = vld [vmem:[#allocation142_spill] sm:$0xff]  ;;  %v17440_v16 = vld [vmem:[#allocation148_spill] sm:$0xff] }
 0x482   : > { %9983 = vmatprep.subr.bf16.mxu1 %v17423_v40  ;;  %v17434_v20 = vpack.c.bf16 %v17432_v54, %v17433_v31  ;;  %v17437_v40 = vld [vmem:[#allocation144_spill] sm:$0xff]  ;;  %v17462_v54 = vld [vmem:[#allocation98_spill] sm:$0xff] }
 0x483   : > { %v17438_v0 = vpack.c.bf16 %v17436_v18, %v17437_v40 }
 0x484   : > { %10673 = vmatpush1.bf16.msra.mxu0 %v17430_v39  ;;  %v17444_v39 = vpack.c.bf16 %v17301_v19, %v17299_v8  ;;  %v17456_v8 = vld [vmem:[#allocation159_spill] sm:$0xff] }
 0x485   : > { %9985 = vmatpush1.bf16.msra.mxu1 %v17427_v1  ;;  %10675 = vmatprep.subr.bf16.mxu0 %v17434_v20  ;;  %v17441_v1 = vld [vmem:[#allocation146_spill] sm:$0xff]  ;;  %v17446_v20 = vld [vmem:[#allocation153_spill] sm:$0xff] }
 0x486   : > { %9987 = vmatprep.subr.bf16.mxu1 %v17431_v25  ;;  %v17442_v38 = vpack.c.bf16 %v17440_v16, %v17441_v1  ;;  %v17445_v25 = vld [vmem:[#allocation27_spill] sm:$0xff]  ;;  %v17452_v1 = vld [vmem:[#allocation156_spill] sm:$0xff] }
 0x488   : > { %10677 = vmatpush1.bf16.msra.mxu0 %v17438_v0 }
 0x489   : > { %9989 = vmatpush1.bf16.msra.mxu1 %v17435_v13  ;;  %10679 = vmatprep.subr.bf16.mxu0 %v17442_v38  ;;  %v17447_v13 = vpack.c.bf16 %v17303_v27, %v17446_v20  ;;  %v17450_v38 = vld [vmem:[#allocation89_spill] sm:$0xff]  ;;  %v17459_v20 = vld [vmem:[#allocation164_spill] sm:$0xff] }
 0x48a   : > { %9991 = vmatprep.subr.bf16.mxu1 %v17439_v4 }
 0x48b   : > { %v13627_v18 = vpop.f32.mrb[4].mxu1 }
 0x48c   : > { %10681 = vmatpush1.bf16.msra.mxu0 %v17444_v39  ;;  %v13629_v0 = vpop.f32.mrb[6].mxu0  ;;  %v13631_v4 = vpop.f32.mrb[5].mxu1  ;;  %v17454_v39 = vld [vmem:[#allocation29_spill] sm:$0xff] }
 0x48d   : > { %9993 = vmatpush1.bf16.msra.mxu1 %v17443_v21  ;;  %10683 = vmatprep.subr.bf16.mxu0 %v17447_v13  ;;  %17448 = vst [vmem:[#allocation183_spill] sm:$0xff] %v13629_v0  ;;  %v13633_v16 = vpop.f32.mrb[7].mxu0  ;;  %v17451_v21 = vld [vmem:[#allocation158_spill] sm:$0xff]  ;;  %v17458_v13 = vld [vmem:[#allocation93_spill] sm:$0xff] }
 0x48e   : > { %9995 = vmatprep.subr.bf16.mxu1 %v17445_v25  ;;  %17449 = vst [vmem:[#allocation185_spill] sm:$0xff] %v13633_v16  ;;  %v17453_v19 = vpack.c.bf16 %v17451_v21, %v17452_v1  ;;  %v17455_v25 = vld [vmem:[#allocation161_spill] sm:$0xff]  ;;  %v17460_v0 = vld [vmem:[#allocation162_spill] sm:$0xff]  ;;  %v17463_v16 = vld [vmem:[#allocation167_spill] sm:$0xff] }
 0x48f   : > { %v17457_v27 = vpack.c.bf16 %v17455_v25, %v17456_v8  ;;  %v17461_v40 = vpack.c.bf16 %v17459_v20, %v17460_v0  ;;  %v17466_v21 = vld [vmem:[#allocation100_spill] sm:$0xff]  ;;  %v17470_v25 = vld [vmem:[#allocation30_spill] sm:$0xff] }
 0x490   : > { %10685 = vmatpush1.bf16.msra.mxu0 %v17453_v19  ;;  %v17467_v19 = vld [vmem:[#allocation170_spill] sm:$0xff] }
 0x491   : > { %9997 = vmatpush1.bf16.msra.mxu1 %v17450_v38  ;;  %10687 = vmatprep.subr.bf16.mxu0 %v17457_v27  ;;  %v17464_v38 = vld [vmem:[#allocation165_spill] sm:$0xff]  ;;  %v17474_v20 = vld [vmem:[#allocation106_spill] sm:$0xff] }
 0x492   : > { %9999 = vmatprep.subr.bf16.mxu1 %v17454_v39  ;;  %v17465_v31 = vpack.c.bf16 %v17463_v16, %v17464_v38  ;;  %v17468_v39 = vld [vmem:[#allocation168_spill] sm:$0xff]  ;;  %v17471_v27 = vld [vmem:[#allocation173_spill] sm:$0xff] }
 0x493   : > { %v17469_v1 = vpack.c.bf16 %v17467_v19, %v17468_v39  ;;  %v17478_v16 = vld [vmem:[#allocation108_spill] sm:$0xff]  ;;  %v17481_v19 = vld [vmem:[#allocation110_spill] sm:$0xff] }
 0x494   : > { %10689 = vmatpush1.bf16.msra.mxu0 %v17461_v40  ;;  %v17475_v40 = vld [vmem:[#allocation176_spill] sm:$0xff] }
 0x495   : > { %10001 = vmatpush1.bf16.msra.mxu1 %v17458_v13  ;;  %10691 = vmatprep.subr.bf16.mxu0 %v17465_v31  ;;  %v17472_v13 = vld [vmem:[#allocation171_spill] sm:$0xff]  ;;  %v17479_v31 = vld [vmem:[#allocation177_spill] sm:$0xff] }
 0x496   : > { %10003 = vmatprep.subr.bf16.mxu1 %v17462_v54  ;;  %v17473_v8 = vpack.c.bf16 %v17471_v27, %v17472_v13  ;;  %v17476_v54 = vld [vmem:[#allocation174_spill] sm:$0xff] }
 0x497   : > { %v17477_v0 = vpack.c.bf16 %v17475_v40, %v17476_v54 }
 0x498   : > { %10693 = vmatpush1.bf16.msra.mxu0 %v17469_v1  ;;  %v17482_v1 = vpack.c.bf16 %v17355_v3, %v17354_v51  ;;  %v17491_v3 = vld [vmem:[#allocation33_spill] sm:$0xff] }
 0x499   : > { %10005 = vmatpush1.bf16.msra.mxu1 %v17466_v21  ;;  %10695 = vmatprep.subr.bf16.mxu0 %v17473_v8  ;;  %v17480_v21 = vpack.c.bf16 %v17347_v57, %v17479_v31  ;;  %v17484_v8 = vpack.c.bf16 %v17361_v17, %v17360_v10  ;;  %v17493_v57 = vld [vmem:[#allocation124_spill] sm:$0xff] }
 0x49a   : > { %10007 = vmatprep.subr.bf16.mxu1 %v17470_v25  ;;  %v17483_v25 = vld [vmem:[#allocation44_spill] sm:$0xff] }
 0x49c   : > { %10697 = vmatpush1.bf16.msra.mxu0 %v17477_v0  ;;  %v17486_v0 = vpack.c.bf16 %v17367_v49, %v17366_v44 }
 0x49d   : > { %10009 = vmatpush1.bf16.msra.mxu1 %v17474_v20  ;;  %10699 = vmatprep.subr.bf16.mxu0 %v17480_v21  ;;  %v17485_v20 = vld [vmem:[#allocation115_spill] sm:$0xff]  ;;  %v17488_v21 = vpack.c.bf16 %v13124_v43, %v13114_v37 }
 0x49e   : > { %10011 = vmatprep.subr.bf16.mxu1 %v17478_v16  ;;  %v17487_v16 = vld [vmem:[#allocation120_spill] sm:$0xff] }
 0x4a0   : > { %10701 = vmatpush1.bf16.msra.mxu0 %v17482_v1 }
 0x4a1   : > { %10013 = vmatpush1.bf16.msra.mxu1 %v17481_v19  ;;  %10703 = vmatprep.subr.bf16.mxu0 %v17484_v8  ;;  %v17489_v19 = vld [vmem:[#allocation32_spill] sm:$0xff]  ;;  %v17494_v8 = vpack.c.bf16 %v13138_v30, %v13126_v33 }
 0x4a2   : > { %10015 = vmatprep.subr.bf16.mxu1 %v17483_v25  ;;  %v17490_v1 = vand.u32 4294901760, %v17489_v19  ;;  %v17492_v25 = vand.u32 4294901760, %v17491_v3  ;;  %v17500_v19 = vld [vmem:[#allocation42_spill] sm:$0xff]  ;;  %v17502_v3 = vld [vmem:[#allocation43_spill] sm:$0xff] }
 0x4a3   : > { %v17501_v43 = vand.u32 4294901760, %v17500_v19  ;;  %v17512_v19 = vld [vmem:[#allocation50_spill] sm:$0xff] }
 0x4a4   : > { %10705 = vmatpush1.bf16.msra.mxu0 %v17486_v0  ;;  %v10022_v51 = vpack.c.bf16 %v17492_v25, %v17490_v1  ;;  %v17497_v0 = vld [vmem:[#allocation38_spill] sm:$0xff]  ;;  %v17503_v25 = vand.u32 4294901760, %v17502_v3  ;;  %v17513_v3 = vand.u32 4294901760, %v17512_v19  ;;  %v17523_v19 = vld [vmem:[#allocation56_spill] sm:$0xff] }
 0x4a5   : > { %10017 = vmatpush1.bf16.msra.mxu1 %v17485_v20  ;;  %10707 = vmatprep.subr.bf16.mxu0 %v17488_v21  ;;  %v17495_v20 = vld [vmem:[#allocation37_spill] sm:$0xff]  ;;  %v17498_v44 = vand.u32 4294901760, %v17497_v0  ;;  %v17499_v21 = vpack.c.bf16 %v17378_v6, %v13142_v15 }
 0x4a6   : > { %10019 = vmatprep.subr.bf16.mxu1 %v17487_v16  ;;  %v17496_v49 = vand.u32 4294901760, %v17495_v20  ;;  %v10026_v1 = vpack.c.bf16 %v17503_v25, %v17501_v43  ;;  %v17506_v20 = vld [vmem:[#allocation47_spill] sm:$0xff] }
 0x4a7   : > { %v17507_v0 = vand.u32 4294901760, %v17506_v20  ;;  %v17514_v43 = vld [vmem:[#allocation51_spill] sm:$0xff]  ;;  %v17518_v20 = vld [vmem:[#allocation53_spill] sm:$0xff] }
 0x4a8   : > { %10709 = vmatpush1.bf16.msra.mxu0 %v17494_v8  ;;  %v10024_v16 = vpack.c.bf16 %v17498_v44, %v17496_v49  ;;  %v17505_v8 = vpack.c.bf16 %v17381_v34, %v13158_v55  ;;  %v17508_v49 = vld [vmem:[#allocation48_spill] sm:$0xff]  ;;  %v17515_v25 = vand.u32 4294901760, %v17514_v43  ;;  %v17524_v43 = vand.u32 4294901760, %v17523_v19  ;;  %v17535_v19 = vld [vmem:[#allocation63_spill] sm:$0xff] }
 0x4a9   : > { %10021 = vmatpush1.bf16.msra.mxu1 %v17493_v57  ;;  %10711 = vmatprep.subr.bf16.mxu0 %v17499_v21  ;;  %v17504_v57 = vld [vmem:[#allocation126_spill] sm:$0xff]  ;;  %v17509_v44 = vand.u32 4294901760, %v17508_v49  ;;  %v17510_v21 = vld [vmem:[#allocation195_spill] sm:$0xff]  ;;  %v17519_v49 = vand.u32 4294901760, %v17518_v20 }
 0x4aa   : > { %10023 = vmatprep.subr.bf16.mxu1 %v10022_v51  ;;  %v17511_v6 = vpack.c.bf16 %v13171_v11, %v17510_v21  ;;  %v10030_v15 = vpack.c.bf16 %v17515_v25, %v17513_v3  ;;  %v17525_v3 = vld [vmem:[#allocation57_spill] sm:$0xff] }
 0x4ab   : > { %v10028_v51 = vpack.c.bf16 %v17509_v44, %v17507_v0  ;;  %v17520_v0 = vld [vmem:[#allocation54_spill] sm:$0xff]  ;;  %v17526_v25 = vand.u32 4294901760, %v17525_v3  ;;  %v17536_v3 = vand.u32 4294901760, %v17535_v19 }
 0x4ac   : > { %4813 = vmatmul.mubr.f32.vlgmr.msra.gmra.mrb[8].mxu1 %v17504_v57  ;;  %10713 = vmatpush1.bf16.msra.mxu0 %v17505_v8  ;;  %v17517_v8 = vpack.c.bf16 %v13180_v23, %v13173_v60  ;;  %v17530_v23 = vld [vmem:[#allocation60_spill] sm:$0xff] }
 0x4ad   : > { %10025 = vmatpush1.bf16.msra.mxu1 %v10024_v16  ;;  %10715 = vmatprep.subr.bf16.mxu0 %v17511_v6  ;;  %v17516_v16 = vld [vmem:[#allocation83_spill] sm:$0xff]  ;;  %v17522_v6 = vpack.c.bf16 %v13195_v42, %v13189_v62  ;;  %v10034_v11 = vpack.c.bf16 %v17526_v25, %v17524_v43  ;;  %v17538_v25 = vld [vmem:[#allocation65_spill] sm:$0xff] }
 0x4ae   : > { %10027 = vmatprep.subr.bf16.mxu1 %v10026_v1  ;;  %5076 = vmatprep.mubr.f32.mxu1 %v17516_v16  ;;  %v17521_v1 = vand.u32 4294901760, %v17520_v0  ;;  %v17531_v0 = vand.u32 4294901760, %v17530_v23 }
 0x4b0   : > { %10717 = vmatpush1.bf16.msra.mxu0 %v17517_v8  ;;  %v10032_v44 = vpack.c.bf16 %v17521_v1, %v17519_v49  ;;  %v17528_v8 = vld [vmem:[#allocation58_spill] sm:$0xff] }
 0x4b1   : > { %10029 = vmatpush1.bf16.msra.mxu1 %v10028_v51  ;;  %10719 = vmatprep.subr.bf16.mxu0 %v17522_v6  ;;  %v17527_v51 = vpack.c.bf16 %v13216_v9, %v13205_v45  ;;  %v17529_v20 = vand.u32 4294901760, %v17528_v8  ;;  %v17533_v1 = vld [vmem:[#allocation62_spill] sm:$0xff] }
 0x4b2   : > { %10031 = vmatprep.subr.bf16.mxu1 %v10030_v15  ;;  %v17532_v15 = vpack.c.bf16 %v13238_v59, %v13218_v50  ;;  %v17534_v6 = vand.u32 4294901760, %v17533_v1  ;;  %v17540_v8 = vld [vmem:[#allocation66_spill] sm:$0xff]  ;;  %v17545_v1 = vld [vmem:[#allocation69_spill] sm:$0xff] }
 0x4b3   : > { %v10036_v49 = vpack.c.bf16 %v17531_v0, %v17529_v20  ;;  %v17541_v23 = vand.u32 4294901760, %v17540_v8  ;;  %v17542_v0 = vld [vmem:[#allocation128_spill] sm:$0xff]  ;;  %v17546_v50 = vand.u32 4294901760, %v17545_v1 }
 0x4b4   : > { %10721 = vmatpush1.bf16.msra.mxu0 %v17527_v51  ;;  %v10038_v43 = vpack.c.bf16 %v17536_v3, %v17534_v6  ;;  %v17539_v51 = vand.u32 4294901760, %v17538_v25  ;;  %v17548_v6 = vld [vmem:[#allocation70_spill] sm:$0xff] }
 0x4b5   : > { %10033 = vmatpush1.bf16.msra.mxu1 %v10032_v44  ;;  %10723 = vmatprep.subr.bf16.mxu0 %v17532_v15  ;;  %v17537_v44 = vpack.c.bf16 %v13272_v36, %v13270_v5  ;;  %v17543_v15 = vld [vmem:[#allocation68_spill] sm:$0xff]  ;;  %v17549_v3 = vand.u32 4294901760, %v17548_v6 }
 0x4b6   : > { %10035 = vmatprep.subr.bf16.mxu1 %v10034_v11  ;;  %v10040_v20 = vpack.c.bf16 %v17541_v23, %v17539_v51  ;;  %v2051_v11 = vlaneseq  ;;  %v17544_v59 = vand.u32 4294901760, %v17543_v15  ;;  %v17554_v23 = vld [vmem:[#allocation19_spill] sm:$0xff] }
 0x4b7   : > { %v17555_v15 = vand.u32 4294901760, %v17554_v23 }
 0x4b8   : > { %10725 = vmatpush1.bf16.msra.mxu0 %v17537_v44  ;;  %v10042_v19 = vpack.c.bf16 %v17546_v50, %v17544_v59  ;;  %v17550_v44 = vld [vmem:[#allocation72_spill] sm:$0xff]  ;;  %v13764_v51 = vshrl.u32 %v2051_v11, 7  ;;  %v17558_v50 = vld [vmem:[#allocation82_spill] sm:$0xff] }
 0x4b9   : > { %10037 = vmatpush1.bf16.msra.mxu1 %v10036_v49  ;;  %10727 = vmatprep.subr.bf16.mxu0 %v17542_v0  ;;  %v17547_v49 = vld [vmem:[#allocation129_spill] sm:$0xff]  ;;  %v17551_v25 = vand.u32 4294901760, %v17550_v44  ;;  %v17556_v0 = vld [vmem:[#allocation74_spill] sm:$0xff] }
 0x4ba   : > { %10039 = vmatprep.subr.bf16.mxu1 %v10038_v43  ;;  %17552 = vst [vmem:[#allocation194_spill] sm:$0xff] %v13764_v51  ;;  %v17553_v43 = vld [vmem:[#allocation80_spill] sm:$0xff]  ;;  %v17557_v1 = vand.u32 4294901760, %v17556_v0  ;;  %v2053_v11 = vsub.s32 0, %v13764_v51 }
 0x4bb   : > { %7240 = vmatmul.mubr.f32.vlgmr.msra.gmra.mrb[10].mxu0 %v17401_v35  ;;  %v10044_v8 = vpack.c.bf16 %v17551_v25, %v17549_v3  ;;  %v17561_v35 = vld [vmem:[#allocation77_spill] sm:$0xff]  ;;  %v17564_v25 = vld [vmem:[#allocation20_spill] sm:$0xff] }
 0x4bc   : > { %10729 = vmatpush1.bf16.msra.mxu0 %v17547_v49  ;;  %v10046_v59 = vpack.c.bf16 %v17557_v1, %v17555_v15  ;;  %7377 = vmatprep.mubr.f32.mxu0 %v17406_v46  ;;  %v17562_v44 = vand.u32 4294901760, %v17561_v35  ;;  %v17565_v23 = vand.u32 4294901760, %v17564_v25  ;;  %v2057_v1 = vsub.s32 1, %v13764_v51  ;;  %v17569_v35 = vld [vmem:[#allocation79_spill] sm:$0xff]  ;;  %v17573_v25 = vld [vmem:[#allocation141_spill] sm:$0xff]  ;;  %v17578_v51 = vld [vmem:[#allocation34_spill] sm:$0xff] }
 0x4bd   : > { %10041 = vmatpush1.bf16.msra.mxu1 %v10040_v20  ;;  %10731 = vmatprep.subr.bf16.mxu0 %v17553_v43  ;;  %v17559_v20 = vld [vmem:[#allocation76_spill] sm:$0xff]  ;;  %v17566_v43 = vld [vmem:[#allocation21_spill] sm:$0xff] }
 0x4be   : > { %10043 = vmatprep.subr.bf16.mxu1 %v10042_v19  ;;  %v17560_v6 = vand.u32 4294901760, %v17559_v20  ;;  %v17563_v19 = vld [vmem:[#allocation135_spill] sm:$0xff]  ;;  %v17567_v0 = vand.u32 4294901760, %v17566_v43  ;;  %v17568_v20 = vld [vmem:[#allocation138_spill] sm:$0xff]  ;;  %v17574_v43 = vld [vmem:[#allocation84_spill] sm:$0xff] }
 0x4c0   : > { %10733 = vmatpush1.bf16.msra.mxu0 %v17558_v50  ;;  %v10048_v3 = vpack.c.bf16 %v17562_v44, %v17560_v6  ;;  %v10050_v15 = vpack.c.bf16 %v17567_v0, %v17565_v23  ;;  %v17570_v6 = vand.u32 4294901760, %v17569_v35  ;;  %v17571_v44 = vld [vmem:[#allocation23_spill] sm:$0xff]  ;;  %v17575_v23 = vand.u32 4294901760, %v17574_v43  ;;  %v17576_v0 = vld [vmem:[#allocation24_spill] sm:$0xff]  ;;  %v17579_v35 = vld [vmem:[#allocation25_spill] sm:$0xff] }
 0x4c1   : > { %10045 = vmatpush1.bf16.msra.mxu1 %v10044_v8  ;;  %10735 = vmatprep.subr.bf16.mxu0 %v17563_v19  ;;  %v2049_v8 = vld [vmem:[%s16085_s9 + $0x3] sm:$0x3f]  ;;  %v17577_v50 = vand.u32 4294901760, %v17576_v0  ;;  %v17583_v43 = vld [vmem:[#allocation147_spill] sm:$0xff] }
 0x4c2   : > { %10047 = vmatprep.subr.bf16.mxu1 %v10046_v59  ;;  %v17572_v59 = vand.u32 4294901760, %v17571_v44  ;;  %v2054_v19 = vrot.slane %v2049_v8, %v2053_v11  ;;  %v2058_v36 = vrot.slane %v2049_v8, %v2057_v1  ;;  %v17580_v44 = vand.u32 4294901760, %v17579_v35  ;;  %v17589_v35 = vld [vmem:[#allocation90_spill] sm:$0xff] }
 0x4c3   : > { %v10054_v49 = vpack.c.bf16 %v17577_v50, %v17575_v23  ;;  %v17584_v50 = vld [vmem:[#allocation86_spill] sm:$0xff]  ;;  %v17586_v23 = vld [vmem:[#allocation88_spill] sm:$0xff] }
 0x4c4   : > { %10737 = vmatpush1.bf16.msra.mxu0 %v17568_v20  ;;  %v10052_v46 = vpack.c.bf16 %v17572_v59, %v17570_v6  ;;  %v17581_v6 = vld [vmem:[#allocation26_spill] sm:$0xff]  ;;  %v17585_v8 = vand.u32 4294901760, %v17584_v50  ;;  %v17587_v20 = vand.u32 4294901760, %v17586_v23 }
 0x4c5   : > { %10049 = vmatpush1.bf16.msra.mxu1 %v10048_v3  ;;  %10739 = vmatprep.subr.bf16.mxu0 %v17573_v25  ;;  %v3905_v3 = vld [vmem:[%s16085_s9 + $0x9] sm:$0x3f]  ;;  %v17582_v59 = vand.u32 4294901760, %v17581_v6  ;;  %v11115_v25 = vadd.f32 %v13627_v18, %v2054_v19  ;;  %v17590_v6 = vand.u32 4294901760, %v17589_v35  ;;  %v17601_v35 = vld [vmem:[#allocation95_spill] sm:$0xff] }
 0x4c6   : > { %10051 = vmatprep.subr.bf16.mxu1 %v10050_v15  ;;  %v3910_v0 = vrot.slane %v3905_v3, %v2053_v11  ;;  %v10058_v5 = vpack.c.bf16 %v17587_v20, %v17585_v8  ;;  %v3914_v9 = vrot.slane %v3905_v3, %v2057_v1  ;;  %v17593_v19 = vld [vmem:[#allocation154_spill] sm:$0xff]  ;;  %v17594_v11 = vld [vmem:[#allocation91_spill] sm:$0xff] }
 0x4c7   : > { %v10056_v15 = vpack.c.bf16 %v17582_v59, %v17580_v44  ;;  %v17591_v44 = vld [vmem:[#allocation28_spill] sm:$0xff]  ;;  %v17595_v50 = vand.u32 4294901760, %v17594_v11  ;;  %v17608_v11 = vld [vmem:[#allocation99_spill] sm:$0xff] }
 0x4c8   : > { %10741 = vmatpush1.bf16.msra.mxu0 %v17578_v51  ;;  %v17588_v51 = vld [vmem:[#allocation150_spill] sm:$0xff]  ;;  %v17592_v59 = vand.u32 4294901760, %v17591_v44  ;;  %v17605_v44 = vld [vmem:[#allocation160_spill] sm:$0xff] }
 0x4c9   : > { %10053 = vmatpush1.bf16.msra.mxu1 %v10052_v46  ;;  %10743 = vmatprep.subr.bf16.mxu0 %v17583_v43  ;;  %v11119_v46 = vadd.f32 %v13631_v4, %v2058_v36  ;;  %v17596_v43 = vld [vmem:[#allocation92_spill] sm:$0xff] }
 0x4ca   : > { %10055 = vmatprep.subr.bf16.mxu1 %v10054_v49  ;;  %v10060_v18 = vpack.c.bf16 %v17592_v59, %v17590_v6  ;;  %v11116_v49 = vadd.f32 %v11115_v25, %v3910_v0  ;;  %v17597_v23 = vand.u32 4294901760, %v17596_v43  ;;  %v17602_v25 = vand.u32 4294901760, %v17601_v35  ;;  %v17606_v43 = vld [vmem:[#allocation97_spill] sm:$0xff]  ;;  %v17616_v35 = vld [vmem:[#allocation103_spill] sm:$0xff] }
 0x4cb   : > { %v11120_v36 = vadd.f32 %v11119_v46, %v3914_v9  ;;  %v17607_v59 = vand.u32 4294901760, %v17606_v43  ;;  %v17609_v9 = vand.u32 4294901760, %v17608_v11  ;;  %v17620_v43 = vld [vmem:[#allocation169_spill] sm:$0xff]  ;;  %v17623_v11 = vld [vmem:[#allocation107_spill] sm:$0xff] }
 0x4cc   : > { %10745 = vmatpush1.bf16.msra.mxu0 %v17588_v51  ;;  %v10062_v20 = vpack.c.bf16 %v17597_v23, %v17595_v50  ;;  %v17611_v50 = vld [vmem:[#allocation101_spill] sm:$0xff]  ;;  %v17613_v23 = vld [vmem:[#allocation102_spill] sm:$0xff] }
 0x4cd   : > { %10057 = vmatpush1.bf16.msra.mxu1 %v10056_v15  ;;  %10747 = vmatprep.subr.bf16.mxu0 %v17593_v19  ;;  %v17600_v15 = vld [vmem:[#allocation157_spill] sm:$0xff]  ;;  %v10066_v46 = vpack.c.bf16 %v17609_v9, %v17607_v59  ;;  %v17621_v59 = vld [vmem:[#allocation40_spill] sm:$0xff]  ;;  %v17624_v9 = vand.u32 4294901760, %v17623_v11 }
 0x4ce   : > { %10059 = vmatprep.subr.bf16.mxu1 %v10058_v5  ;;  %v4077_v8 = vpop.f32.mrb[8].mxu0  ;;  %v17603_v5 = vld [vmem:[#allocation96_spill] sm:$0xff] }
 0x4cf   : > { %v13822_v4 = vadd.f32 %v11116_v49, %v4077_v8  ;;  %v4079_v1 = vpop.f32.mrb[9].mxu0  ;;  %v17604_v0 = vand.u32 4294901760, %v17603_v5  ;;  %v17610_v49 = vld [vmem:[#allocation163_spill] sm:$0xff]  ;;  %v17614_v8 = vand.u32 4294901760, %v17613_v23  ;;  %v17628_v23 = vld [vmem:[#allocation45_spill] sm:$0xff] }
 0x4d0   : > { %v13824_v3 = vadd.f32 %v11120_v36, %v4079_v1  ;;  %10749 = vmatpush1.bf16.msra.mxu0 %v17600_v15  ;;  %v17615_v1 = vld [vmem:[#allocation166_spill] sm:$0xff] }
 0x4d1   : > { %17598 = vst [vmem:[#allocation114_spill] sm:$0xff] %v13822_v4  ;;  %10061 = vmatpush1.bf16.msra.mxu1 %v10060_v18  ;;  %v10064_v6 = vpack.c.bf16 %v17604_v0, %v17602_v25  ;;  %10751 = vmatprep.subr.bf16.mxu0 %v17605_v44  ;;  %v17612_v18 = vand.u32 4294901760, %v17611_v50  ;;  %v17618_v25 = vld [vmem:[#allocation105_spill] sm:$0xff]  ;;  %v17625_v50 = vld [vmem:[#allocation172_spill] sm:$0xff] }
 0x4d2   : > { %17599 = vst [vmem:[#allocation113_spill] sm:$0xff] %v13824_v3  ;;  %10063 = vmatprep.subr.bf16.mxu1 %v10062_v20  ;;  %v17617_v20 = vand.u32 4294901760, %v17616_v35  ;;  %v17619_v5 = vand.u32 4294901760, %v17618_v25  ;;  %v17630_v35 = vld [vmem:[#allocation175_spill] sm:$0xff]  ;;  %v17633_v25 = vld [vmem:[#allocation112_spill] sm:$0xff] }
 0x4d3   : > { %v10068_v36 = vpack.c.bf16 %v17614_v8, %v17612_v18  ;;  %v17626_v18 = vld [vmem:[#allocation109_spill] sm:$0xff]  ;;  %v17629_v8 = vand.u32 4294901760, %v17628_v23  ;;  %v17641_v23 = vld [vmem:[#allocation184_spill] sm:$0xff] }
 0x4d4   : > { %10753 = vmatpush1.bf16.msra.mxu0 %v17610_v49  ;;  %v10070_v0 = vpack.c.bf16 %v17619_v5, %v17617_v20  ;;  %v17631_v20 = vld [vmem:[#allocation111_spill] sm:$0xff]  ;;  %v17634_v5 = vand.u32 4294901760, %v17633_v25 }
 0x4d5   : > { %10065 = vmatpush1.bf16.msra.mxu1 %v10064_v6  ;;  %10755 = vmatprep.subr.bf16.mxu0 %v17615_v1  ;;  %v17622_v6 = vand.u32 4294901760, %v17621_v59  ;;  %v17635_v59 = vld [vmem:[#allocation178_spill] sm:$0xff] }
 0x4d6   : > { %10067 = vmatprep.subr.bf16.mxu1 %v10066_v46  ;;  %v17627_v46 = vand.u32 4294901760, %v17626_v18  ;;  %v17640_v18 = vand.u32 4294901760, %v17388_v24  ;;  %v17652_v24 = vld [vmem:[#allocation189_spill] sm:$0xff] }
 0x4d7   : > { %v10072_v3 = vpack.c.bf16 %v17624_v9, %v17622_v6  ;;  %v17637_v6 = vand.u32 4294901760, %v17383_v56  ;;  %v17638_v9 = vld [vmem:[#allocation181_spill] sm:$0xff]  ;;  %v17647_v56 = vld [vmem:[#allocation123_spill] sm:$0xff] }
 0x4d8   : > { %10757 = vmatpush1.bf16.msra.mxu0 %v17620_v43  ;;  %v10074_v4 = vpack.c.bf16 %v17629_v8, %v17627_v46  ;;  %v17642_v8 = vld [vmem:[#allocation119_spill] sm:$0xff] }
 0x4d9   : > { %10069 = vmatpush1.bf16.msra.mxu1 %v10068_v36  ;;  %10759 = vmatprep.subr.bf16.mxu0 %v17625_v50  ;;  %v17632_v36 = vand.u32 4294901760, %v17631_v20  ;;  %v17644_v20 = vld [vmem:[#allocation121_spill] sm:$0xff] }
 0x4da   : > { %10071 = vmatprep.subr.bf16.mxu1 %v10070_v0  ;;  %v17636_v0 = vand.u32 4294901760, %v17384_v14  ;;  %v17646_v14 = vld [vmem:[#allocation36_spill] sm:$0xff] }
 0x4db   : > { %v10076_v43 = vpack.c.bf16 %v17634_v5, %v17632_v36  ;;  %v17645_v36 = vand.u32 4294901760, %v17644_v20  ;;  %v17649_v5 = vld [vmem:[#allocation125_spill] sm:$0xff]  ;;  %v17659_v20 = vld [vmem:[#allocation200_spill] sm:$0xff] }
 0x4dc   : > { %10761 = vmatpush1.bf16.msra.mxu0 %v17630_v35  ;;  %v10078_v11 = vpack.c.bf16 %v17637_v6, %v17636_v0  ;;  %v17650_v0 = vand.u32 4294901760, %v17649_v5  ;;  %v17666_v5 = vand.u32 4294901760, %v17252_v52  ;;  %v17674_v52 = vld [vmem:[#allocation67_spill] sm:$0xff] }
 0x4dd   : > { %10073 = vmatpush1.bf16.msra.mxu1 %v10072_v3  ;;  %10763 = vmatprep.subr.bf16.mxu0 %v17635_v59  ;;  %v17639_v3 = vand.u32 4294901760, %v17389_v47  ;;  %v17651_v47 = vld [vmem:[#allocation187_spill] sm:$0xff] }
 0x4de   : > { %10075 = vmatprep.subr.bf16.mxu1 %v10074_v4  ;;  %v17643_v4 = vand.u32 4294901760, %v17642_v8  ;;  %v17657_v8 = vld [vmem:[#allocation196_spill] sm:$0xff] }
 0x4df   : > { %v10080_v46 = vpack.c.bf16 %v17640_v18, %v17639_v3  ;;  %v17654_v3 = vld [vmem:[#allocation190_spill] sm:$0xff]  ;;  %v17655_v18 = vld [vmem:[#allocation35_spill] sm:$0xff] }
 0x4e0   : > { %10765 = vmatpush1.bf16.msra.mxu0 %v17638_v9  ;;  %v10082_v25 = vpack.c.bf16 %v17645_v36, %v17643_v4  ;;  %v17658_v4 = vld [vmem:[#allocation198_spill] sm:$0xff]  ;;  %v17660_v36 = vld [vmem:[#allocation201_spill] sm:$0xff] }
 0x4e1   : > { %10077 = vmatpush1.bf16.msra.mxu1 %v10076_v43  ;;  %10767 = vmatprep.subr.bf16.mxu0 %v17641_v23  ;;  %v17648_v43 = vand.u32 4294901760, %v17647_v56  ;;  %v17663_v56 = vand.u32 4294901760, %v17189_v41  ;;  %v17669_v41 = vld [vmem:[#allocation64_spill] sm:$0xff] }
 0x4e2   : > { %10079 = vmatprep.subr.bf16.mxu1 %v10078_v11  ;;  %v17653_v11 = vld [vmem:[#allocation31_spill] sm:$0xff] }
 0x4e3   : > { %v10084_v6 = vpack.c.bf16 %v17650_v0, %v17648_v43  ;;  %v17668_v0 = vand.u32 4294901760, %v17258_v22  ;;  %v17679_v22 = vld [vmem:[#allocation71_spill] sm:$0xff] }
 0x4e4   : > { %10769 = vmatpush1.bf16.msra.mxu0 %v17646_v14 }
 0x4e5   : > { %10081 = vmatpush1.bf16.msra.mxu1 %v10080_v46  ;;  %10771 = vmatprep.subr.bf16.mxu0 %v17651_v47  ;;  %v17656_v46 = vld [vmem:[#allocation193_spill] sm:$0xff] }
 0x4e6   : > { %10083 = vmatprep.subr.bf16.mxu1 %v10082_v25  ;;  %v17661_v25 = vld [vmem:[#allocation131_spill] sm:$0xff] }
 0x4e8   : > { %10773 = vmatpush1.bf16.msra.mxu0 %v17652_v24  ;;  %v17837_v24 = vld [vmem:[#allocation147_spill] sm:$0xff] }
 0x4e9   : > { %10085 = vmatpush1.bf16.msra.mxu1 %v10084_v6  ;;  %10775 = vmatprep.subr.bf16.mxu0 %v17654_v3  ;;  %v14329_v3 = vld [vmem:[#allocation3 + $0x438] sm:$0xff] }
 0x4ea   : > { %10087 = vmatprep.subr.bf16.mxu1 %v17653_v11  ;;  %v17672_v11 = vld [vmem:[#allocation134_spill] sm:$0xff]  ;;  %17841 = vst [vmem:[#allocation42_spill] sm:$0xff] %v14329_v3 }
 0x4ec   : > { %5078 = vmatmul.mubr.f32.vlgmr.msra.gmra.mrb[8].mxu1 %v17415_v12  ;;  %10777 = vmatpush1.bf16.msra.mxu0 %v17656_v46 }
 0x4ed   : > { %10089 = vmatpush1.bf16.msra.mxu1 %v17655_v18  ;;  %10779 = vmatprep.subr.bf16.mxu0 %v17657_v8 }
 0x4ee   : > { %10091 = vmatprep.subr.bf16.mxu1 %v17405_v28  ;;  %5213 = vmatprep.mubr.f32.mxu1 %v17516_v16  ;;  %v17662_v28 = vand.u32 4294901760, %v17413_v32 }
 0x4f0   : > { %10781 = vmatpush1.bf16.msra.mxu0 %v17658_v4  ;;  %v10790_v43 = vpack.c.bf16 %v17663_v56, %v17662_v28  ;;  %v17677_v56 = vld [vmem:[#allocation137_spill] sm:$0xff]  ;;  %v14301_v4 = vld [vmem:[#allocation3 + $0x3d8] sm:$0xff] }
 0x4f1   : > { %10093 = vmatpush1.bf16.msra.mxu1 %v17407_v63  ;;  %10783 = vmatprep.subr.bf16.mxu0 %v17659_v20  ;;  %v17664_v63 = vld [vmem:[#allocation39_spill] sm:$0xff]  ;;  %17831 = vst [vmem:[#allocation32_spill] sm:$0xff] %v14301_v4 }
 0x4f2   : > { %10095 = vmatprep.subr.bf16.mxu1 %v17408_v53  ;;  %v17665_v53 = vand.u32 4294901760, %v17190_v29  ;;  %v17673_v29 = vand.u32 4294901760, %v17672_v11 }
 0x4f4   : > { %10785 = vmatpush1.bf16.msra.mxu0 %v17660_v36 }
 0x4f5   : > { %10097 = vmatpush1.bf16.msra.mxu1 %v17409_v61  ;;  %10787 = vmatprep.subr.bf16.mxu0 %v17661_v25  ;;  %v10792_v61 = vpack.c.bf16 %v17666_v5, %v17665_v53  ;;  %v17680_v53 = vand.u32 4294901760, %v17429_v26  ;;  %v17681_v5 = vld [vmem:[#allocation140_spill] sm:$0xff]  ;;  %v17693_v26 = vld [vmem:[#allocation78_spill] sm:$0xff]  ;;  %v17818_v25 = vld [vmem:[#allocation135_spill] sm:$0xff] }
 0x4f6   : > { %10099 = vmatprep.subr.bf16.mxu1 %v17410_v48  ;;  %v17667_v48 = vand.u32 4294901760, %v17257_v7  ;;  %v17678_v7 = vand.u32 4294901760, %v17677_v56 }
 0x4f8   : > { %10789 = vmatpush1.bf16.msra.mxu0 %v17664_v63  ;;  %v10794_v32 = vpack.c.bf16 %v17668_v0, %v17667_v48  ;;  %v17683_v0 = vld [vmem:[#allocation73_spill] sm:$0xff]  ;;  %v14273_v63 = vld [vmem:[#allocation3 + $0x378] sm:$0xff] }
 0x4f9   : > { %10101 = vmatpush1.bf16.msra.mxu1 %v17411_v2  ;;  %10791 = vmatprep.subr.bf16.mxu0 %v10790_v43  ;;  %v17670_v2 = vld [vmem:[#allocation133_spill] sm:$0xff]  ;;  %v17838_v47 = vand.u32 4294901760, %v14273_v63 }
 0x4fa   : > { %10103 = vmatprep.subr.bf16.mxu1 %v17412_v58  ;;  %v17671_v6 = vand.u32 4294901760, %v17670_v2  ;;  %v17675_v58 = vld [vmem:[#allocation136_spill] sm:$0xff]  ;;  %v17686_v2 = vld [vmem:[#allocation143_spill] sm:$0xff] }
 0x4fb   : > { %7381 = vmatmul.mubr.f32.vlgmr.msra.gmra.mrb[10].mxu0 %v17504_v57  ;;  %v17676_v28 = vand.u32 4294901760, %v17675_v58 }
 0x4fc   : > { %10793 = vmatpush1.bf16.msra.mxu0 %v10792_v61  ;;  %v10796_v18 = vpack.c.bf16 %v17673_v29, %v17671_v6  ;;  %7644 = vmatprep.mubr.f32.mxu0 %v17516_v16  ;;  %v17682_v61 = vand.u32 4294901760, %v17681_v5  ;;  %v17687_v6 = vand.u32 4294901760, %v17686_v2  ;;  %v17688_v29 = vld [vmem:[#allocation75_spill] sm:$0xff] }
 0x4fd   : > { %10105 = vmatpush1.bf16.msra.mxu1 %v17669_v41  ;;  %10795 = vmatprep.subr.bf16.mxu0 %v10794_v32  ;;  %v10798_v43 = vpack.c.bf16 %v17678_v7, %v17676_v28  ;;  %v17684_v41 = vld [vmem:[#allocation142_spill] sm:$0xff]  ;;  %v17691_v28 = vld [vmem:[#allocation145_spill] sm:$0xff] }
 0x4fe   : > { %10107 = vmatprep.subr.bf16.mxu1 %v17674_v52  ;;  %v10800_v48 = vpack.c.bf16 %v17682_v61, %v17680_v53  ;;  %v17685_v32 = vand.u32 4294901760, %v17684_v41  ;;  %v17689_v52 = vld [vmem:[#allocation144_spill] sm:$0xff]  ;;  %v17694_v7 = vld [vmem:[#allocation146_spill] sm:$0xff] }
 0x4ff   : > { %v17690_v58 = vand.u32 4294901760, %v17689_v52  ;;  %v17696_v53 = vld [vmem:[#allocation148_spill] sm:$0xff]  ;;  %v17698_v61 = vld [vmem:[#allocation22_spill] sm:$0xff] }
 0x500   : > { %10797 = vmatpush1.bf16.msra.mxu0 %v10796_v18  ;;  %v10802_v11 = vpack.c.bf16 %v17687_v6, %v17685_v32  ;;  %v17692_v18 = vand.u32 4294901760, %v17691_v28  ;;  %v17701_v32 = vld [vmem:[#allocation152_spill] sm:$0xff]  ;;  %v17703_v6 = vld [vmem:[#allocation81_spill] sm:$0xff] }
 0x501   : > { %10109 = vmatpush1.bf16.msra.mxu1 %v17679_v22  ;;  %10799 = vmatprep.subr.bf16.mxu0 %v10798_v43  ;;  %v17695_v22 = vand.u32 4294901760, %v17694_v7  ;;  %v17697_v43 = vand.u32 4294901760, %v17696_v53 }
 0x502   : > { %10111 = vmatprep.subr.bf16.mxu1 %v17683_v0  ;;  %v10804_v56 = vpack.c.bf16 %v17692_v18, %v17690_v58  ;;  %v17699_v0 = vld [vmem:[#allocation149_spill] sm:$0xff]  ;;  %v17706_v58 = vld [vmem:[#allocation155_spill] sm:$0xff] }
 0x503   : > { %v10806_v5 = vpack.c.bf16 %v17697_v43, %v17695_v22  ;;  %v17700_v41 = vand.u32 4294901760, %v17699_v0  ;;  %v17708_v18 = vld [vmem:[#allocation85_spill] sm:$0xff]  ;;  %v17711_v22 = vld [vmem:[#allocation158_spill] sm:$0xff]  ;;  %v17713_v43 = vld [vmem:[#allocation27_spill] sm:$0xff] }
 0x504   : > { %10801 = vmatpush1.bf16.msra.mxu0 %v10800_v48  ;;  %v17702_v48 = vand.u32 4294901760, %v17701_v32 }
 0x505   : > { %10113 = vmatpush1.bf16.msra.mxu1 %v17688_v29  ;;  %10803 = vmatprep.subr.bf16.mxu0 %v10802_v11  ;;  %v17704_v29 = vld [vmem:[#allocation153_spill] sm:$0xff]  ;;  %v17707_v11 = vand.u32 4294901760, %v17706_v58 }
 0x506   : > { %10115 = vmatprep.subr.bf16.mxu1 %v17693_v26  ;;  %v10808_v2 = vpack.c.bf16 %v17702_v48, %v17700_v41  ;;  %v17705_v52 = vand.u32 4294901760, %v17704_v29  ;;  %v17709_v26 = vld [vmem:[#allocation156_spill] sm:$0xff]  ;;  %v17716_v41 = vld [vmem:[#allocation161_spill] sm:$0xff] }
 0x507   : > { %v17710_v7 = vand.u32 4294901760, %v17709_v26  ;;  %v17718_v48 = vld [vmem:[#allocation89_spill] sm:$0xff]  ;;  %v17725_v26 = vld [vmem:[#allocation167_spill] sm:$0xff] }
 0x508   : > { %10805 = vmatpush1.bf16.msra.mxu0 %v10804_v56  ;;  %v10810_v28 = vpack.c.bf16 %v17707_v11, %v17705_v52  ;;  %v17712_v56 = vand.u32 4294901760, %v17711_v22  ;;  %v17721_v52 = vld [vmem:[#allocation164_spill] sm:$0xff]  ;;  %v17723_v11 = vld [vmem:[#allocation29_spill] sm:$0xff] }
 0x509   : > { %10117 = vmatpush1.bf16.msra.mxu1 %v17698_v61  ;;  %10807 = vmatprep.subr.bf16.mxu0 %v10806_v5  ;;  %v17714_v61 = vld [vmem:[#allocation159_spill] sm:$0xff]  ;;  %v17717_v5 = vand.u32 4294901760, %v17716_v41  ;;  %v17727_v22 = vld [vmem:[#allocation93_spill] sm:$0xff]  ;;  %v17732_v41 = vand.u32 4294901760, %v17472_v13  ;;  %v17741_v13 = vld [vmem:[#allocation106_spill] sm:$0xff] }
 0x50a   : > { %10119 = vmatprep.subr.bf16.mxu1 %v17703_v6  ;;  %v10812_v53 = vpack.c.bf16 %v17712_v56, %v17710_v7  ;;  %v17715_v0 = vand.u32 4294901760, %v17714_v61  ;;  %v17719_v6 = vld [vmem:[#allocation162_spill] sm:$0xff]  ;;  %v17728_v56 = vand.u32 4294901760, %v17468_v39 }
 0x50b   : > { %v17720_v29 = vand.u32 4294901760, %v17719_v6  ;;  %v17736_v6 = vand.u32 4294901760, %v17475_v40  ;;  %v17737_v39 = vld [vmem:[#allocation30_spill] sm:$0xff]  ;;  %v17747_v40 = vand.u32 4294901760, %v17360_v10  ;;  %v17755_v10 = vand.u32 4294901760, %v13114_v37 }
 0x50c   : > { %10809 = vmatpush1.bf16.msra.mxu0 %v10808_v2  ;;  %v10814_v32 = vpack.c.bf16 %v17717_v5, %v17715_v0  ;;  %v17722_v2 = vand.u32 4294901760, %v17721_v52  ;;  %v17731_v0 = vld [vmem:[#allocation98_spill] sm:$0xff]  ;;  %v17733_v5 = vand.u32 4294901760, %v17471_v27  ;;  %v17738_v52 = vand.u32 4294901760, %v17479_v31  ;;  %v17742_v27 = vld [vmem:[#allocation180_spill] sm:$0xff] }
 0x50d   : > { %10121 = vmatpush1.bf16.msra.mxu1 %v17708_v18  ;;  %10811 = vmatprep.subr.bf16.mxu0 %v10810_v28  ;;  %v17724_v18 = vand.u32 4294901760, %v17464_v38  ;;  %v17726_v28 = vand.u32 4294901760, %v17725_v26  ;;  %v17734_v38 = vld [vmem:[#allocation100_spill] sm:$0xff]  ;;  %v17744_v26 = vld [vmem:[#allocation182_spill] sm:$0xff]  ;;  %v17759_v37 = vand.u32 4294901760, %v13126_v33 }
 0x50e   : > { %10123 = vmatprep.subr.bf16.mxu1 %v17713_v43  ;;  %v10816_v58 = vpack.c.bf16 %v17722_v2, %v17720_v29  ;;  %v17729_v43 = vld [vmem:[#allocation170_spill] sm:$0xff]  ;;  %v17739_v2 = vld [vmem:[#allocation179_spill] sm:$0xff] }
 0x50f   : > { %v10818_v7 = vpack.c.bf16 %v17726_v28, %v17724_v18  ;;  %v17743_v18 = vand.u32 4294901760, %v17742_v27  ;;  %v17745_v28 = vand.u32 4294901760, %v17744_v26  ;;  %v14006_v31 = vld [vmem:[#allocation3 + $0x18] sm:$0xff]  ;;  %v17760_v27 = vand.u32 4294901760, %v13138_v30 }
 0x510   : > { %10813 = vmatpush1.bf16.msra.mxu0 %v10812_v53  ;;  %v17730_v53 = vand.u32 4294901760, %v17729_v43  ;;  %v14008_v43 = vld [vmem:[#allocation3 + $0x48] sm:$0xff] }
 0x511   : > { %10125 = vmatpush1.bf16.msra.mxu1 %v17718_v48  ;;  %10815 = vmatprep.subr.bf16.mxu0 %v10814_v32  ;;  %v10822_v32 = vpack.c.bf16 %v17733_v5, %v17732_v41  ;;  %v17735_v48 = vand.u32 4294901760, %v17476_v54  ;;  %v17746_v54 = vld [vmem:[#allocation108_spill] sm:$0xff]  ;;  %v17752_v41 = vld [vmem:[#allocation130_spill] sm:$0xff] }
 0x512   : > { %10127 = vmatprep.subr.bf16.mxu1 %v17723_v11  ;;  %v10820_v61 = vpack.c.bf16 %v17730_v53, %v17728_v56  ;;  %v17749_v53 = vld [vmem:[#allocation110_spill] sm:$0xff]  ;;  %v17753_v5 = vand.u32 4294901760, %v17752_v41  ;;  %v14052_v41 = vld [vmem:[#allocation3 + $0xa0] sm:$0xff] }
 0x513   : > { %v10824_v29 = vpack.c.bf16 %v17736_v6, %v17735_v48  ;;  %v17756_v48 = vld [vmem:[#allocation188_spill] sm:$0xff] }
 0x514   : > { %10817 = vmatpush1.bf16.msra.mxu0 %v10816_v58  ;;  %v17740_v58 = vand.u32 4294901760, %v17739_v2  ;;  %v14024_v2 = vld [vmem:[#allocation3 + $0x40] sm:$0xff] }
 0x515   : > { %10129 = vmatpush1.bf16.msra.mxu1 %v17727_v22  ;;  %10819 = vmatprep.subr.bf16.mxu0 %v10818_v7  ;;  %v10828_v7 = vpack.c.bf16 %v17745_v28, %v17743_v18  ;;  %v17748_v22 = vand.u32 4294901760, %v17361_v17  ;;  %v17757_v17 = vand.u32 4294901760, %v17756_v48  ;;  %v10836_v18 = vpack.c.bf16 %v17760_v27, %v17759_v37 }
 0x516   : > { %10131 = vmatprep.subr.bf16.mxu1 %v17731_v0  ;;  %v10826_v11 = vpack.c.bf16 %v17740_v58, %v17738_v52  ;;  %v14022_v52 = vld [vmem:[#allocation3 + $0x10] sm:$0xff]  ;;  %v14026_v58 = vld [vmem:[#allocation3 + $0x78] sm:$0xff]  ;;  %v16527_v28 = vand.u32 4294901760, %v14024_v2  ;;  %v17769_v48 = vand.u32 4294901760, %v13158_v55  ;;  %v16524_v37 = vand.u32 4294901760, %v14052_v41 }
 0x517   : > { %v10830_v56 = vpack.c.bf16 %v17748_v22, %v17747_v40  ;;  %v10834_v6 = vpack.c.bf16 %v17757_v17, %v17755_v10  ;;  %v16528_v26 = vand.u32 4294901760, %v14022_v52  ;;  %v17763_v40 = vld [vmem:[#allocation191_spill] sm:$0xff]  ;;  %v16526_v30 = vand.u32 4294901760, %v14026_v58 }
 0x518   : > { %10821 = vmatpush1.bf16.msra.mxu0 %v10820_v61  ;;  %v17750_v61 = vld [vmem:[#allocation186_spill] sm:$0xff]  ;;  %v17764_v22 = vand.u32 4294901760, %v17763_v40  ;;  %v17770_v17 = vand.u32 4294901760, %v17381_v34  ;;  %v17847_v23 = vand.u32 4294901760, %v14022_v52  ;;  %v17849_v9 = vand.u32 4294901760, %v14024_v2 }
 0x519   : > { %10133 = vmatpush1.bf16.msra.mxu1 %v17734_v38  ;;  %10823 = vmatprep.subr.bf16.mxu0 %v10822_v32  ;;  %v17751_v0 = vand.u32 4294901760, %v17750_v61  ;;  %v17754_v38 = vld [vmem:[#allocation44_spill] sm:$0xff]  ;;  %v14063_v10 = vpack.c.bf16 %v16527_v28, %v16528_v26 }
 0x51a   : > { %10135 = vmatprep.subr.bf16.mxu1 %v17737_v39  ;;  %v16531_v39 = vand.u32 4294901760, %v14008_v43  ;;  %v14125_v28 = vld [vmem:[#allocation3 + $0x1c8] sm:$0xff]  ;;  %v14351_v59 = vsub.f32 %v14024_v2, %v17849_v9  ;;  %v14383_v9 = vld [vmem:[#allocation3 + $0x430] sm:$0xff] }
 0x51b   : > { %v10832_v32 = vpack.c.bf16 %v17753_v5, %v17751_v0  ;;  %v14050_v0 = vld [vmem:[#allocation3 + $0x70] sm:$0xff]  ;;  %v14054_v5 = vld [vmem:[#allocation3 + $0xd8] sm:$0xff]  ;;  %17768 = vst [vmem:[#allocation116_spill] sm:$0xff] %v14063_v10  ;;  %v17782_v26 = vld [vmem:[#allocation104_spill] sm:$0xff] }
 0x51c   : > { %10825 = vmatpush1.bf16.msra.mxu0 %v10824_v29  ;;  %v16534_v29 = vand.u32 4294901760, %v14006_v31  ;;  %v16530_v34 = vand.u32 4294901760, %v14054_v5  ;;  %17850 = vst [vmem:[#allocation50_spill] sm:$0xff] %v14351_v59 }
 0x51d   : > { %10137 = vmatpush1.bf16.msra.mxu1 %v17741_v13  ;;  %10827 = vmatprep.subr.bf16.mxu0 %v10826_v11  ;;  %v14028_v11 = vld [vmem:[#allocation3 + $0xa8] sm:$0xff]  ;;  %v17758_v13 = vld [vmem:[#allocation115_spill] sm:$0xff] }
 0x51e   : > { %10139 = vmatprep.subr.bf16.mxu1 %v17746_v54  ;;  %v14042_v54 = vpack.c.bf16 %v16531_v39, %v16534_v29  ;;  %v16523_v61 = vand.u32 4294901760, %v14028_v11  ;;  %v14156_v39 = vld [vmem:[#allocation3 + $0x1c0] sm:$0xff]  ;;  %v17856_v2 = vand.u32 4294901760, %v14028_v11 }
 0x520   : > { %10829 = vmatpush1.bf16.msra.mxu0 %v10828_v7  ;;  %v17761_v7 = vld [vmem:[#allocation120_spill] sm:$0xff]  ;;  %17762 = vst [vmem:[#allocation117_spill] sm:$0xff] %v14042_v54  ;;  %v14076_v27 = vpack.c.bf16 %v16523_v61, %v16526_v30  ;;  %v14121_v30 = vld [vmem:[#allocation3 + $0x160] sm:$0xff] }
 0x521   : > { %10141 = vmatpush1.bf16.msra.mxu1 %v17749_v53  ;;  %10831 = vmatprep.subr.bf16.mxu0 %v10830_v56  ;;  %v17765_v56 = vld [vmem:[#allocation192_spill] sm:$0xff] }
 0x522   : > { %10143 = vmatprep.subr.bf16.mxu1 %v17754_v38  ;;  %v17766_v33 = vand.u32 4294901760, %v17765_v56  ;;  %v17767_v38 = vld [vmem:[#allocation124_spill] sm:$0xff]  ;;  %17771 = vst [vmem:[#allocation41_spill] sm:$0xff] %v14076_v27  ;;  %v14084_v56 = vld [vmem:[#allocation3 + $0xd0] sm:$0xff] }
 0x524   : > { %10833 = vmatpush1.bf16.msra.mxu0 %v10832_v32  ;;  %v10838_v53 = vpack.c.bf16 %v17766_v33, %v17764_v22  ;;  %v14056_v32 = vld [vmem:[#allocation3 + $0x108] sm:$0xff]  ;;  %v14086_v33 = vld [vmem:[#allocation3 + $0x100] sm:$0xff] }
 0x525   : > { %10145 = vmatpush1.bf16.msra.mxu1 %v17758_v13  ;;  %10835 = vmatprep.subr.bf16.mxu0 %v10834_v6  ;;  %v10840_v6 = vpack.c.bf16 %v17770_v17, %v17769_v48  ;;  %v16525_v13 = vand.u32 4294901760, %v14050_v0  ;;  %v16529_v22 = vand.u32 4294901760, %v14056_v32  ;;  %v17776_v48 = vand.u32 4294901760, %v13173_v60  ;;  %v17777_v17 = vld [vmem:[#allocation199_spill] sm:$0xff] }
 0x526   : > { %10147 = vmatprep.subr.bf16.mxu1 %v17761_v7  ;;  %v17773_v7 = vld [vmem:[#allocation197_spill] sm:$0xff]  ;;  %v16532_v61 = vand.u32 4294901760, %v14086_v33  ;;  %v17781_v60 = vand.u32 4294901760, %v13195_v42  ;;  %v17784_v42 = vand.u32 4294901760, %v13205_v45 }
 0x527   : > { %v17774_v55 = vand.u32 4294901760, %v17773_v7 }
 0x528   : > { %10837 = vmatpush1.bf16.msra.mxu0 %v10836_v18  ;;  %v17772_v18 = vand.u32 4294901760, %v17510_v21  ;;  %v14098_v21 = vpack.c.bf16 %v16524_v37, %v16525_v13  ;;  %v17780_v37 = vand.u32 4294901760, %v13189_v62 }
 0x529   : > { %10149 = vmatpush1.bf16.msra.mxu1 %v17767_v38  ;;  %10839 = vmatprep.subr.bf16.mxu0 %v10838_v53  ;;  %v14088_v53 = vld [vmem:[#allocation3 + $0x138] sm:$0xff]  ;;  %v14090_v38 = vld [vmem:[#allocation3 + $0x168] sm:$0xff] }
 0x52a   : > { %10151 = vmatprep.subr.bf16.mxu1 %v14042_v54  ;;  %v10842_v40 = vpack.c.bf16 %v17774_v55, %v17772_v18  ;;  %17775 = vst [vmem:[#allocation46_spill] sm:$0xff] %v14098_v21  ;;  %v17778_v18 = vand.u32 4294901760, %v17777_v17  ;;  %v16533_v55 = vand.u32 4294901760, %v14084_v56  ;;  %v10846_v13 = vpack.c.bf16 %v17781_v60, %v17780_v37  ;;  %v17785_v37 = vld [vmem:[#allocation202_spill] sm:$0xff] }
 0x52b   : > { %v16535_v17 = vand.u32 4294901760, %v14090_v38  ;;  %v17786_v60 = vand.u32 4294901760, %v17785_v37 }
 0x52c   : > { %5215 = vmatmul.mubr.f32.vlgmr.msra.gmra.mrb[8].mxu1 %v17415_v12  ;;  %10841 = vmatpush1.bf16.msra.mxu0 %v10840_v6  ;;  %v10844_v7 = vpack.c.bf16 %v17778_v18, %v17776_v48  ;;  %v14111_v6 = vpack.c.bf16 %v16529_v22, %v16530_v34  ;;  %v16536_v48 = vand.u32 4294901760, %v14088_v53  ;;  %v14119_v18 = vld [vmem:[#allocation3 + $0x130] sm:$0xff]  ;;  %v14133_v62 = vpack.c.bf16 %v16532_v61, %v16533_v55  ;;  %v17790_v55 = vld [vmem:[#allocation132_spill] sm:$0xff] }
 0x52d   : > { %10153 = vmatpush1.bf16.msra.mxu1 %v14063_v10  ;;  %10843 = vmatprep.subr.bf16.mxu0 %v10842_v40  ;;  %v14123_v40 = vld [vmem:[#allocation3 + $0x198] sm:$0xff]  ;;  %v10848_v22 = vpack.c.bf16 %v17786_v60, %v17784_v42  ;;  %v17791_v45 = vand.u32 4294901760, %v17790_v55  ;;  %v14154_v60 = vld [vmem:[#allocation3 + $0x190] sm:$0xff]  ;;  %v14160_v34 = vld [vmem:[#allocation3 + $0x228] sm:$0xff]  ;;  %v17793_v55 = vand.u32 4294901760, %v14121_v30 }
 0x52e   : > { %10155 = vmatprep.subr.bf16.mxu1 %v14076_v27  ;;  %17779 = vst [vmem:[#allocation49_spill] sm:$0xff] %v14111_v6  ;;  %5354 = vmatprep.mubr.f32.mxu1 %v17782_v26  ;;  %17783 = vst [vmem:[#allocation52_spill] sm:$0xff] %v14133_v62  ;;  %v14146_v26 = vpack.c.bf16 %v16535_v17, %v16536_v48  ;;  %v17797_v48 = vld [vmem:[#allocation205_spill] sm:$0xff]  ;;  %v16551_v57 = vand.u32 4294901760, %v14154_v60  ;;  %v17810_v10 = vld [vmem:[#allocation80_spill] sm:$0xff] }
 0x52f   : > { %v17798_v37 = vand.u32 4294901760, %v17797_v48  ;;  %v14186_v48 = vld [vmem:[#allocation3 + $0x220] sm:$0xff]  ;;  %v14244_v27 = vld [vmem:[#allocation3 + $0x318] sm:$0xff] }
 0x530   : > { %10845 = vmatpush1.bf16.msra.mxu0 %v10844_v7  ;;  %17787 = vst [vmem:[#allocation55_spill] sm:$0xff] %v14146_v26  ;;  %v17788_v7 = vld [vmem:[#allocation203_spill] sm:$0xff]  ;;  %v17828_v8 = vand.u32 4294901760, %v14244_v27 }
 0x531   : > { %10157 = vmatpush1.bf16.msra.mxu1 %v14098_v21  ;;  %10847 = vmatprep.subr.bf16.mxu0 %v10846_v13  ;;  %v17789_v61 = vand.u32 4294901760, %v17788_v7  ;;  %v14158_v13 = vld [vmem:[#allocation3 + $0x1f8] sm:$0xff]  ;;  %v17792_v7 = vand.u32 4294901760, %v14119_v18 }
 0x532   : > { %10159 = vmatprep.subr.bf16.mxu1 %v14111_v6  ;;  %v16550_v6 = vand.u32 4294901760, %v14156_v39 }
 0x533   : > { %v10850_v29 = vpack.c.bf16 %v17791_v45, %v17789_v61  ;;  %v14167_v61 = vpack.c.bf16 %v17793_v55, %v17792_v7  ;;  %v17795_v45 = vld [vmem:[#allocation204_spill] sm:$0xff]  ;;  %v16552_v7 = vand.u32 4294901760, %v14158_v13 }
 0x534   : > { %10849 = vmatpush1.bf16.msra.mxu0 %v10848_v22  ;;  %v17796_v17 = vand.u32 4294901760, %v17795_v45  ;;  %v17799_v22 = vand.u32 4294901760, %v14123_v40  ;;  %v14184_v45 = vld [vmem:[#allocation3 + $0x1f0] sm:$0xff]  ;;  %v17803_v55 = vld [vmem:[#allocation128_spill] sm:$0xff] }
 0x535   : > { %10161 = vmatpush1.bf16.msra.mxu1 %v14133_v62  ;;  %17794 = vst [vmem:[#allocation59_spill] sm:$0xff] %v14167_v61  ;;  %10851 = vmatprep.subr.bf16.mxu0 %v10850_v29  ;;  %v17800_v62 = vand.u32 4294901760, %v14125_v28  ;;  %v14197_v29 = vpack.c.bf16 %v16550_v6, %v16551_v57  ;;  %v14211_v6 = vld [vmem:[#allocation3 + $0x250] sm:$0xff]  ;;  %v14213_v57 = vld [vmem:[#allocation3 + $0x280] sm:$0xff] }
 0x536   : > { %v10852_v42 = vpack.c.bf16 %v17798_v37, %v17796_v17  ;;  %10163 = vmatprep.subr.bf16.mxu1 %v14146_v26  ;;  %v14188_v17 = vld [vmem:[#allocation3 + $0x258] sm:$0xff]  ;;  %v14190_v37 = vld [vmem:[#allocation3 + $0x288] sm:$0xff]  ;;  %v17804_v26 = vand.u32 4294901760, %v14160_v34 }
 0x537   : > { %v14180_v21 = vpack.c.bf16 %v17800_v62, %v17799_v22  ;;  %17802 = vst [vmem:[#allocation127_spill] sm:$0xff] %v14197_v29  ;;  %v14215_v62 = vld [vmem:[#allocation3 + $0x2b8] sm:$0xff]  ;;  %v14217_v22 = vld [vmem:[#allocation3 + $0x2e8] sm:$0xff]  ;;  %v17811_v54 = vand.u32 4294901760, %v14188_v17 }
 0x538   : > { %10853 = vmatpush1.bf16.msra.mxu0 %v10852_v42  ;;  %v17819_v36 = vand.u32 4294901760, %v14215_v62 }
 0x539   : > { %17801 = vst [vmem:[#allocation61_spill] sm:$0xff] %v14180_v21  ;;  %10165 = vmatpush1.bf16.msra.mxu1 %v14167_v61  ;;  %10855 = vmatprep.subr.bf16.mxu0 %v17803_v55  ;;  %v14207_v61 = vpack.c.bf16 %v17804_v26, %v16552_v7  ;;  %v17806_v55 = vld [vmem:[#allocation129_spill] sm:$0xff]  ;;  %v17807_v26 = vand.u32 4294901760, %v14184_v45  ;;  %v17808_v7 = vand.u32 4294901760, %v14186_v48 }
 0x53a   : > { %10167 = vmatprep.subr.bf16.mxu1 %v14180_v21  ;;  %v14246_v21 = vld [vmem:[#allocation3 + $0x348] sm:$0xff] }
 0x53b   : > { %17805 = vst [vmem:[#allocation139_spill] sm:$0xff] %v14207_v61  ;;  %7646 = vmatmul.mubr.f32.vlgmr.msra.gmra.mrb[10].mxu0 %v17415_v12  ;;  %v14226_v42 = vpack.c.bf16 %v17808_v7, %v17807_v26  ;;  %v14240_v7 = vld [vmem:[#allocation3 + $0x2b0] sm:$0xff]  ;;  %v14242_v26 = vld [vmem:[#allocation3 + $0x2e0] sm:$0xff] }
 0x53c   : > { %10857 = vmatpush1.bf16.msra.mxu0 %v17806_v55  ;;  %7781 = vmatprep.mubr.f32.mxu0 %v17516_v16  ;;  %v17827_v16 = vld [vmem:[#allocation141_spill] sm:$0xff] }
 0x53d   : > { %10169 = vmatpush1.bf16.msra.mxu1 %v14197_v29  ;;  %17809 = vst [vmem:[#allocation165_spill] sm:$0xff] %v14226_v42  ;;  %10859 = vmatprep.subr.bf16.mxu0 %v17810_v10  ;;  %v17812_v29 = vand.u32 4294901760, %v14190_v37  ;;  %v17814_v10 = vld [vmem:[#allocation82_spill] sm:$0xff] }
 0x53e   : > { %10171 = vmatprep.subr.bf16.mxu1 %v14207_v61  ;;  %v14275_v61 = vld [vmem:[#allocation3 + $0x3a8] sm:$0xff] }
 0x53f   : > { %v14236_v12 = vpack.c.bf16 %v17812_v29, %v17811_v54  ;;  %v17815_v54 = vand.u32 4294901760, %v14211_v6  ;;  %v17816_v29 = vand.u32 4294901760, %v14213_v57  ;;  %17822 = vst [vmem:[#allocation176_spill] sm:$0xff] %v14275_v61 }
 0x540   : > { %10861 = vmatpush1.bf16.msra.mxu0 %v17814_v10  ;;  %v14303_v10 = vld [vmem:[#allocation3 + $0x408] sm:$0xff] }
 0x541   : > { %17813 = vst [vmem:[#allocation168_spill] sm:$0xff] %v14236_v12  ;;  %10173 = vmatpush1.bf16.msra.mxu1 %v14226_v42  ;;  %v14255_v55 = vpack.c.bf16 %v17816_v29, %v17815_v54  ;;  %10863 = vmatprep.subr.bf16.mxu0 %v17818_v25  ;;  %v17820_v42 = vand.u32 4294901760, %v14217_v22  ;;  %v14269_v54 = vld [vmem:[#allocation3 + $0x310] sm:$0xff]  ;;  %v14271_v29 = vld [vmem:[#allocation3 + $0x340] sm:$0xff]  ;;  %v17823_v25 = vld [vmem:[#allocation138_spill] sm:$0xff] }
 0x542   : > { %10175 = vmatprep.subr.bf16.mxu1 %v14236_v12  ;;  %v17824_v12 = vand.u32 4294901760, %v14240_v7  ;;  %17832 = vst [vmem:[#allocation33_spill] sm:$0xff] %v14303_v10 }
 0x543   : > { %17817 = vst [vmem:[#allocation173_spill] sm:$0xff] %v14255_v55  ;;  %v14265_v20 = vpack.c.bf16 %v17820_v42, %v17819_v36  ;;  %v17825_v36 = vand.u32 4294901760, %v14242_v26 }
 0x544   : > { %10865 = vmatpush1.bf16.msra.mxu0 %v17823_v25  ;;  %v14331_v25 = vld [vmem:[#allocation3 + $0x468] sm:$0xff] }
 0x545   : > { %17821 = vst [vmem:[#allocation171_spill] sm:$0xff] %v14265_v20  ;;  %10177 = vmatpush1.bf16.msra.mxu1 %v14255_v55  ;;  %v14283_v42 = vpack.c.bf16 %v17825_v36, %v17824_v12  ;;  %10867 = vmatprep.subr.bf16.mxu0 %v17827_v16  ;;  %v17829_v55 = vand.u32 4294901760, %v14246_v21  ;;  %v14297_v12 = vld [vmem:[#allocation3 + $0x370] sm:$0xff]  ;;  %v14299_v36 = vld [vmem:[#allocation3 + $0x3a0] sm:$0xff]  ;;  %v17833_v16 = vld [vmem:[#allocation34_spill] sm:$0xff] }
 0x546   : > { %10179 = vmatprep.subr.bf16.mxu1 %v14265_v20  ;;  %v17834_v20 = vand.u32 4294901760, %v14269_v54  ;;  %17842 = vst [vmem:[#allocation43_spill] sm:$0xff] %v14331_v25 }
 0x547   : > { %17826 = vst [vmem:[#allocation174_spill] sm:$0xff] %v14283_v42  ;;  %v14293_v46 = vpack.c.bf16 %v17829_v55, %v17828_v8  ;;  %v17835_v8 = vand.u32 4294901760, %v14271_v29 }
 0x548   : > { %10869 = vmatpush1.bf16.msra.mxu0 %v17833_v16  ;;  %v14346_v16 = vsub.f32 %v14022_v52, %v17847_v23  ;;  %v14385_v52 = vld [vmem:[#allocation3 + $0x460] sm:$0xff] }
 0x549   : > { %17830 = vst [vmem:[#allocation177_spill] sm:$0xff] %v14293_v46  ;;  %10181 = vmatpush1.bf16.msra.mxu1 %v14283_v42  ;;  %v14311_v55 = vpack.c.bf16 %v17835_v8, %v17834_v20  ;;  %10871 = vmatprep.subr.bf16.mxu0 %v17837_v24  ;;  %v17839_v42 = vand.u32 4294901760, %v14275_v61  ;;  %v14325_v20 = vld [vmem:[#allocation3 + $0x3d0] sm:$0xff]  ;;  %v14327_v8 = vld [vmem:[#allocation3 + $0x400] sm:$0xff]  ;;  %v17843_v24 = vand.u32 4294901760, %v14006_v31  ;;  %v17851_v61 = vand.u32 4294901760, %v14026_v58 }
 0x54a   : > { %10183 = vmatprep.subr.bf16.mxu1 %v14293_v46  ;;  %17848 = vst [vmem:[#allocation195_spill] sm:$0xff] %v14346_v16  ;;  %17861 = vst [vmem:[#allocation57_spill] sm:$0xff] %v14385_v52 }
 0x54b   : > { %17836 = vst [vmem:[#allocation37_spill] sm:$0xff] %v14311_v55  ;;  %v14321_v14 = vpack.c.bf16 %v17839_v42, %v17838_v47  ;;  %v14336_v46 = vsub.f32 %v14006_v31, %v17843_v24  ;;  %v17845_v47 = vand.u32 4294901760, %v14008_v43  ;;  %v14356_v31 = vsub.f32 %v14026_v58, %v17851_v61 }
 0x54c   : > { %10873 = vmatpush1.bf16.msra.mxu0 %v17588_v51  ;;  %v17854_v24 = vand.u32 4294901760, %v14299_v36  ;;  %v17858_v51 = vand.u32 4294901760, %v14301_v4  ;;  %v17859_v58 = vand.u32 4294901760, %v14303_v10  ;;  %v14409_v10 = vld [vmem:[#allocation3 + $0x4c8] sm:$0xff]  ;;  %v17876_v4 = vand.u32 4294901760, %v14119_v18 }
 0x54d   : > { %17840 = vst [vmem:[#allocation38_spill] sm:$0xff] %v14321_v14  ;;  %17844 = vst [vmem:[#allocation47_spill] sm:$0xff] %v14336_v46  ;;  %v14341_v42 = vsub.f32 %v14008_v43, %v17845_v47  ;;  %10185 = vmatpush1.bf16.msra.mxu1 %v14311_v55  ;;  %v17853_v43 = vand.u32 4294901760, %v14297_v12  ;;  %v14371_v47 = vsub.f32 %v14028_v11, %v17856_v2  ;;  %10875 = vmatprep.subr.bf16.mxu0 %v17593_v19  ;;  %v14407_v55 = vld [vmem:[#allocation3 + $0x498] sm:$0xff] }
 0x54e   : > { %17852 = vst [vmem:[#allocation51_spill] sm:$0xff] %v14356_v31  ;;  %10187 = vmatprep.subr.bf16.mxu1 %v14321_v14  ;;  %v14379_v61 = vpack.c.bf16 %v17859_v58, %v17858_v51  ;;  %v17862_v11 = vand.u32 4294901760, %v14050_v0  ;;  %v17864_v19 = vand.u32 4294901760, %v14052_v41  ;;  %v17866_v51 = vand.u32 4294901760, %v14054_v5  ;;  %17869 = vst [vmem:[#allocation63_spill] sm:$0xff] %v14407_v55 }
 0x54f   : > { %17846 = vst [vmem:[#allocation48_spill] sm:$0xff] %v14341_v42  ;;  %v14364_v23 = vpack.c.bf16 %v17854_v24, %v17853_v43  ;;  %17857 = vst [vmem:[#allocation54_spill] sm:$0xff] %v14371_v47  ;;  %v17867_v24 = vand.u32 4294901760, %v14056_v32 }
 0x550   : > { %17860 = vst [vmem:[#allocation56_spill] sm:$0xff] %v14379_v61  ;;  %v14390_v2 = vsub.f32 %v14050_v0, %v17862_v11  ;;  %v14395_v14 = vsub.f32 %v14052_v41, %v17864_v19  ;;  %v14400_v58 = vsub.f32 %v14054_v5, %v17866_v51  ;;  %17870 = vst [vmem:[#allocation65_spill] sm:$0xff] %v14409_v10  ;;  %v17871_v0 = vand.u32 4294901760, %v14084_v56 }
 0x551   : > { %17855 = vst [vmem:[#allocation53_spill] sm:$0xff] %v14364_v23  ;;  %v14405_v43 = vsub.f32 %v14056_v32, %v17867_v24  ;;  %v17873_v41 = vand.u32 4294901760, %v14086_v33  ;;  %v17874_v5 = vand.u32 4294901760, %v14088_v53  ;;  %v17875_v32 = vand.u32 4294901760, %v14090_v38  ;;  %10189 = vmatpush1.bf16.msra.mxu1 %v14364_v23  ;;  %10877 = vmatpush1.bf16.msra.mxu0 %v17600_v15  ;;  %v14485_v23 = vld [vmem:[#allocation3 + $0x4f8] sm:$0xff] }
 0x552   : > { %17863 = vst [vmem:[#allocation58_spill] sm:$0xff] %v14390_v2  ;;  %17865 = vst [vmem:[#allocation60_spill] sm:$0xff] %v14395_v14  ;;  %v14414_v11 = vsub.f32 %v14084_v56, %v17871_v0  ;;  %v14434_v56 = vsub.f32 %v14119_v18, %v17876_v4  ;;  %v17878_v0 = vand.u32 4294901760, %v14327_v8  ;;  %10191 = vmatprep.subr.bf16.mxu1 %v14379_v61  ;;  %10879 = vmatprep.subr.bf16.mxu0 %v17605_v44 }
 0x553   : > { %17868 = vst [vmem:[#allocation62_spill] sm:$0xff] %v14405_v43  ;;  %v14419_v19 = vsub.f32 %v14086_v33, %v17873_v41  ;;  %v14424_v51 = vsub.f32 %v14088_v53, %v17874_v5  ;;  %v14429_v24 = vsub.f32 %v14090_v38, %v17875_v32  ;;  %v17877_v33 = vand.u32 4294901760, %v14325_v20  ;;  %v14461_v38 = vld [vmem:[#allocation3 + $0x490] sm:$0xff]  ;;  %v14463_v41 = vld [vmem:[#allocation3 + $0x4c0] sm:$0xff] }
 0x554   : > { %17872 = vst [vmem:[#allocation66_spill] sm:$0xff] %v14414_v11  ;;  %v17880_v5 = vand.u32 4294901760, %v14121_v30  ;;  %v17882_v15 = vand.u32 4294901760, %v14329_v3  ;;  %v17883_v4 = vand.u32 4294901760, %v14331_v25  ;;  %v17887_v44 = vand.u32 4294901760, %v14125_v28  ;;  %v14487_v25 = vld [vmem:[#allocation3 + $0x528] sm:$0xff] }
 0x555   : > { %v14442_v53 = vpack.c.bf16 %v17878_v0, %v17877_v33  ;;  %v17890_v0 = vand.u32 4294901760, %v14156_v39  ;;  %17891 = vst [vmem:[#allocation74_spill] sm:$0xff] %v14487_v25  ;;  %v17898_v3 = vand.u32 4294901760, %v14188_v17  ;;  %10881 = vmatpush1.bf16.msra.mxu0 %v17610_v49  ;;  %v17907_v49 = vand.u32 4294901760, %v14407_v55 }
 0x556   : > { %v14449_v32 = vsub.f32 %v14121_v30, %v17880_v5  ;;  %v14457_v18 = vpack.c.bf16 %v17883_v4, %v17882_v15  ;;  %v17885_v30 = vand.u32 4294901760, %v14123_v40  ;;  %v14473_v61 = vsub.f32 %v14125_v28, %v17887_v44  ;;  %10883 = vmatprep.subr.bf16.mxu0 %v17615_v1 }
 0x557   : > { %17879 = vst [vmem:[#allocation68_spill] sm:$0xff] %v14442_v53  ;;  %v17889_v15 = vand.u32 4294901760, %v14154_v60  ;;  %v14483_v33 = vsub.f32 %v14156_v39, %v17890_v0  ;;  %v17893_v28 = vand.u32 4294901760, %v14160_v34  ;;  %v17896_v39 = vand.u32 4294901760, %v14186_v48  ;;  %10193 = vmatpush1.bf16.msra.mxu1 %v14442_v53 }
 0x558   : > { %17881 = vst [vmem:[#allocation69_spill] sm:$0xff] %v14449_v32  ;;  %17884 = vst [vmem:[#allocation70_spill] sm:$0xff] %v14457_v18  ;;  %v14468_v5 = vsub.f32 %v14123_v40, %v17885_v30  ;;  %v17892_v40 = vand.u32 4294901760, %v14158_v13  ;;  %10195 = vmatprep.subr.bf16.mxu1 %v14457_v18  ;;  %v17910_v53 = vand.u32 4294901760, %v14211_v6  ;;  %v17914_v1 = vand.u32 4294901760, %v14215_v62 }
 0x559   : > { %17888 = vst [vmem:[#allocation19_spill] sm:$0xff] %v14473_v61  ;;  %v14478_v4 = vsub.f32 %v14154_v60, %v17889_v15  ;;  %v14497_v44 = vsub.f32 %v14160_v34, %v17893_v28  ;;  %v17895_v60 = vand.u32 4294901760, %v14184_v45  ;;  %v14507_v0 = vsub.f32 %v14186_v48, %v17896_v39  ;;  %v14526_v39 = vld [vmem:[#allocation3 + $0x520] sm:$0xff]  ;;  %v14563_v28 = vld [vmem:[#allocation3 + $0x558] sm:$0xff]  ;;  %v14565_v48 = vld [vmem:[#allocation3 + $0x588] sm:$0xff] }
 0x55a   : > { %17886 = vst [vmem:[#allocation72_spill] sm:$0xff] %v14468_v5  ;;  %v14492_v30 = vsub.f32 %v14158_v13, %v17892_v40  ;;  %v14512_v13 = vsub.f32 %v14188_v17, %v17898_v3  ;;  %v17900_v34 = vand.u32 4294901760, %v14383_v9  ;;  %v17901_v40 = vand.u32 4294901760, %v14385_v52  ;;  %17904 = vst [vmem:[#allocation23_spill] sm:$0xff] %v14526_v39 }
 0x55b   : > { %17894 = vst [vmem:[#allocation76_spill] sm:$0xff] %v14497_v44  ;;  %v14502_v15 = vsub.f32 %v14184_v45, %v17895_v60  ;;  %17897 = vst [vmem:[#allocation77_spill] sm:$0xff] %v14507_v0  ;;  %v14524_v60 = vld [vmem:[#allocation3 + $0x4f0] sm:$0xff]  ;;  %v17905_v3 = vand.u32 4294901760, %v14190_v37  ;;  %v14546_v52 = vsub.f32 %v14211_v6, %v17910_v53  ;;  %v14556_v18 = vsub.f32 %v14215_v62, %v17914_v1 }
 0x55c   : > { %17899 = vst [vmem:[#allocation20_spill] sm:$0xff] %v14512_v13  ;;  %v14520_v45 = vpack.c.bf16 %v17901_v40, %v17900_v34  ;;  %17903 = vst [vmem:[#allocation79_spill] sm:$0xff] %v14524_v60  ;;  %v17908_v34 = vand.u32 4294901760, %v14409_v10  ;;  %v17917_v6 = vand.u32 4294901760, %v14240_v7  ;;  %v17922_v10 = vand.u32 4294901760, %v14244_v27 }
 0x55d   : > { %v14531_v17 = vsub.f32 %v14190_v37, %v17905_v3  ;;  %17911 = vst [vmem:[#allocation25_spill] sm:$0xff] %v14546_v52  ;;  %v17912_v37 = vand.u32 4294901760, %v14213_v57  ;;  %17916 = vst [vmem:[#allocation86_spill] sm:$0xff] %v14565_v48  ;;  %v17932_v62 = vand.u32 4294901760, %v14269_v54 }
 0x55e   : > { %17902 = vst [vmem:[#allocation21_spill] sm:$0xff] %v14520_v45  ;;  %v14539_v40 = vpack.c.bf16 %v17908_v34, %v17907_v49  ;;  %v17915_v49 = vand.u32 4294901760, %v14217_v22  ;;  %v14570_v53 = vsub.f32 %v14240_v7, %v17917_v6  ;;  %v14586_v55 = vsub.f32 %v14244_v27, %v17922_v10  ;;  %10197 = vmatpush1.bf16.msra.mxu1 %v14520_v45  ;;  %v17923_v7 = vld [vmem:[#allocation169_spill] sm:$0xff] }
 0x55f   : > { %17906 = vst [vmem:[#allocation84_spill] sm:$0xff] %v14531_v17  ;;  %v14551_v3 = vsub.f32 %v14213_v57, %v17912_v37  ;;  %v17919_v57 = vand.u32 4294901760, %v14242_v26  ;;  %10885 = vmatpush1.bf16.msra.mxu0 %v17923_v7  ;;  %v17925_v6 = vand.u32 4294901760, %v14463_v41  ;;  %v17929_v27 = vand.u32 4294901760, %v14485_v23 }
 0x560   : > { %17909 = vst [vmem:[#allocation24_spill] sm:$0xff] %v14539_v40  ;;  %v14561_v34 = vsub.f32 %v14217_v22, %v17915_v49  ;;  %17918 = vst [vmem:[#allocation88_spill] sm:$0xff] %v14570_v53  ;;  %v14579_v22 = vld [vmem:[#allocation3 + $0x550] sm:$0xff]  ;;  %v14581_v49 = vld [vmem:[#allocation3 + $0x580] sm:$0xff]  ;;  %10199 = vmatprep.subr.bf16.mxu1 %v14539_v40  ;;  %10887 = vmatprep.subr.bf16.mxu0 %v17625_v50  ;;  %v17930_v10 = vand.u32 4294901760, %v14487_v25  ;;  %v14616_v1 = vsub.f32 %v14269_v54, %v17932_v62 }
 0x561   : > { %17913 = vst [vmem:[#allocation26_spill] sm:$0xff] %v14551_v3  ;;  %v14575_v37 = vsub.f32 %v14242_v26, %v17919_v57  ;;  %17921 = vst [vmem:[#allocation90_spill] sm:$0xff] %v14581_v49  ;;  %v17924_v26 = vand.u32 4294901760, %v14461_v38  ;;  %v17937_v54 = vand.u32 4294901760, %v14524_v60  ;;  %v17938_v62 = vand.u32 4294901760, %v14526_v39  ;;  %v17942_v25 = vld [vmem:[#allocation176_spill] sm:$0xff] }
 0x562   : > { %v14609_v7 = vpack.c.bf16 %v17930_v10, %v17929_v27  ;;  %v14625_v27 = vld [vmem:[#allocation3 + $0x5b8] sm:$0xff]  ;;  %v14627_v10 = vld [vmem:[#allocation3 + $0x5e8] sm:$0xff]  ;;  %v17941_v39 = vand.u32 4294901760, %v14341_v42  ;;  %v17943_v40 = vand.u32 4294901760, %v17942_v25  ;;  %v17949_v60 = vand.u32 4294901760, %v14297_v12 }
 0x563   : > { %17920 = vst [vmem:[#allocation150_spill] sm:$0xff] %v14575_v37  ;;  %v14594_v57 = vpack.c.bf16 %v17925_v6, %v17924_v26  ;;  %v17927_v37 = vand.u32 4294901760, %v14246_v21  ;;  %17934 = vst [vmem:[#allocation92_spill] sm:$0xff] %v14627_v10  ;;  %v17935_v6 = vand.u32 4294901760, %v14273_v63  ;;  %v14638_v45 = vpack.c.bf16 %v17938_v62, %v17937_v54  ;;  %10889 = vmatpush1.bf16.msra.mxu0 %v17630_v35  ;;  %v17945_v35 = vld [vmem:[#allocation178_spill] sm:$0xff] }
 0x564   : > { %17931 = vst [vmem:[#allocation91_spill] sm:$0xff] %v14609_v7  ;;  %v5381_v54 = vsub.f32 %v14341_v42, %v17941_v39  ;;  %v14659_v50 = vsub.f32 %v17942_v25, %v17943_v40  ;;  %10891 = vmatprep.subr.bf16.mxu0 %v17945_v35  ;;  %v14674_v42 = vsub.f32 %v14297_v12, %v17949_v60  ;;  %v17950_v25 = vand.u32 4294901760, %v14579_v22  ;;  %v17960_v60 = vld [vmem:[#allocation184_spill] sm:$0xff] }
 0x565   : > { %17926 = vst [vmem:[#allocation28_spill] sm:$0xff] %v14594_v57  ;;  %v14601_v53 = vsub.f32 %v14246_v21, %v17927_v37  ;;  %v17933_v21 = vand.u32 4294901760, %v14271_v29  ;;  %v14632_v26 = vsub.f32 %v14273_v63, %v17935_v6  ;;  %17939 = vst [vmem:[#allocation95_spill] sm:$0xff] %v14638_v45  ;;  %10201 = vmatpush1.bf16.msra.mxu1 %v14594_v57  ;;  %v17940_v63 = vand.u32 4294901760, %v14336_v46 }
 0x566   : > { %17944 = vst [vmem:[#allocation96_spill] sm:$0xff] %v14659_v50  ;;  %10203 = vmatprep.subr.bf16.mxu1 %v14609_v7  ;;  %v17946_v57 = vand.u32 4294901760, %v14563_v28  ;;  %v17951_v40 = vand.u32 4294901760, %v14581_v49  ;;  %v17954_v62 = vand.u32 4294901760, %v14351_v59  ;;  %v5382_v7 = vand.u32 4294901760, %v5381_v54 }
 0x567   : > { %17928 = vst [vmem:[#allocation154_spill] sm:$0xff] %v14601_v53  ;;  %v14621_v37 = vsub.f32 %v14271_v29, %v17933_v21  ;;  %17936 = vst [vmem:[#allocation157_spill] sm:$0xff] %v14632_v26  ;;  %v14640_v29 = vld [vmem:[#allocation3 + $0x5b0] sm:$0xff]  ;;  %v14642_v21 = vld [vmem:[#allocation3 + $0x5e0] sm:$0xff]  ;;  %v5369_v6 = vsub.f32 %v14336_v46, %v17940_v63  ;;  %v17947_v63 = vand.u32 4294901760, %v14565_v48  ;;  %v17962_v54 = vand.u32 4294901760, %v14627_v10 }
 0x568   : > { %v14680_v35 = vpack.c.bf16 %v17951_v40, %v17950_v25  ;;  %v5387_v48 = vsub.f32 %v14351_v59, %v17954_v62  ;;  %v17955_v25 = vld [vmem:[#allocation181_spill] sm:$0xff]  ;;  %v17958_v62 = vand.u32 4294901760, %v14299_v36  ;;  %v17970_v10 = vand.u32 4294901760, %v14395_v14 }
 0x569   : > { %v14667_v46 = vpack.c.bf16 %v17947_v63, %v17946_v57  ;;  %v17953_v63 = vand.u32 4294901760, %v14346_v16  ;;  %10205 = vmatpush1.bf16.msra.mxu1 %v14638_v45  ;;  %10893 = vmatpush1.bf16.msra.mxu0 %v17955_v25  ;;  %v5370_v40 = vand.u32 4294901760, %v5369_v6  ;;  %v17956_v57 = vand.u32 4294901760, %v14356_v31 }
 0x56a   : > { %17952 = vst [vmem:[#allocation97_spill] sm:$0xff] %v14680_v35  ;;  %v14703_v12 = vsub.f32 %v14299_v36, %v17958_v62  ;;  %10895 = vmatprep.subr.bf16.mxu0 %v17960_v60  ;;  %v17961_v6 = vand.u32 4294901760, %v14625_v27  ;;  %v17966_v36 = vld [vmem:[#allocation33_spill] sm:$0xff] }
 0x56b   : > { %17948 = vst [vmem:[#allocation160_spill] sm:$0xff] %v14667_v46  ;;  %v5375_v39 = vsub.f32 %v14346_v16, %v17953_v63  ;;  %v5393_v49 = vsub.f32 %v14356_v31, %v17956_v57  ;;  %v17957_v63 = vand.u32 4294901760, %v14371_v47  ;;  %10207 = vmatprep.subr.bf16.mxu1 %v14667_v46  ;;  %v17967_v62 = vand.u32 4294901760, %v17966_v36 }
 0x56c   : > { %17959 = vst [vmem:[#allocation99_spill] sm:$0xff] %v14703_v12  ;;  %v14711_v25 = vpack.c.bf16 %v17962_v54, %v17961_v6  ;;  %v5388_v54 = vand.u32 4294901760, %v5387_v48  ;;  %v17969_v57 = vand.u32 4294901760, %v14390_v2 }
 0x56d   : > { %v5405_v16 = vsub.f32 %v14371_v47, %v17957_v63  ;;  %v17964_v63 = vld [vmem:[#allocation32_spill] sm:$0xff]  ;;  %v14723_v46 = vsub.f32 %v17966_v36, %v17967_v62  ;;  %v5376_v6 = vand.u32 4294901760, %v5375_v39  ;;  %10209 = vmatpush1.bf16.msra.mxu1 %v14680_v35  ;;  %v17972_v36 = vand.u32 4294901760, %v14640_v29 }
 0x56e   : > { %17963 = vst [vmem:[#allocation163_spill] sm:$0xff] %v14711_v25  ;;  %v17965_v47 = vand.u32 4294901760, %v17964_v63  ;;  %v5399_v45 = vsub.f32 %v14390_v2, %v17969_v57  ;;  %v17973_v62 = vand.u32 4294901760, %v14642_v21  ;;  %v10214_v39 = vpack.c.bf16 %v5382_v7, %v5370_v40  ;;  %10211 = vmatprep.subr.bf16.mxu1 %v14711_v25  ;;  %v17975_v57 = vld [vmem:[#allocation187_spill] sm:$0xff] }
 0x56f   : > { %17968 = vst [vmem:[#allocation101_spill] sm:$0xff] %v14723_v46  ;;  %v5394_v48 = vand.u32 4294901760, %v5393_v49  ;;  %v5406_v59 = vand.u32 4294901760, %v5405_v16  ;;  %v17976_v2 = vand.u32 4294901760, %v14400_v58  ;;  %v17977_v35 = vand.u32 4294901760, %v14405_v43 }
 0x570   : > { %v14718_v31 = vsub.f32 %v17964_v63, %v17965_v47  ;;  %v5411_v47 = vsub.f32 %v14395_v14, %v17970_v10  ;;  %v17971_v63 = vld [vmem:[#allocation36_spill] sm:$0xff]  ;;  %v14739_v60 = vpack.c.bf16 %v17973_v62, %v17972_v36  ;;  %v17978_v7 = vand.u32 4294901760, %v14325_v20 }
 0x571   : > { %10897 = vmatpush1.bf16.msra.mxu0 %v17971_v63  ;;  %v5417_v10 = vsub.f32 %v14400_v58, %v17976_v2  ;;  %v5429_v63 = vsub.f32 %v14405_v43, %v17977_v35  ;;  %v17980_v49 = vand.u32 4294901760, %v14327_v8  ;;  %v17982_v2 = vand.u32 4294901760, %v14414_v11 }
 0x572   : > { %17974 = vst [vmem:[#allocation102_spill] sm:$0xff] %v14739_v60  ;;  %10899 = vmatprep.subr.bf16.mxu0 %v17975_v57  ;;  %v14754_v16 = vsub.f32 %v14325_v20, %v17978_v7  ;;  %v17983_v35 = vand.u32 4294901760, %v14419_v19  ;;  %v10216_v14 = vpack.c.bf16 %v5388_v54, %v5376_v6  ;;  %v5400_v36 = vand.u32 4294901760, %v5399_v45  ;;  %10213 = vmatpush1.bf16.msra.mxu1 %v14739_v60  ;;  %v17984_v20 = vld [vmem:[#allocation189_spill] sm:$0xff] }
 0x573   : > { %v14759_v40 = vsub.f32 %v14327_v8, %v17980_v49  ;;  %v5423_v62 = vsub.f32 %v14414_v11, %v17982_v2  ;;  %v5412_v25 = vand.u32 4294901760, %v5411_v47  ;;  %v16655_v43 = vand.u32 4294901760, %v14434_v56  ;;  %10215 = vmatprep.subr.bf16.mxu1 %v10214_v39  ;;  %v17985_v11 = vld [vmem:[#allocation190_spill] sm:$0xff]  ;;  %v17988_v2 = vld [vmem:[#allocation151_spill] sm:$0xff] }
 0x574   : > { %17979 = vst [vmem:[#allocation166_spill] sm:$0xff] %v14754_v16  ;;  %v5435_v57 = vsub.f32 %v14419_v19, %v17983_v35  ;;  %v10218_v7 = vpack.c.bf16 %v5406_v59, %v5394_v48  ;;  %v5418_v35 = vand.u32 4294901760, %v5417_v10  ;;  %v5430_v6 = vand.u32 4294901760, %v5429_v63 }
 0x575   : > { %17981 = vst [vmem:[#allocation103_spill] sm:$0xff] %v14759_v40  ;;  %10901 = vmatpush1.bf16.msra.mxu0 %v17984_v20  ;;  %v17986_v45 = vand.u32 4294901760, %v14424_v51  ;;  %v17987_v47 = vand.u32 4294901760, %v14429_v24  ;;  %v5424_v59 = vand.u32 4294901760, %v5423_v62  ;;  %5360 = vmatmul.mubr.f32.vlgmr.msra.gmra.mrb[6].mxu1 %v17988_v2  ;;  %v10220_v39 = vpack.c.bf16 %v5412_v25, %v5400_v36 }
 0x576   : > { %10903 = vmatprep.subr.bf16.mxu0 %v17985_v11  ;;  %v5436_v48 = vand.u32 4294901760, %v5435_v57  ;;  %v5447_v11 = vsub.f32 %v14434_v56, %v16655_v43  ;;  %10217 = vmatpush1.bf16.msra.mxu1 %v10216_v14  ;;  %v17990_v62 = vand.u32 4294901760, %v14449_v32  ;;  %v17992_v25 = vand.u32 4294901760, %v14473_v61  ;;  %v17993_v43 = vld [vmem:[#allocation42_spill] sm:$0xff]  ;;  %v17995_v14 = vld [vmem:[#allocation196_spill] sm:$0xff] }
 0x577   : > { %v5441_v54 = vsub.f32 %v14424_v51, %v17986_v45  ;;  %v5453_v20 = vsub.f32 %v14429_v24, %v17987_v47  ;;  %v17989_v45 = vld [vmem:[#allocation193_spill] sm:$0xff]  ;;  %v17991_v47 = vand.u32 4294901760, %v14468_v5  ;;  %v17994_v49 = vand.u32 4294901760, %v17993_v43  ;;  %10219 = vmatprep.subr.bf16.mxu1 %v10218_v7  ;;  %v18000_v7 = vld [vmem:[#allocation83_spill] sm:$0xff] }
 0x578   : > { %v5459_v57 = vsub.f32 %v14449_v32, %v17990_v62  ;;  %v5477_v36 = vsub.f32 %v14473_v61, %v17992_v25  ;;  %v17996_v62 = vld [vmem:[#allocation43_spill] sm:$0xff]  ;;  %v17999_v61 = vand.u32 4294901760, %v14483_v33  ;;  %5751 = vmatprep.mubr.f32.mxu1 %v18000_v7 }
 0x579   : > { %10905 = vmatpush1.bf16.msra.mxu0 %v17989_v45  ;;  %v5465_v2 = vsub.f32 %v14468_v5, %v17991_v47  ;;  %v14801_v10 = vsub.f32 %v17993_v43, %v17994_v49  ;;  %v10222_v45 = vpack.c.bf16 %v5430_v6, %v5418_v35  ;;  %v5442_v63 = vand.u32 4294901760, %v5441_v54 }
 0x57a   : > { %10907 = vmatprep.subr.bf16.mxu0 %v17995_v14  ;;  %v5454_v8 = vand.u32 4294901760, %v5453_v20  ;;  %v17997_v60 = vand.u32 4294901760, %v17996_v62  ;;  %v10224_v47 = vpack.c.bf16 %v5436_v48, %v5424_v59  ;;  %v17998_v5 = vand.u32 4294901760, %v14478_v4  ;;  %10221 = vmatpush1.bf16.msra.mxu1 %v10220_v39 }
 0x57b   : > { %v5483_v43 = vsub.f32 %v14483_v33, %v17999_v61  ;;  %v18001_v49 = vand.u32 4294901760, %v14492_v30  ;;  %v18002_v6 = vand.u32 4294901760, %v14497_v44  ;;  %v5448_v59 = vand.u32 4294901760, %v5447_v11  ;;  %10223 = vmatprep.subr.bf16.mxu1 %v10222_v45 }
 0x57c   : > { %v14807_v32 = vsub.f32 %v17996_v62, %v17997_v60  ;;  %v5471_v25 = vsub.f32 %v14478_v4, %v17998_v5  ;;  %v18003_v5 = vld [vmem:[#allocation198_spill] sm:$0xff]  ;;  %v5460_v48 = vand.u32 4294901760, %v5459_v57  ;;  %v5466_v61 = vand.u32 4294901760, %v5465_v2 }
 0x57d   : > { %v5489_v35 = vsub.f32 %v14492_v30, %v18001_v49  ;;  %v5501_v60 = vsub.f32 %v14497_v44, %v18002_v6  ;;  %10909 = vmatpush1.bf16.msra.mxu0 %v18003_v5  ;;  %v5478_v14 = vand.u32 4294901760, %v5477_v36  ;;  %v18004_v62 = vand.u32 4294901760, %v14383_v9  ;;  %v18005_v49 = vld [vmem:[#allocation200_spill] sm:$0xff] }
 0x57e   : > { %10911 = vmatprep.subr.bf16.mxu0 %v18005_v49  ;;  %v10226_v6 = vpack.c.bf16 %v5454_v8, %v5442_v63  ;;  %v16667_v54 = vand.u32 4294901760, %v14512_v13  ;;  %v16666_v20 = vand.u32 4294901760, %v14531_v17  ;;  %v5472_v39 = vand.u32 4294901760, %v5471_v25  ;;  %v18008_v63 = vld [vmem:[#allocation57_spill] sm:$0xff]  ;;  %10225 = vmatpush1.bf16.msra.mxu1 %v10224_v47  ;;  %v18012_v47 = vld [vmem:[#allocation63_spill] sm:$0xff] }
 0x57f   : > { %v14828_v7 = vsub.f32 %v14383_v9, %v18004_v62  ;;  %v5484_v44 = vand.u32 4294901760, %v5483_v43  ;;  %v16674_v11 = vand.u32 4294901760, %v14546_v52  ;;  %v5490_v2 = vand.u32 4294901760, %v5489_v35  ;;  %v18010_v25 = vld [vmem:[#allocation201_spill] sm:$0xff]  ;;  %v18011_v35 = vld [vmem:[#allocation131_spill] sm:$0xff] }
 0x580   : > { %v5502_v36 = vand.u32 4294901760, %v5501_v60  ;;  %v18006_v5 = vand.u32 4294901760, %v14502_v15  ;;  %v18007_v45 = vand.u32 4294901760, %v14507_v0  ;;  %v18009_v62 = vand.u32 4294901760, %v18008_v63  ;;  %10227 = vmatprep.subr.bf16.mxu1 %v10226_v6 }
 0x581   : > { %10913 = vmatpush1.bf16.msra.mxu0 %v18010_v25  ;;  %v10228_v43 = vpack.c.bf16 %v5460_v48, %v5448_v59  ;;  %v10230_v57 = vpack.c.bf16 %v5478_v14, %v5466_v61  ;;  %v5513_v60 = vsub.f32 %v14512_v13, %v16667_v54  ;;  %v18014_v48 = vld [vmem:[#allocation65_spill] sm:$0xff]  ;;  %v5519_v6 = vsub.f32 %v14546_v52, %v16674_v11  ;;  %v18020_v13 = vld [vmem:[#allocation150_spill] sm:$0xff] }
 0x582   : > { %v5495_v9 = vsub.f32 %v14502_v15, %v18006_v5  ;;  %v5507_v8 = vsub.f32 %v14507_v0, %v18007_v45  ;;  %v14844_v49 = vsub.f32 %v18008_v63, %v18009_v62  ;;  %10915 = vmatprep.subr.bf16.mxu0 %v18011_v35  ;;  %v5525_v5 = vsub.f32 %v14531_v17, %v16666_v20 }
 0x583   : > { %v18013_v62 = vand.u32 4294901760, %v18012_v47  ;;  %v18015_v61 = vand.u32 4294901760, %v18014_v48  ;;  %v18017_v25 = vand.u32 4294901760, %v14551_v3  ;;  %v10232_v20 = vpack.c.bf16 %v5484_v44, %v5472_v39  ;;  %10229 = vmatpush1.bf16.msra.mxu1 %v10228_v43 }
 0x584   : > { %v10234_v54 = vpack.c.bf16 %v5502_v36, %v5490_v2  ;;  %v5496_v63 = vand.u32 4294901760, %v5495_v9  ;;  %v5508_v45 = vand.u32 4294901760, %v5507_v8  ;;  %10231 = vmatprep.subr.bf16.mxu1 %v10230_v57  ;;  %v5514_v11 = vand.u32 4294901760, %v5513_v60  ;;  %v18024_v60 = vld [vmem:[#allocation118_spill] sm:$0xff] }
 0x585   : > { %v14859_v59 = vsub.f32 %v18012_v47, %v18013_v62  ;;  %v14864_v14 = vsub.f32 %v18014_v48, %v18015_v61  ;;  %v5531_v35 = vsub.f32 %v14551_v3, %v18017_v25  ;;  %v18018_v47 = vld [vmem:[#allocation39_spill] sm:$0xff]  ;;  %v18019_v62 = vld [vmem:[#allocation88_spill] sm:$0xff]  ;;  %v16678_v48 = vand.u32 4294901760, %v18020_v13 }
 0x586   : > { %10917 = vmatpush1.bf16.msra.mxu0 %v18018_v47  ;;  %v16677_v17 = vand.u32 4294901760, %v18019_v62  ;;  %v16679_v61 = vand.u32 4294901760, %v14586_v55  ;;  %v5526_v52 = vand.u32 4294901760, %v5525_v5  ;;  %v18021_v25 = vand.u32 4294901760, %v14556_v18 }
 0x587   : > { %18016 = vst [vmem:[#allocation105_spill] sm:$0xff] %v14864_v14  ;;  %v18022_v39 = vand.u32 4294901760, %v14561_v34  ;;  %v5520_v36 = vand.u32 4294901760, %v5519_v6  ;;  %v5532_v9 = vand.u32 4294901760, %v5531_v35  ;;  %v16682_v8 = vand.u32 4294901760, %v14616_v1  ;;  %10233 = vmatpush1.bf16.msra.mxu1 %v10232_v20 }
 0x588   : > { %v5537_v44 = vsub.f32 %v14556_v18, %v18021_v25  ;;  %v18023_v47 = vand.u32 4294901760, %v14461_v38  ;;  %v10236_v5 = vpack.c.bf16 %v5508_v45, %v5496_v63  ;;  %v5543_v6 = vsub.f32 %v18019_v62, %v16677_v17  ;;  %10235 = vmatprep.subr.bf16.mxu1 %v10234_v54 }
 0x589   : > { %v5549_v2 = vsub.f32 %v14561_v34, %v18022_v39  ;;  %7783 = vmatmul.mubr.f32.vlgmr.msra.gmra.mrb[10].mxu0 %v18024_v60  ;;  %v5555_v35 = vsub.f32 %v18020_v13, %v16678_v48  ;;  %v18025_v39 = vand.u32 4294901760, %v14601_v53  ;;  %v18026_v63 = vand.u32 4294901760, %v14463_v41 }
 0x58a   : > { %v14888_v57 = vsub.f32 %v14461_v38, %v18023_v47  ;;  %v5561_v38 = vsub.f32 %v14586_v55, %v16679_v61  ;;  %v10238_v47 = vpack.c.bf16 %v5526_v52, %v5514_v11  ;;  %v5538_v17 = vand.u32 4294901760, %v5537_v44 }
 0x58b   : > { %v5573_v45 = vsub.f32 %v14601_v53, %v18025_v39  ;;  %v14908_v20 = vsub.f32 %v14463_v41, %v18026_v63  ;;  %v5550_v0 = vand.u32 4294901760, %v5549_v2  ;;  %v18027_v25 = vand.u32 4294901760, %v14485_v23  ;;  %10237 = vmatpush1.bf16.msra.mxu1 %v10236_v5  ;;  %v18032_v63 = vld [vmem:[#allocation74_spill] sm:$0xff] }
 0x58c   : > { %v10240_v43 = vpack.c.bf16 %v5532_v9, %v5520_v36  ;;  %v5567_v61 = vsub.f32 %v14616_v1, %v16682_v8  ;;  %v18029_v39 = vand.u32 4294901760, %v14621_v37  ;;  %v18030_v41 = vand.u32 4294901760, %v14632_v26  ;;  %10239 = vmatprep.subr.bf16.mxu1 %v10238_v47 }
 0x58d   : > { %v14913_v48 = vsub.f32 %v14485_v23, %v18027_v25  ;;  %v18031_v54 = vand.u32 4294901760, %v14659_v50  ;;  %v5544_v2 = vand.u32 4294901760, %v5543_v6  ;;  %v5556_v36 = vand.u32 4294901760, %v5555_v35 }
 0x58e   : > { %v5579_v53 = vsub.f32 %v14621_v37, %v18029_v39  ;;  %v5585_v52 = vsub.f32 %v14632_v26, %v18030_v41  ;;  %v5562_v9 = vand.u32 4294901760, %v5561_v38  ;;  %v5574_v25 = vand.u32 4294901760, %v5573_v45 }
 0x58f   : > { %18028 = vst [vmem:[#allocation40_spill] sm:$0xff] %v14913_v48  ;;  %v5597_v11 = vsub.f32 %v14659_v50, %v18031_v54  ;;  %v18033_v8 = vand.u32 4294901760, %v18032_v63  ;;  %v10242_v41 = vpack.c.bf16 %v5550_v0, %v5538_v17  ;;  %v16688_v26 = vand.u32 4294901760, %v14718_v31  ;;  %v18036_v17 = vld [vmem:[#allocation79_spill] sm:$0xff]  ;;  %10241 = vmatpush1.bf16.msra.mxu1 %v10240_v43  ;;  %v18042_v43 = vld [vmem:[#allocation86_spill] sm:$0xff] }
 0x590   : > { %v16687_v54 = vand.u32 4294901760, %v14723_v46  ;;  %v5568_v50 = vand.u32 4294901760, %v5567_v61  ;;  %v5580_v23 = vand.u32 4294901760, %v5579_v53  ;;  %v5586_v6 = vand.u32 4294901760, %v5585_v52  ;;  %v18038_v53 = vld [vmem:[#allocation23_spill] sm:$0xff] }
 0x591   : > { %v14932_v39 = vsub.f32 %v18032_v63, %v18033_v8  ;;  %v5598_v35 = vand.u32 4294901760, %v5597_v11  ;;  %v18034_v38 = vand.u32 4294901760, %v14674_v42  ;;  %v18035_v8 = vand.u32 4294901760, %v14703_v12  ;;  %10243 = vmatprep.subr.bf16.mxu1 %v10242_v41 }
 0x592   : > { %v18037_v47 = vand.u32 4294901760, %v18036_v17  ;;  %v18039_v61 = vand.u32 4294901760, %v18038_v53  ;;  %v10244_v52 = vpack.c.bf16 %v5556_v36, %v5544_v2  ;;  %v10246_v11 = vpack.c.bf16 %v5574_v25, %v5562_v9 }
 0x593   : > { %v5591_v45 = vsub.f32 %v14674_v42, %v18034_v38  ;;  %v5603_v0 = vsub.f32 %v14703_v12, %v18035_v8  ;;  %v5609_v38 = vsub.f32 %v14718_v31, %v16688_v26  ;;  %v5621_v8 = vsub.f32 %v14723_v46, %v16687_v54 }
 0x594   : > { %v14947_v63 = vsub.f32 %v18036_v17, %v18037_v47  ;;  %v14952_v44 = vsub.f32 %v18038_v53, %v18039_v61  ;;  %v18041_v5 = vand.u32 4294901760, %v14563_v28  ;;  %v18043_v2 = vand.u32 4294901760, %v18042_v43  ;;  %10245 = vmatpush1.bf16.msra.mxu1 %v10244_v52 }
 0x595   : > { %v18045_v9 = vand.u32 4294901760, %v14754_v16  ;;  %v18046_v41 = vand.u32 4294901760, %v14759_v40  ;;  %v10248_v54 = vpack.c.bf16 %v5580_v23, %v5568_v50  ;;  %v10250_v26 = vpack.c.bf16 %v5598_v35, %v5586_v6  ;;  %10247 = vmatprep.subr.bf16.mxu1 %v10246_v11 }
 0x596   : > { %18040 = vst [vmem:[#allocation107_spill] sm:$0xff] %v14952_v44  ;;  %v14965_v53 = vsub.f32 %v14563_v28, %v18041_v5  ;;  %v14970_v36 = vsub.f32 %v18042_v43, %v18043_v2  ;;  %v5592_v47 = vand.u32 4294901760, %v5591_v45  ;;  %v5604_v17 = vand.u32 4294901760, %v5603_v0 }
 0x597   : > { %v5615_v25 = vsub.f32 %v14754_v16, %v18045_v9  ;;  %v5627_v61 = vsub.f32 %v14759_v40, %v18046_v41  ;;  %v16693_v28 = vand.u32 4294901760, %v14828_v7  ;;  %v16694_v5 = vand.u32 4294901760, %v14844_v49 }
 0x598   : > { %18044 = vst [vmem:[#allocation172_spill] sm:$0xff] %v14970_v36  ;;  %v16695_v43 = vand.u32 4294901760, %v14859_v59  ;;  %v16696_v2 = vand.u32 4294901760, %v14864_v14  ;;  %v5610_v46 = vand.u32 4294901760, %v5609_v38  ;;  %v5622_v9 = vand.u32 4294901760, %v5621_v8  ;;  %10249 = vmatpush1.bf16.msra.mxu1 %v10248_v54 }
 0x599   : > { %v18047_v16 = vand.u32 4294901760, %v14801_v10  ;;  %v18048_v50 = vand.u32 4294901760, %v14807_v32  ;;  %v5616_v6 = vand.u32 4294901760, %v5615_v25  ;;  %v5628_v35 = vand.u32 4294901760, %v5627_v61  ;;  %10251 = vmatprep.subr.bf16.mxu1 %v10250_v26 }
 0x59a   : > { %v16699_v45 = vand.u32 4294901760, %v14888_v57  ;;  %v18049_v52 = vand.u32 4294901760, %v14579_v22  ;;  %v10252_v38 = vpack.c.bf16 %v5604_v17, %v5592_v47  ;;  %v5639_v25 = vsub.f32 %v14828_v7, %v16693_v28  ;;  %v18050_v17 = vld [vmem:[#allocation90_spill] sm:$0xff] }
 0x59b   : > { %v5633_v41 = vsub.f32 %v14801_v10, %v18047_v16  ;;  %v5645_v23 = vsub.f32 %v14807_v32, %v18048_v50  ;;  %v5651_v61 = vsub.f32 %v14844_v49, %v16694_v5  ;;  %v5657_v50 = vsub.f32 %v14859_v59, %v16695_v43 }
 0x59c   : > { %v14993_v11 = vsub.f32 %v14579_v22, %v18049_v52  ;;  %v5669_v22 = vsub.f32 %v14864_v14, %v16696_v2  ;;  %v18051_v47 = vand.u32 4294901760, %v18050_v17  ;;  %v10254_v52 = vpack.c.bf16 %v5622_v9, %v5610_v46  ;;  %10253 = vmatpush1.bf16.msra.mxu1 %v10252_v38 }
 0x59d   : > { %v5634_v28 = vand.u32 4294901760, %v5633_v41  ;;  %v5646_v16 = vand.u32 4294901760, %v5645_v23  ;;  %v18053_v8 = vand.u32 4294901760, %v14625_v27  ;;  %v10256_v0 = vpack.c.bf16 %v5628_v35, %v5616_v6 }
 0x59e   : > { %v15012_v54 = vsub.f32 %v18050_v17, %v18051_v47  ;;  %v5663_v43 = vsub.f32 %v14888_v57, %v16699_v45  ;;  %v18055_v2 = vand.u32 4294901760, %v14908_v20  ;;  %v18056_v17 = vand.u32 4294901760, %v14913_v48  ;;  %v18058_v47 = vld [vmem:[#allocation92_spill] sm:$0xff]  ;;  %10255 = vmatprep.subr.bf16.mxu1 %v10254_v52 }
 0x59f   : > { %v15017_v5 = vsub.f32 %v14625_v27, %v18053_v8  ;;  %v18057_v26 = vand.u32 4294901760, %v14932_v39  ;;  %v5640_v23 = vand.u32 4294901760, %v5639_v25  ;;  %v5652_v6 = vand.u32 4294901760, %v5651_v61 }
 0x5a0   : > { %18052 = vst [vmem:[#allocation109_spill] sm:$0xff] %v15012_v54  ;;  %v5675_v14 = vsub.f32 %v14908_v20, %v18055_v2  ;;  %v5681_v46 = vsub.f32 %v14913_v48, %v18056_v17  ;;  %v5658_v35 = vand.u32 4294901760, %v5657_v50  ;;  %v5670_v8 = vand.u32 4294901760, %v5669_v22  ;;  %10257 = vmatpush1.bf16.msra.mxu1 %v10256_v0 }
 0x5a1   : > { %18054 = vst [vmem:[#allocation45_spill] sm:$0xff] %v15017_v5  ;;  %v5693_v9 = vsub.f32 %v14932_v39, %v18057_v26  ;;  %v18059_v45 = vand.u32 4294901760, %v18058_v47  ;;  %v10258_v17 = vpack.c.bf16 %v5646_v16, %v5634_v28  ;;  %v16702_v48 = vand.u32 4294901760, %v14965_v53 }
 0x5a2   : > { %v18061_v27 = vand.u32 4294901760, %v14640_v29  ;;  %v18063_v38 = vand.u32 4294901760, %v14642_v21  ;;  %v5664_v61 = vand.u32 4294901760, %v5663_v43  ;;  %v5676_v50 = vand.u32 4294901760, %v5675_v14 }
 0x5a3   : > { %v15036_v2 = vsub.f32 %v18058_v47, %v18059_v45  ;;  %v5682_v45 = vand.u32 4294901760, %v5681_v46  ;;  %v5694_v22 = vand.u32 4294901760, %v5693_v9  ;;  %v18065_v28 = vand.u32 4294901760, %v14947_v63  ;;  %10259 = vmatprep.subr.bf16.mxu1 %v10258_v17 }
 0x5a4   : > { %v15043_v41 = vsub.f32 %v14640_v29, %v18061_v27  ;;  %v15048_v25 = vsub.f32 %v14642_v21, %v18063_v38  ;;  %v18066_v52 = vand.u32 4294901760, %v14952_v44  ;;  %v10260_v29 = vpack.c.bf16 %v5652_v6, %v5640_v23 }
 0x5a5   : > { %18060 = vst [vmem:[#allocation175_spill] sm:$0xff] %v15036_v2  ;;  %v5687_v16 = vsub.f32 %v14947_v63, %v18065_v28  ;;  %v10262_v27 = vpack.c.bf16 %v5670_v8, %v5658_v35  ;;  %v16707_v26 = vand.u32 4294901760, %v14993_v11  ;;  %v16704_v21 = vand.u32 4294901760, %v15012_v54 }
 0x5a6   : > { %18062 = vst [vmem:[#allocation111_spill] sm:$0xff] %v15043_v41  ;;  %18064 = vst [vmem:[#allocation112_spill] sm:$0xff] %v15048_v25  ;;  %v5699_v47 = vsub.f32 %v14952_v44, %v18066_v52  ;;  %v5705_v14 = vsub.f32 %v14965_v53, %v16702_v48  ;;  %v18067_v43 = vand.u32 4294901760, %v14970_v36  ;;  %v16703_v9 = vand.u32 4294901760, %v15017_v5  ;;  %10261 = vmatpush1.bf16.msra.mxu1 %v10260_v29 }
 0x5a7   : > { %v16705_v38 = vand.u32 4294901760, %v15036_v2  ;;  %v10264_v0 = vpack.c.bf16 %v5676_v50, %v5664_v61  ;;  %v10266_v23 = vpack.c.bf16 %v5694_v22, %v5682_v45  ;;  %v5688_v6 = vand.u32 4294901760, %v5687_v16  ;;  %10263 = vmatprep.subr.bf16.mxu1 %v10262_v27 }
 0x5a8   : > { %v5717_v46 = vsub.f32 %v14970_v36, %v18067_v43  ;;  %v5700_v35 = vand.u32 4294901760, %v5699_v47  ;;  %v5711_v8 = vsub.f32 %v14993_v11, %v16707_v26  ;;  %v5723_v17 = vsub.f32 %v15012_v54, %v16704_v21  ;;  %v18071_v26 = vld [vmem:[#allocation50_spill] sm:$0xff] }
 0x5a9   : > { %v16706_v28 = vand.u32 4294901760, %v15043_v41  ;;  %v16708_v52 = vand.u32 4294901760, %v15048_v25  ;;  %v5706_v43 = vand.u32 4294901760, %v5705_v14  ;;  %v5729_v61 = vsub.f32 %v15017_v5, %v16703_v9 }
 0x5aa   : > { %v5718_v48 = vand.u32 4294901760, %v5717_v46  ;;  %v5741_v50 = vsub.f32 %v15036_v2, %v16705_v38  ;;  %v10268_v45 = vpack.c.bf16 %v5700_v35, %v5688_v6  ;;  %10265 = vmatpush1.bf16.msra.mxu1 %v10264_v0  ;;  %v5712_v22 = vand.u32 4294901760, %v5711_v8  ;;  %v18068_v35 = vld [vmem:[#allocation47_spill] sm:$0xff]  ;;  %v18069_v8 = vld [vmem:[#allocation48_spill] sm:$0xff] }
 0x5ab   : > { %v5724_v16 = vand.u32 4294901760, %v5723_v17  ;;  %v5735_v47 = vsub.f32 %v15043_v41, %v16706_v28  ;;  %v5747_v29 = vsub.f32 %v15048_v25, %v16708_v52  ;;  %10267 = vmatprep.subr.bf16.mxu1 %v10266_v23  ;;  %v5730_v14 = vand.u32 4294901760, %v5729_v61  ;;  %v18070_v28 = vld [vmem:[#allocation195_spill] sm:$0xff]  ;;  %v18073_v23 = vld [vmem:[#allocation54_spill] sm:$0xff] }
 0x5ac   : > { %v10270_v27 = vpack.c.bf16 %v5718_v48, %v5706_v43  ;;  %v5742_v46 = vand.u32 4294901760, %v5741_v50  ;;  %v10278_v17 = vpack.c.bf16 %v18069_v8, %v18068_v35  ;;  %v10280_v52 = vpack.c.bf16 %v18071_v26, %v18070_v28  ;;  %v18072_v48 = vld [vmem:[#allocation51_spill] sm:$0xff]  ;;  %v18074_v61 = vld [vmem:[#allocation58_spill] sm:$0xff]  ;;  %v18075_v50 = vld [vmem:[#allocation60_spill] sm:$0xff] }
 0x5ad   : > { %v10272_v9 = vpack.c.bf16 %v5724_v16, %v5712_v22  ;;  %v5736_v21 = vand.u32 4294901760, %v5735_v47  ;;  %v5748_v38 = vand.u32 4294901760, %v5747_v29  ;;  %v10282_v43 = vpack.c.bf16 %v18073_v23, %v18072_v48  ;;  %v18078_v22 = vld [vmem:[#allocation66_spill] sm:$0xff] }
 0x5ae   : > { %10269 = vmatpush1.bf16.msra.mxu1 %v10268_v45  ;;  %v10274_v0 = vpack.c.bf16 %v5742_v46, %v5730_v14  ;;  %v10284_v45 = vpack.c.bf16 %v18075_v50, %v18074_v61  ;;  %v10288_v16 = vpack.c.bf16 %v14419_v19, %v18078_v22  ;;  %v10290_v47 = vpack.c.bf16 %v14429_v24, %v14424_v51  ;;  %v18081_v14 = vld [vmem:[#allocation19_spill] sm:$0xff] }
 0x5af   : > { %10271 = vmatprep.subr.bf16.mxu1 %v10270_v27  ;;  %v10276_v6 = vpack.c.bf16 %v5748_v38, %v5736_v21  ;;  %v18077_v21 = vld [vmem:[#allocation62_spill] sm:$0xff]  ;;  %v18080_v27 = vld [vmem:[#allocation72_spill] sm:$0xff] }
 0x5b0   : > { %v10286_v38 = vpack.c.bf16 %v18077_v21, %v14400_v58  ;;  %v10294_v46 = vpack.c.bf16 %v18081_v14, %v18080_v27 }
 0x5b2   : > { %10273 = vmatpush1.bf16.msra.mxu1 %v10272_v9  ;;  %v18076_v9 = vld [vmem:[#allocation87_spill] sm:$0xff] }
 0x5b3   : > { %10275 = vmatprep.subr.bf16.mxu1 %v10274_v0  ;;  %v10296_v0 = vpack.c.bf16 %v14483_v33, %v14478_v4 }
 0x5b6   : > { %10277 = vmatpush1.bf16.msra.mxu1 %v10276_v6  ;;  %v18082_v6 = vld [vmem:[#allocation76_spill] sm:$0xff] }
 0x5b7   : > { %10279 = vmatprep.subr.bf16.mxu1 %v10278_v17  ;;  %v10298_v17 = vpack.c.bf16 %v18082_v6, %v14492_v30 }
 0x5b9   : > { %5753 = vmatmul.mubr.f32.vlgmr.msra.gmra.mrb[6].mxu1 %v18024_v60 }
 0x5ba   : > { %10281 = vmatpush1.bf16.msra.mxu1 %v10280_v52  ;;  %5953 = vmatprep.mubr.f32.mxu1 %v18076_v9  ;;  %v18079_v52 = vld [vmem:[#allocation69_spill] sm:$0xff]  ;;  %v18084_v9 = vld [vmem:[#allocation20_spill] sm:$0xff] }
 0x5bb   : > { %10283 = vmatprep.subr.bf16.mxu1 %v10282_v43  ;;  %v10292_v29 = vpack.c.bf16 %v18079_v52, %v14434_v56  ;;  %v18083_v43 = vld [vmem:[#allocation77_spill] sm:$0xff] }
 0x5be   : > { %10285 = vmatpush1.bf16.msra.mxu1 %v10284_v45  ;;  %v10300_v45 = vpack.c.bf16 %v18083_v43, %v14502_v15 }
 0x5bf   : > { %10287 = vmatprep.subr.bf16.mxu1 %v10286_v38  ;;  %v18085_v38 = vld [vmem:[#allocation84_spill] sm:$0xff] }
 0x5c2   : > { %10289 = vmatpush1.bf16.msra.mxu1 %v10288_v16  ;;  %v10302_v16 = vpack.c.bf16 %v18085_v38, %v18084_v9  ;;  %v18089_v38 = vld [vmem:[#allocation96_spill] sm:$0xff] }
 0x5c3   : > { %10291 = vmatprep.subr.bf16.mxu1 %v10290_v47  ;;  %v18086_v47 = vld [vmem:[#allocation25_spill] sm:$0xff] }
 0x5c4   : > { %v10304_v60 = vpack.c.bf16 %v14551_v3, %v18086_v47 }
 0x5c6   : > { %10293 = vmatpush1.bf16.msra.mxu1 %v10292_v29  ;;  %v10306_v29 = vpack.c.bf16 %v14561_v34, %v14556_v18 }
 0x5c7   : > { %10295 = vmatprep.subr.bf16.mxu1 %v10294_v46  ;;  %v10308_v46 = vpack.c.bf16 %v18020_v13, %v18019_v62 }
 0x5ca   : > { %10297 = vmatpush1.bf16.msra.mxu1 %v10296_v0  ;;  %v18087_v0 = vld [vmem:[#allocation154_spill] sm:$0xff] }
 0x5cb   : > { %10299 = vmatprep.subr.bf16.mxu1 %v10298_v17  ;;  %v10310_v43 = vpack.c.bf16 %v18087_v0, %v14586_v55  ;;  %v10312_v17 = vpack.c.bf16 %v14621_v37, %v14616_v1 }
 0x5ce   : > { %10301 = vmatpush1.bf16.msra.mxu1 %v10300_v45  ;;  %v18088_v45 = vld [vmem:[#allocation157_spill] sm:$0xff] }
 0x5cf   : > { %10303 = vmatprep.subr.bf16.mxu1 %v10302_v16  ;;  %v10314_v3 = vpack.c.bf16 %v18089_v38, %v18088_v45  ;;  %v10316_v16 = vpack.c.bf16 %v14703_v12, %v14674_v42 }
 0x5d2   : > { %10305 = vmatpush1.bf16.msra.mxu1 %v10304_v60  ;;  %v18090_v60 = vld [vmem:[#allocation101_spill] sm:$0xff] }
 0x5d3   : > { %10307 = vmatprep.subr.bf16.mxu1 %v10306_v29  ;;  %v10318_v13 = vpack.c.bf16 %v18090_v60, %v14718_v31  ;;  %v18091_v29 = vld [vmem:[#allocation166_spill] sm:$0xff] }
 0x5d4   : > { %v10320_v0 = vpack.c.bf16 %v14759_v40, %v18091_v29 }
 0x5d6   : > { %10309 = vmatpush1.bf16.msra.mxu1 %v10308_v46  ;;  %v10322_v46 = vpack.c.bf16 %v14807_v32, %v14801_v10 }
 0x5d7   : > { %10311 = vmatprep.subr.bf16.mxu1 %v10310_v43  ;;  %v10324_v43 = vpack.c.bf16 %v14844_v49, %v14828_v7 }
 0x5da   : > { %10313 = vmatpush1.bf16.msra.mxu1 %v10312_v17  ;;  %v18092_v17 = vld [vmem:[#allocation105_spill] sm:$0xff] }
 0x5db   : > { %10315 = vmatprep.subr.bf16.mxu1 %v10314_v3  ;;  %v10326_v12 = vpack.c.bf16 %v18092_v17, %v14859_v59  ;;  %v10328_v3 = vpack.c.bf16 %v14908_v20, %v14888_v57 }
 0x5de   : > { %10317 = vmatpush1.bf16.msra.mxu1 %v10316_v16  ;;  %v18093_v16 = vld [vmem:[#allocation40_spill] sm:$0xff] }
 0x5df   : > { %10319 = vmatprep.subr.bf16.mxu1 %v10318_v13  ;;  %v10330_v40 = vpack.c.bf16 %v14932_v39, %v18093_v16  ;;  %v10332_v13 = vpack.c.bf16 %v14952_v44, %v14947_v63  ;;  %v18096_v44 = vld [vmem:[#allocation116_spill] sm:$0xff] }
 0x5e2   : > { %10321 = vmatpush1.bf16.msra.mxu1 %v10320_v0  ;;  %v10334_v0 = vpack.c.bf16 %v14970_v36, %v14965_v53  ;;  %v18098_v36 = vld [vmem:[#allocation41_spill] sm:$0xff] }
 0x5e3   : > { %10323 = vmatprep.subr.bf16.mxu1 %v10322_v46  ;;  %v10336_v46 = vpack.c.bf16 %v15012_v54, %v14993_v11  ;;  %v18100_v54 = vld [vmem:[#allocation49_spill] sm:$0xff] }
 0x5e6   : > { %10325 = vmatpush1.bf16.msra.mxu1 %v10324_v43  ;;  %v10338_v43 = vpack.c.bf16 %v15036_v2, %v15017_v5  ;;  %v18102_v2 = vld [vmem:[#allocation55_spill] sm:$0xff]  ;;  %v18109_v5 = vld [vmem:[#allocation165_spill] sm:$0xff] }
 0x5e7   : > { %10327 = vmatprep.subr.bf16.mxu1 %v10326_v12  ;;  %v10340_v12 = vpack.c.bf16 %v15048_v25, %v15043_v41  ;;  %v18108_v41 = vld [vmem:[#allocation113_spill] sm:$0xff] }
 0x5ea   : > { %10329 = vmatpush1.bf16.msra.mxu1 %v10328_v3  ;;  %v18094_v3 = vld [vmem:[#allocation117_spill] sm:$0xff] }
 0x5eb   : > { %10331 = vmatprep.subr.bf16.mxu1 %v10330_v40  ;;  %v18095_v40 = vld [vmem:[#allocation122_spill] sm:$0xff] }
 0x5ee   : > { %10333 = vmatpush1.bf16.msra.mxu1 %v10332_v13  ;;  %v18097_v13 = vld [vmem:[#allocation94_spill] sm:$0xff] }
 0x5ef   : > { %10335 = vmatprep.subr.bf16.mxu1 %v10334_v0  ;;  %v18099_v0 = vld [vmem:[#allocation46_spill] sm:$0xff] }
 0x5f2   : > { %10337 = vmatpush1.bf16.msra.mxu1 %v10336_v46  ;;  %v18101_v46 = vld [vmem:[#allocation52_spill] sm:$0xff] }
 0x5f3   : > { %10339 = vmatprep.subr.bf16.mxu1 %v10338_v43  ;;  %v18103_v43 = vld [vmem:[#allocation59_spill] sm:$0xff] }
 0x5f6   : > { %10341 = vmatpush1.bf16.msra.mxu1 %v10340_v12  ;;  %v18104_v12 = vld [vmem:[#allocation61_spill] sm:$0xff] }
 0x5f7   : > { %10343 = vmatprep.subr.bf16.mxu1 %v18094_v3  ;;  %v18105_v3 = vld [vmem:[#allocation127_spill] sm:$0xff] }
 0x5f9   : > { %5956 = vmatmul.mubr.f32.vlgmr.msra.gmra.mrb[6].mxu1 %v18095_v40  ;;  %v18106_v40 = vld [vmem:[#allocation139_spill] sm:$0xff] }
 0x5fa   : > { %10345 = vmatpush1.bf16.msra.mxu1 %v18096_v44  ;;  %6093 = vmatprep.mubr.f32.mxu1 %v18097_v13  ;;  %v18107_v13 = vld [vmem:[#allocation114_spill] sm:$0xff] }
 0x5fb   : > { %10347 = vmatprep.subr.bf16.mxu1 %v18098_v36 }
 0x5fe   : > { %10349 = vmatpush1.bf16.msra.mxu1 %v18099_v0 }
 0x5ff   : > { %10351 = vmatprep.subr.bf16.mxu1 %v18100_v54  ;;  %v5216_v44 = vpop.f32.mrb[8].mxu1  ;;  %v18110_v54 = vld [vmem:[#allocation168_spill] sm:$0xff] }
 0x600   : > { %v11118_v25 = vadd.f32 %v18107_v13, %v5216_v44  ;;  %v5218_v36 = vpop.f32.mrb[9].mxu1  ;;  %v18117_v44 = vld [vmem:[#allocation53_spill] sm:$0xff]  ;;  %v18118_v13 = vld [vmem:[#allocation56_spill] sm:$0xff] }
 0x601   : > { %v11122_v0 = vadd.f32 %v18108_v41, %v5218_v36  ;;  %v18119_v36 = vld [vmem:[#allocation68_spill] sm:$0xff]  ;;  %v18120_v41 = vld [vmem:[#allocation70_spill] sm:$0xff] }
 0x602   : > { %10353 = vmatpush1.bf16.msra.mxu1 %v18101_v46  ;;  %v18111_v46 = vld [vmem:[#allocation173_spill] sm:$0xff] }
 0x603   : > { %10355 = vmatprep.subr.bf16.mxu1 %v18102_v2  ;;  %v18112_v2 = vld [vmem:[#allocation171_spill] sm:$0xff] }
 0x606   : > { %10357 = vmatpush1.bf16.msra.mxu1 %v18103_v43  ;;  %v18113_v43 = vld [vmem:[#allocation174_spill] sm:$0xff] }
 0x607   : > { %10359 = vmatprep.subr.bf16.mxu1 %v18104_v12  ;;  %v18114_v12 = vld [vmem:[#allocation177_spill] sm:$0xff] }
 0x60a   : > { %10361 = vmatpush1.bf16.msra.mxu1 %v18105_v3  ;;  %v18115_v3 = vld [vmem:[#allocation37_spill] sm:$0xff] }
 0x60b   : > { %10363 = vmatprep.subr.bf16.mxu1 %v18106_v40  ;;  %v18116_v40 = vld [vmem:[#allocation38_spill] sm:$0xff] }
 0x60e   : > { %10365 = vmatpush1.bf16.msra.mxu1 %v18109_v5  ;;  %v18136_v5 = vld [vmem:[#allocation126_spill] sm:$0xff] }
 0x60f   : > { %10367 = vmatprep.subr.bf16.mxu1 %v18110_v54  ;;  %v18121_v54 = vld [vmem:[#allocation21_spill] sm:$0xff] }
 0x612   : > { %10369 = vmatpush1.bf16.msra.mxu1 %v18111_v46  ;;  %v18122_v46 = vld [vmem:[#allocation24_spill] sm:$0xff] }
 0x613   : > { %10371 = vmatprep.subr.bf16.mxu1 %v18112_v2  ;;  %v18123_v2 = vld [vmem:[#allocation28_spill] sm:$0xff] }
 0x616   : > { %10373 = vmatpush1.bf16.msra.mxu1 %v18113_v43  ;;  %v18124_v43 = vld [vmem:[#allocation91_spill] sm:$0xff] }
 0x617   : > { %10375 = vmatprep.subr.bf16.mxu1 %v18114_v12  ;;  %v18125_v12 = vld [vmem:[#allocation95_spill] sm:$0xff] }
 0x61a   : > { %10377 = vmatpush1.bf16.msra.mxu1 %v18115_v3  ;;  %v18126_v3 = vld [vmem:[#allocation160_spill] sm:$0xff] }
 0x61b   : > { %10379 = vmatprep.subr.bf16.mxu1 %v18116_v40  ;;  %v18127_v40 = vld [vmem:[#allocation97_spill] sm:$0xff] }
 0x61e   : > { %10381 = vmatpush1.bf16.msra.mxu1 %v18117_v44  ;;  %v18128_v44 = vld [vmem:[#allocation163_spill] sm:$0xff] }
 0x61f   : > { %10383 = vmatprep.subr.bf16.mxu1 %v18118_v13 }
 0x622   : > { %10385 = vmatpush1.bf16.msra.mxu1 %v18119_v36  ;;  %v18129_v36 = vand.u32 4294901760, %v18068_v35  ;;  %v18137_v35 = vand.u32 4294901760, %v18074_v61  ;;  %v18144_v61 = vand.u32 4294901760, %v14424_v51  ;;  %v18150_v51 = vand.u32 4294901760, %v14478_v4 }
 0x623   : > { %10387 = vmatprep.subr.bf16.mxu1 %v18120_v41  ;;  %v18130_v41 = vand.u32 4294901760, %v18069_v8  ;;  %v18138_v8 = vand.u32 4294901760, %v18075_v50  ;;  %v18145_v50 = vand.u32 4294901760, %v14429_v24  ;;  %v18151_v24 = vand.u32 4294901760, %v14483_v33 }
 0x625   : > { %v10406_v13 = vpack.c.bf16 %v18130_v41, %v18129_v36  ;;  %v10412_v36 = vpack.c.bf16 %v18138_v8, %v18137_v35  ;;  %v18139_v41 = vld [vmem:[#allocation83_spill] sm:$0xff]  ;;  %v18157_v8 = vand.u32 4294901760, %v18084_v9  ;;  %v18165_v9 = vand.u32 4294901760, %v18019_v62 }
 0x626   : > { %10389 = vmatpush1.bf16.msra.mxu1 %v18121_v54  ;;  %v18131_v54 = vld [vmem:[#allocation102_spill] sm:$0xff]  ;;  %v18174_v62 = vand.u32 4294901760, %v18088_v45 }
 0x627   : > { %10391 = vmatprep.subr.bf16.mxu1 %v18122_v46  ;;  %v18132_v46 = vand.u32 4294901760, %v18070_v28 }
 0x62a   : > { %10393 = vmatpush1.bf16.msra.mxu1 %v18123_v2  ;;  %v18133_v2 = vand.u32 4294901760, %v18071_v26  ;;  %v18140_v26 = vand.u32 4294901760, %v14400_v58  ;;  %v18146_v58 = vand.u32 4294901760, %v14434_v56  ;;  %v18152_v56 = vand.u32 4294901760, %v14492_v30 }
 0x62b   : > { %10395 = vmatprep.subr.bf16.mxu1 %v18124_v43  ;;  %v18160_v30 = vand.u32 4294901760, %v18086_v47  ;;  %v18168_v47 = vand.u32 4294901760, %v14586_v55 }
 0x62c   : > { %v10408_v43 = vpack.c.bf16 %v18133_v2, %v18132_v46  ;;  %v18141_v2 = vand.u32 4294901760, %v18077_v21  ;;  %v10418_v46 = vpack.c.bf16 %v18145_v50, %v18144_v61  ;;  %v18147_v21 = vand.u32 4294901760, %v18079_v52  ;;  %v18166_v50 = vld [vmem:[#allocation150_spill] sm:$0xff] }
 0x62d   : > { %v18153_v52 = vand.u32 4294901760, %v18082_v6 }
 0x62e   : > { %10397 = vmatpush1.bf16.msra.mxu1 %v18125_v12  ;;  %v18134_v12 = vand.u32 4294901760, %v18072_v48  ;;  %v10414_v28 = vpack.c.bf16 %v18141_v2, %v18140_v26  ;;  %v18142_v48 = vand.u32 4294901760, %v18078_v22  ;;  %v18148_v22 = vand.u32 4294901760, %v18080_v27  ;;  %v18155_v27 = vld [vmem:[#allocation77_spill] sm:$0xff] }
 0x62f   : > { %10399 = vmatprep.subr.bf16.mxu1 %v18126_v3  ;;  %v18135_v3 = vand.u32 4294901760, %v18073_v23  ;;  %v18143_v23 = vand.u32 4294901760, %v14419_v19  ;;  %v18149_v19 = vand.u32 4294901760, %v18081_v14  ;;  %v18156_v35 = vand.u32 4294901760, %v18155_v27 }
 0x630   : > { %v18179_v27 = vand.u32 4294901760, %v14718_v31 }
 0x632   : > { %10401 = vmatpush1.bf16.msra.mxu1 %v18127_v40  ;;  %v10410_v40 = vpack.c.bf16 %v18135_v3, %v18134_v12  ;;  %v8986_v3 = vmul.f32 -1.442695, %v11118_v25  ;;  %v10420_v12 = vpack.c.bf16 %v18147_v21, %v18146_v58  ;;  %v10422_v25 = vpack.c.bf16 %v18149_v19, %v18148_v22  ;;  %v18169_v58 = vld [vmem:[#allocation154_spill] sm:$0xff] }
 0x633   : > { %10403 = vmatprep.subr.bf16.mxu1 %v18128_v44  ;;  %v18170_v21 = vand.u32 4294901760, %v18169_v58  ;;  %v18173_v19 = vld [vmem:[#allocation194_spill] sm:$0xff] }
 0x634   : > { %11308 = vpow2.f32 %v8986_v3  ;;  %v2073_v55 = vsub.s32 5, %v18173_v19 }
 0x636   : > { %10405 = vmatpush1.bf16.msra.mxu1 %v18131_v54 }
 0x637   : > { %10407 = vmatprep.subr.bf16.mxu1 %v10406_v13  ;;  %v18154_v13 = vand.u32 4294901760, %v14502_v15  ;;  %v18163_v15 = vand.u32 4294901760, %v14556_v18  ;;  %v18171_v18 = vand.u32 4294901760, %v14616_v1 }
 0x639   : > { %6097 = vmatmul.mubr.f32.vlgmr.msra.gmra.mrb[6].mxu1 %v18136_v5  ;;  %v10416_v5 = vpack.c.bf16 %v18143_v23, %v18142_v48  ;;  %v10428_v14 = vpack.c.bf16 %v18156_v35, %v18154_v13  ;;  %v18164_v23 = vand.u32 4294901760, %v14561_v34  ;;  %v18172_v34 = vand.u32 4294901760, %v14621_v37 }
 0x63a   : > { %10409 = vmatpush1.bf16.msra.mxu1 %v10408_v43  ;;  %6360 = vmatprep.mubr.f32.mxu1 %v18139_v41  ;;  %v8987_v43 = vmul.f32 -1.442695, %v11122_v0  ;;  %v10424_v0 = vpack.c.bf16 %v18151_v24, %v18150_v51  ;;  %v18175_v51 = vand.u32 4294901760, %v18089_v38  ;;  %v15282_v38 = vld [vmem:[%s16085_s9 + $0x3] sm:$0x3f]  ;;  %v18180_v35 = vand.u32 4294901760, %v18090_v60 }
 0x63b   : > { %10411 = vmatprep.subr.bf16.mxu1 %v10410_v40  ;;  %v10426_v40 = vpack.c.bf16 %v18153_v52, %v18152_v56  ;;  %v10440_v22 = vpack.c.bf16 %v18172_v34, %v18171_v18  ;;  %v18176_v56 = vand.u32 4294901760, %v14674_v42  ;;  %v18177_v52 = vld [vmem:[#allocation99_spill] sm:$0xff]  ;;  %v18185_v60 = vand.u32 4294901760, %v14801_v10 }
 0x63c   : > { %11310 = vpow2.f32 %v8987_v43  ;;  %v10442_v24 = vpack.c.bf16 %v18175_v51, %v18174_v62  ;;  %v18191_v10 = vand.u32 4294901760, %v18092_v17  ;;  %v18193_v18 = vand.u32 4294901760, %v14908_v20  ;;  %v18197_v62 = vld [vmem:[#allocation107_spill] sm:$0xff] }
 0x63d   : > { %v18199_v17 = vand.u32 4294901760, %v14965_v53  ;;  %v18202_v20 = vand.u32 4294901760, %v14993_v11  ;;  %v18214_v11 = vld [vmem:[#allocation118_spill] sm:$0xff] }
 0x63e   : > { %10413 = vmatpush1.bf16.msra.mxu1 %v10412_v36  ;;  %v18158_v36 = vld [vmem:[#allocation84_spill] sm:$0xff]  ;;  %v11309_v33 = vpop.eup %11308 }
 0x63f   : > { %10415 = vmatprep.subr.bf16.mxu1 %v10414_v28  ;;  %v18159_v4 = vand.u32 4294901760, %v18158_v36  ;;  %v18161_v28 = vld [vmem:[#allocation26_spill] sm:$0xff]  ;;  %v7797_v3 = vadd.f32 1.0, %v11309_v33 }
 0x640   : > { %v18162_v6 = vand.u32 4294901760, %v18161_v28 }
 0x641   : > { %v10430_v26 = vpack.c.bf16 %v18159_v4, %v18157_v8  ;;  %11312 = vrcp.f32 %v7797_v3  ;;  %v2074_v8 = vrot.slane %v15282_v38, %v2073_v55 }
 0x642   : > { %10417 = vmatpush1.bf16.msra.mxu1 %v10416_v5  ;;  %v10432_v48 = vpack.c.bf16 %v18162_v6, %v18160_v30  ;;  %v10434_v5 = vpack.c.bf16 %v18164_v23, %v18163_v15  ;;  %v18182_v30 = vld [vmem:[#allocation103_spill] sm:$0xff] }
 0x643   : > { %10419 = vmatprep.subr.bf16.mxu1 %v10418_v46  ;;  %v18167_v46 = vand.u32 4294901760, %v18166_v50  ;;  %v18183_v28 = vand.u32 4294901760, %v18182_v30  ;;  %v18184_v15 = vld [vmem:[#allocation183_spill] sm:$0xff]  ;;  %v18222_v30 = vld [vmem:[#allocation61_spill] sm:$0xff] }
 0x645   : > { %v10436_v43 = vpack.c.bf16 %v18167_v46, %v18165_v9 }
 0x646   : > { %10421 = vmatpush1.bf16.msra.mxu1 %v10420_v12  ;;  %v11311_v2 = vpop.eup %11310  ;;  %v10438_v12 = vpack.c.bf16 %v18170_v21, %v18168_v47  ;;  %v18189_v47 = vand.u32 4294901760, %v14844_v49  ;;  %v18190_v21 = vand.u32 4294901760, %v14859_v59  ;;  %v18196_v49 = vand.u32 4294901760, %v14947_v63 }
 0x647   : > { %10423 = vmatprep.subr.bf16.mxu1 %v10422_v25  ;;  %v7798_v61 = vadd.f32 1.0, %v11311_v2  ;;  %v2069_v25 = vsub.s32 4, %v18173_v19  ;;  %v18181_v2 = vand.u32 4294901760, %v18091_v29  ;;  %v18188_v29 = vand.u32 4294901760, %v14828_v7 }
 0x648   : > { %v18195_v7 = vand.u32 4294901760, %v14932_v39  ;;  %v18198_v59 = vand.u32 4294901760, %v18197_v62  ;;  %v18205_v39 = vld [vmem:[#allocation45_spill] sm:$0xff] }
 0x649   : > { %11314 = vrcp.f32 %v7798_v61  ;;  %v2070_v13 = vrot.slane %v15282_v38, %v2069_v25  ;;  %v10448_v6 = vpack.c.bf16 %v18183_v28, %v18181_v2  ;;  %v18187_v61 = vld [vmem:[#allocation185_spill] sm:$0xff]  ;;  %v10452_v58 = vpack.c.bf16 %v18189_v47, %v18188_v29  ;;  %v18221_v2 = vld [vmem:[#allocation59_spill] sm:$0xff]  ;;  %v18236_v29 = vld [vmem:[#allocation70_spill] sm:$0xff] }
 0x64a   : > { %10425 = vmatpush1.bf16.msra.mxu1 %v10424_v0  ;;  %v15271_v0 = vld [vmem:[%s16085_s9 + $0x9] sm:$0x3f]  ;;  %v11128_v9 = vadd.f32 %v18187_v61, %v2074_v8  ;;  %v10460_v51 = vpack.c.bf16 %v18198_v59, %v18196_v49  ;;  %v18215_v8 = vld [vmem:[#allocation116_spill] sm:$0xff]  ;;  %v18223_v28 = vld [vmem:[#allocation127_spill] sm:$0xff] }
 0x64b   : > { %10427 = vmatprep.subr.bf16.mxu1 %v10426_v40  ;;  %v3926_v1 = vrot.slane %v15271_v0, %v2069_v25  ;;  %v3930_v37 = vrot.slane %v15271_v0, %v2073_v55  ;;  %v18178_v40 = vand.u32 4294901760, %v18177_v52  ;;  %v11127_v23 = vadd.f32 %v18184_v15, %v2070_v13  ;;  %v18207_v52 = vld [vmem:[#allocation175_spill] sm:$0xff]  ;;  %v18227_v15 = vld [vmem:[#allocation173_spill] sm:$0xff] }
 0x64c   : > { %v18208_v63 = vand.u32 4294901760, %v18207_v52  ;;  %v18233_v61 = vld [vmem:[#allocation53_spill] sm:$0xff] }
 0x64d   : > { %v10444_v45 = vpack.c.bf16 %v18178_v40, %v18176_v56  ;;  %v18206_v56 = vand.u32 4294901760, %v18205_v39  ;;  %v18237_v47 = vld [vmem:[#allocation21_spill] sm:$0xff] }
 0x64e   : > { %10429 = vmatpush1.bf16.msra.mxu1 %v10428_v14  ;;  %v10446_v14 = vpack.c.bf16 %v18180_v35, %v18179_v27  ;;  %v18211_v27 = vld [vmem:[#allocation112_spill] sm:$0xff]  ;;  %v7857_v52 = vld [vmem:[%s16084_s8 + $0xa0] sm:$0xff] }
 0x64f   : > { %10431 = vmatprep.subr.bf16.mxu1 %v10430_v26  ;;  %v11313_v26 = vpop.eup %11312  ;;  %v10466_v40 = vpack.c.bf16 %v18208_v63, %v18206_v56  ;;  %v18212_v53 = vand.u32 4294901760, %v18211_v27  ;;  %v7858_v63 = vld [vmem:[%s16084_s8 + $0xa8] sm:$0xff] }
 0x650   : > { %v7842_v27 = vld [vmem:[%s16084_s8 + $0x28] sm:$0xff] }
 0x652   : > { %10433 = vmatpush1.bf16.msra.mxu1 %v10432_v48 }
 0x653   : > { %10435 = vmatprep.subr.bf16.mxu1 %v10434_v5  ;;  %v11315_v48 = vpop.eup %11314  ;;  %v18186_v5 = vand.u32 4294901760, %v14807_v32  ;;  %v10454_v32 = vpack.c.bf16 %v18191_v10, %v18190_v21  ;;  %v18239_v21 = vld [vmem:[#allocation28_spill] sm:$0xff]  ;;  %v18240_v10 = vld [vmem:[#allocation91_spill] sm:$0xff] }
 0x655   : > { %v10450_v3 = vpack.c.bf16 %v18186_v5, %v18185_v60  ;;  %v18230_v60 = vld [vmem:[#allocation177_spill] sm:$0xff] }
 0x656   : > { %10437 = vmatpush1.bf16.msra.mxu1 %v10436_v43  ;;  %v18231_v5 = vld [vmem:[#allocation37_spill] sm:$0xff] }
 0x657   : > { %10439 = vmatprep.subr.bf16.mxu1 %v10438_v12  ;;  %v18192_v12 = vand.u32 4294901760, %v14888_v57 }
 0x659   : > { %v10456_v34 = vpack.c.bf16 %v18193_v18, %v18192_v12  ;;  %v18242_v12 = vld [vmem:[#allocation160_spill] sm:$0xff]  ;;  %v18243_v18 = vld [vmem:[#allocation97_spill] sm:$0xff] }
 0x65a   : > { %10441 = vmatpush1.bf16.msra.mxu1 %v10440_v22  ;;  %v18194_v22 = vand.u32 4294901760, %v18093_v16 }
 0x65b   : > { %10443 = vmatprep.subr.bf16.mxu1 %v10442_v24  ;;  %v18200_v24 = vld [vmem:[#allocation172_spill] sm:$0xff] }
 0x65c   : > { %v7784_v36 = vpop.f32.mrb[10].mxu0  ;;  %v10458_v25 = vpack.c.bf16 %v18195_v7, %v18194_v22  ;;  %v18201_v57 = vand.u32 4294901760, %v18200_v24  ;;  %v15383_v22 = vld [vmem:[%s16084_s8 + $0x88] sm:$0xff]  ;;  %v15419_v24 = vld [vmem:[%s16084_s8 + $0x98] sm:$0xff] }
 0x65d   : > { %v11129_v42 = vadd.f32 %v7784_v36, %v3926_v1  ;;  %v7786_v4 = vpop.f32.mrb[11].mxu0  ;;  %v18203_v1 = vld [vmem:[#allocation109_spill] sm:$0xff] }
 0x65e   : > { %v11130_v33 = vadd.f32 %v7786_v4, %v3930_v37  ;;  %10445 = vmatpush1.bf16.msra.mxu1 %v10444_v45  ;;  %v10462_v55 = vpack.c.bf16 %v18201_v57, %v18199_v17  ;;  %v18204_v16 = vand.u32 4294901760, %v18203_v1  ;;  %v18209_v45 = vld [vmem:[#allocation111_spill] sm:$0xff]  ;;  %v18216_v36 = vld [vmem:[#allocation41_spill] sm:$0xff]  ;;  %v7840_v1 = vld [vmem:[%s16084_s8 + $0x18] sm:$0xff] }
 0x65f   : > { %v7817_v31 = vmul.f32 %v11313_v26, %v11129_v42  ;;  %10447 = vmatprep.subr.bf16.mxu1 %v10446_v14  ;;  %v18210_v13 = vand.u32 4294901760, %v18209_v45  ;;  %v18213_v14 = vld [vmem:[#allocation117_spill] sm:$0xff]  ;;  %v18217_v42 = vld [vmem:[#allocation46_spill] sm:$0xff]  ;;  %v18219_v26 = vld [vmem:[#allocation52_spill] sm:$0xff]  ;;  %v7940_v45 = vand.u32 4294901760, %v7858_v63 }
 0x660   : > { %v7818_v50 = vmul.f32 %v11315_v48, %v11130_v33  ;;  %v10464_v37 = vpack.c.bf16 %v18204_v16, %v18202_v20  ;;  %v18218_v4 = vld [vmem:[#allocation49_spill] sm:$0xff]  ;;  %v18220_v33 = vld [vmem:[#allocation55_spill] sm:$0xff] }
 0x661   : > { %v15300_v46 = vadd.f32 %v11127_v23, %v7817_v31  ;;  %v10468_v35 = vpack.c.bf16 %v18212_v53, %v18210_v13  ;;  %v18225_v48 = vld [vmem:[#allocation165_spill] sm:$0xff]  ;;  %v18228_v23 = vld [vmem:[#allocation171_spill] sm:$0xff]  ;;  %v18229_v31 = vld [vmem:[#allocation174_spill] sm:$0xff] }
 0x662   : > { %v15302_v43 = vadd.f32 %v11128_v9, %v7818_v50  ;;  %10449 = vmatpush1.bf16.msra.mxu1 %v10448_v6  ;;  %v18224_v6 = vld [vmem:[#allocation139_spill] sm:$0xff]  ;;  %v18234_v9 = vld [vmem:[#allocation56_spill] sm:$0xff]  ;;  %v7841_v13 = vld [vmem:[%s16084_s8 + $0x20] sm:$0xff] }
 0x663   : > { %10451 = vmatprep.subr.bf16.mxu1 %v10450_v3  ;;  %v18232_v3 = vld [vmem:[#allocation38_spill] sm:$0xff]  ;;  %v18235_v50 = vld [vmem:[#allocation68_spill] sm:$0xff]  ;;  %v15414_v17 = vld [vmem:[%s16084_s8 + $0x90] sm:$0xff]  ;;  %v7889_v53 = vand.u32 4294901760, %v7841_v13 }
 0x664   : > { %v7931_v57 = vand.u32 4294901760, %v15414_v17  ;;  %v7839_v20 = vld [vmem:[%s16084_s8 + $0x10] sm:$0xff] }
 0x665   : > { %v7883_v16 = vand.u32 4294901760, %v7839_v20 }
 0x666   : > { %10453 = vmatpush1.bf16.msra.mxu1 %v10452_v58  ;;  %v18238_v58 = vld [vmem:[#allocation24_spill] sm:$0xff] }
 0x667   : > { %10455 = vmatprep.subr.bf16.mxu1 %v10454_v32  ;;  %v18241_v32 = vld [vmem:[#allocation95_spill] sm:$0xff] }
 0x66a   : > { %10457 = vmatpush1.bf16.msra.mxu1 %v10456_v34  ;;  %v15378_v34 = vld [vmem:[%s16084_s8 + $0x80] sm:$0xff] }
 0x66b   : > { %10459 = vmatprep.subr.bf16.mxu1 %v10458_v25  ;;  %v7925_v7 = vand.u32 4294901760, %v15378_v34  ;;  %v7928_v25 = vand.u32 4294901760, %v15383_v22 }
 0x66d   : > { %v15403_v59 = vpack.c.bf16 %v7928_v25, %v7925_v7 }
 0x66e   : > { %10461 = vmatpush1.bf16.msra.mxu1 %v10460_v51 }
 0x66f   : > { %10463 = vmatprep.subr.bf16.mxu1 %v10462_v55  ;;  %18244 = vst [vmem:[#allocation119_spill] sm:$0xff] %v15403_v59  ;;  %10919 = vmatprep.subr.bf16.mxu0 %v15403_v59  ;;  %v7934_v55 = vand.u32 4294901760, %v15419_v24 }
 0x671   : > { %v15431_v39 = vpack.c.bf16 %v7934_v55, %v7931_v57 }
 0x672   : > { %10465 = vmatpush1.bf16.msra.mxu1 %v10464_v37  ;;  %v7886_v37 = vand.u32 4294901760, %v7840_v1 }
 0x673   : > { %10467 = vmatprep.subr.bf16.mxu1 %v10466_v40  ;;  %18246 = vst [vmem:[#allocation123_spill] sm:$0xff] %v15431_v39  ;;  %v7937_v40 = vand.u32 4294901760, %v7857_v52 }
 0x674   : > { %v15433_v56 = vpack.c.bf16 %v7886_v37, %v7883_v16 }
 0x676   : > { %10469 = vmatpush1.bf16.msra.mxu1 %v10468_v35  ;;  %18247 = vst [vmem:[#allocation125_spill] sm:$0xff] %v15433_v56  ;;  %v7892_v35 = vand.u32 4294901760, %v7842_v27 }
 0x677   : > { %10471 = vmatprep.subr.bf16.mxu1 %v18213_v14  ;;  %v15449_v14 = vpack.c.bf16 %v7940_v45, %v7937_v40 }
 0x679   : > { %6362 = vmatmul.mubr.f32.vlgmr.msra.gmra.mrb[6].mxu1 %v18214_v11  ;;  %18248 = vst [vmem:[#allocation31_spill] sm:$0xff] %v15449_v14 }
 0x67a   : > { %10473 = vmatpush1.bf16.msra.mxu1 %v18215_v8  ;;  %6497 = vmatprep.mubr.f32.mxu1 %v18139_v41  ;;  %v18226_v41 = vld [vmem:[#allocation168_spill] sm:$0xff]  ;;  %v7859_v8 = vld [vmem:[%s16084_s8 + $0xb0] sm:$0xff] }
 0x67b   : > { %10475 = vmatprep.subr.bf16.mxu1 %v18216_v36  ;;  %v7860_v36 = vld [vmem:[%s16084_s8 + $0xb8] sm:$0xff] }
 0x67e   : > { %10477 = vmatpush1.bf16.msra.mxu1 %v18217_v42  ;;  %v7943_v42 = vand.u32 4294901760, %v7859_v8 }
 0x67f   : > { %10479 = vmatprep.subr.bf16.mxu1 %v18218_v4  ;;  %v7946_v4 = vand.u32 4294901760, %v7860_v36 }
 0x682   : > { %10481 = vmatpush1.bf16.msra.mxu1 %v18219_v26  ;;  %v7843_v26 = vld [vmem:[%s16084_s8 + $0x30] sm:$0xff] }
 0x683   : > { %10483 = vmatprep.subr.bf16.mxu1 %v18220_v33  ;;  %v7844_v33 = vld [vmem:[%s16084_s8 + $0x38] sm:$0xff] }
 0x686   : > { %10485 = vmatpush1.bf16.msra.mxu1 %v18221_v2  ;;  %v7895_v2 = vand.u32 4294901760, %v7843_v26 }
 0x687   : > { %10487 = vmatprep.subr.bf16.mxu1 %v18222_v30  ;;  %v7898_v30 = vand.u32 4294901760, %v7844_v33 }
 0x68a   : > { %10489 = vmatpush1.bf16.msra.mxu1 %v18223_v28  ;;  %v15467_v28 = vpack.c.bf16 %v7946_v4, %v7943_v42 }
 0x68b   : > { %10491 = vmatprep.subr.bf16.mxu1 %v18224_v6  ;;  %v15469_v6 = vpack.c.bf16 %v7898_v30, %v7895_v2 }
 0x68c   : > { %18250 = vst [vmem:[#allocation64_spill] sm:$0xff] %v15467_v28 }
 0x68d   : > { %18251 = vst [vmem:[#allocation133_spill] sm:$0xff] %v15469_v6 }
 0x68e   : > { %10493 = vmatpush1.bf16.msra.mxu1 %v18225_v48  ;;  %v7861_v48 = vld [vmem:[%s16084_s8 + $0xc0] sm:$0xff] }
 0x68f   : > { %10495 = vmatprep.subr.bf16.mxu1 %v18226_v41  ;;  %v7862_v41 = vld [vmem:[%s16084_s8 + $0xc8] sm:$0xff] }
 0x692   : > { %10497 = vmatpush1.bf16.msra.mxu1 %v18227_v15  ;;  %v7949_v15 = vand.u32 4294901760, %v7861_v48 }
 0x693   : > { %10499 = vmatprep.subr.bf16.mxu1 %v18228_v23  ;;  %v7952_v23 = vand.u32 4294901760, %v7862_v41 }
 0x696   : > { %10501 = vmatpush1.bf16.msra.mxu1 %v18229_v31  ;;  %v7845_v31 = vld [vmem:[%s16084_s8 + $0x40] sm:$0xff] }
 0x697   : > { %10503 = vmatprep.subr.bf16.mxu1 %v18230_v60  ;;  %v7846_v60 = vld [vmem:[%s16084_s8 + $0x48] sm:$0xff] }
 0x69a   : > { %10505 = vmatpush1.bf16.msra.mxu1 %v18231_v5  ;;  %v7901_v5 = vand.u32 4294901760, %v7845_v31 }
 0x69b   : > { %10507 = vmatprep.subr.bf16.mxu1 %v18232_v3  ;;  %v7904_v3 = vand.u32 4294901760, %v7846_v60 }
 0x69e   : > { %10509 = vmatpush1.bf16.msra.mxu1 %v18233_v61  ;;  %v15485_v61 = vpack.c.bf16 %v7952_v23, %v7949_v15 }
 0x69f   : > { %10511 = vmatprep.subr.bf16.mxu1 %v18234_v9  ;;  %v15487_v9 = vpack.c.bf16 %v7904_v3, %v7901_v5 }
 0x6a0   : > { %18252 = vst [vmem:[#allocation134_spill] sm:$0xff] %v15485_v61 }
 0x6a1   : > { %18253 = vst [vmem:[#allocation67_spill] sm:$0xff] %v15487_v9 }
 0x6a2   : > { %10513 = vmatpush1.bf16.msra.mxu1 %v18235_v50  ;;  %v7863_v50 = vld [vmem:[%s16084_s8 + $0xd0] sm:$0xff] }
 0x6a3   : > { %10515 = vmatprep.subr.bf16.mxu1 %v18236_v29  ;;  %v7864_v29 = vld [vmem:[%s16084_s8 + $0xd8] sm:$0xff] }
 0x6a6   : > { %10517 = vmatpush1.bf16.msra.mxu1 %v18237_v47  ;;  %v7955_v47 = vand.u32 4294901760, %v7863_v50 }
 0x6a7   : > { %10519 = vmatprep.subr.bf16.mxu1 %v18238_v58  ;;  %v7958_v58 = vand.u32 4294901760, %v7864_v29 }
 0x6aa   : > { %10521 = vmatpush1.bf16.msra.mxu1 %v18239_v21  ;;  %v7847_v21 = vld [vmem:[%s16084_s8 + $0x50] sm:$0xff] }
 0x6ab   : > { %10523 = vmatprep.subr.bf16.mxu1 %v18240_v10  ;;  %v7848_v10 = vld [vmem:[%s16084_s8 + $0x58] sm:$0xff] }
 0x6ae   : > { %10525 = vmatpush1.bf16.msra.mxu1 %v18241_v32  ;;  %v15503_v32 = vpack.c.bf16 %v7958_v58, %v7955_v47 }
 0x6af   : > { %10527 = vmatprep.subr.bf16.mxu1 %v18242_v12  ;;  %v7907_v12 = vand.u32 4294901760, %v7847_v21 }
 0x6b0   : > { %18254 = vst [vmem:[#allocation136_spill] sm:$0xff] %v15503_v32 }
 0x6b2   : > { %10529 = vmatpush1.bf16.msra.mxu1 %v18243_v18  ;;  %v7910_v18 = vand.u32 4294901760, %v7848_v10 }
 0x6b3   : > { %10531 = vmatprep.subr.bf16.mxu1 %v18128_v44  ;;  %v15395_v44 = vld [vmem:[%s16084_s8 + $0x8] sm:$0xff] }
 0x6b4   : > { %v16721_v62 = vand.u32 4294901760, %v15395_v44 }
 0x6b6   : > { %10533 = vmatpush1.bf16.msra.mxu1 %v18131_v54  ;;  %v15390_v54 = vld [vmem:[%s16084_s8] sm:$0xff] }
 0x6b7   : > { %v16722_v49 = vand.u32 4294901760, %v15390_v54 }
 0x6b9   : > { %6499 = vmatmul.mubr.f32.vlgmr.msra.gmra.mrb[6].mxu1 %v18214_v11  ;;  %v15409_v51 = vpack.c.bf16 %v16721_v62, %v16722_v49  ;;  %v15451_v11 = vpack.c.bf16 %v7892_v35, %v7889_v53  ;;  %v15508_v62 = vsub.f32 %v15378_v34, %v7925_v7  ;;  %v15513_v49 = vsub.f32 %v15383_v22, %v7928_v25 }
 0x6ba   : > { %v15529_v34 = vsub.f32 %v15419_v24, %v7934_v55  ;;  %v15531_v7 = vsub.f32 %v7839_v20, %v7883_v16  ;;  %v15533_v22 = vsub.f32 %v7840_v1, %v7886_v37  ;;  %v15536_v25 = vsub.f32 %v7857_v52, %v7937_v40  ;;  %v7866_v1 = vld [vmem:[%s16084_s8 + $0xe8] sm:$0xff]  ;;  %v7849_v16 = vld [vmem:[%s16084_s8 + $0x60] sm:$0xff] }
 0x6bb   : > { %18245 = vst [vmem:[#allocation121_spill] sm:$0xff] %v15409_v51  ;;  %10921 = vmatpush3.bf16.msra.mxu0 %v15409_v51  ;;  %18249 = vst [vmem:[#allocation35_spill] sm:$0xff] %v15451_v11  ;;  %v15547_v24 = vsub.f32 %v7859_v8, %v7943_v42  ;;  %v15551_v55 = vsub.f32 %v7843_v26, %v7895_v2  ;;  %v15553_v20 = vsub.f32 %v7844_v33, %v7898_v30  ;;  %v7850_v37 = vld [vmem:[%s16084_s8 + $0x68] sm:$0xff] }
 0x6bc   : > { %10923 = vmatprep.subr.bf16.mxu0 %v15431_v39  ;;  %v15564_v52 = vsub.f32 %v7861_v48, %v7949_v15  ;;  %v15568_v40 = vsub.f32 %v7845_v31, %v7901_v5  ;;  %v15583_v8 = vsub.f32 %v7864_v29, %v7958_v58  ;;  %v15587_v42 = vsub.f32 %v7847_v21, %v7907_v12  ;;  %v7852_v15 = vld [vmem:[%s16084_s8 + $0x78] sm:$0xff] }
 0x6bd   : > { %v7964_v33 = vand.u32 4294901760, %v7866_v1  ;;  %v7913_v2 = vand.u32 4294901760, %v7849_v16  ;;  %v7916_v30 = vand.u32 4294901760, %v7850_v37  ;;  %v7922_v21 = vand.u32 4294901760, %v7852_v15 }
 0x6bf   : > { %10925 = vmatpush3.bf16.msra.mxu0 %v15433_v56  ;;  %v15599_v5 = vsub.f32 %v7866_v1, %v7964_v33 }
 0x6c0   : > { %10927 = vmatprep.subr.bf16.mxu0 %v15449_v14 }
 0x6c3   : > { %10929 = vmatpush3.bf16.msra.mxu0 %v15451_v11  ;;  %v15526_v11 = vsub.f32 %v15414_v17, %v7931_v57  ;;  %v7865_v17 = vld [vmem:[%s16084_s8 + $0xe0] sm:$0xff]  ;;  %v15549_v57 = vsub.f32 %v7860_v36, %v7946_v4  ;;  %v15585_v36 = vpack.c.bf16 %v7910_v18, %v7907_v12  ;;  %v15589_v4 = vsub.f32 %v7848_v10, %v7910_v18 }
 0x6c4   : > { %10931 = vmatprep.subr.bf16.mxu0 %v15467_v28  ;;  %v7961_v26 = vand.u32 4294901760, %v7865_v17  ;;  %v16735_v12 = vand.u32 4294901760, %v15508_v62  ;;  %v16734_v18 = vand.u32 4294901760, %v15513_v49 }
 0x6c5   : > { %18257 = vst [vmem:[#allocation137_spill] sm:$0xff] %v15585_v36 }
 0x6c6   : > { %v15595_v31 = vpack.c.bf16 %v7964_v33, %v7961_v26 }
 0x6c7   : > { %10933 = vmatpush3.bf16.msra.mxu0 %v15469_v6 }
 0x6c8   : > { %10935 = vmatprep.subr.bf16.mxu0 %v15485_v61  ;;  %v18255_v61 = vand.u32 4294901760, %v15390_v54  ;;  %18258 = vst [vmem:[#allocation71_spill] sm:$0xff] %v15595_v31 }
 0x6ca   : > { %v15518_v6 = vsub.f32 %v15390_v54, %v18255_v61  ;;  %v15538_v54 = vsub.f32 %v7858_v63, %v7940_v45  ;;  %v15540_v61 = vsub.f32 %v7841_v13, %v7889_v53  ;;  %v15566_v63 = vsub.f32 %v7862_v41, %v7952_v23  ;;  %v7867_v13 = vld [vmem:[%s16084_s8 + $0xf0] sm:$0xff] }
 0x6cb   : > { %10937 = vmatpush3.bf16.msra.mxu0 %v15487_v9  ;;  %v18256_v9 = vand.u32 4294901760, %v15395_v44  ;;  %v15570_v45 = vsub.f32 %v7846_v60, %v7904_v3  ;;  %v7851_v53 = vld [vmem:[%s16084_s8 + $0x70] sm:$0xff]  ;;  %v7967_v48 = vand.u32 4294901760, %v7867_v13  ;;  %v15597_v60 = vsub.f32 %v7865_v17, %v7961_v26 }
 0x6cc   : > { %10939 = vmatprep.subr.bf16.mxu0 %v15503_v32  ;;  %v7919_v23 = vand.u32 4294901760, %v7851_v53  ;;  %v15601_v3 = vsub.f32 %v7849_v16, %v7913_v2  ;;  %v16733_v17 = vand.u32 4294901760, %v15518_v6  ;;  %v16737_v16 = vand.u32 4294901760, %v15526_v11 }
 0x6cd   : > { %v15523_v28 = vsub.f32 %v15395_v44, %v18256_v9  ;;  %v15542_v44 = vsub.f32 %v7842_v27, %v7892_v35  ;;  %v7868_v27 = vld [vmem:[%s16084_s8 + $0xf8] sm:$0xff]  ;;  %v15581_v35 = vsub.f32 %v7863_v50, %v7955_v47  ;;  %v15603_v9 = vpack.c.bf16 %v7916_v30, %v7913_v2 }
 0x6ce   : > { %v7970_v41 = vand.u32 4294901760, %v7868_v27  ;;  %v15605_v50 = vsub.f32 %v7850_v37, %v7916_v30  ;;  %v15609_v47 = vsub.f32 %v7867_v13, %v7967_v48  ;;  %v15614_v10 = vsub.f32 %v7851_v53, %v7919_v23 }
 0x6cf   : > { %10941 = vmatpush3.bf16.msra.mxu0 %v15585_v36  ;;  %18259 = vst [vmem:[#allocation140_spill] sm:$0xff] %v15603_v9  ;;  %v16736_v1 = vand.u32 4294901760, %v15523_v28  ;;  %v15623_v37 = vpack.c.bf16 %v7922_v21, %v7919_v23  ;;  %v15625_v13 = vsub.f32 %v7852_v15, %v7922_v21  ;;  %v16738_v53 = vand.u32 4294901760, %v15529_v34 }
 0x6d0   : > { %v15607_v29 = vpack.c.bf16 %v7970_v41, %v7967_v48  ;;  %18261 = vst [vmem:[#allocation142_spill] sm:$0xff] %v15609_v47  ;;  %10943 = vmatprep.subr.bf16.mxu0 %v15595_v31  ;;  %v15612_v58 = vsub.f32 %v7868_v27, %v7970_v41  ;;  %18263 = vst [vmem:[#allocation75_spill] sm:$0xff] %v15614_v10  ;;  %v8104_v27 = vsub.f32 %v15508_v62, %v16735_v12 }
 0x6d1   : > { %18264 = vst [vmem:[#allocation144_spill] sm:$0xff] %v15623_v37  ;;  %18265 = vst [vmem:[#allocation145_spill] sm:$0xff] %v15625_v13  ;;  %v8111_v26 = vsub.f32 %v15513_v49, %v16734_v18  ;;  %v7992_v33 = vsub.f32 %v15518_v6, %v16733_v17  ;;  %v7999_v2 = vsub.f32 %v15523_v28, %v16736_v1  ;;  %v16750_v15 = vand.u32 4294901760, %v15531_v7 }
 0x6d2   : > { %18260 = vst [vmem:[#allocation73_spill] sm:$0xff] %v15607_v29  ;;  %18262 = vst [vmem:[#allocation143_spill] sm:$0xff] %v15612_v58  ;;  %v8118_v30 = vsub.f32 %v15526_v11, %v16737_v16  ;;  %v8105_v48 = vand.u32 4294901760, %v8104_v27  ;;  %v8125_v41 = vsub.f32 %v15529_v34, %v16738_v53  ;;  %v16745_v23 = vand.u32 4294901760, %v15533_v22 }
 0x6d3   : > { %10945 = vmatpush3.bf16.msra.mxu0 %v15603_v9  ;;  %v8112_v21 = vand.u32 4294901760, %v8111_v26  ;;  %v7993_v17 = vand.u32 4294901760, %v7992_v33  ;;  %v8000_v18 = vand.u32 4294901760, %v7999_v2  ;;  %v8006_v16 = vsub.f32 %v15531_v7, %v16750_v15 }
 0x6d4   : > { %10947 = vmatprep.subr.bf16.mxu0 %v15607_v29  ;;  %v8119_v12 = vand.u32 4294901760, %v8118_v30  ;;  %v8126_v1 = vand.u32 4294901760, %v8125_v41  ;;  %v8013_v27 = vsub.f32 %v15533_v22, %v16745_v23  ;;  %v16748_v53 = vand.u32 4294901760, %v15536_v25 }
 0x6d5   : > { %v10950_v29 = vpack.c.bf16 %v8112_v21, %v8105_v48  ;;  %v15656_v9 = vpack.c.bf16 %v8000_v18, %v7993_v17  ;;  %v16747_v26 = vand.u32 4294901760, %v15540_v61  ;;  %v8007_v2 = vand.u32 4294901760, %v8006_v16 }
 0x6d6   : > { %v15660_v33 = vpack.c.bf16 %v8126_v1, %v8119_v12  ;;  %v8014_v30 = vand.u32 4294901760, %v8013_v27  ;;  %v8132_v41 = vsub.f32 %v15536_v25, %v16748_v53  ;;  %v16749_v17 = vand.u32 4294901760, %v15542_v44 }
 0x6d7   : > { %10949 = vmatpush3.bf16.msra.mxu0 %v15623_v37  ;;  %v16746_v37 = vand.u32 4294901760, %v15538_v54  ;;  %v8020_v18 = vsub.f32 %v15540_v61, %v16747_v26  ;;  %v16753_v12 = vand.u32 4294901760, %v15547_v24  ;;  %v16754_v48 = vand.u32 4294901760, %v15549_v57 }
 0x6d8   : > { %10951 = vmatprep.subr.bf16.mxu0 %v10950_v29  ;;  %v15673_v1 = vpack.c.bf16 %v8014_v30, %v8007_v2  ;;  %v8133_v16 = vand.u32 4294901760, %v8132_v41  ;;  %v16755_v21 = vand.u32 4294901760, %v15551_v55  ;;  %v16758_v41 = vand.u32 4294901760, %v15553_v20 }
 0x6d9   : > { %v8139_v23 = vsub.f32 %v15538_v54, %v16746_v37  ;;  %v8021_v27 = vand.u32 4294901760, %v8020_v18  ;;  %v8027_v37 = vsub.f32 %v15542_v44, %v16749_v17  ;;  %v8146_v26 = vsub.f32 %v15547_v24, %v16753_v12 }
 0x6da   : > { %v8153_v2 = vsub.f32 %v15549_v57, %v16754_v48  ;;  %v8034_v30 = vsub.f32 %v15551_v55, %v16755_v21  ;;  %v16761_v15 = vand.u32 4294901760, %v15566_v63  ;;  %v8041_v48 = vsub.f32 %v15553_v20, %v16758_v41 }
 0x6db   : > { %v8140_v29 = vand.u32 4294901760, %v8139_v23  ;;  %v16762_v23 = vand.u32 4294901760, %v15564_v52  ;;  %v8028_v53 = vand.u32 4294901760, %v8027_v37  ;;  %v8147_v17 = vand.u32 4294901760, %v8146_v26 }
 0x6dc   : > { %v8154_v31 = vand.u32 4294901760, %v8153_v2  ;;  %v8035_v12 = vand.u32 4294901760, %v8034_v30  ;;  %v16763_v37 = vand.u32 4294901760, %v15568_v40  ;;  %v16764_v26 = vand.u32 4294901760, %v15570_v45 }
 0x6dd   : > { %v15691_v18 = vpack.c.bf16 %v8140_v29, %v8133_v16  ;;  %v8160_v21 = vsub.f32 %v15564_v52, %v16762_v23  ;;  %v15700_v36 = vpack.c.bf16 %v8028_v53, %v8021_v27  ;;  %v8167_v16 = vsub.f32 %v15566_v63, %v16761_v15 }
 0x6de   : > { %v15707_v29 = vpack.c.bf16 %v8154_v31, %v8147_v17  ;;  %v8042_v2 = vand.u32 4294901760, %v8041_v48  ;;  %v16767_v41 = vand.u32 4294901760, %v15581_v35  ;;  %v8048_v53 = vsub.f32 %v15568_v40, %v16763_v37 }
 0x6df   : > { %v8161_v30 = vand.u32 4294901760, %v8160_v21  ;;  %v8168_v32 = vand.u32 4294901760, %v8167_v16  ;;  %v8055_v27 = vsub.f32 %v15570_v45, %v16764_v26  ;;  %v16770_v15 = vand.u32 4294901760, %v15583_v8 }
 0x6e0   : > { %v15717_v23 = vpack.c.bf16 %v8042_v2, %v8035_v12  ;;  %v8174_v31 = vsub.f32 %v15581_v35, %v16767_v41  ;;  %v16771_v17 = vand.u32 4294901760, %v15587_v42  ;;  %v16775_v48 = vand.u32 4294901760, %v15589_v4 }
 0x6e1   : > { %v15724_v21 = vpack.c.bf16 %v8168_v32, %v8161_v30  ;;  %v8049_v16 = vand.u32 4294901760, %v8048_v53  ;;  %v8056_v37 = vand.u32 4294901760, %v8055_v27  ;;  %v8181_v26 = vsub.f32 %v15583_v8, %v16770_v15 }
 0x6e2   : > { %v8175_v14 = vand.u32 4294901760, %v8174_v31  ;;  %v8062_v12 = vsub.f32 %v15587_v42, %v16771_v17  ;;  %v8069_v2 = vsub.f32 %v15589_v4, %v16775_v48  ;;  %v16774_v41 = vand.u32 4294901760, %v15597_v60 }
 0x6e3   : > { %v15736_v56 = vpack.c.bf16 %v8056_v37, %v8049_v16  ;;  %v8182_v32 = vand.u32 4294901760, %v8181_v26  ;;  %v16778_v30 = vand.u32 4294901760, %v15599_v5  ;;  %v16779_v53 = vand.u32 4294901760, %v15601_v3 }
 0x6e4   : > { %v8063_v27 = vand.u32 4294901760, %v8062_v12  ;;  %v8070_v15 = vand.u32 4294901760, %v8069_v2  ;;  %v8188_v31 = vsub.f32 %v15597_v60, %v16774_v41  ;;  %v16780_v17 = vand.u32 4294901760, %v15605_v50 }
 0x6e5   : > { %v15744_v39 = vpack.c.bf16 %v8182_v32, %v8175_v14  ;;  %v8195_v37 = vsub.f32 %v15599_v5, %v16778_v30  ;;  %v8076_v26 = vsub.f32 %v15601_v3, %v16779_v53  ;;  %v16781_v41 = vand.u32 4294901760, %v15609_v47 }
 0x6e6   : > { %v15752_v16 = vpack.c.bf16 %v8070_v15, %v8063_v27  ;;  %v8189_v12 = vand.u32 4294901760, %v8188_v31  ;;  %v8083_v2 = vsub.f32 %v15605_v50, %v16780_v17  ;;  %v16784_v32 = vand.u32 4294901760, %v15612_v58 }
 0x6e7   : > { %v8196_v48 = vand.u32 4294901760, %v8195_v37  ;;  %v8077_v14 = vand.u32 4294901760, %v8076_v26  ;;  %v16785_v51 = vand.u32 4294901760, %v15614_v10  ;;  %v8202_v53 = vsub.f32 %v15609_v47, %v16781_v41 }
 0x6e8   : > { %18266 = vst [vmem:[#allocation78_spill] sm:$0xff] %v15752_v16  ;;  %v8084_v30 = vand.u32 4294901760, %v8083_v2  ;;  %v16786_v15 = vand.u32 4294901760, %v15625_v13  ;;  %v8209_v31 = vsub.f32 %v15612_v58, %v16784_v32 }
 0x6e9   : > { %v15764_v27 = vpack.c.bf16 %v8196_v48, %v8189_v12  ;;  %v8090_v37 = vsub.f32 %v15614_v10, %v16785_v51  ;;  %v8203_v17 = vand.u32 4294901760, %v8202_v53 }
 0x6ea   : > { %v15772_v26 = vpack.c.bf16 %v8084_v30, %v8077_v14  ;;  %v8097_v2 = vsub.f32 %v15625_v13, %v16786_v15  ;;  %v8210_v41 = vand.u32 4294901760, %v8209_v31  ;;  %v2061_v31 = vsub.s32 2, %v18173_v19 }
 0x6eb   : > { %v8091_v59 = vand.u32 4294901760, %v8090_v37 }
 0x6ec   : > { %v8098_v16 = vand.u32 4294901760, %v8097_v2  ;;  %v15777_v48 = vpack.c.bf16 %v8210_v41, %v8203_v17  ;;  %v2065_v41 = vsub.s32 3, %v18173_v19  ;;  %v2062_v37 = vrot.slane %v15282_v38, %v2061_v31 }
 0x6ed   : > { %v3918_v2 = vrot.slane %v15271_v0, %v2061_v31 }
 0x6ee   : > { %v15779_v12 = vpack.c.bf16 %v8098_v16, %v8091_v59  ;;  %v2066_v14 = vrot.slane %v15282_v38, %v2065_v41  ;;  %v3922_v15 = vrot.slane %v15271_v0, %v2065_v41  ;;  %v11339_v41 = vld [vmem:[#allocation2 + $0x8] sm:$0xff] }
 0x6ef   : > { %v11123_v53 = vadd.f32 %v3918_v2, %v2062_v37 }
 0x6f0   : > { %v11125_v59 = vadd.f32 %v3922_v15, %v2066_v14 }
 0x78c   : > { %v6500_v30 = vpop.f32.mrb[6].mxu1 }
 0x78d   : > { %v11124_v51 = vadd.f32 %v11123_v53, %v6500_v30  ;;  %v6502_v17 = vpop.f32.mrb[7].mxu1  ;;  %v11338_v53 = vld [vmem:[#allocation2] sm:$0xff] }
 0x78e   : > { %v11126_v32 = vadd.f32 %v11125_v59, %v6502_v17 }
 0x78f   : > { %v8988_v47 = vmul.f32 -1.442695, %v11124_v51 }
 0x790   : > { %v8989_v16 = vmul.f32 -1.442695, %v11126_v32 }
 0x791   : > { %11316 = vpow2.f32 %v8988_v47 }
 0x792   : > { %11318 = vpow2.f32 %v8989_v16 }
 0x79b   : > { %v11317_v10 = vpop.eup %11316 }
 0x79c   : > { %v11319_v19 = vpop.eup %11318  ;;  %v7811_v13 = vadd.f32 1.0, %v11317_v10 }
 0x79d   : > { %v7812_v58 = vadd.f32 1.0, %v11319_v19 }
 0x79e   : > { %11320 = vrcp.f32 %v7811_v13 }
 0x79f   : > { %11322 = vrcp.f32 %v7812_v58 }
 0x7a0   : > { %11324 = vtanh.f32 %v15300_v46 }
 0x7a1   : > { %11326 = vtanh.f32 %v15302_v43 }
 0x7a8   : > { %v11321_v0 = vpop.eup %11320 }
 0x7a9   : > { %v11323_v38 = vpop.eup %11322  ;;  %v7823_v15 = vsub.f32 1.0, %v11321_v0  ;;  %v7827_v14 = vmul.f32 %v11338_v53, %v11321_v0 }
 0x7aa   : > { %v11325_v30 = vpop.eup %11324  ;;  %v7824_v51 = vsub.f32 1.0, %v11323_v38  ;;  %v7828_v10 = vmul.f32 %v11339_v41, %v11323_v38  ;;  %v18286_v41 = vld [vmem:[#allocation75_spill] sm:$0xff] }
 0x7ab   : > { %v11327_v32 = vpop.eup %11326  ;;  %v7825_v47 = vmul.f32 %v11325_v30, %v7823_v15 }
 0x7ac   : > { %v7826_v59 = vmul.f32 %v11327_v32, %v7824_v51  ;;  %v18281_v51 = vpack.c.bf16 %v15605_v50, %v15601_v3  ;;  %v18282_v32 = vld [vmem:[#allocation143_spill] sm:$0xff] }
 0x7ad   : > { %v7829_v13 = vadd.f32 %v7827_v14, %v7825_v47  ;;  %v18283_v47 = vld [vmem:[#allocation142_spill] sm:$0xff]  ;;  %v18285_v14 = vld [vmem:[#allocation145_spill] sm:$0xff] }
 0x7ae   : > { %v7830_v58 = vadd.f32 %v7828_v10, %v7826_v59  ;;  %v18284_v53 = vpack.c.bf16 %v18282_v32, %v18283_v47  ;;  %v18287_v10 = vpack.c.bf16 %v18285_v14, %v18286_v41  ;;  %v18288_v59 = vld [vmem:[#allocation119_spill] sm:$0xff] }
 0x7af   : > { %7831 = vst [vmem:[#allocation2] sm:$0xff] %v7829_v13  ;;  %7833 = vst [vmem:[%s11670_s29] sm:$0xff] %v7829_v13  ;;  %v7835_v46 = vmax.f32 %v7829_v13, 0.0  ;;  %v18289_v13 = vld [vmem:[#allocation121_spill] sm:$0xff] }
 0x7b0   : > { %7832 = vst [vmem:[#allocation2 + $0x8] sm:$0xff] %v7830_v58  ;;  %v7836_v43 = vmax.f32 %v7830_v58, 0.0  ;;  %7834 = vst [vmem:[%s11670_s29 + $0x8] sm:$0xff] %v7830_v58  ;;  %v18290_v58 = vld [vmem:[#allocation123_spill] sm:$0xff] }
 0x7b1   : > { %v15823_v17 = vand.u32 4294901760, %v7835_v46 }
 0x7b2   : > { %v15825_v16 = vand.u32 4294901760, %v7836_v43 }
 0x7b3   : > { %v15828_v31 = vsub.f32 %v7835_v46, %v15823_v17  ;;  %v18291_v46 = vld [vmem:[#allocation125_spill] sm:$0xff] }
 0x7b4   : > { %v7973_v37 = vsub.f32 %v7836_v43, %v15825_v16  ;;  %v18292_v43 = vld [vmem:[#allocation31_spill] sm:$0xff] }
 0x7b5   : > { %v7980_v2 = vand.u32 4294901760, %v15828_v31 }
 0x7b6   : > { %v7974_v19 = vand.u32 4294901760, %v7973_v37 }
 0x7b7   : > { %v7981_v0 = vsub.f32 %v15828_v31, %v7980_v2 }
 0x7b8   : > { %v7975_v38 = vsub.f32 %v7973_v37, %v7974_v19 }
 0x7b9   : > { %v7982_v30 = vand.u32 4294901760, %v7981_v0  ;;  %v18294_v0 = vld [vmem:[#allocation64_spill] sm:$0xff] }
 0x7ba   : > { %v7976_v15 = vand.u32 4294901760, %v7975_v38  ;;  %v18295_v38 = vld [vmem:[#allocation133_spill] sm:$0xff] }
 0x7bc   : > { %7977 = vmatprep.mubr.f32.mxu0 %v7976_v15  ;;  %v18296_v15 = vld [vmem:[#allocation134_spill] sm:$0xff] }
 0x7bd   : > { %7983 = vmatmul.mubr.f32.vlgmr.msra.gmra.mrb[12].mxu0 %v7982_v30  ;;  %v18297_v30 = vld [vmem:[#allocation67_spill] sm:$0xff] }
 0x7be   : > { %10953 = vmatpush3.bf16.msra.mxu0 %v15656_v9  ;;  %8213 = vmatprep.mubr.f32.mxu0 %v15825_v16  ;;  %v18267_v9 = vld [vmem:[#allocation78_spill] sm:$0xff] }
 0x7bf   : > { %10955 = vmatprep.subr.bf16.mxu0 %v15660_v33  ;;  %v18271_v33 = vpack.c.bf16 %v15533_v22, %v15531_v7 }
 0x7c2   : > { %10957 = vmatpush3.bf16.msra.mxu0 %v15673_v1  ;;  %v18272_v1 = vpack.c.bf16 %v15538_v54, %v15536_v25 }
 0x7c3   : > { %10959 = vmatprep.subr.bf16.mxu0 %v15691_v18  ;;  %v18274_v18 = vpack.c.bf16 %v15549_v57, %v15547_v24 }
 0x7c6   : > { %10961 = vmatpush3.bf16.msra.mxu0 %v15700_v36  ;;  %v18268_v36 = vpack.c.bf16 %v15513_v49, %v15508_v62 }
 0x7c7   : > { %10963 = vmatprep.subr.bf16.mxu0 %v15707_v29  ;;  %v18275_v29 = vpack.c.bf16 %v15553_v20, %v15551_v55 }
 0x7ca   : > { %10965 = vmatpush3.bf16.msra.mxu0 %v15717_v23  ;;  %v18273_v23 = vpack.c.bf16 %v15542_v44, %v15540_v61 }
 0x7cb   : > { %10967 = vmatprep.subr.bf16.mxu0 %v15724_v21  ;;  %v18276_v21 = vpack.c.bf16 %v15566_v63, %v15564_v52 }
 0x7ce   : > { %10969 = vmatpush3.bf16.msra.mxu0 %v15736_v56  ;;  %v18269_v56 = vpack.c.bf16 %v15523_v28, %v15518_v6 }
 0x7cf   : > { %10971 = vmatprep.subr.bf16.mxu0 %v15744_v39  ;;  %v18270_v39 = vpack.c.bf16 %v15529_v34, %v15526_v11 }
 0x7d2   : > { %10973 = vmatpush3.bf16.msra.mxu0 %v18267_v9  ;;  %v18298_v9 = vld [vmem:[#allocation136_spill] sm:$0xff] }
 0x7d3   : > { %10975 = vmatprep.subr.bf16.mxu0 %v15764_v27  ;;  %v18277_v27 = vpack.c.bf16 %v15570_v45, %v15568_v40 }
 0x7d6   : > { %10977 = vmatpush3.bf16.msra.mxu0 %v15772_v26  ;;  %v18278_v26 = vpack.c.bf16 %v15583_v8, %v15581_v35 }
 0x7d7   : > { %10979 = vmatprep.subr.bf16.mxu0 %v15777_v48  ;;  %v18279_v48 = vpack.c.bf16 %v15589_v4, %v15587_v42 }
 0x7da   : > { %10981 = vmatpush3.bf16.msra.mxu0 %v15779_v12  ;;  %v18280_v12 = vpack.c.bf16 %v15599_v5, %v15597_v60 }
 0x7db   : > { %10983 = vmatprep.subr.bf16.mxu0 %v18268_v36  ;;  %v18299_v36 = vld [vmem:[#allocation137_spill] sm:$0xff] }
 0x7dd   : > { %8215 = vmatmul.mubr.f32.vlgmr.msra.gmra.mrb[14].mxu0 %v15823_v17 }
 0x7de   : > { %10985 = vmatpush3.bf16.msra.mxu0 %v18269_v56  ;;  %8350 = vmatprep.mubr.f32.mxu0 %v7973_v37  ;;  %v18293_v37 = vld [vmem:[#allocation35_spill] sm:$0xff]  ;;  %v18301_v56 = vld [vmem:[#allocation140_spill] sm:$0xff] }
 0x7df   : > { %10987 = vmatprep.subr.bf16.mxu0 %v18270_v39  ;;  %v18302_v39 = vld [vmem:[#allocation73_spill] sm:$0xff] }
 0x7e2   : > { %10989 = vmatpush3.bf16.msra.mxu0 %v18271_v33  ;;  %v18303_v33 = vand.u32 4294901760, %v15508_v62  ;;  %v18311_v62 = vand.u32 4294901760, %v15533_v22  ;;  %v18318_v22 = vand.u32 4294901760, %v15551_v55  ;;  %v18325_v55 = vand.u32 4294901760, %v15583_v8 }
 0x7e3   : > { %10991 = vmatprep.subr.bf16.mxu0 %v18272_v1  ;;  %v18304_v1 = vand.u32 4294901760, %v15513_v49  ;;  %v18310_v49 = vand.u32 4294901760, %v15531_v7  ;;  %v18317_v7 = vand.u32 4294901760, %v15549_v57  ;;  %v18324_v57 = vand.u32 4294901760, %v15581_v35 }
 0x7e4   : > { %v18331_v35 = vand.u32 4294901760, %v15605_v50  ;;  %v18332_v8 = vand.u32 4294901760, %v18283_v47 }
 0x7e6   : > { %10993 = vmatpush3.bf16.msra.mxu0 %v18273_v23  ;;  %v11046_v23 = vpack.c.bf16 %v18304_v1, %v18303_v33 }
 0x7e7   : > { %10995 = vmatprep.subr.bf16.mxu0 %v18274_v18  ;;  %v18305_v18 = vld [vmem:[#allocation144_spill] sm:$0xff] }
 0x7ea   : > { %10997 = vmatpush3.bf16.msra.mxu0 %v18275_v29  ;;  %v18306_v29 = vand.u32 4294901760, %v15518_v6  ;;  %v11052_v6 = vpack.c.bf16 %v18311_v62, %v18310_v49 }
 0x7eb   : > { %10999 = vmatprep.subr.bf16.mxu0 %v18276_v21  ;;  %v18307_v21 = vand.u32 4294901760, %v15523_v28  ;;  %v18312_v28 = vand.u32 4294901760, %v15536_v25  ;;  %v18319_v25 = vand.u32 4294901760, %v15553_v20  ;;  %v18326_v20 = vand.u32 4294901760, %v15587_v42 }
 0x7ec   : > { %v18333_v42 = vand.u32 4294901760, %v18282_v32  ;;  %v8990_v32 = vld [vmem:[%s16085_s9 + $0xf] ss:$0 sm:$0xff] }
 0x7ed   : > { %v11060_v33 = vpack.c.bf16 %v18319_v25, %v18318_v22 }
 0x7ee   : > { %11001 = vmatpush3.bf16.msra.mxu0 %v18277_v27  ;;  %v11048_v27 = vpack.c.bf16 %v18307_v21, %v18306_v29  ;;  %v11066_v29 = vpack.c.bf16 %v18325_v55, %v18324_v57 }
 0x7ef   : > { %11003 = vmatprep.subr.bf16.mxu0 %v18278_v26  ;;  %v18308_v26 = vand.u32 4294901760, %v15526_v11 }
 0x7f2   : > { %11005 = vmatpush3.bf16.msra.mxu0 %v18279_v48  ;;  %v18309_v48 = vand.u32 4294901760, %v15529_v34  ;;  %v18314_v34 = vand.u32 4294901760, %v15540_v61  ;;  %v18321_v61 = vand.u32 4294901760, %v15566_v63  ;;  %v18328_v63 = vand.u32 4294901760, %v15597_v60 }
 0x7f3   : > { %11007 = vmatprep.subr.bf16.mxu0 %v18280_v12  ;;  %v18335_v60 = vand.u32 4294901760, %v18285_v14 }
 0x7f4   : > { %v11050_v12 = vpack.c.bf16 %v18309_v48, %v18308_v26  ;;  %v11074_v48 = vpack.c.bf16 %v18333_v42, %v18332_v8 }
 0x7f6   : > { %11009 = vmatpush3.bf16.msra.mxu0 %v18281_v51  ;;  %v18313_v51 = vand.u32 4294901760, %v15538_v54  ;;  %v18320_v54 = vand.u32 4294901760, %v15564_v52  ;;  %v18327_v52 = vand.u32 4294901760, %v15589_v4  ;;  %v18334_v4 = vand.u32 4294901760, %v18286_v41 }
 0x7f7   : > { %11011 = vmatprep.subr.bf16.mxu0 %v18284_v53  ;;  %v18316_v53 = vand.u32 4294901760, %v15547_v24  ;;  %v18323_v24 = vand.u32 4294901760, %v15570_v45  ;;  %v18330_v45 = vand.u32 4294901760, %v15601_v3 }
 0x7f8   : > { %v11054_v11 = vpack.c.bf16 %v18313_v51, %v18312_v28  ;;  %v11062_v1 = vpack.c.bf16 %v18321_v61, %v18320_v54  ;;  %v11068_v21 = vpack.c.bf16 %v18327_v52, %v18326_v20 }
 0x7f9   : > { %v11072_v26 = vpack.c.bf16 %v18331_v35, %v18330_v45 }
 0x7fa   : > { %11013 = vmatpush3.bf16.msra.mxu0 %v18287_v10  ;;  %v11058_v10 = vpack.c.bf16 %v18317_v7, %v18316_v53 }
 0x7fb   : > { %11015 = vmatprep.subr.bf16.mxu0 %v18288_v59 }
 0x7fd   : > { %8353 = vmatmul.mubr.f32.vlgmr.msra.gmra.mrb[16].mxu0 %v15828_v31  ;;  %v18315_v31 = vand.u32 4294901760, %v15542_v44  ;;  %v18322_v44 = vand.u32 4294901760, %v15568_v40  ;;  %v18329_v40 = vand.u32 4294901760, %v15599_v5  ;;  %v8744_v5 = vld [vmem:[%s483_s24] sm:$0xff]  ;;  %s11475_s24 = smov 124  }
 0x7fe   : > { %11017 = vmatpush3.bf16.msra.mxu0 %v18289_v13  ;;  %8457 = vmatprep.mubr.f32.mxu0 %v7974_v19  ;;  %v18300_v19 = vld [vmem:[#allocation71_spill] sm:$0xff] }
 0x7ff   : > { %11019 = vmatprep.subr.bf16.mxu0 %v18290_v58  ;;  %8746 = vrot.lane.b32.xlu0 %v8744_v5, %s11474_s7 }
 0x802   : > { %11021 = vmatpush3.bf16.msra.mxu0 %v18291_v46 }
 0x803   : > { %11023 = vmatprep.subr.bf16.mxu0 %v18292_v43 }
 0x806   : > { %11025 = vmatpush3.bf16.msra.mxu0 %v18293_v37 }
 0x807   : > { %11027 = vmatprep.subr.bf16.mxu0 %v18294_v0 }
 0x80a   : > { %11029 = vmatpush3.bf16.msra.mxu0 %v18295_v38 }
 0x80b   : > { %11031 = vmatprep.subr.bf16.mxu0 %v18296_v15 }
 0x80e   : > { %11033 = vmatpush3.bf16.msra.mxu0 %v18297_v30 }
 0x80f   : > { %11035 = vmatprep.subr.bf16.mxu0 %v18298_v9 }
 0x812   : > { %11037 = vmatpush3.bf16.msra.mxu0 %v18299_v36 }
 0x813   : > { %11039 = vmatprep.subr.bf16.mxu0 %v18300_v19 }
 0x816   : > { %11041 = vmatpush3.bf16.msra.mxu0 %v18301_v56 }
 0x817   : > { %11043 = vmatprep.subr.bf16.mxu0 %v18302_v39 }
 0x81a   : > { %11045 = vmatpush3.bf16.msra.mxu0 %v18305_v18 }
 0x81b   : > { %11047 = vmatprep.subr.bf16.mxu0 %v11046_v23  ;;  %v11064_v23 = vpack.c.bf16 %v18323_v24, %v18322_v44 }
 0x81d   : > { %8461 = vmatmul.mubr.f32.vlgmr.msra.gmra.mrb[18].mxu0 %v7980_v2  ;;  %v11056_v2 = vpack.c.bf16 %v18315_v31, %v18314_v34 }
 0x81e   : > { %11049 = vmatpush3.bf16.msra.mxu0 %v11048_v27  ;;  %8627 = vmatprep.mubr.f32.mxu0 %v15825_v16  ;;  %v11070_v27 = vpack.c.bf16 %v18329_v40, %v18328_v63 }
 0x81f   : > { %11051 = vmatprep.subr.bf16.mxu0 %v11050_v12  ;;  %v11076_v12 = vpack.c.bf16 %v18335_v60, %v18334_v4 }
 0x822   : > { %11053 = vmatpush3.bf16.msra.mxu0 %v11052_v6 }
 0x823   : > { %11055 = vmatprep.subr.bf16.mxu0 %v11054_v11 }
 0x826   : > { %11057 = vmatpush3.bf16.msra.mxu0 %v11056_v2 }
 0x827   : > { %11059 = vmatprep.subr.bf16.mxu0 %v11058_v10 }
 0x82a   : > { %11061 = vmatpush3.bf16.msra.mxu0 %v11060_v33 }
 0x82b   : > { %11063 = vmatprep.subr.bf16.mxu0 %v11062_v1  ;;  %v8757_v1 = vmul.f32 %v8744_v5, %v8744_v5 }
 0x82d   : > { %v8758_v44 = vmul.f32 -0.5, %v8757_v1 }
 0x82e   : > { %11065 = vmatpush3.bf16.msra.mxu0 %v11064_v23 }
 0x82f   : > { %11067 = vmatprep.subr.bf16.mxu0 %v11066_v29 }
 0x832   : > { %11069 = vmatpush3.bf16.msra.mxu0 %v11068_v21 }
 0x833   : > { %11071 = vmatprep.subr.bf16.mxu0 %v11070_v27 }
 0x836   : > { %11073 = vmatpush3.bf16.msra.mxu0 %v11072_v26 }
 0x837   : > { %11075 = vmatprep.subr.bf16.mxu0 %v11074_v48 }
 0x83a   : > { %11077 = vmatpush3.bf16.msra.mxu0 %v11076_v12 }
 0x83b   : > { %11079 = vmatprep.subr.bf16.mxu0 %v18288_v59 }
 0x83d   : > { %8629 = vmatmul.mubr.f32.vlgmr.msra.gmra.mrb[20].mxu0 %v15823_v17 }
 0x83e   : > { %11081 = vmatpush3.bf16.msra.mxu0 %v18289_v13  ;;  %8731 = vmatprep.mubr.f32.mxu0 %v15825_v16 }
 0x83f   : > { %11083 = vmatprep.subr.bf16.mxu0 %v18290_v58 }
 0x842   : > { %11085 = vmatpush3.bf16.msra.mxu0 %v18291_v46 }
 0x843   : > { %11087 = vmatprep.subr.bf16.mxu0 %v18292_v43 }
 0x846   : > { %11089 = vmatpush3.bf16.msra.mxu0 %v18293_v37 }
 0x847   : > { %11091 = vmatprep.subr.bf16.mxu0 %v18294_v0 }
 0x84a   : > { %11093 = vmatpush3.bf16.msra.mxu0 %v18295_v38 }
 0x84b   : > { %11095 = vmatprep.subr.bf16.mxu0 %v18296_v15 }
 0x84e   : > { %11097 = vmatpush3.bf16.msra.mxu0 %v18297_v30 }
 0x84f   : > { %11099 = vmatprep.subr.bf16.mxu0 %v18298_v9 }
 0x852   : > { %11101 = vmatpush3.bf16.msra.mxu0 %v18299_v36 }
 0x853   : > { %11103 = vmatprep.subr.bf16.mxu0 %v18300_v19 }
 0x856   : > { %11105 = vmatpush3.bf16.msra.mxu0 %v18301_v56 }
 0x857   : > { %11107 = vmatprep.subr.bf16.mxu0 %v18302_v39 }
 0x85a   : > { %11109 = vmatpush3.bf16.msra.mxu0 %v18305_v18 }
 0x85d   : > { %8733 = vmatmul.mubr.f32.vlgmr.msra.gmra.mrb[22].mxu0 %v15823_v17 }
 0x871   : > { %v8747_v34 = vpop.permute.xlu0 %8746 }
 0x890   : > { %v9126_v3 = vpop.f32.mrb[12].mxu0 }
 0x891   : > { %v9127_v50 = vpop.f32.mrb[13].mxu0 }
 0x892   : > { %v9128_v16 = vadd.f32 %v9127_v50, %v9126_v3 }
 0x894   : > { %v7985_v41 = vadd.f32 %v9128_v16, %v8990_v32 }
 0x8b0   : > { %v9161_v47 = vpop.f32.mrb[14].mxu0 }
 0x8b1   : > { %v9162_v14 = vpop.f32.mrb[15].mxu0 }
 0x8b2   : > { %v9163_v59 = vadd.f32 %v9162_v14, %v9161_v47 }
 0x8b4   : > { %v8217_v13 = vadd.f32 %v9163_v59, %v7985_v41 }
 0x8d0   : > { %v9196_v58 = vpop.f32.mrb[16].mxu0 }
 0x8d1   : > { %v9197_v46 = vpop.f32.mrb[17].mxu0 }
 0x8d2   : > { %v9198_v43 = vadd.f32 %v9197_v46, %v9196_v58 }
 0x8d4   : > { %v8355_v37 = vadd.f32 %v9198_v43, %v8217_v13 }
 0x8f0   : > { %v9231_v0 = vpop.f32.mrb[18].mxu0 }
 0x8f1   : > { %v9232_v38 = vpop.f32.mrb[19].mxu0 }
 0x8f2   : > { %v9233_v15 = vadd.f32 %v9232_v38, %v9231_v0 }
 0x8f4   : > { %v8463_v17 = vadd.f32 %v9233_v15, %v8355_v37 }
 0x910   : > { %v9266_v30 = vpop.f32.mrb[20].mxu0 }
 0x911   : > { %v9267_v9 = vpop.f32.mrb[21].mxu0 }
 0x912   : > { %v9268_v36 = vadd.f32 %v9267_v9, %v9266_v30 }
 0x914   : > { %v8631_v19 = vadd.f32 %v9268_v36, %v8463_v17 }
 0x930   : > { %v9301_v56 = vpop.f32.mrb[22].mxu0 }
 0x931   : > { %v9302_v39 = vpop.f32.mrb[23].mxu0 }
 0x932   : > { %v9303_v18 = vadd.f32 %v9302_v39, %v9301_v56 }
 0x934   : > { %v8735_v49 = vadd.f32 %v9303_v18, %v8631_v19 }
 0x936   : > { %11328 = vtanh.f32 %v8735_v49 }
 0x940   : > { %v11329_v62 = vpop.eup %11328 }
 0x941   : > { %v8739_v6 = vadd.f32 1.0, %v11329_v62 }
 0x943   : > { %v8740_v28 = vmul.f32 11.0, %v8739_v6 }
 0x945   : > { %v8741_v51 = vadd.f32 -20.0, %v8740_v28 }
 0x947   : > { %8760 = vrot.lane.b32.xlu1 %v8741_v51, %s11475_s24  ;;  %v8742_v11 = vmul.f32 1.442695, %v8741_v51 }
 0x949   : > { %11330 = vpow2.f32 %v8742_v11 }
 0x953   : > { %v11331_v31 = vpop.eup %11330 }
 0x954   : > { %v8749_v2 = vmul.f32 %v11331_v31, %v8747_v34 }
 0x956   : > { %8751 = vrot.lane.b32.xlu0 %v8749_v2, %s11475_s24  ;;  %s11372_s24 = sshll.u32 %s11476_s11, 4  ;;  %s11373_s24 = int_to_ptr.vmem [resolvable:$false] %s11372_s24 }
 0x957   : > { %s11374_s20 = scalar_lea.vmem %s11373_s24, 512  ;;  %p11375_p6 = scmp.lt.s32.totalorder %s8813_s22, %s11373_s24 }
 0x958   : > { %p11376_p7 = scmp.lt.s32.totalorder %s11374_s20, %s11368_s16 }
 0x95a   : > { %8777 = vrot.lane.b32.xlu0 %v11329_v62, %s11474_s7  ;;  %s8793_s7 = scalar_lea.sflag [#allocation5], %s18338_s13  ;;  %p11377_p9 = por %p11376_p7, %p11375_p6 }
 0x95c   : > { %p11378_p11 = pnand %p11377_p9, %p11371_p5 }
 0x9b9   : > { %v8761_v24 = vpop.permute.xlu1 %8760 }
 0x9ba   : > { %v8763_v23 = vsub.f32 %v8758_v44, %v8761_v24 }
 0x9bc   : > { %v8991_v55 = vadd.f32 -0.9189385, %v8763_v23 }
 0x9c8   : > { %v8752_v53 = vpop.permute.xlu0 %8751 }
 0x9c9   : > { %v8754_v7 = vadd.f32 %v8752_v53, %v8735_v49 }
 0x9cb   : > { %11332 = vtanh.f32 %v8754_v7 }
 0x9cc   : > { %v8778_v22 = vpop.permute.xlu0 %8777 }
 0x9d5   : > { %v11333_v10 = vpop.eup %11332 }
 0x9d6   : > { %v8765_v25 = vmul.f32 %v11333_v10, %v11333_v10  ;;  %v8780_v33 = vsel %vm8771_vm4, %v11333_v10, %v8778_v22 }
 0x9d8   : > { %v8766_v54 = vsub.f32 1.0, %v8765_v25 }
 0x9da   : > { %v8767_v61 = vadd.f32 1e-06, %v8766_v54 }
 0x9dc   : > { %11334 = vlog2.f32 %v8767_v61 }
 0x9e6   : > { %v11335_v57 = vpop.eup %11334 }
 0x9e7   : > { %v8769_v29 = vmul.f32 0.6931472, %v11335_v57 }
 0x9e9   : > { %v8770_v20 = vsub.f32 %v8991_v55, %v8769_v29 }
 0x9eb   : > { %v8772_v52 = vsel %vm8771_vm4, %v8770_v20, 0.0 }
 0x9ec   : > { %8773 = vadd.xlane.f32.xlu1 %v8772_v52 }
 0x9ed   : > { %11381 = shalt.err (!%p11378_p11)
}
 0x9ee   : > { %s11382_s21 = scalar_lea.hbm %s16021_s15, 256  ;;  %s11386_s26 = scalar_lea.hbm %s18337_s28, 3072 }
 0x9ef   : > { %p11383_p13 = scmp.ne.s32.totalorder %s16021_s15, %s11382_s21  ;;  %p11387_p3 = scmp.lt.u32.totalorder %s16021_s15, %s18337_s28 }
 0x9f0   : > { %p11388_p8 = scmp.lt.u32.totalorder %s11386_s26, %s11382_s21  ;;  %p11390_p12 = scmp.lt.u32.totalorder %s11382_s21, %s16021_s15 }
 0x9f1   : > { %p11384_p1 = pnand %p11383_p13, %p18339_p0 }
 0x9f2   : > { %p11389_p10 = por %p11388_p8, %p11387_p3 }
 0x9f3   : > { %p11385_p4 = pneg %p11384_p1 }
 0x9f4   : > { %p11391_p2 = por %p11390_p12, %p11389_p10 }
 0x9f6   : > { %p11392_p5 = pnand %p11391_p2, %p11385_p4 }
 0x9f8   : > { %11395 = shalt.err (!%p11392_p5)
}
 0x9f9   : > { %11223 = dma.vmem_to_hbm [thread:$0]  (%p18339_p0), %s8813_s22, 256, %s16021_s15, %s8793_s7   ;;  %vm8782_vm5 = vcmask 72704  }
 0xa79   : > { %v8774_v21 = vpop.xlane.xlu1 %8773 }
 0xa7a   : > { %v8781_v63 = vsel %vm516_vm0, %v8780_v33, %v8774_v21 }
 0xa7b   : > { %8783 = vst.msk [vmem:[%s496_s12] sm:$0xff] %vm8782_vm5, %v8781_v63 }
 0xa7c PF: > { %s18340_s13 = sld [smem:[#allocation13_spill]]  ;;  %s18341_s16 = sld [smem:[#allocation9_spill]] }
 0xa7d   : > { %s18342_s11 = sld [smem:[#allocation17_spill]] }
 0xa82   : > { %p11235_p6 = scmp.ge.s32.totalorder %s18340_s13, 2  ;;  %s8835_s24 = sand.u32 1, %s18341_s16  }
 0xa83   : > { %p18343_p7 = scmp.ne.s32.totalorder %s18342_s11, 0  ;;  %s8836_s17 = scalar_lea.sflag [#allocation5], %s8835_s24 }
 0xa85   : > { %p11230_p9 = pnand %p11235_p6, %p18343_p7 }
 0xa87   : > { %11433 = dma.done.wait (!%p11230_p9), %s8836_s17, 256  }
 0xa88   : > { %11435 = vsyncadd (!%p11230_p9), %s8836_s17, 4294967040  ;;  %s26_s24 = sadd.s32 1, %s18340_s13   ;;  %s18344_s22 = sld [smem:[#allocation10_spill]] }
 0xa89   : > { %p23_p0 = scmp.ge.s32.totalorder %s26_s24, 14   ;;  %s18345_s19 = sld [smem:[#allocation18_spill]] }
 0xa8a   : > { %s18346_s20 = sld [smem:[#allocation11_spill]]  ;;  %s18347_s21 = sld [smem:[#allocation12_spill]] }
 0xa8b   : > { %s18348_s12 = sld [smem:[#allocation14_spill]]  ;;  %s18349_s23 = sld [smem:[#allocation16_spill]] }
 0xa8c   : > { %s18350_s17 = smov %s11442_s18  ;;  %25 = sbr.rel (!%p23_p0) target bundleno = 9 (0x9), region = 122 }
 0xa8e   : > { %s18351_s18 = smov %s18344_s22 }
 0xa91   : > { %s18352_s22 = smov %s18348_s12 }
 0xa93   :  { %8841 = vsyncpa [#allocation4], 1 }
 0xa94   :  { %8843 = vsyncpa [#allocation4 + $0x1], 1 }
 0xa95   :  { %8844 = vsyncpa [#allocation5], 1 }
 0xa96   :  { %8846 = vsyncpa [#allocation5 + $0x1], 1 }

</bundles_post_ra>
